<compile_context>
chip_gen: v7x
topology: tpu7x:2x2x1
jax: 0.10.0
libtpu: 0.0.40
codegen_flags: <defaults>
</compile_context>

<pallas_src>
import jax
import jax.numpy as jnp
from jax.experimental import pallas as pl
from jax.experimental.pallas import tpu as pltpu

# ----------------------------- configuration --------------------------------
PATCH = 2               # patch size of the (synthetic) DINOv2 patch embed
IN_CHANS = 3
EMBED_DIM = 32
NUM_HEADS = 2
NUM_BLOCKS = 2
MLP_RATIO = 4
ADAPTER_REDUCTION = 4   # adapter_reduction_factor
Z_SIZE = (4, 4)         # template_feat_size       (W, H)
X_SIZE = (8, 8)         # search_region_feat_size  (W, H)
BATCH = 2

MLP_HIDDEN = EMBED_DIM * MLP_RATIO            # 128
ADAPTER_DIM = EMBED_DIM // ADAPTER_REDUCTION  # 8
ADAPTER_PAD = 16                              # padded adapter bottleneck lanes
NZ = Z_SIZE[0] * Z_SIZE[1]                    # 16
NX = X_SIZE[0] * X_SIZE[1]                    # 64
M_TOK = NZ + NX                               # 80 tokens per sample
PATCH_IN = IN_CHANS * PATCH * PATCH           # 12
PATCH_IN_PAD = 16                             # padded patch contraction dim
HEAD_HID = 2 * EMBED_DIM                      # fused cls|reg head hidden width
OUT_LANES = 128                               # lane-dense output width

# ---------------- slab layouts (shared by wrapper packing & kernel) ----------
# global matrix slab (bf16, 128 lanes); all row offsets multiples of 16
GM_PATCH = 0            # (PATCH_IN_PAD, D)
GM_HW1 = 16             # (D, HEAD_HID)
GM_HW2 = 48             # (HEAD_HID, OUT_LANES)
GMAT_ROWS = 112

# global vector slab rows (f32, 128 lanes)
GV_NORM_G, GV_NORM_B, GV_HB1, GV_HB2 = 0, 1, 2, 3
GVEC_ROWS = 8

# per-block matrix slab (bf16, 128 lanes); all row offsets multiples of 16
BM_QKV = 0              # (D, 3D)
BM_PROJ = 32            # (D, D)
BM_FC1 = 64             # (D, MLP_HIDDEN)
BM_FC2 = 96             # (MLP_HIDDEN, D)
BM_AD1_D = 224          # (D, ADAPTER_PAD)
BM_AD1_U = 256          # (ADAPTER_PAD, D)
BM_AD2_D = 272          # (D, ADAPTER_PAD)
BM_AD2_U = 304          # (ADAPTER_PAD, D)
BMAT_ROWS = 320

# per-block vector slab rows (f32, 128 lanes)
(BV_LN1G, BV_LN1B, BV_QKVB, BV_PROJB, BV_LS1, BV_AD1DB, BV_AD1UB,
 BV_LN2G, BV_LN2B, BV_FC1B, BV_FC2B, BV_LS2, BV_AD2DB, BV_AD2UB) = range(14)
BVEC_ROWS = 16


# ----------------------------- fused forward kernel --------------------------
def _forward_kernel(patch_ref, emb_ref, gmat_ref, gvec_ref, bmat_ref, bvec_ref,
                    out_ref):
    d = EMBED_DIM
    hd = d // NUM_HEADS
    scale = hd ** -0.5

    # bf16 MXU inputs, f32 accumulation; element-wise math stays f32.
    def mm(a, w_bf16):
        return jnp.dot(a.astype(jnp.bfloat16), w_bf16,
                       preferred_element_type=jnp.float32)

    def mm_t(a, b_bf16):   # a @ b.T with the transpose absorbed by the MXU feed
        return jax.lax.dot_general(
            a.astype(jnp.bfloat16), b_bf16,
            (((1,), (1,)), ((), ())), preferred_element_type=jnp.float32)

    def ln(v, g, b):       # DINOv2 LayerNorm eps = 1e-6
        mu = jnp.mean(v, axis=-1, keepdims=True)
        var = jnp.mean(jnp.square(v - mu), axis=-1, keepdims=True)
        return (v - mu) * jax.lax.rsqrt(var + 1e-6) * g + b

    def gelu(v):
        # TODO(synk): torch nn.GELU default is exact erf; tanh approx kept for
        # robust Mosaic lowering.
        return jax.nn.gelu(v, approximate=True)

    def sigmoid(v):        # stable sigmoid, no exp overflow
        return 0.5 * (jnp.tanh(0.5 * v) + 1.0)

    def bvec(bi, row, width):
        return bvec_ref[bi, row:row + 1, 0:width]          # (1, width) f32

    def adapter(y, dw, db, uw, ub):
        hh = gelu(mm(y, dw) + db)       # (M, ADAPTER_PAD); padded lanes stay 0
        return mm(hh, uw) + ub

    # per-head lane masks (softmax scale folded into the query mask)
    lane = jax.lax.broadcasted_iota(jnp.int32, (1, d), 1)
    head_sel = [(lane >= h * hd) & (lane < (h + 1) * hd) for h in range(NUM_HEADS)]
    q_masks = [jnp.where(sel, scale, 0.0).astype(jnp.float32) for sel in head_sel]
    v_masks = [sel.astype(jnp.float32) for sel in head_sel]

    # ---- patch embedding + (pos + token-type + patch-bias) additive embed ----
    patch_w = gmat_ref[GM_PATCH:GM_PATCH + PATCH_IN_PAD, 0:d]
    x = mm(patch_ref[0], patch_w) + emb_ref[0]             # (M_TOK, D) f32

    # ---- transformer + adapter blocks (statically unrolled) ----
    for bi in range(NUM_BLOCKS):
        # attention sublayer
        h1 = ln(x, bvec(bi, BV_LN1G, d), bvec(bi, BV_LN1B, d))
        qkv = (mm(h1, bmat_ref[bi, BM_QKV:BM_QKV + d, 0:3 * d])
               + bvec(bi, BV_QKVB, 3 * d))                  # one fused qkv matmul
        q = qkv[:, 0:d]
        k_b = qkv[:, d:2 * d].astype(jnp.bfloat16)
        v = qkv[:, 2 * d:3 * d]
        ctx = jnp.zeros((M_TOK, d), jnp.float32)
        for h in range(NUM_HEADS):
            s = mm_t(q * q_masks[h], k_b)                   # (M, M), pre-scaled
            p = jnp.exp(s - jnp.max(s, axis=-1, keepdims=True))
            a = p * pl.reciprocal(jnp.sum(p, axis=-1, keepdims=True), approx=True)
            ctx = ctx + mm(a, (v * v_masks[h]).astype(jnp.bfloat16))
        attn = (mm(ctx, bmat_ref[bi, BM_PROJ:BM_PROJ + d, 0:d])
                + bvec(bi, BV_PROJB, d))
        y = attn * bvec(bi, BV_LS1, d)
        # TODO(synk): exact DINOv2AdapterBlock adapter placement is not in the
        # given snippet; sequential bottleneck adapter with internal residual
        # per sublayer.
        y = y + adapter(y,
                        bmat_ref[bi, BM_AD1_D:BM_AD1_D + d, 0:ADAPTER_PAD],
                        bvec(bi, BV_AD1DB, ADAPTER_PAD),
                        bmat_ref[bi, BM_AD1_U:BM_AD1_U + ADAPTER_PAD, 0:d],
                        bvec(bi, BV_AD1UB, d))
        x = x + y

        # MLP sublayer
        h2 = ln(x, bvec(bi, BV_LN2G, d), bvec(bi, BV_LN2B, d))
        h2 = gelu(mm(h2, bmat_ref[bi, BM_FC1:BM_FC1 + d, 0:MLP_HIDDEN])
                  + bvec(bi, BV_FC1B, MLP_HIDDEN))
        h2 = (mm(h2, bmat_ref[bi, BM_FC2:BM_FC2 + MLP_HIDDEN, 0:d])
              + bvec(bi, BV_FC2B, d))
        y = h2 * bvec(bi, BV_LS2, d)
        y = y + adapter(y,
                        bmat_ref[bi, BM_AD2_D:BM_AD2_D + d, 0:ADAPTER_PAD],
                        bvec(bi, BV_AD2DB, ADAPTER_PAD),
                        bmat_ref[bi, BM_AD2_U:BM_AD2_U + ADAPTER_PAD, 0:d],
                        bvec(bi, BV_AD2UB, d))
        x = x + y

    # ---- final LayerNorm, keep the search-region tokens only ----
    xn = ln(x, gvec_ref[GV_NORM_G:GV_NORM_G + 1, 0:d],
            gvec_ref[GV_NORM_B:GV_NORM_B + 1, 0:d])
    xh = xn[NZ:, :]                                         # (NX, D)

    # ---- fused anchor-free head: cls logit lane 0, sigmoid bbox lanes 1..4 ----
    # TODO(synk): exact MlpAnchorFreeHead internals not in the provided snippet;
    # two token-wise 2-layer MLP branches fused into one lane-dense matmul pair.
    hh = gelu(mm(xh, gmat_ref[GM_HW1:GM_HW1 + d, 0:HEAD_HID])
              + gvec_ref[GV_HB1:GV_HB1 + 1, 0:HEAD_HID])
    out = (mm(hh, gmat_ref[GM_HW2:GM_HW2 + HEAD_HID, 0:OUT_LANES])
           + gvec_ref[GV_HB2:GV_HB2 + 1, 0:OUT_LANES])      # (NX, 128)
    ol = jax.lax.broadcasted_iota(jnp.int32, out.shape, 1)
    out = jnp.where((ol >= 1) & (ol < 5), sigmoid(out), out)
    out_ref[0] = out


# ----------------------------- model glue ------------------------------------
def _patchify(img):
    """(B,C,H,W) -> (B, HP*WP, PATCH_IN_PAD) float32, zero-padded lanes."""
    b, c, h, w = img.shape
    hp, wp = h // PATCH, w // PATCH
    p = img.reshape(b, c, hp, PATCH, wp, PATCH)
    p = jnp.transpose(p, (0, 2, 4, 1, 3, 5)).reshape(b, hp * wp,
                                                     c * PATCH * PATCH)
    return jnp.pad(p.astype(jnp.float32),
                   ((0, 0), (0, 0), (0, PATCH_IN_PAD - PATCH_IN)))


def _forward(packed, z_img, x_img, z_feat_mask):
    b = z_img.shape[0]
    d = EMBED_DIM

    # Pure data plumbing stays in JAX (patch unfold, table gather, concat).
    z_patch = _patchify(z_img)                              # (B, NZ, 16)
    x_patch = _patchify(x_img)                              # (B, NX, 16)
    patch_tok = jnp.concatenate([z_patch, x_patch], axis=1)  # (B, M_TOK, 16)

    type_z = packed["token_type_embed"][z_feat_mask.reshape(b, -1)]   # (B,NZ,D)
    emb_z = packed["emb_z_base"][None, :, :] + type_z
    emb_x = jnp.broadcast_to(packed["emb_x_base"][None, :, :], (b, NX, d))
    emb = jnp.concatenate([emb_z, emb_x], axis=1)           # (B, M_TOK, D)

    out = pl.pallas_call(
        _forward_kernel,
        grid=(b,),
        in_specs=[
            pl.BlockSpec((1, M_TOK, PATCH_IN_PAD), lambda i: (i, 0, 0)),
            pl.BlockSpec((1, M_TOK, EMBED_DIM), lambda i: (i, 0, 0)),
            pl.BlockSpec((GMAT_ROWS, 128), lambda i: (0, 0)),
            pl.BlockSpec((GVEC_ROWS, 128), lambda i: (0, 0)),
            pl.BlockSpec((NUM_BLOCKS, BMAT_ROWS, 128), lambda i: (0, 0, 0)),
            pl.BlockSpec((NUM_BLOCKS, BVEC_ROWS, 128), lambda i: (0, 0, 0)),
        ],
        out_specs=pl.BlockSpec((1, NX, OUT_LANES), lambda i: (i, 0, 0)),
        out_shape=jax.ShapeDtypeStruct((b, NX, OUT_LANES), jnp.float32),
        compiler_params=pltpu.CompilerParams(
            dimension_semantics=("parallel",)),
    )(patch_tok, emb, packed["gmat"], packed["gvec"],
      packed["bmat"], packed["bvec"])

    score_map = out[:, :, 0].reshape(b, X_SIZE[1], X_SIZE[0])
    bbox_map = out[:, :, 1:5].reshape(b, X_SIZE[1], X_SIZE[0], 4)
    return {"score_map": score_map, "bbox_map": bbox_map}


forward = jax.jit(_forward)


# ----------------------------- parameter packing -----------------------------
def pack_params(params):
    """Pack the natural per-module parameters into 4 VMEM-friendly slabs."""
    d, nb = EMBED_DIM, NUM_BLOCKS
    bk = params["blocks"]
    hp = params["head"]

    gmat = jnp.zeros((GMAT_ROWS, 128), jnp.float32)
    gmat = gmat.at[GM_PATCH:GM_PATCH + PATCH_IN, 0:d].set(params["patch_w"])
    head_w1 = jnp.concatenate([hp["cls_w1"], hp["reg_w1"]], axis=1)   # (D, 2D)
    gmat = gmat.at[GM_HW1:GM_HW1 + d, 0:HEAD_HID].set(head_w1)
    gmat = gmat.at[GM_HW2:GM_HW2 + d, 0:1].set(hp["cls_w2"])
    gmat = gmat.at[GM_HW2 + d:GM_HW2 + 2 * d, 1:5].set(hp["reg_w2"])
    gmat = gmat.astype(jnp.bfloat16)

    gvec = jnp.zeros((GVEC_ROWS, 128), jnp.float32)
    gvec = gvec.at[GV_NORM_G, 0:d].set(params["norm_g"].reshape(-1))
    gvec = gvec.at[GV_NORM_B, 0:d].set(params["norm_b"].reshape(-1))
    gvec = gvec.at[GV_HB1, 0:d].set(hp["cls_b1"].reshape(-1))
    gvec = gvec.at[GV_HB1, d:2 * d].set(hp["reg_b1"].reshape(-1))
    gvec = gvec.at[GV_HB2, 0:1].set(hp["cls_b2"].reshape(-1))
    gvec = gvec.at[GV_HB2, 1:5].set(hp["reg_b2"].reshape(-1))

    bmat = jnp.zeros((nb, BMAT_ROWS, 128), jnp.float32)
    w_qkv = jnp.concatenate([bk["wq"], bk["wk"], bk["wv"]], axis=2)   # (nb,D,3D)
    bmat = bmat.at[:, BM_QKV:BM_QKV + d, 0:3 * d].set(w_qkv)
    bmat = bmat.at[:, BM_PROJ:BM_PROJ + d, 0:d].set(bk["proj_w"])
    bmat = bmat.at[:, BM_FC1:BM_FC1 + d, 0:MLP_HIDDEN].set(bk["fc1_w"])
    bmat = bmat.at[:, BM_FC2:BM_FC2 + MLP_HIDDEN, 0:d].set(bk["fc2_w"])
    bmat = bmat.at[:, BM_AD1_D:BM_AD1_D + d, 0:ADAPTER_DIM].set(bk["ad1_dw"])
    bmat = bmat.at[:, BM_AD1_U:BM_AD1_U + ADAPTER_DIM, 0:d].set(bk["ad1_uw"])
    bmat = bmat.at[:, BM_AD2_D:BM_AD2_D + d, 0:ADAPTER_DIM].set(bk["ad2_dw"])
    bmat = bmat.at[:, BM_AD2_U:BM_AD2_U + ADAPTER_DIM, 0:d].set(bk["ad2_uw"])
    bmat = bmat.astype(jnp.bfloat16)

    bvec = jnp.zeros((nb, BVEC_ROWS, 128), jnp.float32)

    def setrow(a, row, val, width):
        return a.at[:, row, 0:width].set(val.reshape(nb, width))

    qkv_b = jnp.concatenate([bk["bq"], bk["bk"], bk["bv"]], axis=2)   # (nb,1,3D)
    bvec = setrow(bvec, BV_LN1G, bk["ln1_g"], d)
    bvec = setrow(bvec, BV_LN1B, bk["ln1_b"], d)
    bvec = setrow(bvec, BV_QKVB, qkv_b, 3 * d)
    bvec = setrow(bvec, BV_PROJB, bk["proj_b"], d)
    bvec = setrow(bvec, BV_LS1, bk["ls1"], d)
    bvec = setrow(bvec, BV_AD1DB, bk["ad1_db"], ADAPTER_DIM)
    bvec = setrow(bvec, BV_AD1UB, bk["ad1_ub"], d)
    bvec = setrow(bvec, BV_LN2G, bk["ln2_g"], d)
    bvec = setrow(bvec, BV_LN2B, bk["ln2_b"], d)
    bvec = setrow(bvec, BV_FC1B, bk["fc1_b"], MLP_HIDDEN)
    bvec = setrow(bvec, BV_FC2B, bk["fc2_b"], d)
    bvec = setrow(bvec, BV_LS2, bk["ls2"], d)
    bvec = setrow(bvec, BV_AD2DB, bk["ad2_db"], ADAPTER_DIM)
    bvec = setrow(bvec, BV_AD2UB, bk["ad2_ub"], d)

    # Additive embedding bases with the patch-embed bias folded in.
    x_w, x_h = X_SIZE
    z_w, z_h = Z_SIZE
    pos = params["pos_embed"].reshape(NX, d)
    pos_z = params["pos_embed"].reshape(x_h, x_w, d)[:z_h, :z_w, :].reshape(NZ, d)
    patch_b = params["patch_b"].reshape(1, d)
    emb_x_base = pos + params["token_type_embed"][2].reshape(1, d) + patch_b
    emb_z_base = pos_z + patch_b

    return dict(gmat=gmat, gvec=gvec, bmat=bmat, bvec=bvec,
                emb_x_base=emb_x_base, emb_z_base=emb_z_base,
                token_type_embed=params["token_type_embed"])


# ----------------------------- parameter init --------------------------------
def init_params(key):
    keys = iter(jax.random.split(key, 64))

    def nrm(shape, std=0.02):
        # trunc_normal_ in the torch module replaced by plain normal (deterministic).
        return (std * jax.random.normal(next(keys), shape)).astype(jnp.float32)

    d, dr, mh, nb = EMBED_DIM, ADAPTER_DIM, MLP_HIDDEN, NUM_BLOCKS
    params = {
        "patch_w": nrm((PATCH_IN, d)),
        "patch_b": jnp.zeros((1, d), jnp.float32),
        "pos_embed": nrm((1, NX, d)),
        "token_type_embed": nrm((3, d)),
        "norm_g": jnp.ones((1, d), jnp.float32),
        "norm_b": jnp.zeros((1, d), jnp.float32),
    }
    # Per-block parameters (leading dim = NUM_BLOCKS).  The fused qkv projection
    # is stored pre-split into q / k / v weights (equivalent parameterization).
    params["blocks"] = {
        "ln1_g": jnp.ones((nb, 1, d), jnp.float32),
        "ln1_b": jnp.zeros((nb, 1, d), jnp.float32),
        "wq": nrm((nb, d, d)), "bq": jnp.zeros((nb, 1, d), jnp.float32),
        "wk": nrm((nb, d, d)), "bk": jnp.zeros((nb, 1, d), jnp.float32),
        "wv": nrm((nb, d, d)), "bv": jnp.zeros((nb, 1, d), jnp.float32),
        "proj_w": nrm((nb, d, d)), "proj_b": jnp.zeros((nb, 1, d), jnp.float32),
        "ls1": jnp.full((nb, 1, d), 1e-5, jnp.float32),
        "ad1_dw": nrm((nb, d, dr)), "ad1_db": jnp.zeros((nb, 1, dr), jnp.float32),
        "ad1_uw": nrm((nb, dr, d)), "ad1_ub": jnp.zeros((nb, 1, d), jnp.float32),
        "ln2_g": jnp.ones((nb, 1, d), jnp.float32),
        "ln2_b": jnp.zeros((nb, 1, d), jnp.float32),
        "fc1_w": nrm((nb, d, mh)), "fc1_b": jnp.zeros((nb, 1, mh), jnp.float32),
        "fc2_w": nrm((nb, mh, d)), "fc2_b": jnp.zeros((nb, 1, d), jnp.float32),
        "ls2": jnp.full((nb, 1, d), 1e-5, jnp.float32),
        "ad2_dw": nrm((nb, d, dr)), "ad2_db": jnp.zeros((nb, 1, dr), jnp.float32),
        "ad2_uw": nrm((nb, dr, d)), "ad2_ub": jnp.zeros((nb, 1, d), jnp.float32),
    }
    params["head"] = dict(
        cls_w1=nrm((d, d)), cls_b1=jnp.zeros((1, d), jnp.float32),
        cls_w2=nrm((d, 1)), cls_b2=jnp.zeros((1, 1), jnp.float32),
        reg_w1=nrm((d, d)), reg_b1=jnp.zeros((1, d), jnp.float32),
        reg_w2=nrm((d, 4)), reg_b2=jnp.zeros((1, 4), jnp.float32),
    )
    return params


# ----------------------------- main -------------------------------------------
if __name__ == "__main__":
    key = jax.random.PRNGKey(0)
    k_par, k_z, k_x, k_m = jax.random.split(key, 4)

    params = init_params(k_par)
    packed = pack_params(params)    # one-time slab packing (outside jit)

    z_img = jax.random.normal(
        k_z, (BATCH, IN_CHANS, Z_SIZE[1] * PATCH, Z_SIZE[0] * PATCH), jnp.float32)
    x_img = jax.random.normal(
        k_x, (BATCH, IN_CHANS, X_SIZE[1] * PATCH, X_SIZE[0] * PATCH), jnp.float32)
    z_feat_mask = jax.random.randint(
        k_m, (BATCH, Z_SIZE[1], Z_SIZE[0]), 0, 2, dtype=jnp.int32)

    out = forward(packed, z_img, x_img, z_feat_mask)
    jax.block_until_ready(out)
    assert out["score_map"].shape == (BATCH, X_SIZE[1], X_SIZE[0])
    assert out["bbox_map"].shape == (BATCH, X_SIZE[1], X_SIZE[0], 4)
    print("KERNEL_OK")
</pallas_src>

<mosaic_0001>
module attributes {stable_mosaic.version = 11 : i64} {
  func.func @_forward_kernel(%arg0: i32, %arg1: memref<1x80x16xf32, #tpu.memory_space<vmem>>, %arg2: memref<1x80x32xf32, #tpu.memory_space<vmem>>, %arg3: memref<112x128xbf16, #tpu.memory_space<vmem>>, %arg4: memref<8x128xf32, #tpu.memory_space<vmem>>, %arg5: memref<2x320x128xbf16, #tpu.memory_space<vmem>>, %arg6: memref<2x16x128xf32, #tpu.memory_space<vmem>>, %arg7: memref<1x64x128xf32, #tpu.memory_space<vmem>>) attributes {dimension_semantics = [#tpu.dimension_semantics<parallel>], iteration_bounds = array<i64: 2>, scalar_prefetch = 0 : i64, scratch_operands = 0 : i64, tpu.core_type = #tpu.core_type<tc>, window_params = [{transform_indices = @transform_0, window_bounds = array<i64: 1, 80, 16>}, {transform_indices = @transform_1, window_bounds = array<i64: 1, 80, 32>}, {pipeline_mode = #tpu.pipeline_mode<synchronous>, transform_indices = @transform_2, window_bounds = array<i64: 112, 128>}, {pipeline_mode = #tpu.pipeline_mode<synchronous>, transform_indices = @transform_3, window_bounds = array<i64: 8, 128>}, {pipeline_mode = #tpu.pipeline_mode<synchronous>, transform_indices = @transform_4, window_bounds = array<i64: 2, 320, 128>}, {pipeline_mode = #tpu.pipeline_mode<synchronous>, transform_indices = @transform_5, window_bounds = array<i64: 2, 16, 128>}, {transform_indices = @transform_6, window_bounds = array<i64: 1, 64, 128>}]} {
    %0 = tpu.iota {dimensions = array<i32: 1>} : vector<1x32xi32>
    %c0_i32 = arith.constant 0 : i32
    %1 = vector.broadcast %c0_i32 : i32 to vector<1x32xi32>
    %2 = arith.cmpi sge, %0, %1 : vector<1x32xi32>
    %c16_i32 = arith.constant 16 : i32
    %3 = vector.broadcast %c16_i32 : i32 to vector<1x32xi32>
    %4 = arith.cmpi slt, %0, %3 : vector<1x32xi32>
    %5 = arith.andi %2, %4 : vector<1x32xi1>
    %c16_i32_0 = arith.constant 16 : i32
    %6 = vector.broadcast %c16_i32_0 : i32 to vector<1x32xi32>
    %7 = arith.cmpi sge, %0, %6 : vector<1x32xi32>
    %c32_i32 = arith.constant 32 : i32
    %8 = vector.broadcast %c32_i32 : i32 to vector<1x32xi32>
    %9 = arith.cmpi slt, %0, %8 : vector<1x32xi32>
    %10 = arith.andi %7, %9 : vector<1x32xi1>
    %cst = arith.constant 2.500000e-01 : f32
    %cst_1 = arith.constant 0.000000e+00 : f32
    %11 = vector.broadcast %cst : f32 to vector<1x32xf32>
    %12 = vector.broadcast %cst_1 : f32 to vector<1x32xf32>
    %13 = arith.select %5, %11, %12 : vector<1x32xi1>, vector<1x32xf32>
    %cst_2 = arith.constant 2.500000e-01 : f32
    %cst_3 = arith.constant 0.000000e+00 : f32
    %14 = vector.broadcast %cst_2 : f32 to vector<1x32xf32>
    %15 = vector.broadcast %cst_3 : f32 to vector<1x32xf32>
    %16 = arith.select %10, %14, %15 : vector<1x32xi1>, vector<1x32xf32>
    %17 = arith.extui %5 : vector<1x32xi1> to vector<1x32xi32>
    %18 = arith.sitofp %17 : vector<1x32xi32> to vector<1x32xf32>
    %19 = arith.extui %10 : vector<1x32xi1> to vector<1x32xi32>
    %20 = arith.sitofp %19 : vector<1x32xi32> to vector<1x32xf32>
    %c0 = arith.constant 0 : index
    %c0_4 = arith.constant 0 : index
    %21 = vector.load %arg3[%c0, %c0_4] : memref<112x128xbf16, #tpu.memory_space<vmem>>, vector<16x32xbf16>
    %c0_5 = arith.constant 0 : index
    %c0_6 = arith.constant 0 : index
    %c0_7 = arith.constant 0 : index
    %22 = vector.load %arg1[%c0_5, %c0_6, %c0_7] : memref<1x80x16xf32, #tpu.memory_space<vmem>>, vector<1x80x16xf32>
    %23 = vector.shape_cast %22 : vector<1x80x16xf32> to vector<80x16xf32>
    %24 = arith.truncf %23 : vector<80x16xf32> to vector<80x16xbf16>
    %cst_8 = arith.constant dense<0.000000e+00> : vector<80x32xf32>
    %25 = tpu.matmul %24, %21, %cst_8 {dimension_numbers = #tpu.dot_dimension_numbers<[1], [0], [0], [1], [0, 0, 1, 1], [], []>} : vector<80x16xbf16>, vector<16x32xbf16>, vector<80x32xf32> -> vector<80x32xf32>
    %c0_9 = arith.constant 0 : index
    %c0_10 = arith.constant 0 : index
    %c0_11 = arith.constant 0 : index
    %26 = vector.load %arg2[%c0_9, %c0_10, %c0_11] : memref<1x80x32xf32, #tpu.memory_space<vmem>>, vector<1x80x32xf32>
    %27 = vector.shape_cast %26 : vector<1x80x32xf32> to vector<80x32xf32>
    %28 = arith.addf %25, %27 : vector<80x32xf32>
    %c0_12 = arith.constant 0 : index
    %c0_13 = arith.constant 0 : index
    %c0_14 = arith.constant 0 : index
    %29 = vector.load %arg6[%c0_12, %c0_13, %c0_14] : memref<2x16x128xf32, #tpu.memory_space<vmem>>, vector<1x1x32xf32>
    %30 = vector.shape_cast %29 : vector<1x1x32xf32> to vector<1x32xf32>
    %c0_15 = arith.constant 0 : index
    %c1 = arith.constant 1 : index
    %c0_16 = arith.constant 0 : index
    %31 = vector.load %arg6[%c0_15, %c1, %c0_16] : memref<2x16x128xf32, #tpu.memory_space<vmem>>, vector<1x1x32xf32>
    %32 = vector.shape_cast %31 : vector<1x1x32xf32> to vector<1x32xf32>
    %cst_17 = arith.constant dense<0.000000e+00> : vector<80xf32>
    %33 = vector.multi_reduction <add>, %28, %cst_17 [1] : vector<80x32xf32> to vector<80xf32>
    %34 = vector.shape_cast %33 : vector<80xf32> to vector<80x1xf32>
    %cst_18 = arith.constant 3.200000e+01 : f32
    %35 = vector.broadcast %cst_18 : f32 to vector<80x1xf32>
    %36 = arith.divf %34, %35 : vector<80x1xf32>
    %37 = vector.broadcast %36 : vector<80x1xf32> to vector<80x32xf32>
    %38 = arith.subf %28, %37 : vector<80x32xf32>
    %39 = arith.mulf %38, %38 : vector<80x32xf32>
    %cst_19 = arith.constant dense<0.000000e+00> : vector<80xf32>
    %40 = vector.multi_reduction <add>, %39, %cst_19 [1] : vector<80x32xf32> to vector<80xf32>
    %41 = vector.shape_cast %40 : vector<80xf32> to vector<80x1xf32>
    %cst_20 = arith.constant 3.200000e+01 : f32
    %42 = vector.broadcast %cst_20 : f32 to vector<80x1xf32>
    %43 = arith.divf %41, %42 : vector<80x1xf32>
    %44 = vector.broadcast %36 : vector<80x1xf32> to vector<80x32xf32>
    %45 = arith.subf %28, %44 : vector<80x32xf32>
    %cst_21 = arith.constant 9.99999997E-7 : f32
    %46 = vector.broadcast %cst_21 : f32 to vector<80x1xf32>
    %47 = arith.addf %43, %46 : vector<80x1xf32>
    %48 = math.rsqrt %47 : vector<80x1xf32>
    %49 = vector.broadcast %48 : vector<80x1xf32> to vector<80x32xf32>
    %50 = arith.mulf %45, %49 : vector<80x32xf32>
    %51 = vector.broadcast %30 : vector<1x32xf32> to vector<80x32xf32>
    %52 = arith.mulf %50, %51 : vector<80x32xf32>
    %53 = vector.broadcast %32 : vector<1x32xf32> to vector<80x32xf32>
    %54 = arith.addf %52, %53 : vector<80x32xf32>
    %c0_22 = arith.constant 0 : index
    %c0_23 = arith.constant 0 : index
    %c0_24 = arith.constant 0 : index
    %55 = vector.load %arg5[%c0_22, %c0_23, %c0_24] : memref<2x320x128xbf16, #tpu.memory_space<vmem>>, vector<1x32x96xbf16>
    %56 = vector.shape_cast %55 : vector<1x32x96xbf16> to vector<32x96xbf16>
    %57 = arith.truncf %54 : vector<80x32xf32> to vector<80x32xbf16>
    %cst_25 = arith.constant dense<0.000000e+00> : vector<80x96xf32>
    %58 = tpu.matmul %57, %56, %cst_25 {dimension_numbers = #tpu.dot_dimension_numbers<[1], [0], [0], [1], [0, 0, 1, 1], [], []>} : vector<80x32xbf16>, vector<32x96xbf16>, vector<80x96xf32> -> vector<80x96xf32>
    %c0_26 = arith.constant 0 : index
    %c2 = arith.constant 2 : index
    %c0_27 = arith.constant 0 : index
    %59 = vector.load %arg6[%c0_26, %c2, %c0_27] : memref<2x16x128xf32, #tpu.memory_space<vmem>>, vector<1x1x96xf32>
    %60 = vector.shape_cast %59 : vector<1x1x96xf32> to vector<1x96xf32>
    %61 = vector.broadcast %60 : vector<1x96xf32> to vector<80x96xf32>
    %62 = arith.addf %58, %61 : vector<80x96xf32>
    %63 = vector.extract_strided_slice %62 {offsets = [0, 0], sizes = [80, 32], strides = [1, 1]} : vector<80x96xf32> to vector<80x32xf32>
    %64 = vector.extract_strided_slice %62 {offsets = [0, 32], sizes = [80, 32], strides = [1, 1]} : vector<80x96xf32> to vector<80x32xf32>
    %65 = arith.truncf %64 : vector<80x32xf32> to vector<80x32xbf16>
    %66 = vector.extract_strided_slice %62 {offsets = [0, 64], sizes = [80, 32], strides = [1, 1]} : vector<80x96xf32> to vector<80x32xf32>
    %cst_28 = arith.constant 0.000000e+00 : f32
    %67 = vector.broadcast %cst_28 : f32 to vector<80x32xf32>
    %68 = vector.broadcast %13 : vector<1x32xf32> to vector<80x32xf32>
    %69 = arith.mulf %63, %68 : vector<80x32xf32>
    %70 = arith.truncf %69 : vector<80x32xf32> to vector<80x32xbf16>
    %cst_29 = arith.constant dense<0.000000e+00> : vector<80x80xf32>
    %71 = tpu.matmul %70, %65, %cst_29 {dimension_numbers = #tpu.dot_dimension_numbers<[1], [1], [0], [0], [0, 0, 1, 0], [], []>} : vector<80x32xbf16>, vector<80x32xbf16>, vector<80x80xf32> -> vector<80x80xf32>
    %cst_30 = arith.constant dense<0xFF800000> : vector<80xf32>
    %72 = vector.multi_reduction <maximumf>, %71, %cst_30 [1] : vector<80x80xf32> to vector<80xf32>
    %73 = vector.shape_cast %72 : vector<80xf32> to vector<80x1xf32>
    %74 = vector.broadcast %73 : vector<80x1xf32> to vector<80x80xf32>
    %75 = arith.subf %71, %74 : vector<80x80xf32>
    %76 = math.exp %75 : vector<80x80xf32>
    %cst_31 = arith.constant dense<0.000000e+00> : vector<80xf32>
    %77 = vector.multi_reduction <add>, %76, %cst_31 [1] : vector<80x80xf32> to vector<80xf32>
    %78 = vector.shape_cast %77 : vector<80xf32> to vector<80x1xf32>
    %79 = tpu.reciprocal %78 {approx = true} : vector<80x1xf32> -> vector<80x1xf32>
    %80 = vector.broadcast %79 : vector<80x1xf32> to vector<80x80xf32>
    %81 = arith.mulf %76, %80 : vector<80x80xf32>
    %82 = vector.broadcast %18 : vector<1x32xf32> to vector<80x32xf32>
    %83 = arith.mulf %66, %82 : vector<80x32xf32>
    %84 = arith.truncf %83 : vector<80x32xf32> to vector<80x32xbf16>
    %85 = arith.truncf %81 : vector<80x80xf32> to vector<80x80xbf16>
    %cst_32 = arith.constant dense<0.000000e+00> : vector<80x32xf32>
    %86 = tpu.matmul %85, %84, %cst_32 {dimension_numbers = #tpu.dot_dimension_numbers<[1], [0], [0], [1], [0, 0, 1, 1], [], []>} : vector<80x80xbf16>, vector<80x32xbf16>, vector<80x32xf32> -> vector<80x32xf32>
    %87 = arith.addf %67, %86 : vector<80x32xf32>
    %88 = vector.broadcast %16 : vector<1x32xf32> to vector<80x32xf32>
    %89 = arith.mulf %63, %88 : vector<80x32xf32>
    %90 = arith.truncf %89 : vector<80x32xf32> to vector<80x32xbf16>
    %cst_33 = arith.constant dense<0.000000e+00> : vector<80x80xf32>
    %91 = tpu.matmul %90, %65, %cst_33 {dimension_numbers = #tpu.dot_dimension_numbers<[1], [1], [0], [0], [0, 0, 1, 0], [], []>} : vector<80x32xbf16>, vector<80x32xbf16>, vector<80x80xf32> -> vector<80x80xf32>
    %cst_34 = arith.constant dense<0xFF800000> : vector<80xf32>
    %92 = vector.multi_reduction <maximumf>, %91, %cst_34 [1] : vector<80x80xf32> to vector<80xf32>
    %93 = vector.shape_cast %92 : vector<80xf32> to vector<80x1xf32>
    %94 = vector.broadcast %93 : vector<80x1xf32> to vector<80x80xf32>
    %95 = arith.subf %91, %94 : vector<80x80xf32>
    %96 = math.exp %95 : vector<80x80xf32>
    %cst_35 = arith.constant dense<0.000000e+00> : vector<80xf32>
    %97 = vector.multi_reduction <add>, %96, %cst_35 [1] : vector<80x80xf32> to vector<80xf32>
    %98 = vector.shape_cast %97 : vector<80xf32> to vector<80x1xf32>
    %99 = tpu.reciprocal %98 {approx = true} : vector<80x1xf32> -> vector<80x1xf32>
    %100 = vector.broadcast %99 : vector<80x1xf32> to vector<80x80xf32>
    %101 = arith.mulf %96, %100 : vector<80x80xf32>
    %102 = vector.broadcast %20 : vector<1x32xf32> to vector<80x32xf32>
    %103 = arith.mulf %66, %102 : vector<80x32xf32>
    %104 = arith.truncf %103 : vector<80x32xf32> to vector<80x32xbf16>
    %105 = arith.truncf %101 : vector<80x80xf32> to vector<80x80xbf16>
    %cst_36 = arith.constant dense<0.000000e+00> : vector<80x32xf32>
    %106 = tpu.matmul %105, %104, %cst_36 {dimension_numbers = #tpu.dot_dimension_numbers<[1], [0], [0], [1], [0, 0, 1, 1], [], []>} : vector<80x80xbf16>, vector<80x32xbf16>, vector<80x32xf32> -> vector<80x32xf32>
    %107 = arith.addf %87, %106 : vector<80x32xf32>
    %c0_37 = arith.constant 0 : index
    %c32 = arith.constant 32 : index
    %c0_38 = arith.constant 0 : index
    %108 = vector.load %arg5[%c0_37, %c32, %c0_38] : memref<2x320x128xbf16, #tpu.memory_space<vmem>>, vector<1x32x32xbf16>
    %109 = vector.shape_cast %108 : vector<1x32x32xbf16> to vector<32x32xbf16>
    %110 = arith.truncf %107 : vector<80x32xf32> to vector<80x32xbf16>
    %cst_39 = arith.constant dense<0.000000e+00> : vector<80x32xf32>
    %111 = tpu.matmul %110, %109, %cst_39 {dimension_numbers = #tpu.dot_dimension_numbers<[1], [0], [0], [1], [0, 0, 1, 1], [], []>} : vector<80x32xbf16>, vector<32x32xbf16>, vector<80x32xf32> -> vector<80x32xf32>
    %c0_40 = arith.constant 0 : index
    %c3 = arith.constant 3 : index
    %c0_41 = arith.constant 0 : index
    %112 = vector.load %arg6[%c0_40, %c3, %c0_41] : memref<2x16x128xf32, #tpu.memory_space<vmem>>, vector<1x1x32xf32>
    %113 = vector.shape_cast %112 : vector<1x1x32xf32> to vector<1x32xf32>
    %114 = vector.broadcast %113 : vector<1x32xf32> to vector<80x32xf32>
    %115 = arith.addf %111, %114 : vector<80x32xf32>
    %c0_42 = arith.constant 0 : index
    %c4 = arith.constant 4 : index
    %c0_43 = arith.constant 0 : index
    %116 = vector.load %arg6[%c0_42, %c4, %c0_43] : memref<2x16x128xf32, #tpu.memory_space<vmem>>, vector<1x1x32xf32>
    %117 = vector.shape_cast %116 : vector<1x1x32xf32> to vector<1x32xf32>
    %118 = vector.broadcast %117 : vector<1x32xf32> to vector<80x32xf32>
    %119 = arith.mulf %115, %118 : vector<80x32xf32>
    %c0_44 = arith.constant 0 : index
    %c224 = arith.constant 224 : index
    %c0_45 = arith.constant 0 : index
    %120 = vector.load %arg5[%c0_44, %c224, %c0_45] : memref<2x320x128xbf16, #tpu.memory_space<vmem>>, vector<1x32x16xbf16>
    %121 = vector.shape_cast %120 : vector<1x32x16xbf16> to vector<32x16xbf16>
    %c0_46 = arith.constant 0 : index
    %c5 = arith.constant 5 : index
    %c0_47 = arith.constant 0 : index
    %122 = vector.load %arg6[%c0_46, %c5, %c0_47] : memref<2x16x128xf32, #tpu.memory_space<vmem>>, vector<1x1x16xf32>
    %123 = vector.shape_cast %122 : vector<1x1x16xf32> to vector<1x16xf32>
    %c0_48 = arith.constant 0 : index
    %c256 = arith.constant 256 : index
    %c0_49 = arith.constant 0 : index
    %124 = vector.load %arg5[%c0_48, %c256, %c0_49] : memref<2x320x128xbf16, #tpu.memory_space<vmem>>, vector<1x16x32xbf16>
    %125 = vector.shape_cast %124 : vector<1x16x32xbf16> to vector<16x32xbf16>
    %c0_50 = arith.constant 0 : index
    %c6 = arith.constant 6 : index
    %c0_51 = arith.constant 0 : index
    %126 = vector.load %arg6[%c0_50, %c6, %c0_51] : memref<2x16x128xf32, #tpu.memory_space<vmem>>, vector<1x1x32xf32>
    %127 = vector.shape_cast %126 : vector<1x1x32xf32> to vector<1x32xf32>
    %128 = arith.truncf %119 : vector<80x32xf32> to vector<80x32xbf16>
    %cst_52 = arith.constant dense<0.000000e+00> : vector<80x16xf32>
    %129 = tpu.matmul %128, %121, %cst_52 {dimension_numbers = #tpu.dot_dimension_numbers<[1], [0], [0], [1], [0, 0, 1, 1], [], []>} : vector<80x32xbf16>, vector<32x16xbf16>, vector<80x16xf32> -> vector<80x16xf32>
    %130 = vector.broadcast %123 : vector<1x16xf32> to vector<80x16xf32>
    %131 = arith.addf %129, %130 : vector<80x16xf32>
    %132 = arith.mulf %131, %131 : vector<80x16xf32>
    %133 = arith.mulf %131, %132 : vector<80x16xf32>
    %cst_53 = arith.constant 4.471500e-02 : f32
    %134 = vector.broadcast %cst_53 : f32 to vector<80x16xf32>
    %135 = arith.mulf %134, %133 : vector<80x16xf32>
    %136 = arith.addf %131, %135 : vector<80x16xf32>
    %cst_54 = arith.constant 0.797884583 : f32
    %137 = vector.broadcast %cst_54 : f32 to vector<80x16xf32>
    %138 = arith.mulf %137, %136 : vector<80x16xf32>
    %139 = math.tanh %138 : vector<80x16xf32>
    %cst_55 = arith.constant 1.000000e+00 : f32
    %140 = vector.broadcast %cst_55 : f32 to vector<80x16xf32>
    %141 = arith.addf %140, %139 : vector<80x16xf32>
    %cst_56 = arith.constant 5.000000e-01 : f32
    %142 = vector.broadcast %cst_56 : f32 to vector<80x16xf32>
    %143 = arith.mulf %142, %141 : vector<80x16xf32>
    %144 = arith.mulf %131, %143 : vector<80x16xf32>
    %145 = arith.truncf %144 : vector<80x16xf32> to vector<80x16xbf16>
    %cst_57 = arith.constant dense<0.000000e+00> : vector<80x32xf32>
    %146 = tpu.matmul %145, %125, %cst_57 {dimension_numbers = #tpu.dot_dimension_numbers<[1], [0], [0], [1], [0, 0, 1, 1], [], []>} : vector<80x16xbf16>, vector<16x32xbf16>, vector<80x32xf32> -> vector<80x32xf32>
    %147 = vector.broadcast %127 : vector<1x32xf32> to vector<80x32xf32>
    %148 = arith.addf %146, %147 : vector<80x32xf32>
    %149 = arith.addf %119, %148 : vector<80x32xf32>
    %150 = arith.addf %28, %149 : vector<80x32xf32>
    %c0_58 = arith.constant 0 : index
    %c7 = arith.constant 7 : index
    %c0_59 = arith.constant 0 : index
    %151 = vector.load %arg6[%c0_58, %c7, %c0_59] : memref<2x16x128xf32, #tpu.memory_space<vmem>>, vector<1x1x32xf32>
    %152 = vector.shape_cast %151 : vector<1x1x32xf32> to vector<1x32xf32>
    %c0_60 = arith.constant 0 : index
    %c8 = arith.constant 8 : index
    %c0_61 = arith.constant 0 : index
    %153 = vector.load %arg6[%c0_60, %c8, %c0_61] : memref<2x16x128xf32, #tpu.memory_space<vmem>>, vector<1x1x32xf32>
    %154 = vector.shape_cast %153 : vector<1x1x32xf32> to vector<1x32xf32>
    %cst_62 = arith.constant dense<0.000000e+00> : vector<80xf32>
    %155 = vector.multi_reduction <add>, %150, %cst_62 [1] : vector<80x32xf32> to vector<80xf32>
    %156 = vector.shape_cast %155 : vector<80xf32> to vector<80x1xf32>
    %cst_63 = arith.constant 3.200000e+01 : f32
    %157 = vector.broadcast %cst_63 : f32 to vector<80x1xf32>
    %158 = arith.divf %156, %157 : vector<80x1xf32>
    %159 = vector.broadcast %158 : vector<80x1xf32> to vector<80x32xf32>
    %160 = arith.subf %150, %159 : vector<80x32xf32>
    %161 = arith.mulf %160, %160 : vector<80x32xf32>
    %cst_64 = arith.constant dense<0.000000e+00> : vector<80xf32>
    %162 = vector.multi_reduction <add>, %161, %cst_64 [1] : vector<80x32xf32> to vector<80xf32>
    %163 = vector.shape_cast %162 : vector<80xf32> to vector<80x1xf32>
    %cst_65 = arith.constant 3.200000e+01 : f32
    %164 = vector.broadcast %cst_65 : f32 to vector<80x1xf32>
    %165 = arith.divf %163, %164 : vector<80x1xf32>
    %166 = vector.broadcast %158 : vector<80x1xf32> to vector<80x32xf32>
    %167 = arith.subf %150, %166 : vector<80x32xf32>
    %cst_66 = arith.constant 9.99999997E-7 : f32
    %168 = vector.broadcast %cst_66 : f32 to vector<80x1xf32>
    %169 = arith.addf %165, %168 : vector<80x1xf32>
    %170 = math.rsqrt %169 : vector<80x1xf32>
    %171 = vector.broadcast %170 : vector<80x1xf32> to vector<80x32xf32>
    %172 = arith.mulf %167, %171 : vector<80x32xf32>
    %173 = vector.broadcast %152 : vector<1x32xf32> to vector<80x32xf32>
    %174 = arith.mulf %172, %173 : vector<80x32xf32>
    %175 = vector.broadcast %154 : vector<1x32xf32> to vector<80x32xf32>
    %176 = arith.addf %174, %175 : vector<80x32xf32>
    %c0_67 = arith.constant 0 : index
    %c64 = arith.constant 64 : index
    %c0_68 = arith.constant 0 : index
    %177 = vector.load %arg5[%c0_67, %c64, %c0_68] : memref<2x320x128xbf16, #tpu.memory_space<vmem>>, vector<1x32x128xbf16>
    %178 = vector.shape_cast %177 : vector<1x32x128xbf16> to vector<32x128xbf16>
    %179 = arith.truncf %176 : vector<80x32xf32> to vector<80x32xbf16>
    %cst_69 = arith.constant dense<0.000000e+00> : vector<80x128xf32>
    %180 = tpu.matmul %179, %178, %cst_69 {dimension_numbers = #tpu.dot_dimension_numbers<[1], [0], [0], [1], [0, 0, 1, 1], [], []>} : vector<80x32xbf16>, vector<32x128xbf16>, vector<80x128xf32> -> vector<80x128xf32>
    %c0_70 = arith.constant 0 : index
    %c9 = arith.constant 9 : index
    %c0_71 = arith.constant 0 : index
    %181 = vector.load %arg6[%c0_70, %c9, %c0_71] : memref<2x16x128xf32, #tpu.memory_space<vmem>>, vector<1x1x128xf32>
    %182 = vector.shape_cast %181 : vector<1x1x128xf32> to vector<1x128xf32>
    %183 = vector.broadcast %182 : vector<1x128xf32> to vector<80x128xf32>
    %184 = arith.addf %180, %183 : vector<80x128xf32>
    %185 = arith.mulf %184, %184 : vector<80x128xf32>
    %186 = arith.mulf %184, %185 : vector<80x128xf32>
    %cst_72 = arith.constant 4.471500e-02 : f32
    %187 = vector.broadcast %cst_72 : f32 to vector<80x128xf32>
    %188 = arith.mulf %187, %186 : vector<80x128xf32>
    %189 = arith.addf %184, %188 : vector<80x128xf32>
    %cst_73 = arith.constant 0.797884583 : f32
    %190 = vector.broadcast %cst_73 : f32 to vector<80x128xf32>
    %191 = arith.mulf %190, %189 : vector<80x128xf32>
    %192 = math.tanh %191 : vector<80x128xf32>
    %cst_74 = arith.constant 1.000000e+00 : f32
    %193 = vector.broadcast %cst_74 : f32 to vector<80x128xf32>
    %194 = arith.addf %193, %192 : vector<80x128xf32>
    %cst_75 = arith.constant 5.000000e-01 : f32
    %195 = vector.broadcast %cst_75 : f32 to vector<80x128xf32>
    %196 = arith.mulf %195, %194 : vector<80x128xf32>
    %197 = arith.mulf %184, %196 : vector<80x128xf32>
    %c0_76 = arith.constant 0 : index
    %c96 = arith.constant 96 : index
    %c0_77 = arith.constant 0 : index
    %198 = vector.load %arg5[%c0_76, %c96, %c0_77] : memref<2x320x128xbf16, #tpu.memory_space<vmem>>, vector<1x128x32xbf16>
    %199 = vector.shape_cast %198 : vector<1x128x32xbf16> to vector<128x32xbf16>
    %200 = arith.truncf %197 : vector<80x128xf32> to vector<80x128xbf16>
    %cst_78 = arith.constant dense<0.000000e+00> : vector<80x32xf32>
    %201 = tpu.matmul %200, %199, %cst_78 {dimension_numbers = #tpu.dot_dimension_numbers<[1], [0], [0], [1], [0, 0, 1, 1], [], []>} : vector<80x128xbf16>, vector<128x32xbf16>, vector<80x32xf32> -> vector<80x32xf32>
    %c0_79 = arith.constant 0 : index
    %c10 = arith.constant 10 : index
    %c0_80 = arith.constant 0 : index
    %202 = vector.load %arg6[%c0_79, %c10, %c0_80] : memref<2x16x128xf32, #tpu.memory_space<vmem>>, vector<1x1x32xf32>
    %203 = vector.shape_cast %202 : vector<1x1x32xf32> to vector<1x32xf32>
    %204 = vector.broadcast %203 : vector<1x32xf32> to vector<80x32xf32>
    %205 = arith.addf %201, %204 : vector<80x32xf32>
    %c0_81 = arith.constant 0 : index
    %c11 = arith.constant 11 : index
    %c0_82 = arith.constant 0 : index
    %206 = vector.load %arg6[%c0_81, %c11, %c0_82] : memref<2x16x128xf32, #tpu.memory_space<vmem>>, vector<1x1x32xf32>
    %207 = vector.shape_cast %206 : vector<1x1x32xf32> to vector<1x32xf32>
    %208 = vector.broadcast %207 : vector<1x32xf32> to vector<80x32xf32>
    %209 = arith.mulf %205, %208 : vector<80x32xf32>
    %c0_83 = arith.constant 0 : index
    %c272 = arith.constant 272 : index
    %c0_84 = arith.constant 0 : index
    %210 = vector.load %arg5[%c0_83, %c272, %c0_84] : memref<2x320x128xbf16, #tpu.memory_space<vmem>>, vector<1x32x16xbf16>
    %211 = vector.shape_cast %210 : vector<1x32x16xbf16> to vector<32x16xbf16>
    %c0_85 = arith.constant 0 : index
    %c12 = arith.constant 12 : index
    %c0_86 = arith.constant 0 : index
    %212 = vector.load %arg6[%c0_85, %c12, %c0_86] : memref<2x16x128xf32, #tpu.memory_space<vmem>>, vector<1x1x16xf32>
    %213 = vector.shape_cast %212 : vector<1x1x16xf32> to vector<1x16xf32>
    %c0_87 = arith.constant 0 : index
    %c304 = arith.constant 304 : index
    %c0_88 = arith.constant 0 : index
    %214 = vector.load %arg5[%c0_87, %c304, %c0_88] : memref<2x320x128xbf16, #tpu.memory_space<vmem>>, vector<1x16x32xbf16>
    %215 = vector.shape_cast %214 : vector<1x16x32xbf16> to vector<16x32xbf16>
    %c0_89 = arith.constant 0 : index
    %c13 = arith.constant 13 : index
    %c0_90 = arith.constant 0 : index
    %216 = vector.load %arg6[%c0_89, %c13, %c0_90] : memref<2x16x128xf32, #tpu.memory_space<vmem>>, vector<1x1x32xf32>
    %217 = vector.shape_cast %216 : vector<1x1x32xf32> to vector<1x32xf32>
    %218 = arith.truncf %209 : vector<80x32xf32> to vector<80x32xbf16>
    %cst_91 = arith.constant dense<0.000000e+00> : vector<80x16xf32>
    %219 = tpu.matmul %218, %211, %cst_91 {dimension_numbers = #tpu.dot_dimension_numbers<[1], [0], [0], [1], [0, 0, 1, 1], [], []>} : vector<80x32xbf16>, vector<32x16xbf16>, vector<80x16xf32> -> vector<80x16xf32>
    %220 = vector.broadcast %213 : vector<1x16xf32> to vector<80x16xf32>
    %221 = arith.addf %219, %220 : vector<80x16xf32>
    %222 = arith.mulf %221, %221 : vector<80x16xf32>
    %223 = arith.mulf %221, %222 : vector<80x16xf32>
    %cst_92 = arith.constant 4.471500e-02 : f32
    %224 = vector.broadcast %cst_92 : f32 to vector<80x16xf32>
    %225 = arith.mulf %224, %223 : vector<80x16xf32>
    %226 = arith.addf %221, %225 : vector<80x16xf32>
    %cst_93 = arith.constant 0.797884583 : f32
    %227 = vector.broadcast %cst_93 : f32 to vector<80x16xf32>
    %228 = arith.mulf %227, %226 : vector<80x16xf32>
    %229 = math.tanh %228 : vector<80x16xf32>
    %cst_94 = arith.constant 1.000000e+00 : f32
    %230 = vector.broadcast %cst_94 : f32 to vector<80x16xf32>
    %231 = arith.addf %230, %229 : vector<80x16xf32>
    %cst_95 = arith.constant 5.000000e-01 : f32
    %232 = vector.broadcast %cst_95 : f32 to vector<80x16xf32>
    %233 = arith.mulf %232, %231 : vector<80x16xf32>
    %234 = arith.mulf %221, %233 : vector<80x16xf32>
    %235 = arith.truncf %234 : vector<80x16xf32> to vector<80x16xbf16>
    %cst_96 = arith.constant dense<0.000000e+00> : vector<80x32xf32>
    %236 = tpu.matmul %235, %215, %cst_96 {dimension_numbers = #tpu.dot_dimension_numbers<[1], [0], [0], [1], [0, 0, 1, 1], [], []>} : vector<80x16xbf16>, vector<16x32xbf16>, vector<80x32xf32> -> vector<80x32xf32>
    %237 = vector.broadcast %217 : vector<1x32xf32> to vector<80x32xf32>
    %238 = arith.addf %236, %237 : vector<80x32xf32>
    %239 = arith.addf %209, %238 : vector<80x32xf32>
    %240 = arith.addf %150, %239 : vector<80x32xf32>
    %c1_97 = arith.constant 1 : index
    %c0_98 = arith.constant 0 : index
    %c0_99 = arith.constant 0 : index
    %241 = vector.load %arg6[%c1_97, %c0_98, %c0_99] : memref<2x16x128xf32, #tpu.memory_space<vmem>>, vector<1x1x32xf32>
    %242 = vector.shape_cast %241 : vector<1x1x32xf32> to vector<1x32xf32>
    %c1_100 = arith.constant 1 : index
    %c1_101 = arith.constant 1 : index
    %c0_102 = arith.constant 0 : index
    %243 = vector.load %arg6[%c1_100, %c1_101, %c0_102] : memref<2x16x128xf32, #tpu.memory_space<vmem>>, vector<1x1x32xf32>
    %244 = vector.shape_cast %243 : vector<1x1x32xf32> to vector<1x32xf32>
    %cst_103 = arith.constant dense<0.000000e+00> : vector<80xf32>
    %245 = vector.multi_reduction <add>, %240, %cst_103 [1] : vector<80x32xf32> to vector<80xf32>
    %246 = vector.shape_cast %245 : vector<80xf32> to vector<80x1xf32>
    %cst_104 = arith.constant 3.200000e+01 : f32
    %247 = vector.broadcast %cst_104 : f32 to vector<80x1xf32>
    %248 = arith.divf %246, %247 : vector<80x1xf32>
    %249 = vector.broadcast %248 : vector<80x1xf32> to vector<80x32xf32>
    %250 = arith.subf %240, %249 : vector<80x32xf32>
    %251 = arith.mulf %250, %250 : vector<80x32xf32>
    %cst_105 = arith.constant dense<0.000000e+00> : vector<80xf32>
    %252 = vector.multi_reduction <add>, %251, %cst_105 [1] : vector<80x32xf32> to vector<80xf32>
    %253 = vector.shape_cast %252 : vector<80xf32> to vector<80x1xf32>
    %cst_106 = arith.constant 3.200000e+01 : f32
    %254 = vector.broadcast %cst_106 : f32 to vector<80x1xf32>
    %255 = arith.divf %253, %254 : vector<80x1xf32>
    %256 = vector.broadcast %248 : vector<80x1xf32> to vector<80x32xf32>
    %257 = arith.subf %240, %256 : vector<80x32xf32>
    %cst_107 = arith.constant 9.99999997E-7 : f32
    %258 = vector.broadcast %cst_107 : f32 to vector<80x1xf32>
    %259 = arith.addf %255, %258 : vector<80x1xf32>
    %260 = math.rsqrt %259 : vector<80x1xf32>
    %261 = vector.broadcast %260 : vector<80x1xf32> to vector<80x32xf32>
    %262 = arith.mulf %257, %261 : vector<80x32xf32>
    %263 = vector.broadcast %242 : vector<1x32xf32> to vector<80x32xf32>
    %264 = arith.mulf %262, %263 : vector<80x32xf32>
    %265 = vector.broadcast %244 : vector<1x32xf32> to vector<80x32xf32>
    %266 = arith.addf %264, %265 : vector<80x32xf32>
    %c1_108 = arith.constant 1 : index
    %c0_109 = arith.constant 0 : index
    %c0_110 = arith.constant 0 : index
    %267 = vector.load %arg5[%c1_108, %c0_109, %c0_110] : memref<2x320x128xbf16, #tpu.memory_space<vmem>>, vector<1x32x96xbf16>
    %268 = vector.shape_cast %267 : vector<1x32x96xbf16> to vector<32x96xbf16>
    %269 = arith.truncf %266 : vector<80x32xf32> to vector<80x32xbf16>
    %cst_111 = arith.constant dense<0.000000e+00> : vector<80x96xf32>
    %270 = tpu.matmul %269, %268, %cst_111 {dimension_numbers = #tpu.dot_dimension_numbers<[1], [0], [0], [1], [0, 0, 1, 1], [], []>} : vector<80x32xbf16>, vector<32x96xbf16>, vector<80x96xf32> -> vector<80x96xf32>
    %c1_112 = arith.constant 1 : index
    %c2_113 = arith.constant 2 : index
    %c0_114 = arith.constant 0 : index
    %271 = vector.load %arg6[%c1_112, %c2_113, %c0_114] : memref<2x16x128xf32, #tpu.memory_space<vmem>>, vector<1x1x96xf32>
    %272 = vector.shape_cast %271 : vector<1x1x96xf32> to vector<1x96xf32>
    %273 = vector.broadcast %272 : vector<1x96xf32> to vector<80x96xf32>
    %274 = arith.addf %270, %273 : vector<80x96xf32>
    %275 = vector.extract_strided_slice %274 {offsets = [0, 0], sizes = [80, 32], strides = [1, 1]} : vector<80x96xf32> to vector<80x32xf32>
    %276 = vector.extract_strided_slice %274 {offsets = [0, 32], sizes = [80, 32], strides = [1, 1]} : vector<80x96xf32> to vector<80x32xf32>
    %277 = arith.truncf %276 : vector<80x32xf32> to vector<80x32xbf16>
    %278 = vector.extract_strided_slice %274 {offsets = [0, 64], sizes = [80, 32], strides = [1, 1]} : vector<80x96xf32> to vector<80x32xf32>
    %cst_115 = arith.constant 0.000000e+00 : f32
    %279 = vector.broadcast %cst_115 : f32 to vector<80x32xf32>
    %280 = vector.broadcast %13 : vector<1x32xf32> to vector<80x32xf32>
    %281 = arith.mulf %275, %280 : vector<80x32xf32>
    %282 = arith.truncf %281 : vector<80x32xf32> to vector<80x32xbf16>
    %cst_116 = arith.constant dense<0.000000e+00> : vector<80x80xf32>
    %283 = tpu.matmul %282, %277, %cst_116 {dimension_numbers = #tpu.dot_dimension_numbers<[1], [1], [0], [0], [0, 0, 1, 0], [], []>} : vector<80x32xbf16>, vector<80x32xbf16>, vector<80x80xf32> -> vector<80x80xf32>
    %cst_117 = arith.constant dense<0xFF800000> : vector<80xf32>
    %284 = vector.multi_reduction <maximumf>, %283, %cst_117 [1] : vector<80x80xf32> to vector<80xf32>
    %285 = vector.shape_cast %284 : vector<80xf32> to vector<80x1xf32>
    %286 = vector.broadcast %285 : vector<80x1xf32> to vector<80x80xf32>
    %287 = arith.subf %283, %286 : vector<80x80xf32>
    %288 = math.exp %287 : vector<80x80xf32>
    %cst_118 = arith.constant dense<0.000000e+00> : vector<80xf32>
    %289 = vector.multi_reduction <add>, %288, %cst_118 [1] : vector<80x80xf32> to vector<80xf32>
    %290 = vector.shape_cast %289 : vector<80xf32> to vector<80x1xf32>
    %291 = tpu.reciprocal %290 {approx = true} : vector<80x1xf32> -> vector<80x1xf32>
    %292 = vector.broadcast %291 : vector<80x1xf32> to vector<80x80xf32>
    %293 = arith.mulf %288, %292 : vector<80x80xf32>
    %294 = vector.broadcast %18 : vector<1x32xf32> to vector<80x32xf32>
    %295 = arith.mulf %278, %294 : vector<80x32xf32>
    %296 = arith.truncf %295 : vector<80x32xf32> to vector<80x32xbf16>
    %297 = arith.truncf %293 : vector<80x80xf32> to vector<80x80xbf16>
    %cst_119 = arith.constant dense<0.000000e+00> : vector<80x32xf32>
    %298 = tpu.matmul %297, %296, %cst_119 {dimension_numbers = #tpu.dot_dimension_numbers<[1], [0], [0], [1], [0, 0, 1, 1], [], []>} : vector<80x80xbf16>, vector<80x32xbf16>, vector<80x32xf32> -> vector<80x32xf32>
    %299 = arith.addf %279, %298 : vector<80x32xf32>
    %300 = vector.broadcast %16 : vector<1x32xf32> to vector<80x32xf32>
    %301 = arith.mulf %275, %300 : vector<80x32xf32>
    %302 = arith.truncf %301 : vector<80x32xf32> to vector<80x32xbf16>
    %cst_120 = arith.constant dense<0.000000e+00> : vector<80x80xf32>
    %303 = tpu.matmul %302, %277, %cst_120 {dimension_numbers = #tpu.dot_dimension_numbers<[1], [1], [0], [0], [0, 0, 1, 0], [], []>} : vector<80x32xbf16>, vector<80x32xbf16>, vector<80x80xf32> -> vector<80x80xf32>
    %cst_121 = arith.constant dense<0xFF800000> : vector<80xf32>
    %304 = vector.multi_reduction <maximumf>, %303, %cst_121 [1] : vector<80x80xf32> to vector<80xf32>
    %305 = vector.shape_cast %304 : vector<80xf32> to vector<80x1xf32>
    %306 = vector.broadcast %305 : vector<80x1xf32> to vector<80x80xf32>
    %307 = arith.subf %303, %306 : vector<80x80xf32>
    %308 = math.exp %307 : vector<80x80xf32>
    %cst_122 = arith.constant dense<0.000000e+00> : vector<80xf32>
    %309 = vector.multi_reduction <add>, %308, %cst_122 [1] : vector<80x80xf32> to vector<80xf32>
    %310 = vector.shape_cast %309 : vector<80xf32> to vector<80x1xf32>
    %311 = tpu.reciprocal %310 {approx = true} : vector<80x1xf32> -> vector<80x1xf32>
    %312 = vector.broadcast %311 : vector<80x1xf32> to vector<80x80xf32>
    %313 = arith.mulf %308, %312 : vector<80x80xf32>
    %314 = vector.broadcast %20 : vector<1x32xf32> to vector<80x32xf32>
    %315 = arith.mulf %278, %314 : vector<80x32xf32>
    %316 = arith.truncf %315 : vector<80x32xf32> to vector<80x32xbf16>
    %317 = arith.truncf %313 : vector<80x80xf32> to vector<80x80xbf16>
    %cst_123 = arith.constant dense<0.000000e+00> : vector<80x32xf32>
    %318 = tpu.matmul %317, %316, %cst_123 {dimension_numbers = #tpu.dot_dimension_numbers<[1], [0], [0], [1], [0, 0, 1, 1], [], []>} : vector<80x80xbf16>, vector<80x32xbf16>, vector<80x32xf32> -> vector<80x32xf32>
    %319 = arith.addf %299, %318 : vector<80x32xf32>
    %c1_124 = arith.constant 1 : index
    %c32_125 = arith.constant 32 : index
    %c0_126 = arith.constant 0 : index
    %320 = vector.load %arg5[%c1_124, %c32_125, %c0_126] : memref<2x320x128xbf16, #tpu.memory_space<vmem>>, vector<1x32x32xbf16>
    %321 = vector.shape_cast %320 : vector<1x32x32xbf16> to vector<32x32xbf16>
    %322 = arith.truncf %319 : vector<80x32xf32> to vector<80x32xbf16>
    %cst_127 = arith.constant dense<0.000000e+00> : vector<80x32xf32>
    %323 = tpu.matmul %322, %321, %cst_127 {dimension_numbers = #tpu.dot_dimension_numbers<[1], [0], [0], [1], [0, 0, 1, 1], [], []>} : vector<80x32xbf16>, vector<32x32xbf16>, vector<80x32xf32> -> vector<80x32xf32>
    %c1_128 = arith.constant 1 : index
    %c3_129 = arith.constant 3 : index
    %c0_130 = arith.constant 0 : index
    %324 = vector.load %arg6[%c1_128, %c3_129, %c0_130] : memref<2x16x128xf32, #tpu.memory_space<vmem>>, vector<1x1x32xf32>
    %325 = vector.shape_cast %324 : vector<1x1x32xf32> to vector<1x32xf32>
    %326 = vector.broadcast %325 : vector<1x32xf32> to vector<80x32xf32>
    %327 = arith.addf %323, %326 : vector<80x32xf32>
    %c1_131 = arith.constant 1 : index
    %c4_132 = arith.constant 4 : index
    %c0_133 = arith.constant 0 : index
    %328 = vector.load %arg6[%c1_131, %c4_132, %c0_133] : memref<2x16x128xf32, #tpu.memory_space<vmem>>, vector<1x1x32xf32>
    %329 = vector.shape_cast %328 : vector<1x1x32xf32> to vector<1x32xf32>
    %330 = vector.broadcast %329 : vector<1x32xf32> to vector<80x32xf32>
    %331 = arith.mulf %327, %330 : vector<80x32xf32>
    %c1_134 = arith.constant 1 : index
    %c224_135 = arith.constant 224 : index
    %c0_136 = arith.constant 0 : index
    %332 = vector.load %arg5[%c1_134, %c224_135, %c0_136] : memref<2x320x128xbf16, #tpu.memory_space<vmem>>, vector<1x32x16xbf16>
    %333 = vector.shape_cast %332 : vector<1x32x16xbf16> to vector<32x16xbf16>
    %c1_137 = arith.constant 1 : index
    %c5_138 = arith.constant 5 : index
    %c0_139 = arith.constant 0 : index
    %334 = vector.load %arg6[%c1_137, %c5_138, %c0_139] : memref<2x16x128xf32, #tpu.memory_space<vmem>>, vector<1x1x16xf32>
    %335 = vector.shape_cast %334 : vector<1x1x16xf32> to vector<1x16xf32>
    %c1_140 = arith.constant 1 : index
    %c256_141 = arith.constant 256 : index
    %c0_142 = arith.constant 0 : index
    %336 = vector.load %arg5[%c1_140, %c256_141, %c0_142] : memref<2x320x128xbf16, #tpu.memory_space<vmem>>, vector<1x16x32xbf16>
    %337 = vector.shape_cast %336 : vector<1x16x32xbf16> to vector<16x32xbf16>
    %c1_143 = arith.constant 1 : index
    %c6_144 = arith.constant 6 : index
    %c0_145 = arith.constant 0 : index
    %338 = vector.load %arg6[%c1_143, %c6_144, %c0_145] : memref<2x16x128xf32, #tpu.memory_space<vmem>>, vector<1x1x32xf32>
    %339 = vector.shape_cast %338 : vector<1x1x32xf32> to vector<1x32xf32>
    %340 = arith.truncf %331 : vector<80x32xf32> to vector<80x32xbf16>
    %cst_146 = arith.constant dense<0.000000e+00> : vector<80x16xf32>
    %341 = tpu.matmul %340, %333, %cst_146 {dimension_numbers = #tpu.dot_dimension_numbers<[1], [0], [0], [1], [0, 0, 1, 1], [], []>} : vector<80x32xbf16>, vector<32x16xbf16>, vector<80x16xf32> -> vector<80x16xf32>
    %342 = vector.broadcast %335 : vector<1x16xf32> to vector<80x16xf32>
    %343 = arith.addf %341, %342 : vector<80x16xf32>
    %344 = arith.mulf %343, %343 : vector<80x16xf32>
    %345 = arith.mulf %343, %344 : vector<80x16xf32>
    %cst_147 = arith.constant 4.471500e-02 : f32
    %346 = vector.broadcast %cst_147 : f32 to vector<80x16xf32>
    %347 = arith.mulf %346, %345 : vector<80x16xf32>
    %348 = arith.addf %343, %347 : vector<80x16xf32>
    %cst_148 = arith.constant 0.797884583 : f32
    %349 = vector.broadcast %cst_148 : f32 to vector<80x16xf32>
    %350 = arith.mulf %349, %348 : vector<80x16xf32>
    %351 = math.tanh %350 : vector<80x16xf32>
    %cst_149 = arith.constant 1.000000e+00 : f32
    %352 = vector.broadcast %cst_149 : f32 to vector<80x16xf32>
    %353 = arith.addf %352, %351 : vector<80x16xf32>
    %cst_150 = arith.constant 5.000000e-01 : f32
    %354 = vector.broadcast %cst_150 : f32 to vector<80x16xf32>
    %355 = arith.mulf %354, %353 : vector<80x16xf32>
    %356 = arith.mulf %343, %355 : vector<80x16xf32>
    %357 = arith.truncf %356 : vector<80x16xf32> to vector<80x16xbf16>
    %cst_151 = arith.constant dense<0.000000e+00> : vector<80x32xf32>
    %358 = tpu.matmul %357, %337, %cst_151 {dimension_numbers = #tpu.dot_dimension_numbers<[1], [0], [0], [1], [0, 0, 1, 1], [], []>} : vector<80x16xbf16>, vector<16x32xbf16>, vector<80x32xf32> -> vector<80x32xf32>
    %359 = vector.broadcast %339 : vector<1x32xf32> to vector<80x32xf32>
    %360 = arith.addf %358, %359 : vector<80x32xf32>
    %361 = arith.addf %331, %360 : vector<80x32xf32>
    %362 = arith.addf %240, %361 : vector<80x32xf32>
    %c1_152 = arith.constant 1 : index
    %c7_153 = arith.constant 7 : index
    %c0_154 = arith.constant 0 : index
    %363 = vector.load %arg6[%c1_152, %c7_153, %c0_154] : memref<2x16x128xf32, #tpu.memory_space<vmem>>, vector<1x1x32xf32>
    %364 = vector.shape_cast %363 : vector<1x1x32xf32> to vector<1x32xf32>
    %c1_155 = arith.constant 1 : index
    %c8_156 = arith.constant 8 : index
    %c0_157 = arith.constant 0 : index
    %365 = vector.load %arg6[%c1_155, %c8_156, %c0_157] : memref<2x16x128xf32, #tpu.memory_space<vmem>>, vector<1x1x32xf32>
    %366 = vector.shape_cast %365 : vector<1x1x32xf32> to vector<1x32xf32>
    %cst_158 = arith.constant dense<0.000000e+00> : vector<80xf32>
    %367 = vector.multi_reduction <add>, %362, %cst_158 [1] : vector<80x32xf32> to vector<80xf32>
    %368 = vector.shape_cast %367 : vector<80xf32> to vector<80x1xf32>
    %cst_159 = arith.constant 3.200000e+01 : f32
    %369 = vector.broadcast %cst_159 : f32 to vector<80x1xf32>
    %370 = arith.divf %368, %369 : vector<80x1xf32>
    %371 = vector.broadcast %370 : vector<80x1xf32> to vector<80x32xf32>
    %372 = arith.subf %362, %371 : vector<80x32xf32>
    %373 = arith.mulf %372, %372 : vector<80x32xf32>
    %cst_160 = arith.constant dense<0.000000e+00> : vector<80xf32>
    %374 = vector.multi_reduction <add>, %373, %cst_160 [1] : vector<80x32xf32> to vector<80xf32>
    %375 = vector.shape_cast %374 : vector<80xf32> to vector<80x1xf32>
    %cst_161 = arith.constant 3.200000e+01 : f32
    %376 = vector.broadcast %cst_161 : f32 to vector<80x1xf32>
    %377 = arith.divf %375, %376 : vector<80x1xf32>
    %378 = vector.broadcast %370 : vector<80x1xf32> to vector<80x32xf32>
    %379 = arith.subf %362, %378 : vector<80x32xf32>
    %cst_162 = arith.constant 9.99999997E-7 : f32
    %380 = vector.broadcast %cst_162 : f32 to vector<80x1xf32>
    %381 = arith.addf %377, %380 : vector<80x1xf32>
    %382 = math.rsqrt %381 : vector<80x1xf32>
    %383 = vector.broadcast %382 : vector<80x1xf32> to vector<80x32xf32>
    %384 = arith.mulf %379, %383 : vector<80x32xf32>
    %385 = vector.broadcast %364 : vector<1x32xf32> to vector<80x32xf32>
    %386 = arith.mulf %384, %385 : vector<80x32xf32>
    %387 = vector.broadcast %366 : vector<1x32xf32> to vector<80x32xf32>
    %388 = arith.addf %386, %387 : vector<80x32xf32>
    %c1_163 = arith.constant 1 : index
    %c64_164 = arith.constant 64 : index
    %c0_165 = arith.constant 0 : index
    %389 = vector.load %arg5[%c1_163, %c64_164, %c0_165] : memref<2x320x128xbf16, #tpu.memory_space<vmem>>, vector<1x32x128xbf16>
    %390 = vector.shape_cast %389 : vector<1x32x128xbf16> to vector<32x128xbf16>
    %391 = arith.truncf %388 : vector<80x32xf32> to vector<80x32xbf16>
    %cst_166 = arith.constant dense<0.000000e+00> : vector<80x128xf32>
    %392 = tpu.matmul %391, %390, %cst_166 {dimension_numbers = #tpu.dot_dimension_numbers<[1], [0], [0], [1], [0, 0, 1, 1], [], []>} : vector<80x32xbf16>, vector<32x128xbf16>, vector<80x128xf32> -> vector<80x128xf32>
    %c1_167 = arith.constant 1 : index
    %c9_168 = arith.constant 9 : index
    %c0_169 = arith.constant 0 : index
    %393 = vector.load %arg6[%c1_167, %c9_168, %c0_169] : memref<2x16x128xf32, #tpu.memory_space<vmem>>, vector<1x1x128xf32>
    %394 = vector.shape_cast %393 : vector<1x1x128xf32> to vector<1x128xf32>
    %395 = vector.broadcast %394 : vector<1x128xf32> to vector<80x128xf32>
    %396 = arith.addf %392, %395 : vector<80x128xf32>
    %397 = arith.mulf %396, %396 : vector<80x128xf32>
    %398 = arith.mulf %396, %397 : vector<80x128xf32>
    %cst_170 = arith.constant 4.471500e-02 : f32
    %399 = vector.broadcast %cst_170 : f32 to vector<80x128xf32>
    %400 = arith.mulf %399, %398 : vector<80x128xf32>
    %401 = arith.addf %396, %400 : vector<80x128xf32>
    %cst_171 = arith.constant 0.797884583 : f32
    %402 = vector.broadcast %cst_171 : f32 to vector<80x128xf32>
    %403 = arith.mulf %402, %401 : vector<80x128xf32>
    %404 = math.tanh %403 : vector<80x128xf32>
    %cst_172 = arith.constant 1.000000e+00 : f32
    %405 = vector.broadcast %cst_172 : f32 to vector<80x128xf32>
    %406 = arith.addf %405, %404 : vector<80x128xf32>
    %cst_173 = arith.constant 5.000000e-01 : f32
    %407 = vector.broadcast %cst_173 : f32 to vector<80x128xf32>
    %408 = arith.mulf %407, %406 : vector<80x128xf32>
    %409 = arith.mulf %396, %408 : vector<80x128xf32>
    %c1_174 = arith.constant 1 : index
    %c96_175 = arith.constant 96 : index
    %c0_176 = arith.constant 0 : index
    %410 = vector.load %arg5[%c1_174, %c96_175, %c0_176] : memref<2x320x128xbf16, #tpu.memory_space<vmem>>, vector<1x128x32xbf16>
    %411 = vector.shape_cast %410 : vector<1x128x32xbf16> to vector<128x32xbf16>
    %412 = arith.truncf %409 : vector<80x128xf32> to vector<80x128xbf16>
    %cst_177 = arith.constant dense<0.000000e+00> : vector<80x32xf32>
    %413 = tpu.matmul %412, %411, %cst_177 {dimension_numbers = #tpu.dot_dimension_numbers<[1], [0], [0], [1], [0, 0, 1, 1], [], []>} : vector<80x128xbf16>, vector<128x32xbf16>, vector<80x32xf32> -> vector<80x32xf32>
    %c1_178 = arith.constant 1 : index
    %c10_179 = arith.constant 10 : index
    %c0_180 = arith.constant 0 : index
    %414 = vector.load %arg6[%c1_178, %c10_179, %c0_180] : memref<2x16x128xf32, #tpu.memory_space<vmem>>, vector<1x1x32xf32>
    %415 = vector.shape_cast %414 : vector<1x1x32xf32> to vector<1x32xf32>
    %416 = vector.broadcast %415 : vector<1x32xf32> to vector<80x32xf32>
    %417 = arith.addf %413, %416 : vector<80x32xf32>
    %c1_181 = arith.constant 1 : index
    %c11_182 = arith.constant 11 : index
    %c0_183 = arith.constant 0 : index
    %418 = vector.load %arg6[%c1_181, %c11_182, %c0_183] : memref<2x16x128xf32, #tpu.memory_space<vmem>>, vector<1x1x32xf32>
    %419 = vector.shape_cast %418 : vector<1x1x32xf32> to vector<1x32xf32>
    %420 = vector.broadcast %419 : vector<1x32xf32> to vector<80x32xf32>
    %421 = arith.mulf %417, %420 : vector<80x32xf32>
    %c1_184 = arith.constant 1 : index
    %c272_185 = arith.constant 272 : index
    %c0_186 = arith.constant 0 : index
    %422 = vector.load %arg5[%c1_184, %c272_185, %c0_186] : memref<2x320x128xbf16, #tpu.memory_space<vmem>>, vector<1x32x16xbf16>
    %423 = vector.shape_cast %422 : vector<1x32x16xbf16> to vector<32x16xbf16>
    %c1_187 = arith.constant 1 : index
    %c12_188 = arith.constant 12 : index
    %c0_189 = arith.constant 0 : index
    %424 = vector.load %arg6[%c1_187, %c12_188, %c0_189] : memref<2x16x128xf32, #tpu.memory_space<vmem>>, vector<1x1x16xf32>
    %425 = vector.shape_cast %424 : vector<1x1x16xf32> to vector<1x16xf32>
    %c1_190 = arith.constant 1 : index
    %c304_191 = arith.constant 304 : index
    %c0_192 = arith.constant 0 : index
    %426 = vector.load %arg5[%c1_190, %c304_191, %c0_192] : memref<2x320x128xbf16, #tpu.memory_space<vmem>>, vector<1x16x32xbf16>
    %427 = vector.shape_cast %426 : vector<1x16x32xbf16> to vector<16x32xbf16>
    %c1_193 = arith.constant 1 : index
    %c13_194 = arith.constant 13 : index
    %c0_195 = arith.constant 0 : index
    %428 = vector.load %arg6[%c1_193, %c13_194, %c0_195] : memref<2x16x128xf32, #tpu.memory_space<vmem>>, vector<1x1x32xf32>
    %429 = vector.shape_cast %428 : vector<1x1x32xf32> to vector<1x32xf32>
    %430 = arith.truncf %421 : vector<80x32xf32> to vector<80x32xbf16>
    %cst_196 = arith.constant dense<0.000000e+00> : vector<80x16xf32>
    %431 = tpu.matmul %430, %423, %cst_196 {dimension_numbers = #tpu.dot_dimension_numbers<[1], [0], [0], [1], [0, 0, 1, 1], [], []>} : vector<80x32xbf16>, vector<32x16xbf16>, vector<80x16xf32> -> vector<80x16xf32>
    %432 = vector.broadcast %425 : vector<1x16xf32> to vector<80x16xf32>
    %433 = arith.addf %431, %432 : vector<80x16xf32>
    %434 = arith.mulf %433, %433 : vector<80x16xf32>
    %435 = arith.mulf %433, %434 : vector<80x16xf32>
    %cst_197 = arith.constant 4.471500e-02 : f32
    %436 = vector.broadcast %cst_197 : f32 to vector<80x16xf32>
    %437 = arith.mulf %436, %435 : vector<80x16xf32>
    %438 = arith.addf %433, %437 : vector<80x16xf32>
    %cst_198 = arith.constant 0.797884583 : f32
    %439 = vector.broadcast %cst_198 : f32 to vector<80x16xf32>
    %440 = arith.mulf %439, %438 : vector<80x16xf32>
    %441 = math.tanh %440 : vector<80x16xf32>
    %cst_199 = arith.constant 1.000000e+00 : f32
    %442 = vector.broadcast %cst_199 : f32 to vector<80x16xf32>
    %443 = arith.addf %442, %441 : vector<80x16xf32>
    %cst_200 = arith.constant 5.000000e-01 : f32
    %444 = vector.broadcast %cst_200 : f32 to vector<80x16xf32>
    %445 = arith.mulf %444, %443 : vector<80x16xf32>
    %446 = arith.mulf %433, %445 : vector<80x16xf32>
    %447 = arith.truncf %446 : vector<80x16xf32> to vector<80x16xbf16>
    %cst_201 = arith.constant dense<0.000000e+00> : vector<80x32xf32>
    %448 = tpu.matmul %447, %427, %cst_201 {dimension_numbers = #tpu.dot_dimension_numbers<[1], [0], [0], [1], [0, 0, 1, 1], [], []>} : vector<80x16xbf16>, vector<16x32xbf16>, vector<80x32xf32> -> vector<80x32xf32>
    %449 = vector.broadcast %429 : vector<1x32xf32> to vector<80x32xf32>
    %450 = arith.addf %448, %449 : vector<80x32xf32>
    %451 = arith.addf %421, %450 : vector<80x32xf32>
    %452 = arith.addf %362, %451 : vector<80x32xf32>
    %c0_202 = arith.constant 0 : index
    %c0_203 = arith.constant 0 : index
    %453 = vector.load %arg4[%c0_202, %c0_203] : memref<8x128xf32, #tpu.memory_space<vmem>>, vector<1x32xf32>
    %c1_204 = arith.constant 1 : index
    %c0_205 = arith.constant 0 : index
    %454 = vector.load %arg4[%c1_204, %c0_205] : memref<8x128xf32, #tpu.memory_space<vmem>>, vector<1x32xf32>
    %cst_206 = arith.constant dense<0.000000e+00> : vector<80xf32>
    %455 = vector.multi_reduction <add>, %452, %cst_206 [1] : vector<80x32xf32> to vector<80xf32>
    %456 = vector.shape_cast %455 : vector<80xf32> to vector<80x1xf32>
    %cst_207 = arith.constant 3.200000e+01 : f32
    %457 = vector.broadcast %cst_207 : f32 to vector<80x1xf32>
    %458 = arith.divf %456, %457 : vector<80x1xf32>
    %459 = vector.broadcast %458 : vector<80x1xf32> to vector<80x32xf32>
    %460 = arith.subf %452, %459 : vector<80x32xf32>
    %461 = arith.mulf %460, %460 : vector<80x32xf32>
    %cst_208 = arith.constant dense<0.000000e+00> : vector<80xf32>
    %462 = vector.multi_reduction <add>, %461, %cst_208 [1] : vector<80x32xf32> to vector<80xf32>
    %463 = vector.shape_cast %462 : vector<80xf32> to vector<80x1xf32>
    %cst_209 = arith.constant 3.200000e+01 : f32
    %464 = vector.broadcast %cst_209 : f32 to vector<80x1xf32>
    %465 = arith.divf %463, %464 : vector<80x1xf32>
    %466 = vector.broadcast %458 : vector<80x1xf32> to vector<80x32xf32>
    %467 = arith.subf %452, %466 : vector<80x32xf32>
    %cst_210 = arith.constant 9.99999997E-7 : f32
    %468 = vector.broadcast %cst_210 : f32 to vector<80x1xf32>
    %469 = arith.addf %465, %468 : vector<80x1xf32>
    %470 = math.rsqrt %469 : vector<80x1xf32>
    %471 = vector.broadcast %470 : vector<80x1xf32> to vector<80x32xf32>
    %472 = arith.mulf %467, %471 : vector<80x32xf32>
    %473 = vector.broadcast %453 : vector<1x32xf32> to vector<80x32xf32>
    %474 = arith.mulf %472, %473 : vector<80x32xf32>
    %475 = vector.broadcast %454 : vector<1x32xf32> to vector<80x32xf32>
    %476 = arith.addf %474, %475 : vector<80x32xf32>
    %477 = vector.extract_strided_slice %476 {offsets = [16, 0], sizes = [64, 32], strides = [1, 1]} : vector<80x32xf32> to vector<64x32xf32>
    %c16 = arith.constant 16 : index
    %c0_211 = arith.constant 0 : index
    %478 = vector.load %arg3[%c16, %c0_211] : memref<112x128xbf16, #tpu.memory_space<vmem>>, vector<32x64xbf16>
    %479 = arith.truncf %477 : vector<64x32xf32> to vector<64x32xbf16>
    %cst_212 = arith.constant dense<0.000000e+00> : vector<64x64xf32>
    %480 = tpu.matmul %479, %478, %cst_212 {dimension_numbers = #tpu.dot_dimension_numbers<[1], [0], [0], [1], [0, 0, 1, 1], [], []>} : vector<64x32xbf16>, vector<32x64xbf16>, vector<64x64xf32> -> vector<64x64xf32>
    %c2_213 = arith.constant 2 : index
    %c0_214 = arith.constant 0 : index
    %481 = vector.load %arg4[%c2_213, %c0_214] : memref<8x128xf32, #tpu.memory_space<vmem>>, vector<1x64xf32>
    %482 = vector.broadcast %481 : vector<1x64xf32> to vector<64x64xf32>
    %483 = arith.addf %480, %482 : vector<64x64xf32>
    %484 = arith.mulf %483, %483 : vector<64x64xf32>
    %485 = arith.mulf %483, %484 : vector<64x64xf32>
    %cst_215 = arith.constant 4.471500e-02 : f32
    %486 = vector.broadcast %cst_215 : f32 to vector<64x64xf32>
    %487 = arith.mulf %486, %485 : vector<64x64xf32>
    %488 = arith.addf %483, %487 : vector<64x64xf32>
    %cst_216 = arith.constant 0.797884583 : f32
    %489 = vector.broadcast %cst_216 : f32 to vector<64x64xf32>
    %490 = arith.mulf %489, %488 : vector<64x64xf32>
    %491 = math.tanh %490 : vector<64x64xf32>
    %cst_217 = arith.constant 1.000000e+00 : f32
    %492 = vector.broadcast %cst_217 : f32 to vector<64x64xf32>
    %493 = arith.addf %492, %491 : vector<64x64xf32>
    %cst_218 = arith.constant 5.000000e-01 : f32
    %494 = vector.broadcast %cst_218 : f32 to vector<64x64xf32>
    %495 = arith.mulf %494, %493 : vector<64x64xf32>
    %496 = arith.mulf %483, %495 : vector<64x64xf32>
    %c48 = arith.constant 48 : index
    %c0_219 = arith.constant 0 : index
    %497 = vector.load %arg3[%c48, %c0_219] : memref<112x128xbf16, #tpu.memory_space<vmem>>, vector<64x128xbf16>
    %498 = arith.truncf %496 : vector<64x64xf32> to vector<64x64xbf16>
    %cst_220 = arith.constant dense<0.000000e+00> : vector<64x128xf32>
    %499 = tpu.matmul %498, %497, %cst_220 {dimension_numbers = #tpu.dot_dimension_numbers<[1], [0], [0], [1], [0, 0, 1, 1], [], []>} : vector<64x64xbf16>, vector<64x128xbf16>, vector<64x128xf32> -> vector<64x128xf32>
    %c3_221 = arith.constant 3 : index
    %c0_222 = arith.constant 0 : index
    %500 = vector.load %arg4[%c3_221, %c0_222] : memref<8x128xf32, #tpu.memory_space<vmem>>, vector<1x128xf32>
    %501 = vector.broadcast %500 : vector<1x128xf32> to vector<64x128xf32>
    %502 = arith.addf %499, %501 : vector<64x128xf32>
    %503 = tpu.iota {dimensions = array<i32: 1>} : vector<64x128xi32>
    %c1_i32 = arith.constant 1 : i32
    %504 = vector.broadcast %c1_i32 : i32 to vector<64x128xi32>
    %505 = arith.cmpi sge, %503, %504 : vector<64x128xi32>
    %c5_i32 = arith.constant 5 : i32
    %506 = vector.broadcast %c5_i32 : i32 to vector<64x128xi32>
    %507 = arith.cmpi slt, %503, %506 : vector<64x128xi32>
    %508 = arith.andi %505, %507 : vector<64x128xi1>
    %cst_223 = arith.constant 5.000000e-01 : f32
    %509 = vector.broadcast %cst_223 : f32 to vector<64x128xf32>
    %510 = arith.mulf %509, %502 : vector<64x128xf32>
    %511 = math.tanh %510 : vector<64x128xf32>
    %cst_224 = arith.constant 1.000000e+00 : f32
    %512 = vector.broadcast %cst_224 : f32 to vector<64x128xf32>
    %513 = arith.addf %511, %512 : vector<64x128xf32>
    %cst_225 = arith.constant 5.000000e-01 : f32
    %514 = vector.broadcast %cst_225 : f32 to vector<64x128xf32>
    %515 = arith.mulf %514, %513 : vector<64x128xf32>
    %516 = arith.select %508, %515, %502 : vector<64x128xi1>, vector<64x128xf32>
    %c0_226 = arith.constant 0 : index
    %c0_227 = arith.constant 0 : index
    %c0_228 = arith.constant 0 : index
    %517 = vector.load %arg7[%c0_226, %c0_227, %c0_228] : memref<1x64x128xf32, #tpu.memory_space<vmem>>, vector<1x64x128xf32>
    %518 = vector.shape_cast %517 : vector<1x64x128xf32> to vector<64x128xf32>
    %519 = vector.shape_cast %516 : vector<64x128xf32> to vector<1x64x128xf32>
    tpu.vector_store %arg7[%c0_226, %c0_227, %c0_228], %519 {strides = array<i32>} : memref<1x64x128xf32, #tpu.memory_space<vmem>>, vector<1x64x128xf32>,
    return
  }
  func.func @transform_0(%arg0: i32) -> (i32, i32, i32) {
    %c0_i32 = arith.constant 0 : i32
    %c0_i32_0 = arith.constant 0 : i32
    %c0_i32_1 = arith.constant 0 : i32
    return %arg0, %c0_i32, %c0_i32_0 : i32, i32, i32
  }
  func.func @transform_1(%arg0: i32) -> (i32, i32, i32) {
    %c0_i32 = arith.constant 0 : i32
    %c0_i32_0 = arith.constant 0 : i32
    %c0_i32_1 = arith.constant 0 : i32
    return %arg0, %c0_i32, %c0_i32_0 : i32, i32, i32
  }
  func.func @transform_2(%arg0: i32) -> (i32, i32) {
    %c0_i32 = arith.constant 0 : i32
    %c0_i32_0 = arith.constant 0 : i32
    %c0_i32_1 = arith.constant 0 : i32
    return %c0_i32, %c0_i32_0 : i32, i32
  }
  func.func @transform_3(%arg0: i32) -> (i32, i32) {
    %c0_i32 = arith.constant 0 : i32
    %c0_i32_0 = arith.constant 0 : i32
    %c0_i32_1 = arith.constant 0 : i32
    return %c0_i32, %c0_i32_0 : i32, i32
  }
  func.func @transform_4(%arg0: i32) -> (i32, i32, i32) {
    %c0_i32 = arith.constant 0 : i32
    %c0_i32_0 = arith.constant 0 : i32
    %c0_i32_1 = arith.constant 0 : i32
    %c0_i32_2 = arith.constant 0 : i32
    return %c0_i32, %c0_i32_0, %c0_i32_1 : i32, i32, i32
  }
  func.func @transform_5(%arg0: i32) -> (i32, i32, i32) {
    %c0_i32 = arith.constant 0 : i32
    %c0_i32_0 = arith.constant 0 : i32
    %c0_i32_1 = arith.constant 0 : i32
    %c0_i32_2 = arith.constant 0 : i32
    return %c0_i32, %c0_i32_0, %c0_i32_1 : i32, i32, i32
  }
  func.func @transform_6(%arg0: i32) -> (i32, i32, i32) {
    %c0_i32 = arith.constant 0 : i32
    %c0_i32_0 = arith.constant 0 : i32
    %c0_i32_1 = arith.constant 0 : i32
    return %arg0, %c0_i32, %c0_i32_0 : i32, i32, i32
  }
}

</mosaic_0001>

<bundles_post_ra>
// kernel: squeeze.1
= control target key start
LH: loop header
LB: loop body
LE: loop exit
PB: predicated region body
PF: predicated region fallthrough
CT: control target
= control target key end

     0   :  { %s135_s0 = inlined_call_operand.vmem [shape: f32[2,64], index: 0, kind: input, shape index: {}]   ;;  %s136_s1 = inlined_call_operand.hbm [shape: f32[2,8,8], index: 1, kind: output, shape index: {}]  }
   0x1   :  { %v5_v0 = vld [vmem:[%s135_s0] sm:$0x3] }
   0x2   :  { %6 = vst [vmem:[#allocation2] sm:$0x3] %v5_v0 }
   0x3   :  { %2 = vsyncpa [#allocation1], 0  ;;  %s94_s0 = smov 120   ;;  %s95_s8 = smov 104   ;;  %vm8_vm0 = vcmask 64512  }
   0x4   :  { %s96_s9 = smov 112   ;;  %s97_s10 = smov 96  }
   0x5   :  { %s98_s11 = smov 88   ;;  %s99_s12 = smov 80  }
   0x6   :  { %s100_s13 = smov 72   ;;  %s101_s14 = smov [#allocation0]  }
   0x7   :  { %s56_s15 = sshll.u32 %s101_s14, 4  ;;  %s57_s15 = int_to_ptr.vmem [resolvable:$true] %s56_s15 }
   0x8   :  { %s70_s16 = scalar_lea.vmem %s57_s15, 256  ;;  %p75_p1 = scmp.lt.s32.totalorder %s57_s15, %s57_s15 }
   0x9   :  { %v10_v1 = vld [vmem:[#allocation2] sm:$0x3]   ;;  %p71_p0 = scmp.ne.s32.totalorder %s57_s15, %s70_s16  ;;  %p76_p2 = scmp.lt.s32.totalorder %s70_s16, %s70_s16 }
   0xa   :  { %v22_v2 = vld [vmem:[#allocation2] sm:$0x3]   ;;  %11 = vrot.lane.b32.xlu0 %v10_v1, %s94_s0 }
   0xb   :  { %23 = vrot.lane.b32.xlu1 %v22_v2, %s95_s8  ;;  %v16_v3 = vld [vmem:[#allocation2] sm:$0x3]   ;;  %p77_p3 = por %p76_p2, %p75_p1 }
   0xc   :  { %v28_v4 = vld [vmem:[#allocation2] sm:$0x3]  }
   0xd   :  { %v7_v5 = vld [vmem:[#allocation2] sm:$0x3]   ;;  %p78_p4 = pnand %p77_p3, %p71_p0 }
   0xe   :  { %9 = vst.msk [vmem:[#allocation0] ss:$8 sm:$0x3] %vm8_vm0, %v7_v5   ;;  %17 = vrot.lane.b32.xlu0 %v16_v3, %s96_s9  ;;  %v34_v6 = vld [vmem:[#allocation2] sm:$0x3]  }
   0xf   :  { %29 = vrot.lane.b32.xlu1 %v28_v4, %s97_s10  ;;  %v40_v7 = vld [vmem:[#allocation2] sm:$0x3]  }
  0x10   :  { %v46_v8 = vld [vmem:[#allocation2] sm:$0x3]  }
  0x12   :  { %35 = vrot.lane.b32.xlu0 %v34_v6, %s98_s11 }
  0x13   :  { %41 = vrot.lane.b32.xlu1 %v40_v7, %s99_s12 }
  0x16   :  { %47 = vrot.lane.b32.xlu0 %v46_v8, %s100_s13 }
  0x7c   :  { %v12_v9 = vpop.permute.xlu0 %11  }
  0x7d   :  { %v24_v10 = vpop.permute.xlu1 %23   ;;  %15 = vst.msk [vmem:[#allocation0 + $0x1] ss:$8 sm:$0x3] %vm8_vm0, %v12_v9  }
  0x7e   :  { %27 = vst.msk [vmem:[#allocation0 + $0x3] ss:$8 sm:$0x3] %vm8_vm0, %v24_v10  }
  0x80   :  { %v18_v11 = vpop.permute.xlu0 %17  }
  0x81   :  { %v30_v12 = vpop.permute.xlu1 %29   ;;  %21 = vst.msk [vmem:[#allocation0 + $0x2] ss:$8 sm:$0x3] %vm8_vm0, %v18_v11  }
  0x82   :  { %33 = vst.msk [vmem:[#allocation0 + $0x4] ss:$8 sm:$0x3] %vm8_vm0, %v30_v12  }
  0x84   :  { %v36_v13 = vpop.permute.xlu0 %35  }
  0x85   :  { %v42_v14 = vpop.permute.xlu1 %41   ;;  %39 = vst.msk [vmem:[#allocation0 + $0x5] ss:$8 sm:$0x3] %vm8_vm0, %v36_v13  }
  0x86   :  { %45 = vst.msk [vmem:[#allocation0 + $0x6] ss:$8 sm:$0x3] %vm8_vm0, %v42_v14  }
  0x88   :  { %v48_v15 = vpop.permute.xlu0 %47  }
  0x89   :  { %51 = vst.msk [vmem:[#allocation0 + $0x7] ss:$8 sm:$0x3] %vm8_vm0, %v48_v15  }
  0x8a   :  { %81 = shalt.err (!%p78_p4)
}
  0x8b   :  { %s82_s19 = scalar_lea.hbm %s136_s1, 256 }
  0x8c   :  { %p83_p5 = scmp.ne.s32.totalorder %s136_s1, %s82_s19  ;;  %p86_p6 = scmp.lt.u32.totalorder %s82_s19, %s136_s1 }
  0x8e   :  { %p88_p7 = pnand %p86_p6, %p83_p5 }
  0x90   :  { %91 = shalt.err (!%p88_p7)
}
  0x91   :  { %59 = dma.vmem_to_hbm [thread:$0]  %s57_s15, 256, %s136_s1, [#allocation1]  }
  0x92   :  { %92 = dma.done.wait [#allocation1], 256  }
  0x93   :  { %93 = vsyncadd [#allocation1], 4294967040 }
  0x94   :  { %61 = vsyncpa [#allocation1], 1 }

// kernel: _forward.1
= control target key start
LH: loop header
LB: loop body
LE: loop exit
PB: predicated region body
PF: predicated region fallthrough
CT: control target
= control target key end

     0   :  { %s7309_s21 = smov 0   ;;  %s9906_s0 = inlined_call_operand.vmem [shape: f32[2,80,16], index: 0, kind: input, shape index: {}]   ;;  %s9907_s1 = inlined_call_operand.vmem [shape: f32[2,80,32], index: 1, kind: input, shape index: {}]   ;;  %s9908_s2 = inlined_call_operand.vmem [shape: bf16[112,128], index: 2, kind: input, shape index: {}]   ;;  %s9909_s3 = inlined_call_operand.vmem [shape: f32[8,128], index: 3, kind: input, shape index: {}]   ;;  %s9910_s4 = inlined_call_operand.vmem [shape: bf16[2,320,128], index: 4, kind: input, shape index: {}]   ;;  %s9911_s5 = inlined_call_operand.vmem [shape: f32[2,16,128], index: 5, kind: input, shape index: {}]   ;;  %s9912_s6 = inlined_call_operand.vmem [shape: f32[2,64,128], index: 6, kind: output, shape index: {}]  }
   0x1 LB: > { %s5569_s22 = sadd.s32 4294967295, %s7268_s21   ;;  %p5573_p0 = scmp.ge.s32.totalorder %s7268_s21, 1  ;;  %s7268_s21 = sphi %s7309_s21, %s16_s21  }
   0x2   : > { %p222_p1 = scmp.lt.s32.totalorder %s7268_s21, 3 }
   0x4   : > { %p223_p2 = pnand %p5573_p0, %p222_p1 }
   0x5   : > { %v6807_v0 = vld [vmem:[%s9908_s2] sm:$0xff] (!%p223_p2)   ;;  %v7270_v1 = vmov (!%p223_p2), 0.0   ;;  %p257_p3 = scmp.lt.s32.totalorder (!%p223_p2), %s5569_s22, 1  ;;  %vm7271_vm0 = vmmov (!%p223_p2), 0   ;;  %vm320_vm1 = vcmask (!%p223_p2), 130048   ;;  %vm411_vm2 = vcmask (!%p223_p2), 261120  }
   0x6   : > { %226 = sbr.rel (%p223_p2) target bundleno = 8082 (0x1f92), region = 44  ;;  %6059 = vmatprep.subr.bf16.mxu0 (!%p223_p2), %v7270_v1  ;;  %6081 = vmatprep.subr.bf16.mxu1 (!%p223_p2), %v7270_v1  ;;  %s7272_s18 = smov (!%p223_p2), 96   ;;  %vm823_vm7 = vcmask (!%p223_p2), 654336   ;;  %vm5373_vm8 = vcmask (!%p223_p2), 523264  }
   0x7   : > { %6060 = vmatpush3.bf16.msra.mxu0 (!%p223_p2), %v6807_v0  ;;  %6061 = vmatprep.mubr.msk.bf16.mxu0 (!%p223_p2), %vm7271_vm0, %v7270_v1  ;;  %s7273_s19 = smov (!%p223_p2), 64  }
   0x8   : > { %6085 = vmatprep.mubr.msk.bf16.mxu1 (!%p223_p2), %vm7271_vm0, %v7270_v1  ;;  %6105 = vmatprep.subr.bf16.mxu0 (!%p223_p2), %v7270_v1 }
   0xd   : > { %s9923_s22 = smov (!%p257_p3, %s5569_s22), 1 }
   0xe   : > { %s6789_s25 = smul.u32 80, %s9923_s22  ;;  %s5838_s16 = sshll.u32 %s9923_s22, 6 }
   0xf   : > { %s9877_s23 = scalar_lea.vmem %s9912_s6, %s5838_s16 }
  0x10   : > { %s261_s28 = scalar_lea.vmem %s9906_s0, %s6789_s25  ;;  %s7351_s7 = scalar_lea.vmem %s9907_s1, %s6789_s25 }
  0x11   : > { %v289_v2 = vld [vmem:[%s261_s28] sm:$0xff]  ;;  %v290_v3 = vld [vmem:[%s261_s28 + $0x8] sm:$0xff]  ;;  %v291_v5 = vld [vmem:[%s261_s28 + $0x10] sm:$0xff] }
  0x12   : > { %v299_v4 = vpack.c.bf16 %v290_v3, %v289_v2  ;;  %v292_v6 = vld [vmem:[%s261_s28 + $0x18] sm:$0xff]  ;;  %v293_v8 = vld [vmem:[%s261_s28 + $0x20] sm:$0xff]  ;;  %v294_v9 = vld [vmem:[%s261_s28 + $0x28] sm:$0xff] }
  0x13   : > { %v300_v7 = vpack.c.bf16 %v292_v6, %v291_v5  ;;  %v301_v10 = vpack.c.bf16 %v294_v9, %v293_v8  ;;  %v295_v11 = vld [vmem:[%s261_s28 + $0x30] sm:$0xff]  ;;  %v296_v12 = vld [vmem:[%s261_s28 + $0x38] sm:$0xff]  ;;  %v297_v14 = vld [vmem:[%s261_s28 + $0x40] sm:$0xff] }
  0x14   : > { %6062 = vmatmul.mubr.msk.bf16.vlgmr.msra.gmra.mrb[0].mxu0 %vm320_vm1, %v299_v4  ;;  %v302_v13 = vpack.c.bf16 %v296_v12, %v295_v11  ;;  %v298_v15 = vld [vmem:[%s261_s28 + $0x48] sm:$0xff]  ;;  %v304_v17 = vld [vmem:[%s7351_s7] sm:$0xff]  ;;  %v306_v26 = vld [vmem:[%s7351_s7 + $0x10] sm:$0xff] }
  0x15   : > { %6065 = vmatprep.mubr.msk.bf16.mxu0 %vm7271_vm0, %v7270_v1  ;;  %v303_v16 = vpack.c.bf16 %v298_v15, %v297_v14  ;;  %v305_v19 = vld [vmem:[%s7351_s7 + $0x8] sm:$0xff]  ;;  %v307_v29 = vld [vmem:[%s7351_s7 + $0x18] sm:$0xff]  ;;  %v308_v36 = vld [vmem:[%s7351_s7 + $0x20] sm:$0xff] }
  0x16   : > { %v309_v39 = vld [vmem:[%s7351_s7 + $0x28] sm:$0xff]  ;;  %v310_v47 = vld [vmem:[%s7351_s7 + $0x30] sm:$0xff]  ;;  %v311_v49 = vld [vmem:[%s7351_s7 + $0x38] sm:$0xff] }
  0x17   : > { %v312_v57 = vld [vmem:[%s7351_s7 + $0x40] sm:$0xff]  ;;  %v313_v59 = vld [vmem:[%s7351_s7 + $0x48] sm:$0xff] }
  0x1c   : > { %6066 = vmatmul.mubr.msk.bf16.gmra.mrb[4].mxu0 %vm320_vm1, %v300_v7 }
  0x1d   : > { %6069 = vmatprep.mubr.msk.bf16.mxu0 %vm7271_vm0, %v7270_v1 }
  0x24   : > { %6070 = vmatmul.mubr.msk.bf16.gmra.mrb[8].mxu0 %vm320_vm1, %v301_v10 }
  0x25   : > { %6073 = vmatprep.mubr.msk.bf16.mxu0 %vm7271_vm0, %v7270_v1 }
  0x2c   : > { %6074 = vmatmul.mubr.msk.bf16.gmra.mrb[12].mxu0 %vm320_vm1, %v302_v13 }
  0x2d   : > { %6077 = vmatprep.mubr.msk.bf16.mxu0 %vm7271_vm0, %v7270_v1 }
  0x34   : > { %6078 = vmatmul.mubr.msk.bf16.gmra.mrb[16].mxu0 %vm320_vm1, %v303_v16 }
  0x35   : > { %6115 = vmatprep.mubr.msk.bf16.mxu0 %vm7271_vm0, %v7270_v1 }
  0xe7   : > { %v370_v18 = vpop.f32.mrb[0].mxu0 }
  0xe8   : > { %v7355_v20 = vadd.f32 %v370_v18, %v304_v17  ;;  %v6063_v21 = vpop.f32.mrb[1].mxu0 }
  0xe9   : > { %v373_v22 = vpop.f32.mrb[2].mxu0 }
  0xea   : > { %v7357_v23 = vadd.f32 %v373_v22, %v305_v19  ;;  %v6064_v24 = vpop.f32.mrb[3].mxu0  ;;  %v412_v25 = vsel %vm411_vm2, %v7355_v20, 0.0 }
  0xeb   : > { %413 = vadd.xlane.f32.xlu0 %v412_v25 }
  0xec   : > { %v415_v27 = vsel %vm411_vm2, %v7357_v23, 0.0 }
  0xef   : > { %416 = vadd.xlane.f32.xlu0 %v415_v27  ;;  %v378_v28 = vpop.f32.mrb[4].mxu0 }
  0xf0   : > { %v7365_v30 = vadd.f32 %v378_v28, %v306_v26  ;;  %v6067_v31 = vpop.f32.mrb[5].mxu0 }
  0xf1   : > { %v381_v32 = vpop.f32.mrb[6].mxu0 }
  0xf2   : > { %v7367_v33 = vadd.f32 %v381_v32, %v307_v29  ;;  %v6068_v34 = vpop.f32.mrb[7].mxu0  ;;  %v418_v35 = vsel %vm411_vm2, %v7365_v30, 0.0 }
  0xf3   : > { %419 = vadd.xlane.f32.xlu1 %v418_v35 }
  0xf4   : > { %v421_v37 = vsel %vm411_vm2, %v7367_v33, 0.0 }
  0xf7   : > { %422 = vadd.xlane.f32.xlu1 %v421_v37  ;;  %v386_v38 = vpop.f32.mrb[8].mxu0 }
  0xf8   : > { %v7375_v40 = vadd.f32 %v386_v38, %v308_v36  ;;  %v6071_v41 = vpop.f32.mrb[9].mxu0 }
  0xf9   : > { %v389_v42 = vpop.f32.mrb[10].mxu0 }
  0xfa   : > { %v7377_v43 = vadd.f32 %v389_v42, %v309_v39  ;;  %v6072_v44 = vpop.f32.mrb[11].mxu0  ;;  %v424_v45 = vsel %vm411_vm2, %v7375_v40, 0.0 }
  0xfb   : > { %425 = vadd.xlane.f32.xlu0 %v424_v45 }
  0xfc   : > { %v427_v46 = vsel %vm411_vm2, %v7377_v43, 0.0 }
  0xfd   : > { %428 = vadd.xlane.f32.xlu1 %v427_v46 }
  0xff   : > { %v394_v48 = vpop.f32.mrb[12].mxu0 }
 0x100   : > { %v7385_v50 = vadd.f32 %v394_v48, %v310_v47  ;;  %v6075_v51 = vpop.f32.mrb[13].mxu0 }
 0x101   : > { %v397_v52 = vpop.f32.mrb[14].mxu0 }
 0x102   : > { %v7387_v53 = vadd.f32 %v397_v52, %v311_v49  ;;  %v6076_v54 = vpop.f32.mrb[15].mxu0  ;;  %v430_v55 = vsel %vm411_vm2, %v7385_v50, 0.0 }
 0x103   : > { %431 = vadd.xlane.f32.xlu0 %v430_v55 }
 0x104   : > { %v433_v56 = vsel %vm411_vm2, %v7387_v53, 0.0 }
 0x105   : > { %434 = vadd.xlane.f32.xlu1 %v433_v56 }
 0x107   : > { %v402_v58 = vpop.f32.mrb[16].mxu0 }
 0x108   : > { %v7395_v60 = vadd.f32 %v402_v58, %v312_v57  ;;  %v6079_v61 = vpop.f32.mrb[17].mxu0 }
 0x109   : > { %v405_v62 = vpop.f32.mrb[18].mxu0 }
 0x10a   : > { %v7397_v63 = vadd.f32 %v405_v62, %v313_v59  ;;  %v6080_v0 = vpop.f32.mrb[19].mxu0  ;;  %v436_v2 = vsel %vm411_vm2, %v7395_v60, 0.0  ;;  %v6808_v62 = vld [vmem:[%s9910_s4] sm:$0xff]  }
 0x10b   : > { %437 = vadd.xlane.f32.xlu0 %v436_v2  ;;  %6082 = vmatpush3.bf16.msra.mxu1 %v6808_v62  ;;  %v6809_v2 = vld [vmem:[%s9910_s4 + $0x8] sm:$0xff]  }
 0x10c   : > { %v439_v3 = vsel %vm411_vm2, %v7397_v63, 0.0  ;;  %6083 = vmatprep.subr.bf16.mxu1 %v7270_v1 }
 0x10d   : > { %440 = vadd.xlane.f32.xlu1 %v439_v3 }
 0x10f   : > { %6084 = vmatpush3.bf16.msra.mxu1 %v6809_v2 }
 0x110   : > { %6135 = vmatprep.subr.bf16.mxu1 %v7270_v1 }
 0x178   : > { %v414_v4 = vpop.xlane.xlu0 %413 }
 0x179   : > { %v443_v5 = vmul.f32 0.03125, %v414_v4 }
 0x17b   : > { %v7404_v6 = vsub.f32 %v7355_v20, %v443_v5 }
 0x17c   : > { %v417_v7 = vpop.xlane.xlu0 %416 }
 0x17d   : > { %v444_v8 = vmul.f32 0.03125, %v417_v7  ;;  %v463_v9 = vmul.f32 %v7404_v6, %v7404_v6 }
 0x17f   : > { %v7409_v10 = vsub.f32 %v7357_v23, %v444_v8  ;;  %v473_v11 = vsel %vm411_vm2, %v463_v9, 0.0 }
 0x180   : > { %v420_v12 = vpop.xlane.xlu1 %419  ;;  %474 = vadd.xlane.f32.xlu0 %v473_v11 }
 0x181   : > { %v445_v13 = vmul.f32 0.03125, %v420_v12  ;;  %v464_v14 = vmul.f32 %v7409_v10, %v7409_v10 }
 0x183   : > { %v7415_v15 = vsub.f32 %v7365_v30, %v445_v13  ;;  %v476_v16 = vsel %vm411_vm2, %v464_v14, 0.0 }
 0x184   : > { %v423_v17 = vpop.xlane.xlu1 %422  ;;  %477 = vadd.xlane.f32.xlu1 %v476_v16 }
 0x185   : > { %v446_v18 = vmul.f32 0.03125, %v423_v17  ;;  %v465_v19 = vmul.f32 %v7415_v15, %v7415_v15 }
 0x187   : > { %v7421_v21 = vsub.f32 %v7367_v33, %v446_v18  ;;  %v479_v22 = vsel %vm411_vm2, %v465_v19, 0.0 }
 0x188   : > { %v426_v24 = vpop.xlane.xlu0 %425  ;;  %480 = vadd.xlane.f32.xlu0 %v479_v22 }
 0x189   : > { %v447_v25 = vmul.f32 0.03125, %v426_v24  ;;  %v466_v26 = vmul.f32 %v7421_v21, %v7421_v21 }
 0x18a   : > { %v429_v27 = vpop.xlane.xlu1 %428 }
 0x18b   : > { %v7427_v28 = vsub.f32 %v7375_v40, %v447_v25  ;;  %v448_v29 = vmul.f32 0.03125, %v429_v27  ;;  %v482_v31 = vsel %vm411_vm2, %v466_v26, 0.0  ;;  %v7475_v25 = vld [vmem:[%s9911_s5] ss:$0 sm:$0xff] }
 0x18c   : > { %483 = vadd.xlane.f32.xlu1 %v482_v31 }
 0x18d   : > { %v7431_v32 = vsub.f32 %v7377_v43, %v448_v29  ;;  %v467_v34 = vmul.f32 %v7427_v28, %v7427_v28 }
 0x18f   : > { %v485_v35 = vsel %vm411_vm2, %v467_v34, 0.0  ;;  %v468_v36 = vmul.f32 %v7431_v32, %v7431_v32 }
 0x190   : > { %v432_v37 = vpop.xlane.xlu0 %431  ;;  %486 = vadd.xlane.f32.xlu0 %v485_v35 }
 0x191   : > { %v449_v38 = vmul.f32 0.03125, %v432_v37  ;;  %v488_v39 = vsel %vm411_vm2, %v468_v36, 0.0 }
 0x192   : > { %v435_v41 = vpop.xlane.xlu1 %434  ;;  %489 = vadd.xlane.f32.xlu1 %v488_v39 }
 0x193   : > { %v7440_v42 = vsub.f32 %v7385_v50, %v449_v38  ;;  %v450_v44 = vmul.f32 0.03125, %v435_v41 }
 0x195   : > { %v7443_v45 = vsub.f32 %v7387_v53, %v450_v44  ;;  %v469_v46 = vmul.f32 %v7440_v42, %v7440_v42 }
 0x197   : > { %v491_v47 = vsel %vm411_vm2, %v469_v46, 0.0  ;;  %v470_v48 = vmul.f32 %v7443_v45, %v7443_v45 }
 0x198   : > { %492 = vadd.xlane.f32.xlu0 %v491_v47  ;;  %v438_v49 = vpop.xlane.xlu0 %437 }
 0x199   : > { %v451_v51 = vmul.f32 0.03125, %v438_v49  ;;  %v494_v52 = vsel %vm411_vm2, %v470_v48, 0.0 }
 0x19a   : > { %495 = vadd.xlane.f32.xlu1 %v494_v52  ;;  %v441_v54 = vpop.xlane.xlu1 %440 }
 0x19b   : > { %v7452_v55 = vsub.f32 %v7395_v60, %v451_v51  ;;  %v452_v56 = vmul.f32 0.03125, %v441_v54 }
 0x19d   : > { %v7455_v57 = vsub.f32 %v7397_v63, %v452_v56  ;;  %v471_v58 = vmul.f32 %v7452_v55, %v7452_v55 }
 0x19f   : > { %v497_v59 = vsel %vm411_vm2, %v471_v58, 0.0  ;;  %v472_v61 = vmul.f32 %v7455_v57, %v7455_v57 }
 0x1a0   : > { %498 = vadd.xlane.f32.xlu0 %v497_v59 }
 0x1a1   : > { %v500_v0 = vsel %vm411_vm2, %v472_v61, 0.0 }
 0x1a2   : > { %501 = vadd.xlane.f32.xlu1 %v500_v0 }
 0x20d   : > { %v475_v3 = vpop.xlane.xlu0 %474 }
 0x20e   : > { %v503_v4 = vmul.f32 0.03125, %v475_v3 }
 0x210   : > { %v513_v5 = vadd.f32 1e-06, %v503_v4 }
 0x211   : > { %v478_v7 = vpop.xlane.xlu1 %477 }
 0x212   : > { %6854 = vrsqrt.f32 %v513_v5  ;;  %v504_v8 = vmul.f32 0.03125, %v478_v7 }
 0x214   : > { %v514_v9 = vadd.f32 1e-06, %v504_v8 }
 0x215   : > { %v481_v11 = vpop.xlane.xlu0 %480 }
 0x216   : > { %6856 = vrsqrt.f32 %v514_v9  ;;  %v505_v12 = vmul.f32 0.03125, %v481_v11 }
 0x218   : > { %v515_v13 = vadd.f32 1e-06, %v505_v12 }
 0x219   : > { %v484_v14 = vpop.xlane.xlu1 %483 }
 0x21a   : > { %6858 = vrsqrt.f32 %v515_v13  ;;  %v506_v16 = vmul.f32 0.03125, %v484_v14 }
 0x21c   : > { %v6855_v17 = vpop.eup %6854  ;;  %v516_v18 = vadd.f32 1e-06, %v506_v16 }
 0x21d   : > { %v487_v19 = vpop.xlane.xlu0 %486  ;;  %v533_v22 = vmul.f32 %v6855_v17, %v7404_v6  ;;  %v7482_v6 = vld [vmem:[%s9911_s5 + $0x1] ss:$0 sm:$0xff] }
 0x21e   : > { %6860 = vrsqrt.f32 %v516_v18  ;;  %v507_v24 = vmul.f32 0.03125, %v487_v19 }
 0x21f   : > { %v490_v26 = vpop.xlane.xlu1 %489  ;;  %v547_v35 = vmul.f32 %v7475_v25, %v533_v22 }
 0x220   : > { %v6857_v27 = vpop.eup %6856  ;;  %v517_v29 = vadd.f32 1e-06, %v507_v24  ;;  %v508_v31 = vmul.f32 0.03125, %v490_v26 }
 0x221   : > { %v534_v34 = vmul.f32 %v6857_v27, %v7409_v10  ;;  %v561_v41 = vadd.f32 %v7482_v6, %v547_v35 }
 0x222   : > { %6862 = vrsqrt.f32 %v517_v29  ;;  %v518_v36 = vadd.f32 1e-06, %v508_v31 }
 0x223   : > { %v548_v37 = vmul.f32 %v7475_v25, %v534_v34 }
 0x224   : > { %v6859_v38 = vpop.eup %6858  ;;  %6864 = vrsqrt.f32 %v518_v36 }
 0x225   : > { %v493_v39 = vpop.xlane.xlu0 %492  ;;  %v562_v44 = vadd.f32 %v7482_v6, %v548_v37  ;;  %v535_v10 = vmul.f32 %v6859_v38, %v7415_v15 }
 0x226   : > { %v509_v46 = vmul.f32 0.03125, %v493_v39 }
 0x227   : > { %v496_v47 = vpop.xlane.xlu1 %495  ;;  %v575_v48 = vpack.c.bf16 %v562_v44, %v561_v41  ;;  %v549_v56 = vmul.f32 %v7475_v25, %v535_v10 }
 0x228   : > { %v6861_v49 = vpop.eup %6860  ;;  %v519_v51 = vadd.f32 1e-06, %v509_v46  ;;  %v510_v52 = vmul.f32 0.03125, %v496_v47 }
 0x229   : > { %6086 = vmatmul.mubr.msk.bf16.vlgmr.msra.gmra.mrb[0].mxu1 %vm411_vm2, %v575_v48  ;;  %v536_v54 = vmul.f32 %v6861_v49, %v7421_v21  ;;  %v563_v62 = vadd.f32 %v7482_v6, %v549_v56 }
 0x22a   : > { %6866 = vrsqrt.f32 %v519_v51  ;;  %v520_v58 = vadd.f32 1e-06, %v510_v52  ;;  %6089 = vmatprep.mubr.msk.bf16.mxu1 %vm7271_vm0, %v7270_v1 }
 0x22b   : > { %v550_v59 = vmul.f32 %v7475_v25, %v536_v54 }
 0x22c   : > { %v6863_v15 = vpop.eup %6862  ;;  %6868 = vrsqrt.f32 %v520_v58 }
 0x22d   : > { %v499_v61 = vpop.xlane.xlu0 %498  ;;  %v564_v0 = vadd.f32 %v7482_v6, %v550_v59  ;;  %v537_v2 = vmul.f32 %v6863_v15, %v7427_v28  ;;  %v273_v59 = vlaneseq }
 0x22e   : > { %v6865_v3 = vpop.eup %6864  ;;  %v511_v21 = vmul.f32 0.03125, %v499_v61 }
 0x22f   : > { %v502_v4 = vpop.xlane.xlu1 %501  ;;  %v576_v5 = vpack.c.bf16 %v564_v0, %v563_v62  ;;  %v538_v7 = vmul.f32 %v6865_v3, %v7431_v32  ;;  %v551_v11 = vmul.f32 %v7475_v25, %v537_v2  ;;  %v7547_v3 = vand.u32 127, %v273_v59 }
 0x230   : > { %v521_v8 = vadd.f32 1e-06, %v511_v21  ;;  %v512_v9 = vmul.f32 0.03125, %v502_v4 }
 0x231   : > { %6090 = vmatmul.mubr.msk.bf16.gmra.mrb[4].mxu1 %vm411_vm2, %v576_v5  ;;  %v552_v12 = vmul.f32 %v7475_v25, %v538_v7  ;;  %v565_v16 = vadd.f32 %v7482_v6, %v551_v11  ;;  %vm278_vm3 = vcmp.ge.s32.totalorder %v7547_v3, 16  ;;  %vm279_vm4 = vcmp.lt.s32.totalorder %v7547_v3, 32 }
 0x232   : > { %6870 = vrsqrt.f32 %v521_v8  ;;  %v522_v13 = vadd.f32 1e-06, %v512_v9  ;;  %6093 = vmatprep.mubr.msk.bf16.mxu1 %vm7271_vm0, %v7270_v1  ;;  %vm276_vm5 = vcmp.lt.s32.totalorder %v7547_v3, 16  ;;  %vm7559_vm6 = vmand %vm278_vm3, %vm279_vm4  ;;  %vm5451_vm9 = vcmp.ge.s32.totalorder %v7547_v3, 1 }
 0x233   : > { %v566_v28 = vadd.f32 %v7482_v6, %v552_v12  ;;  %vm5452_vm10 = vcmp.lt.s32.totalorder %v7547_v3, 5 }
 0x234   : > { %v6867_v14 = vpop.eup %6866  ;;  %6872 = vrsqrt.f32 %v522_v13  ;;  %v5578_v13 = vsel %vm276_vm5, 1.0, %v7270_v1  ;;  %vm9870_vm11 = vmand %vm5451_vm9, %vm5452_vm10 }
 0x235   : > { %v539_v32 = vmul.f32 %v6867_v14, %v7440_v42  ;;  %v577_v18 = vpack.c.bf16 %v566_v28, %v565_v16  ;;  %v5579_v28 = vsel %vm7559_vm6, 1.0, %v7270_v1 }
 0x236   : > { %v6869_v17 = vpop.eup %6868  ;;  %v6802_v16 = vpack.i.bf16 %v5578_v13, %v5579_v28 }
 0x237   : > { %v540_v19 = vmul.f32 %v6869_v17, %v7443_v45  ;;  %v553_v22 = vmul.f32 %v7475_v25, %v539_v32 }
 0x239   : > { %6094 = vmatmul.mubr.msk.bf16.gmra.mrb[8].mxu1 %vm411_vm2, %v577_v18  ;;  %v554_v24 = vmul.f32 %v7475_v25, %v540_v19  ;;  %v567_v29 = vadd.f32 %v7482_v6, %v553_v22 }
 0x23a   : > { %6097 = vmatprep.mubr.msk.bf16.mxu1 %vm7271_vm0, %v7270_v1 }
 0x23b   : > { %v568_v26 = vadd.f32 %v7482_v6, %v554_v24 }
 0x23c   : > { %v6871_v27 = vpop.eup %6870 }
 0x23d   : > { %v541_v42 = vmul.f32 %v6871_v27, %v7452_v55  ;;  %v578_v34 = vpack.c.bf16 %v568_v26, %v567_v29  ;;  %v5588_v55 = vld [vmem:[%s9911_s5 + $0x2] ss:$0 sm:$0xff] }
 0x23e   : > { %v6873_v31 = vpop.eup %6872 }
 0x23f   : > { %v542_v45 = vmul.f32 %v6873_v31, %v7455_v57  ;;  %v555_v35 = vmul.f32 %v7475_v25, %v541_v42 }
 0x241   : > { %6098 = vmatmul.mubr.msk.bf16.gmra.mrb[12].mxu1 %vm411_vm2, %v578_v34  ;;  %v556_v36 = vmul.f32 %v7475_v25, %v542_v45  ;;  %v569_v38 = vadd.f32 %v7482_v6, %v555_v35 }
 0x242   : > { %6101 = vmatprep.mubr.msk.bf16.mxu1 %vm7271_vm0, %v7270_v1 }
 0x243   : > { %v570_v37 = vadd.f32 %v7482_v6, %v556_v36 }
 0x245   : > { %v579_v39 = vpack.c.bf16 %v570_v37, %v569_v38 }
 0x249   : > { %6102 = vmatmul.mubr.msk.bf16.gmra.mrb[16].mxu1 %vm411_vm2, %v579_v39 }
 0x24a   : > { %6145 = vmatprep.mubr.msk.bf16.mxu1 %vm7271_vm0, %v7270_v1 }
 0x2fc   : > { %v646_v57 = vpop.f32.mrb[0].mxu1 }
 0x2fd   : > { %v6087_v41 = vpop.f32.mrb[1].mxu1  ;;  %v7529_v44 = vadd.f32 %v5588_v55, %v646_v57 }
 0x2fe   : > { %v649_v25 = vpop.f32.mrb[2].mxu1 }
 0x2ff   : > { %v7531_v10 = vadd.f32 %v5588_v55, %v649_v25  ;;  %v6088_v46 = vpop.f32.mrb[3].mxu1 }
 0x301   : > { %v685_v6 = vpack.c.bf16 %v7531_v10, %v7529_v44 }
 0x303   : > { %710 = vrot.lane.b32.xlu0 %v685_v6, %s7272_s18 }
 0x304   : > { %v654_v47 = vpop.f32.mrb[4].mxu1 }
 0x305   : > { %v6091_v48 = vpop.f32.mrb[5].mxu1  ;;  %v7536_v51 = vadd.f32 %v5588_v55, %v654_v47 }
 0x306   : > { %v657_v49 = vpop.f32.mrb[6].mxu1  ;;  %v7609_v48 = vsel %vm7559_vm6, 0.25, %v7270_v1 }
 0x307   : > { %v7538_v52 = vadd.f32 %v5588_v55, %v657_v49  ;;  %v6092_v54 = vpop.f32.mrb[7].mxu1  ;;  %v7614_v49 = vsel %vm276_vm5, 0.25, %v7270_v1  ;;  %v958_v59 = vmul.f32 %v7529_v44, %v7609_v48 }
 0x308   : > { %v691_v54 = vmul.f32 %v7531_v10, %v7614_v49 }
 0x309   : > { %v686_v56 = vpack.c.bf16 %v7538_v52, %v7536_v51 }
 0x30b   : > { %712 = vrot.lane.b32.xlu1 %v686_v56, %s7272_s18  ;;  %v959_v56 = vmul.f32 %v7531_v10, %v7609_v48 }
 0x30c   : > { %v662_v58 = vpop.f32.mrb[8].mxu1 }
 0x30d   : > { %v6095_v15 = vpop.f32.mrb[9].mxu1  ;;  %v7543_v62 = vadd.f32 %v5588_v55, %v662_v58  ;;  %v690_v58 = vmul.f32 %v7529_v44, %v7614_v49 }
 0x30e   : > { %v665_v61 = vpop.f32.mrb[10].mxu1 }
 0x30f   : > { %v7545_v0 = vadd.f32 %v5588_v55, %v665_v61  ;;  %v6096_v2 = vpop.f32.mrb[11].mxu1  ;;  %v700_v15 = vpack.c.bf16 %v691_v54, %v690_v58  ;;  %v968_v61 = vpack.c.bf16 %v959_v56, %v958_v59  ;;  %v694_v28 = vmul.f32 %v7543_v62, %v7614_v49 }
 0x310   : > { %v693_v2 = vmul.f32 %v7538_v52, %v7614_v49 }
 0x311   : > { %v687_v21 = vpack.c.bf16 %v7545_v0, %v7543_v62  ;;  %v695_v12 = vmul.f32 %v7545_v0, %v7614_v49  ;;  %v963_v13 = vmul.f32 %v7545_v0, %v7609_v48 }
 0x313   : > { %714 = vrot.lane.b32.xlu1 %v687_v21, %s7272_s18  ;;  %v961_v21 = vmul.f32 %v7538_v52, %v7609_v48 }
 0x314   : > { %v670_v4 = vpop.f32.mrb[12].mxu1 }
 0x315   : > { %v6099_v5 = vpop.f32.mrb[13].mxu1  ;;  %v7554_v8 = vadd.f32 %v5588_v55, %v670_v4  ;;  %v692_v4 = vmul.f32 %v7536_v51, %v7614_v49 }
 0x316   : > { %v673_v7 = vpop.f32.mrb[14].mxu1  ;;  %v960_v5 = vmul.f32 %v7536_v51, %v7609_v48 }
 0x317   : > { %v7556_v9 = vadd.f32 %v5588_v55, %v673_v7  ;;  %v6100_v11 = vpop.f32.mrb[15].mxu1  ;;  %v701_v7 = vpack.c.bf16 %v693_v2, %v692_v4 }
 0x318   : > { %v969_v11 = vpack.c.bf16 %v961_v21, %v960_v5 }
 0x319   : > { %v688_v14 = vpack.c.bf16 %v7556_v9, %v7554_v8 }
 0x31b   : > { %716 = vrot.lane.b32.xlu1 %v688_v14, %s7272_s18  ;;  %v962_v14 = vmul.f32 %v7543_v62, %v7609_v48 }
 0x31c   : > { %v678_v32 = vpop.f32.mrb[16].mxu1 }
 0x31d   : > { %v6103_v17 = vpop.f32.mrb[17].mxu1  ;;  %v7572_v19 = vadd.f32 %v5588_v55, %v678_v32  ;;  %v970_v32 = vpack.c.bf16 %v963_v13, %v962_v14 }
 0x31e   : > { %v681_v18 = vpop.f32.mrb[18].mxu1  ;;  %v697_v17 = vmul.f32 %v7556_v9, %v7614_v49 }
 0x31f   : > { %v7574_v22 = vadd.f32 %v5588_v55, %v681_v18  ;;  %6803 = vrot.lane.b32.xlu1 %v6802_v16, %s7273_s19  ;;  %v6104_v24 = vpop.f32.mrb[19].mxu1  ;;  %v702_v16 = vpack.c.bf16 %v695_v12, %v694_v28  ;;  %v965_v18 = vmul.f32 %v7556_v9, %v7609_v48 }
 0x320   : > { %v696_v24 = vmul.f32 %v7554_v8, %v7614_v49 }
 0x321   : > { %v689_v26 = vpack.c.bf16 %v7574_v22, %v7572_v19 }
 0x323   : > { %718 = vrot.lane.b32.xlu0 %v689_v26, %s7272_s18  ;;  %v964_v26 = vmul.f32 %v7554_v8, %v7609_v48 }
 0x375   : > { %v711_v27 = vpop.permute.xlu0 %710 }
 0x376   : > { %v736_v29 = vsel %vm411_vm2, %v711_v27, 0  ;;  %v703_v27 = vpack.c.bf16 %v697_v17, %v696_v24 }
 0x377   : > { %6106 = vmatpush3.bf16.xpose.msra.mxu0 %v736_v29  ;;  %6136 = vmatpush3.bf16.xpose.msra.mxu1 %v736_v29  ;;  %v971_v29 = vpack.c.bf16 %v965_v18, %v964_v26 }
 0x378   : > { %6107 = vmatprep.subr.bf16.mxu0 %v7270_v1  ;;  %6137 = vmatprep.subr.bf16.mxu1 %v7270_v1 }
 0x37d   : > { %v713_v42 = vpop.permute.xlu1 %712 }
 0x37e   : > { %v739_v31 = vsel %vm411_vm2, %v713_v42, 0  ;;  %v699_v42 = vmul.f32 %v7574_v22, %v7614_v49 }
 0x37f   : > { %6108 = vmatpush3.bf16.xpose.msra.mxu0 %v739_v31  ;;  %6138 = vmatpush3.bf16.xpose.msra.mxu1 %v739_v31  ;;  %v967_v31 = vmul.f32 %v7574_v22, %v7609_v48 }
 0x380   : > { %6109 = vmatprep.subr.bf16.mxu0 %v7270_v1  ;;  %6139 = vmatprep.subr.bf16.mxu1 %v7270_v1 }
 0x385   : > { %v715_v34 = vpop.permute.xlu1 %714 }
 0x386   : > { %v742_v45 = vsel %vm411_vm2, %v715_v34, 0  ;;  %v698_v34 = vmul.f32 %v7572_v19, %v7614_v49 }
 0x387   : > { %6110 = vmatpush3.bf16.xpose.msra.mxu0 %v742_v45  ;;  %6140 = vmatpush3.bf16.xpose.msra.mxu1 %v742_v45  ;;  %v966_v45 = vmul.f32 %v7572_v19, %v7609_v48 }
 0x388   : > { %6111 = vmatprep.subr.bf16.mxu0 %v7270_v1  ;;  %6141 = vmatprep.subr.bf16.mxu1 %v7270_v1 }
 0x38d   : > { %v717_v35 = vpop.permute.xlu1 %716 }
 0x38e   : > { %v745_v36 = vsel %vm411_vm2, %v717_v35, 0  ;;  %v704_v35 = vpack.c.bf16 %v699_v42, %v698_v34 }
 0x38f   : > { %6112 = vmatpush3.bf16.xpose.msra.mxu0 %v745_v36  ;;  %6142 = vmatpush3.bf16.xpose.msra.mxu1 %v745_v36  ;;  %v972_v36 = vpack.c.bf16 %v967_v31, %v966_v45 }
 0x390   : > { %6113 = vmatprep.subr.bf16.mxu0 %v7270_v1  ;;  %6143 = vmatprep.subr.bf16.mxu1 %v7270_v1 }
 0x391   : > { %v7592_v37 = vpop.permute.xlu1 %6803 }
 0x392   : > { %v7595_v38 = vunpack.i.l.bf16 %v7592_v37 }
 0x394   : > { %v1177_v39 = vmul.f32 %v7595_v38, %v7536_v51  ;;  %v1178_v55 = vmul.f32 %v7595_v38, %v7538_v52  ;;  %v1175_v57 = vmul.f32 %v7595_v38, %v7529_v44  ;;  %v1176_v41 = vmul.f32 %v7595_v38, %v7531_v10 }
 0x395   : > { %v719_v25 = vpop.permute.xlu0 %718 }
 0x396   : > { %v748_v46 = vsel %vm411_vm2, %v719_v25, 0  ;;  %v1186_v6 = vpack.c.bf16 %v1178_v55, %v1177_v39  ;;  %v1185_v47 = vpack.c.bf16 %v1176_v41, %v1175_v57 }
 0x397   : > { %6114 = vmatpush3.bf16.xpose.msra.mxu0 %v748_v46  ;;  %6144 = vmatpush3.bf16.xpose.msra.mxu1 %v748_v46 }
 0x398   : > { %1202 = vrot.lane.b32.xlu0 %v1186_v6, %s7273_s19  ;;  %1200 = vrot.lane.b32.xlu1 %v1185_v47, %s7273_s19 }
 0x399   : > { %6165 = vmatprep.subr.bf16.mxu0 %v7270_v1  ;;  %6225 = vmatprep.subr.bf16.mxu1 %v7270_v1 }
 0x39e   : > { %6116 = vmatmul.mubr.msk.bf16.vlgmr.msra.gmra.mrb[20].mxu0 %vm411_vm2, %v700_v15  ;;  %6146 = vmatmul.mubr.msk.bf16.vlgmr.msra.gmra.mrb[20].mxu1 %vm411_vm2, %v968_v61 }
 0x39f   : > { %6119 = vmatprep.mubr.msk.bf16.mxu0 %vm7271_vm0, %v7270_v1  ;;  %6149 = vmatprep.mubr.msk.bf16.mxu1 %vm7271_vm0, %v7270_v1 }
 0x3a6   : > { %6120 = vmatmul.mubr.msk.bf16.gmra.mrb[24].mxu0 %vm411_vm2, %v701_v7  ;;  %6150 = vmatmul.mubr.msk.bf16.gmra.mrb[24].mxu1 %vm411_vm2, %v969_v11 }
 0x3a7   : > { %6123 = vmatprep.mubr.msk.bf16.mxu0 %vm7271_vm0, %v7270_v1  ;;  %6153 = vmatprep.mubr.msk.bf16.mxu1 %vm7271_vm0, %v7270_v1 }
 0x3ae   : > { %6124 = vmatmul.mubr.msk.bf16.gmra.mrb[28].mxu0 %vm411_vm2, %v702_v16  ;;  %6154 = vmatmul.mubr.msk.bf16.gmra.mrb[28].mxu1 %vm411_vm2, %v970_v32 }
 0x3af   : > { %6127 = vmatprep.mubr.msk.bf16.mxu0 %vm7271_vm0, %v7270_v1  ;;  %6157 = vmatprep.mubr.msk.bf16.mxu1 %vm7271_vm0, %v7270_v1 }
 0x3b6   : > { %6128 = vmatmul.mubr.msk.bf16.gmra.mrb[32].mxu0 %vm411_vm2, %v703_v27  ;;  %6158 = vmatmul.mubr.msk.bf16.gmra.mrb[32].mxu1 %vm411_vm2, %v971_v29 }
 0x3b7   : > { %6131 = vmatprep.mubr.msk.bf16.mxu0 %vm7271_vm0, %v7270_v1  ;;  %6161 = vmatprep.mubr.msk.bf16.mxu1 %vm7271_vm0, %v7270_v1 }
 0x3be   : > { %6132 = vmatmul.mubr.msk.bf16.gmra.mrb[36].mxu0 %vm411_vm2, %v704_v35  ;;  %6162 = vmatmul.mubr.msk.bf16.gmra.mrb[36].mxu1 %vm411_vm2, %v972_v36 }
 0x3bf   : > { %6175 = vmatprep.mubr.msk.bf16.mxu0 %vm7271_vm0, %v7270_v1  ;;  %6229 = vmatprep.mubr.msk.bf16.mxu1 %vm7271_vm0, %v7270_v1 }
 0x40a   : > { %v1201_v39 = vpop.permute.xlu1 %1200  ;;  %v1203_v55 = vpop.permute.xlu0 %1202 }
 0x40b   : > { %6166 = vmatpush3.bf16.msra.mxu0 %v1201_v39 }
 0x40c   : > { %6167 = vmatprep.subr.bf16.mxu0 %v7270_v1 }
 0x40f   : > { %6168 = vmatpush3.bf16.msra.mxu0 %v1203_v55 }
 0x410   : > { %6169 = vmatprep.subr.bf16.mxu0 %v7270_v1 }
 0x471   : > { %v7692_v57 = vpop.f32.mrb[20].mxu0  ;;  %v7694_v41 = vpop.f32.mrb[20].mxu1 }
 0x472   : > { %v6117_v25 = vpop.f32.mrb[21].mxu0  ;;  %v6147_v46 = vpop.f32.mrb[21].mxu1  ;;  %v1061_v6 = vsel %vm823_vm7, %v7694_v41, -inf  ;;  %v824_v47 = vsel %vm823_vm7, %v7692_v57, -inf }
 0x473   : > { %v7700_v54 = vpop.f32.mrb[22].mxu1  ;;  %1062 = vmax.xlane.f32.xlu1 %v1061_v6  ;;  %825 = vmax.xlane.f32.xlu0 %v824_v47  ;;  %v7702_v56 = vpop.f32.mrb[22].mxu0 }
 0x474   : > { %v6118_v58 = vpop.f32.mrb[23].mxu0  ;;  %v6148_v59 = vpop.f32.mrb[23].mxu1  ;;  %v1064_v15 = vsel %vm823_vm7, %v7700_v54, -inf  ;;  %v827_v5 = vsel %vm823_vm7, %v7702_v56, -inf }
 0x477   : > { %1065 = vmax.xlane.f32.xlu0 %v1064_v15 }
 0x479   : > { %v7706_v61 = vpop.f32.mrb[24].mxu0  ;;  %v7708_v2 = vpop.f32.mrb[24].mxu1 }
 0x47a   : > { %v6121_v21 = vpop.f32.mrb[25].mxu0  ;;  %v6151_v4 = vpop.f32.mrb[25].mxu1  ;;  %v1067_v28 = vsel %vm823_vm7, %v7708_v2, -inf  ;;  %v830_v24 = vsel %vm823_vm7, %v7706_v61, -inf }
 0x47b   : > { %v7712_v7 = vpop.f32.mrb[26].mxu1  ;;  %828 = vmax.xlane.f32.xlu0 %v827_v5  ;;  %v7714_v11 = vpop.f32.mrb[26].mxu0 }
 0x47c   : > { %v6122_v12 = vpop.f32.mrb[27].mxu0  ;;  %v6152_v13 = vpop.f32.mrb[27].mxu1  ;;  %v1070_v31 = vsel %vm823_vm7, %v7712_v7, -inf  ;;  %v833_v55 = vsel %vm823_vm7, %v7714_v11, -inf }
 0x47f   : > { %1068 = vmax.xlane.f32.xlu0 %v1067_v28 }
 0x481   : > { %v7718_v14 = vpop.f32.mrb[28].mxu0  ;;  %v7720_v16 = vpop.f32.mrb[28].mxu1 }
 0x482   : > { %v6125_v32 = vpop.f32.mrb[29].mxu0  ;;  %v6155_v17 = vpop.f32.mrb[29].mxu1  ;;  %v1073_v18 = vsel %vm823_vm7, %v7720_v16, -inf  ;;  %v836_v34 = vsel %vm823_vm7, %v7718_v14, -inf }
 0x483   : > { %v7726_v26 = vpop.f32.mrb[30].mxu1  ;;  %1074 = vmax.xlane.f32.xlu1 %v1073_v18  ;;  %831 = vmax.xlane.f32.xlu0 %v830_v24  ;;  %v7728_v27 = vpop.f32.mrb[30].mxu0  ;;  %v1179_v18 = vmul.f32 %v7595_v38, %v7543_v62  ;;  %v1180_v24 = vmul.f32 %v7595_v38, %v7545_v0 }
 0x484   : > { %v6126_v29 = vpop.f32.mrb[31].mxu0  ;;  %v6156_v42 = vpop.f32.mrb[31].mxu1  ;;  %v1076_v59 = vsel %vm823_vm7, %v7726_v26, -inf  ;;  %v839_v12 = vsel %vm823_vm7, %v7728_v27, -inf }
 0x485   : > { %v1187_v29 = vpack.c.bf16 %v1180_v24, %v1179_v18  ;;  %v1181_v42 = vmul.f32 %v7595_v38, %v7554_v8 }
 0x487   : > { %1071 = vmax.xlane.f32.xlu0 %v1070_v31  ;;  %837 = vmax.xlane.f32.xlu1 %v836_v34  ;;  %v1182_v31 = vmul.f32 %v7595_v38, %v7556_v9 }
 0x489   : > { %v7734_v45 = vpop.f32.mrb[32].mxu0  ;;  %v7736_v35 = vpop.f32.mrb[32].mxu1  ;;  %v1188_v34 = vpack.c.bf16 %v1182_v31, %v1181_v42 }
 0x48a   : > { %v6129_v36 = vpop.f32.mrb[33].mxu0  ;;  %v6159_v39 = vpop.f32.mrb[33].mxu1  ;;  %v1079_v25 = vsel %vm823_vm7, %v7736_v35, -inf }
 0x48b   : > { %v7742_v46 = vpop.f32.mrb[34].mxu1  ;;  %834 = vmax.xlane.f32.xlu0 %v833_v55  ;;  %1080 = vmax.xlane.f32.xlu1 %v1079_v25  ;;  %v7744_v6 = vpop.f32.mrb[34].mxu0  ;;  %v842_v39 = vsel %vm823_vm7, %v7734_v45, -inf  ;;  %v7773_v55 = vunpack.i.h.bf16 %v7592_v37 }
 0x48c   : > { %v6130_v47 = vpop.f32.mrb[35].mxu0  ;;  %v6160_v58 = vpop.f32.mrb[35].mxu1  ;;  %v1082_v25 = vsel %vm823_vm7, %v7742_v46, -inf }
 0x48d   : > { %v1183_v47 = vmul.f32 %v7595_v38, %v7572_v19  ;;  %v1184_v58 = vmul.f32 %v7595_v38, %v7574_v22  ;;  %v943_v37 = vmul.f32 %v7773_v55, %v7545_v0 }
 0x48f   : > { %1077 = vmax.xlane.f32.xlu0 %v1076_v59  ;;  %v845_v59 = vsel %vm823_vm7, %v7744_v6, -inf }
 0x491   : > { %v7748_v15 = vpop.f32.mrb[36].mxu0  ;;  %v7750_v21 = vpop.f32.mrb[36].mxu1 }
 0x492   : > { %v6133_v4 = vpop.f32.mrb[37].mxu0  ;;  %v6163_v5 = vpop.f32.mrb[37].mxu1  ;;  %v1085_v36 = vsel %vm823_vm7, %v7750_v21, -inf  ;;  %v848_v0 = vsel %vm823_vm7, %v7748_v15, -inf }
 0x493   : > { %v7754_v13 = vpop.f32.mrb[38].mxu1  ;;  %840 = vmax.xlane.f32.xlu0 %v839_v12  ;;  %v7756_v28 = vpop.f32.mrb[38].mxu0  ;;  %v1189_v4 = vpack.c.bf16 %v1184_v58, %v1183_v47  ;;  %v942_v5 = vmul.f32 %v7773_v55, %v7543_v62 }
 0x494   : > { %v6134_v32 = vpop.f32.mrb[39].mxu0  ;;  %v6164_v17 = vpop.f32.mrb[39].mxu1  ;;  %v1088_v42 = vsel %vm823_vm7, %v7754_v13, -inf }
 0x495   : > { %v950_v12 = vpack.c.bf16 %v943_v37, %v942_v5  ;;  %v938_v32 = vmul.f32 %v7773_v55, %v7529_v44  ;;  %v939_v17 = vmul.f32 %v7773_v55, %v7531_v10  ;;  %v940_v37 = vmul.f32 %v7773_v55, %v7536_v51 }
 0x497   : > { %v948_v18 = vpack.c.bf16 %v939_v17, %v938_v32 }
 0x49c   : > { %1204 = vrot.lane.b32.xlu1 %v1187_v29, %s7273_s19 }
 0x4a9   : > { %1206 = vrot.lane.b32.xlu0 %v1188_v34, %s7273_s19 }
 0x4c0   : > { %1086 = vmax.xlane.f32.xlu1 %v1085_v36 }
 0x4c8   : > { %843 = vmax.xlane.f32.xlu0 %v842_v39 }
 0x4cc   : > { %1083 = vmax.xlane.f32.xlu0 %v1082_v25 }
 0x4d0   : > { %846 = vmax.xlane.f32.xlu0 %v845_v59 }
 0x4d1   : > { %1208 = vrot.lane.b32.xlu1 %v1189_v4, %s7273_s19 }
 0x4d5   : > { %1312 = vrot.lane.b32.xlu1 %v950_v12, %s7273_s19  ;;  %v941_v12 = vmul.f32 %v7773_v55, %v7538_v52 }
 0x4e6   : > { %1308 = vrot.lane.b32.xlu0 %v948_v18, %s7273_s19 }
 0x500   : > { %v826_v24 = vpop.xlane.xlu0 %825  ;;  %v1063_v31 = vpop.xlane.xlu1 %1062 }
 0x504   : > { %v1066_v62 = vpop.xlane.xlu0 %1065 }
 0x505   : > { %849 = vmax.xlane.f32.xlu0 %v848_v0 }
 0x508   : > { %v829_v29 = vpop.xlane.xlu0 %828 }
 0x509   : > { %1089 = vmax.xlane.f32.xlu0 %v1088_v42 }
 0x50c   : > { %v1069_v34 = vpop.xlane.xlu0 %1068 }
 0x510   : > { %v1075_v44 = vpop.xlane.xlu1 %1074  ;;  %v832_v36 = vpop.xlane.xlu0 %831 }
 0x511   : > { %v1095_v10 = vsub.f32 %v7720_v16, %v1075_v44  ;;  %v856_v39 = vsub.f32 %v7706_v61, %v832_v36  ;;  %v949_v61 = vpack.c.bf16 %v941_v12, %v940_v37 }
 0x513   : > { %v868_v25 = vmul.f32 1.442695, %v856_v39  ;;  %v1109_v47 = vmul.f32 1.442695, %v1095_v10 }
 0x514   : > { %v1072_v58 = vpop.xlane.xlu0 %1071  ;;  %v7800_v59 = vpop.xlane.xlu1 %837 }
 0x515   : > { %6874 = vpow2.f32 %v868_v25 }
 0x516   : > { %6876 = vpow2.f32 %v1109_v47  ;;  %v854_v47 = vsub.f32 %v7692_v57, %v826_v24  ;;  %v1093_v24 = vsub.f32 %v7708_v2, %v1069_v34 }
 0x518   : > { %v7802_v4 = vpop.xlane.xlu0 %834  ;;  %v1081_v5 = vpop.xlane.xlu1 %1080  ;;  %v864_v12 = vmul.f32 1.442695, %v854_v47 }
 0x519   : > { %v1097_v17 = vsub.f32 %v7736_v35, %v1081_v5 }
 0x51b   : > { %v1113_v44 = vmul.f32 1.442695, %v1097_v17  ;;  %v851_v17 = vsel %vm823_vm7, %v7756_v28, -inf }
 0x51c   : > { %v7808_v32 = vpop.xlane.xlu0 %1077  ;;  %v1205_v16 = vpop.permute.xlu1 %1204 }
 0x51d   : > { %6170 = vmatpush3.bf16.msra.mxu0 %v1205_v16  ;;  %v1092_v16 = vsub.f32 %v7700_v54, %v1066_v62  ;;  %v944_v54 = vmul.f32 %v7773_v55, %v7554_v8  ;;  %v1105_v62 = vmul.f32 1.442695, %v1093_v24 }
 0x51e   : > { %6171 = vmatprep.subr.bf16.mxu0 %v7270_v1 }
 0x51f   : > { %1310 = vrot.lane.b32.xlu0 %v949_v61, %s7273_s19  ;;  %v7813_v18 = vpop.eup %6874 }
 0x520   : > { %v841_v0 = vpop.xlane.xlu0 %840  ;;  %v890_v51 = vsel %vm823_vm7, %v7813_v18, 0.0  ;;  %v7818_v52 = vpop.eup %6876 }
 0x521   : > { %v859_v42 = vsub.f32 %v7728_v27, %v841_v0  ;;  %891 = vadd.xlane.f32.xlu1 %v890_v51  ;;  %v1133_v35 = vsel %vm823_vm7, %v7818_v52, 0.0  ;;  %v1091_v27 = vsub.f32 %v7694_v41, %v1063_v31  ;;  %v1103_v41 = vmul.f32 1.442695, %v1092_v16 }
 0x522   : > { %v855_v31 = vsub.f32 %v7702_v56, %v829_v29  ;;  %v945_v56 = vmul.f32 %v7773_v55, %v7556_v9  ;;  %v857_v51 = vsub.f32 %v7714_v11, %v7802_v4  ;;  %v858_v9 = vsub.f32 %v7718_v14, %v7800_v59 }
 0x523   : > { %v874_v36 = vmul.f32 1.442695, %v859_v42  ;;  %v1101_v25 = vmul.f32 1.442695, %v1091_v27  ;;  %v1094_v42 = vsub.f32 %v7712_v7, %v1072_v58  ;;  %v1096_v4 = vsub.f32 %v7726_v26, %v7808_v32 }
 0x524   : > { %v1207_v10 = vpop.permute.xlu0 %1206  ;;  %v866_v57 = vmul.f32 1.442695, %v855_v31  ;;  %v870_v7 = vmul.f32 1.442695, %v857_v51  ;;  %v872_v11 = vmul.f32 1.442695, %v858_v9 }
 0x525   : > { %6878 = vpow2.f32 %v874_v36  ;;  %6172 = vmatpush3.bf16.msra.mxu0 %v1207_v10  ;;  %1134 = vadd.xlane.f32.xlu1 %v1133_v35  ;;  %v1107_v34 = vmul.f32 1.442695, %v1094_v42  ;;  %v1111_v14 = vmul.f32 1.442695, %v1096_v4 }
 0x526   : > { %6173 = vmatprep.subr.bf16.mxu0 %v7270_v1  ;;  %6880 = vpow2.f32 %v1113_v44  ;;  %v951_v44 = vpack.c.bf16 %v945_v56, %v944_v54 }
 0x527   : > { %6882 = vpow2.f32 %v1101_v25 }
 0x528   : > { %6884 = vpow2.f32 %v864_v12 }
 0x529   : > { %6886 = vpow2.f32 %v1103_v41 }
 0x52a   : > { %6888 = vpow2.f32 %v866_v57 }
 0x52b   : > { %6890 = vpow2.f32 %v1105_v62 }
 0x52c   : > { %6892 = vpow2.f32 %v1107_v34 }
 0x52d   : > { %6894 = vpow2.f32 %v870_v7 }
 0x52e   : > { %6896 = vpow2.f32 %v872_v11 }
 0x52f   : > { %v7824_v39 = vpop.eup %6878  ;;  %6898 = vpow2.f32 %v1111_v14 }
 0x530   : > { %v899_v5 = vsel %vm823_vm7, %v7824_v39, 0.0  ;;  %v7829_v37 = vpop.eup %6880 }
 0x531   : > { %900 = vadd.xlane.f32.xlu1 %v899_v5  ;;  %v1139_v61 = vsel %vm823_vm7, %v7829_v37, 0.0  ;;  %v7838_v0 = vpop.eup %6882 }
 0x532   : > { %v1121_v29 = vsel %vm823_vm7, %v7838_v0, 0.0  ;;  %v7847_v2 = vpop.eup %6884 }
 0x533   : > { %v884_v8 = vsel %vm823_vm7, %v7847_v2, 0.0  ;;  %v7853_v36 = vpop.eup %6886 }
 0x534   : > { %v1124_v58 = vsel %vm823_vm7, %v7853_v36, 0.0  ;;  %v7860_v10 = vpop.eup %6888 }
 0x535   : > { %1140 = vadd.xlane.f32.xlu1 %v1139_v61  ;;  %v887_v27 = vsel %vm823_vm7, %v7860_v10, 0.0  ;;  %v7866_v25 = vpop.eup %6890 }
 0x536   : > { %v1127_v47 = vsel %vm823_vm7, %v7866_v25, 0.0  ;;  %v7870_v5 = vpop.eup %6892 }
 0x537   : > { %v1130_v32 = vsel %vm823_vm7, %v7870_v5, 0.0  ;;  %v7875_v12 = vpop.eup %6894 }
 0x538   : > { %v893_v31 = vsel %vm823_vm7, %v7875_v12, 0.0  ;;  %v7880_v57 = vpop.eup %6896 }
 0x539   : > { %v896_v42 = vsel %vm823_vm7, %v7880_v57, 0.0 }
 0x53e   : > { %852 = vmax.xlane.f32.xlu0 %v851_v17 }
 0x542   : > { %1122 = vadd.xlane.f32.xlu0 %v1121_v29 }
 0x546   : > { %1314 = vrot.lane.b32.xlu1 %v951_v44, %s7273_s19  ;;  %885 = vadd.xlane.f32.xlu0 %v884_v8 }
 0x54a   : > { %1125 = vadd.xlane.f32.xlu0 %v1124_v58 }
 0x54d   : > { %v1087_v35 = vpop.xlane.xlu1 %1086 }
 0x54e   : > { %888 = vadd.xlane.f32.xlu0 %v887_v27  ;;  %v1099_v17 = vsub.f32 %v7750_v21, %v1087_v35 }
 0x550   : > { %v1117_v29 = vmul.f32 1.442695, %v1099_v17 }
 0x551   : > { %v1209_v59 = vpop.permute.xlu1 %1208 }
 0x552   : > { %6174 = vmatpush3.bf16.msra.mxu0 %v1209_v59  ;;  %1128 = vadd.xlane.f32.xlu0 %v1127_v47 }
 0x553   : > { %6195 = vmatprep.subr.bf16.mxu0 %v7270_v1 }
 0x555   : > { %v844_v26 = vpop.xlane.xlu0 %843 }
 0x556   : > { %v860_v16 = vsub.f32 %v7734_v45, %v844_v26  ;;  %1131 = vadd.xlane.f32.xlu0 %v1130_v32  ;;  %v7886_v45 = vpop.eup %6898  ;;  %v946_v26 = vmul.f32 %v7773_v55, %v7572_v19  ;;  %v947_v32 = vmul.f32 %v7773_v55, %v7574_v22  ;;  %v1313_v22 = vpop.permute.xlu1 %1312 }
 0x558   : > { %v876_v61 = vmul.f32 1.442695, %v860_v16  ;;  %v952_v16 = vpack.c.bf16 %v947_v32, %v946_v26 }
 0x559   : > { %v1084_v41 = vpop.xlane.xlu0 %1083 }
 0x55a   : > { %v1098_v24 = vsub.f32 %v7742_v46, %v1084_v41  ;;  %894 = vadd.xlane.f32.xlu0 %v893_v31  ;;  %6900 = vpow2.f32 %v876_v61  ;;  %v1136_v46 = vsel %vm823_vm7, %v7886_v45, 0.0 }
 0x55c   : > { %v1115_v54 = vmul.f32 1.442695, %v1098_v24 }
 0x55d   : > { %v847_v62 = vpop.xlane.xlu0 %846 }
 0x55e   : > { %6902 = vpow2.f32 %v1115_v54  ;;  %v861_v56 = vsub.f32 %v7744_v6, %v847_v62  ;;  %897 = vadd.xlane.f32.xlu0 %v896_v42 }
 0x560   : > { %v878_v34 = vmul.f32 1.442695, %v861_v56 }
 0x561   : > { %v1309_v11 = vpop.permute.xlu0 %1308 }
 0x562   : > { %6904 = vpow2.f32 %v878_v34  ;;  %1137 = vadd.xlane.f32.xlu0 %v1136_v46 }
 0x563   : > { %6906 = vpow2.f32 %v1117_v29 }
 0x564   : > { %v7891_v21 = vpop.eup %6900 }
 0x565   : > { %v902_v44 = vsel %vm823_vm7, %v7891_v21, 0.0 }
 0x568   : > { %v7893_v51 = vpop.eup %6902 }
 0x569   : > { %v1142_v8 = vsel %vm823_vm7, %v7893_v51, 0.0 }
 0x56a   : > { %903 = vadd.xlane.f32.xlu1 %v902_v44  ;;  %1143 = vadd.xlane.f32.xlu0 %v1142_v8 }
 0x56c   : > { %v7899_v6 = vpop.eup %6904 }
 0x56d   : > { %v905_v9 = vsel %vm823_vm7, %v7899_v6, 0.0  ;;  %v7903_v7 = vpop.eup %6906 }
 0x56e   : > { %906 = vadd.xlane.f32.xlu0 %v905_v9  ;;  %v1145_v58 = vsel %vm823_vm7, %v7903_v7, 0.0 }
 0x572   : > { %1146 = vadd.xlane.f32.xlu0 %v1145_v58 }
 0x592   : > { %v850_v4 = vpop.xlane.xlu0 %849 }
 0x593   : > { %v862_v61 = vsub.f32 %v7748_v15, %v850_v4 }
 0x595   : > { %v880_v41 = vmul.f32 1.442695, %v862_v61 }
 0x596   : > { %v1090_v35 = vpop.xlane.xlu0 %1089 }
 0x597   : > { %v1100_v27 = vsub.f32 %v7754_v13, %v1090_v35 }
 0x599   : > { %v1119_v14 = vmul.f32 1.442695, %v1100_v27 }
 0x59a   : > { %v1311_v13 = vpop.permute.xlu0 %1310 }
 0x59b   : > { %6908 = vpow2.f32 %v1119_v14 }
 0x59c   : > { %6910 = vpow2.f32 %v880_v41 }
 0x5a5   : > { %v7908_v59 = vpop.eup %6908 }
 0x5a6   : > { %v1148_v47 = vsel %vm823_vm7, %v7908_v59, 0.0  ;;  %v7921_v42 = vpop.eup %6910 }
 0x5a7   : > { %1149 = vadd.xlane.f32.xlu0 %v1148_v47  ;;  %v908_v29 = vsel %vm823_vm7, %v7921_v42, 0.0 }
 0x5ae   : > { %v7931_v34 = vpop.xlane.xlu1 %891 }
 0x5b2   : > { %v1135_v9 = vpop.xlane.xlu1 %1134 }
 0x5bd   : > { %1316 = vrot.lane.b32.xlu0 %v952_v16, %s7273_s19 }
 0x5be   : > { %v7935_v14 = vpop.xlane.xlu1 %900 }
 0x5cb   : > { %v853_v31 = vpop.xlane.xlu0 %852 }
 0x5cc   : > { %v863_v24 = vsub.f32 %v7756_v28, %v853_v31 }
 0x5ce   : > { %v882_v17 = vmul.f32 1.442695, %v863_v24 }
 0x5cf   : > { %v1123_v54 = vpop.xlane.xlu0 %1122 }
 0x5d0   : > { %6912 = vpow2.f32 %v882_v17 }
 0x5d1   : > { %6914 = vrcp.f32 %v1123_v54 }
 0x5d3   : > { %v7919_v62 = vpop.xlane.xlu0 %885 }
 0x5d7   : > { %v1126_v19 = vpop.xlane.xlu0 %1125 }
 0x5d8   : > { %6916 = vrcp.f32 %v1126_v19  ;;  %v6811_v19 = vld [vmem:[%s9910_s4 + $0x18] sm:$0xff]  }
 0x5da   : > { %v7923_v56 = vpop.eup %6912 }
 0x5db   : > { %v7925_v15 = vpop.xlane.xlu0 %888  ;;  %v911_v28 = vsel %vm823_vm7, %v7923_v56, 0.0  ;;  %v6915_v44 = vpop.eup %6914 }
 0x5dc   : > { %909 = vadd.xlane.f32.xlu0 %v908_v29  ;;  %912 = vadd.xlane.f32.xlu1 %v911_v28  ;;  %v1161_v58 = vmul.f32 %v6915_v44, %v7838_v0  ;;  %v1141_v0 = vpop.xlane.xlu1 %1140 }
 0x5df   : > { %v1129_v46 = vpop.xlane.xlu0 %1128 }
 0x5e0   : > { %6918 = vrcp.f32 %v1129_v46  ;;  %v1315_v31 = vpop.permute.xlu1 %1314 }
 0x5e2   : > { %v6917_v8 = vpop.eup %6916 }
 0x5e3   : > { %v1162_v4 = vmul.f32 %v6917_v8, %v7853_v36  ;;  %v1132_v35 = vpop.xlane.xlu0 %1131 }
 0x5e4   : > { %6920 = vrcp.f32 %v1132_v35 }
 0x5e5   : > { %v1190_v27 = vpack.c.bf16 %v1162_v4, %v1161_v58  ;;  %6922 = vrcp.f32 %v1135_v9 }
 0x5e7   : > { %6176 = vmatmul.mubr.msk.bf16.vlgmr.msra.gmra.mrb[40].mxu0 %vm823_vm7, %v1190_v27  ;;  %v895_v47 = vpop.xlane.xlu0 %894 }
 0x5e8   : > { %6196 = vmatpush3.bf16.msra.mxu0 %v1309_v11  ;;  %6179 = vmatprep.mubr.msk.bf16.mxu0 %vm7271_vm0, %v7270_v1 }
 0x5e9   : > { %6197 = vmatprep.subr.bf16.mxu0 %v7270_v1 }
 0x5ea   : > { %v6919_v32 = vpop.eup %6918 }
 0x5eb   : > { %v7941_v26 = vpop.xlane.xlu0 %897  ;;  %v1163_v61 = vmul.f32 %v6919_v32, %v7866_v25 }
 0x5ec   : > { %6198 = vmatpush3.bf16.msra.mxu0 %v1311_v13 }
 0x5ed   : > { %6199 = vmatprep.subr.bf16.mxu0 %v7270_v1 }
 0x5ee   : > { %v6921_v36 = vpop.eup %6920 }
 0x5ef   : > { %v1138_v16 = vpop.xlane.xlu0 %1137  ;;  %v1164_v41 = vmul.f32 %v6921_v36, %v7870_v5  ;;  %v6923_v24 = vpop.eup %6922  ;;  %v6810_v5 = vld [vmem:[%s9910_s4 + $0x10] sm:$0xff]  }
 0x5f0   : > { %6200 = vmatpush3.bf16.msra.mxu0 %v1313_v22  ;;  %6924 = vrcp.f32 %v1138_v16  ;;  %v1165_v17 = vmul.f32 %v6923_v24, %v7818_v52  ;;  %6226 = vmatpush3.bf16.msra.mxu1 %v6810_v5 }
 0x5f1   : > { %6201 = vmatprep.subr.bf16.mxu0 %v7270_v1  ;;  %v1191_v11 = vpack.c.bf16 %v1164_v41, %v1163_v61  ;;  %6926 = vrcp.f32 %v1141_v0  ;;  %6227 = vmatprep.subr.bf16.mxu1 %v7270_v1 }
 0x5f3   : > { %6180 = vmatmul.mubr.msk.bf16.gmra.mrb[44].mxu0 %vm823_vm7, %v1191_v11 }
 0x5f4   : > { %6202 = vmatpush3.bf16.msra.mxu0 %v1315_v31  ;;  %6183 = vmatprep.mubr.msk.bf16.mxu0 %vm7271_vm0, %v7270_v1 }
 0x5f5   : > { %6203 = vmatprep.subr.bf16.mxu0 %v7270_v1  ;;  %6228 = vmatpush3.bf16.msra.mxu1 %v6811_v19 }
 0x5f6   : > { %6249 = vmatprep.subr.bf16.mxu1 %v7270_v1 }
 0x5f7   : > { %v1144_v13 = vpop.xlane.xlu0 %1143 }
 0x5f8   : > { %6928 = vrcp.f32 %v1144_v13 }
 0x5fa   : > { %v6925_v25 = vpop.eup %6924 }
 0x5fb   : > { %v1166_v54 = vmul.f32 %v6925_v25, %v7886_v45  ;;  %v6927_v29 = vpop.eup %6926  ;;  %v907_v44 = vpop.xlane.xlu0 %906 }
 0x5fc   : > { %v1167_v45 = vmul.f32 %v6927_v29, %v7829_v37 }
 0x5fd   : > { %v1192_v22 = vpack.c.bf16 %v1166_v54, %v1165_v17 }
 0x5ff   : > { %6184 = vmatmul.mubr.msk.bf16.gmra.mrb[48].mxu0 %vm823_vm7, %v1192_v22  ;;  %v1147_v8 = vpop.xlane.xlu0 %1146  ;;  %v6812_v22 = vld [vmem:[%s9910_s4 + $0x70] sm:$0xff]  }
 0x600   : > { %6187 = vmatprep.mubr.msk.bf16.mxu0 %vm7271_vm0, %v7270_v1  ;;  %6930 = vrcp.f32 %v1147_v8 }
 0x602   : > { %v6929_v52 = vpop.eup %6928 }
 0x603   : > { %v1168_v28 = vmul.f32 %v6929_v52, %v7893_v51 }
 0x605   : > { %v1193_v46 = vpack.c.bf16 %v1168_v28, %v1167_v45 }
 0x607   : > { %6188 = vmatmul.mubr.msk.bf16.gmra.mrb[52].mxu0 %vm823_vm7, %v1193_v46 }
 0x608   : > { %6191 = vmatprep.mubr.msk.bf16.mxu0 %vm7271_vm0, %v7270_v1 }
 0x60a   : > { %v6931_v37 = vpop.eup %6930 }
 0x60b   : > { %v1169_v4 = vmul.f32 %v6931_v37, %v7903_v7 }
 0x634   : > { %v1150_v9 = vpop.xlane.xlu0 %1149 }
 0x635   : > { %6932 = vrcp.f32 %v1150_v9 }
 0x636   : > { %6934 = vrcp.f32 %v7925_v15 }
 0x637   : > { %6936 = vrcp.f32 %v7919_v62 }
 0x638   : > { %v1317_v58 = vpop.permute.xlu0 %1316  ;;  %6938 = vrcp.f32 %v895_v47  ;;  %v904_v47 = vpop.xlane.xlu1 %903 }
 0x639   : > { %6204 = vmatpush3.bf16.msra.mxu0 %v1317_v58  ;;  %6940 = vrcp.f32 %v7931_v34 }
 0x63a   : > { %6273 = vmatprep.subr.bf16.mxu0 %v7270_v1  ;;  %6942 = vrcp.f32 %v7941_v26 }
 0x63b   : > { %6944 = vrcp.f32 %v7935_v14 }
 0x63c   : > { %6946 = vrcp.f32 %v907_v44 }
 0x63d   : > { %6948 = vrcp.f32 %v904_v47 }
 0x63f   : > { %v6933_v51 = vpop.eup %6932 }
 0x640   : > { %v1170_v35 = vmul.f32 %v6933_v51, %v7908_v59  ;;  %v6935_v32 = vpop.eup %6934 }
 0x641   : > { %v6937_v0 = vpop.eup %6936  ;;  %v925_v15 = vmul.f32 %v6935_v32, %v7860_v10 }
 0x642   : > { %v1194_v27 = vpack.c.bf16 %v1170_v35, %v1169_v4  ;;  %v924_v62 = vmul.f32 %v6937_v0, %v7847_v2  ;;  %v6939_v36 = vpop.eup %6938 }
 0x643   : > { %v6941_v59 = vpop.eup %6940  ;;  %v927_v34 = vmul.f32 %v6939_v36, %v7875_v12 }
 0x644   : > { %6192 = vmatmul.mubr.msk.bf16.gmra.mrb[56].mxu0 %vm823_vm7, %v1194_v27  ;;  %v953_v7 = vpack.c.bf16 %v925_v15, %v924_v62  ;;  %v926_v16 = vmul.f32 %v6941_v59, %v7813_v18  ;;  %v6943_v2 = vpop.eup %6942  ;;  %v6813_v59 = vld [vmem:[%s9910_s4 + $0x78] sm:$0xff]  }
 0x645   : > { %6205 = vmatprep.mubr.msk.bf16.mxu0 %vm7271_vm0, %v7270_v1  ;;  %v6945_v26 = vpop.eup %6944  ;;  %v928_v14 = vmul.f32 %v6943_v2, %v7880_v57  ;;  %v5624_v2 = vld [vmem:[%s9911_s5 + $0x4] ss:$0 sm:$0xff] }
 0x646   : > { %v954_v10 = vpack.c.bf16 %v927_v34, %v926_v16  ;;  %v929_v61 = vmul.f32 %v6945_v26, %v7824_v39  ;;  %v6947_v11 = vpop.eup %6946  ;;  %v5616_v34 = vld [vmem:[%s9911_s5 + $0x3] ss:$0 sm:$0xff] }
 0x647   : > { %v6949_v12 = vpop.eup %6948  ;;  %v931_v18 = vmul.f32 %v6947_v11, %v7899_v6 }
 0x648   : > { %v955_v41 = vpack.c.bf16 %v929_v61, %v928_v14  ;;  %v930_v31 = vmul.f32 %v6949_v12, %v7891_v21 }
 0x64a   : > { %v956_v13 = vpack.c.bf16 %v931_v18, %v930_v31 }
 0x64c   : > { %6206 = vmatmul.mubr.msk.bf16.vlgmr.msra.gmra.mrb[40].mxu0 %vm823_vm7, %v953_v7 }
 0x64d   : > { %6209 = vmatprep.mubr.msk.bf16.mxu0 %vm7271_vm0, %v7270_v1 }
 0x654   : > { %6210 = vmatmul.mubr.msk.bf16.gmra.mrb[44].mxu0 %vm823_vm7, %v954_v10 }
 0x655   : > { %6213 = vmatprep.mubr.msk.bf16.mxu0 %vm7271_vm0, %v7270_v1 }
 0x65c   : > { %6214 = vmatmul.mubr.msk.bf16.gmra.mrb[48].mxu0 %vm823_vm7, %v955_v41 }
 0x65d   : > { %6217 = vmatprep.mubr.msk.bf16.mxu0 %vm7271_vm0, %v7270_v1 }
 0x664   : > { %6218 = vmatmul.mubr.msk.bf16.gmra.mrb[52].mxu0 %vm823_vm7, %v956_v13 }
 0x665   : > { %6221 = vmatprep.mubr.msk.bf16.mxu0 %vm7271_vm0, %v7270_v1 }
 0x669   : > { %v913_v57 = vpop.xlane.xlu1 %912  ;;  %v910_v39 = vpop.xlane.xlu0 %909 }
 0x66a   : > { %6950 = vrcp.f32 %v913_v57 }
 0x66b   : > { %6952 = vrcp.f32 %v910_v39 }
 0x674   : > { %v6951_v24 = vpop.eup %6950 }
 0x675   : > { %v6953_v25 = vpop.eup %6952  ;;  %v933_v5 = vmul.f32 %v6951_v24, %v7923_v56 }
 0x676   : > { %v932_v17 = vmul.f32 %v6953_v25, %v7921_v42 }
 0x678   : > { %v957_v54 = vpack.c.bf16 %v933_v5, %v932_v17 }
 0x67a   : > { %6222 = vmatmul.mubr.msk.bf16.gmra.mrb[56].mxu0 %vm823_vm7, %v957_v54 }
 0x67b   : > { %6275 = vmatprep.mubr.msk.bf16.mxu0 %vm7271_vm0, %v7270_v1 }
 0x71f   : > { %v1372_v21 = vpop.f32.mrb[40].mxu0 }
 0x720   : > { %v6207_v6 = vpop.f32.mrb[41].mxu0 }
 0x721   : > { %v1375_v19 = vpop.f32.mrb[42].mxu0 }
 0x722   : > { %v1415_v29 = vpack.c.bf16 %v1375_v19, %v1372_v21  ;;  %v6208_v52 = vpop.f32.mrb[43].mxu0 }
 0x724   : > { %6230 = vmatmul.mubr.msk.bf16.vlgmr.msra.gmra.mrb[40].mxu1 %vm411_vm2, %v1415_v29 }
 0x725   : > { %6233 = vmatprep.mubr.msk.bf16.mxu1 %vm7271_vm0, %v7270_v1  ;;  %6250 = vmatpush3.bf16.msra.mxu1 %v6812_v22 }
 0x726   : > { %6251 = vmatprep.subr.bf16.mxu1 %v7270_v1 }
 0x727   : > { %v1380_v42 = vpop.f32.mrb[44].mxu0 }
 0x728   : > { %v6211_v56 = vpop.f32.mrb[45].mxu0 }
 0x729   : > { %v1383_v45 = vpop.f32.mrb[46].mxu0  ;;  %6252 = vmatpush3.bf16.msra.mxu1 %v6813_v59  ;;  %v6814_v59 = vld [vmem:[%s9910_s4 + $0x80] sm:$0xff]  }
 0x72a   : > { %v1416_v28 = vpack.c.bf16 %v1383_v45, %v1380_v42  ;;  %v6212_v46 = vpop.f32.mrb[47].mxu0  ;;  %6295 = vmatprep.subr.bf16.mxu1 %v7270_v1  ;;  %6274 = vmatpush3.bf16.msra.mxu0 %v6814_v59 }
 0x72b   : > { %6319 = vmatprep.subr.bf16.mxu0 %v7270_v1 }
 0x72c   : > { %6234 = vmatmul.mubr.msk.bf16.gmra.mrb[44].mxu1 %vm411_vm2, %v1416_v28 }
 0x72d   : > { %6237 = vmatprep.mubr.msk.bf16.mxu1 %vm7271_vm0, %v7270_v1 }
 0x72f   : > { %v1388_v44 = vpop.f32.mrb[48].mxu0 }
 0x730   : > { %v6215_v8 = vpop.f32.mrb[49].mxu0 }
 0x731   : > { %v1391_v9 = vpop.f32.mrb[50].mxu0 }
 0x732   : > { %v1417_v58 = vpack.c.bf16 %v1391_v9, %v1388_v44  ;;  %v6216_v37 = vpop.f32.mrb[51].mxu0 }
 0x734   : > { %6238 = vmatmul.mubr.msk.bf16.gmra.mrb[48].mxu1 %vm411_vm2, %v1417_v58 }
 0x735   : > { %6241 = vmatprep.mubr.msk.bf16.mxu1 %vm7271_vm0, %v7270_v1 }
 0x737   : > { %v1396_v51 = vpop.f32.mrb[52].mxu0 }
 0x738   : > { %v6219_v4 = vpop.f32.mrb[53].mxu0 }
 0x739   : > { %v1399_v35 = vpop.f32.mrb[54].mxu0 }
 0x73a   : > { %v1418_v27 = vpack.c.bf16 %v1399_v35, %v1396_v51  ;;  %v6220_v32 = vpop.f32.mrb[55].mxu0 }
 0x73c   : > { %6242 = vmatmul.mubr.msk.bf16.gmra.mrb[52].mxu1 %vm411_vm2, %v1418_v27 }
 0x73d   : > { %6245 = vmatprep.mubr.msk.bf16.mxu1 %vm7271_vm0, %v7270_v1 }
 0x74d   : > { %v1404_v0 = vpop.f32.mrb[56].mxu0 }
 0x74e   : > { %v6223_v15 = vpop.f32.mrb[57].mxu0 }
 0x74f   : > { %v1407_v62 = vpop.f32.mrb[58].mxu0 }
 0x750   : > { %v1419_v7 = vpack.c.bf16 %v1407_v62, %v1404_v0  ;;  %v6224_v36 = vpop.f32.mrb[59].mxu0 }
 0x752   : > { %6246 = vmatmul.mubr.msk.bf16.gmra.mrb[56].mxu1 %vm411_vm2, %v1419_v7 }
 0x753   : > { %6253 = vmatprep.mubr.msk.bf16.mxu1 %vm7271_vm0, %v7270_v1 }
 0x7f7   : > { %v1486_v47 = vpop.f32.mrb[40].mxu1 }
 0x7f8   : > { %v1487_v16 = vadd.f32 %v5616_v34, %v1486_v47  ;;  %v6231_v10 = vpop.f32.mrb[41].mxu1 }
 0x7f9   : > { %v1489_v26 = vpop.f32.mrb[42].mxu1 }
 0x7fa   : > { %v1490_v14 = vadd.f32 %v5616_v34, %v1489_v26  ;;  %v6232_v61 = vpop.f32.mrb[43].mxu1  ;;  %v8034_v41 = vmul.f32 %v5624_v2, %v1487_v16 }
 0x7fc   : > { %v8036_v11 = vmul.f32 %v5624_v2, %v1490_v14 }
 0x7fe   : > { %v1548_v12 = vpack.c.bf16 %v8036_v11, %v8034_v41 }
 0x7ff   : > { %v1494_v18 = vpop.f32.mrb[44].mxu1 }
 0x800   : > { %v1495_v31 = vadd.f32 %v5616_v34, %v1494_v18  ;;  %v6235_v13 = vpop.f32.mrb[45].mxu1  ;;  %6254 = vmatmul.mubr.msk.bf16.vlgmr.msra.gmra.mrb[60].mxu1 %vm411_vm2, %v1548_v12 }
 0x801   : > { %v1497_v57 = vpop.f32.mrb[46].mxu1  ;;  %6257 = vmatprep.mubr.msk.bf16.mxu1 %vm7271_vm0, %v7270_v1 }
 0x802   : > { %v1498_v39 = vadd.f32 %v5616_v34, %v1497_v57  ;;  %v6236_v24 = vpop.f32.mrb[47].mxu1  ;;  %v8043_v25 = vmul.f32 %v5624_v2, %v1495_v31 }
 0x804   : > { %v8045_v5 = vmul.f32 %v5624_v2, %v1498_v39 }
 0x806   : > { %v1549_v17 = vpack.c.bf16 %v8045_v5, %v8043_v25 }
 0x807   : > { %v1502_v54 = vpop.f32.mrb[48].mxu1 }
 0x808   : > { %v1503_v21 = vadd.f32 %v5616_v34, %v1502_v54  ;;  %v6239_v6 = vpop.f32.mrb[49].mxu1  ;;  %6258 = vmatmul.mubr.msk.bf16.gmra.mrb[64].mxu1 %vm411_vm2, %v1549_v17 }
 0x809   : > { %v1505_v19 = vpop.f32.mrb[50].mxu1  ;;  %6261 = vmatprep.mubr.msk.bf16.mxu1 %vm7271_vm0, %v7270_v1 }
 0x80a   : > { %v1506_v22 = vadd.f32 %v5616_v34, %v1505_v19  ;;  %v6240_v29 = vpop.f32.mrb[51].mxu1  ;;  %v8052_v52 = vmul.f32 %v5624_v2, %v1503_v21 }
 0x80c   : > { %v8054_v42 = vmul.f32 %v5624_v2, %v1506_v22 }
 0x80e   : > { %v1550_v56 = vpack.c.bf16 %v8054_v42, %v8052_v52 }
 0x80f   : > { %v1510_v45 = vpop.f32.mrb[52].mxu1 }
 0x810   : > { %v1511_v28 = vadd.f32 %v5616_v34, %v1510_v45  ;;  %v6243_v46 = vpop.f32.mrb[53].mxu1  ;;  %6262 = vmatmul.mubr.msk.bf16.gmra.mrb[68].mxu1 %vm411_vm2, %v1550_v56 }
 0x811   : > { %v1513_v44 = vpop.f32.mrb[54].mxu1  ;;  %6265 = vmatprep.mubr.msk.bf16.mxu1 %vm7271_vm0, %v7270_v1 }
 0x812   : > { %v1514_v8 = vadd.f32 %v5616_v34, %v1513_v44  ;;  %v6244_v9 = vpop.f32.mrb[55].mxu1  ;;  %v8061_v58 = vmul.f32 %v5624_v2, %v1511_v28 }
 0x814   : > { %v8063_v37 = vmul.f32 %v5624_v2, %v1514_v8 }
 0x816   : > { %v1551_v51 = vpack.c.bf16 %v8063_v37, %v8061_v58 }
 0x818   : > { %6266 = vmatmul.mubr.msk.bf16.gmra.mrb[72].mxu1 %vm411_vm2, %v1551_v51 }
 0x819   : > { %6269 = vmatprep.mubr.msk.bf16.mxu1 %vm7271_vm0, %v7270_v1 }
 0x825   : > { %v1518_v4 = vpop.f32.mrb[56].mxu1 }
 0x826   : > { %v1519_v35 = vadd.f32 %v5616_v34, %v1518_v4  ;;  %v6247_v27 = vpop.f32.mrb[57].mxu1 }
 0x827   : > { %v1521_v32 = vpop.f32.mrb[58].mxu1 }
 0x828   : > { %v1522_v0 = vadd.f32 %v5616_v34, %v1521_v32  ;;  %v6248_v15 = vpop.f32.mrb[59].mxu1  ;;  %v8070_v62 = vmul.f32 %v5624_v2, %v1519_v35  ;;  %v8086_v34 = vld [vmem:[%s9911_s5 + $0x5] ss:$0 sm:$0xff] }
 0x82a   : > { %v8072_v7 = vmul.f32 %v5624_v2, %v1522_v0 }
 0x82c   : > { %v1552_v36 = vpack.c.bf16 %v8072_v7, %v8070_v62 }
 0x82e   : > { %6270 = vmatmul.mubr.msk.bf16.gmra.mrb[76].mxu1 %vm411_vm2, %v1552_v36 }
 0x82f   : > { %6299 = vmatprep.mubr.msk.bf16.mxu1 %vm7271_vm0, %v7270_v1 }
 0x8d3   : > { %v1618_v47 = vpop.f32.mrb[60].mxu1 }
 0x8d4   : > { %v8089_v16 = vadd.f32 %v8086_v34, %v1618_v47  ;;  %v6255_v10 = vpop.f32.mrb[61].mxu1 }
 0x8d5   : > { %v1621_v2 = vpop.f32.mrb[62].mxu1 }
 0x8d6   : > { %v1657_v26 = vmul.f32 %v8089_v16, %v8089_v16  ;;  %v8094_v14 = vadd.f32 %v8086_v34, %v1621_v2  ;;  %v6256_v61 = vpop.f32.mrb[63].mxu1 }
 0x8d8   : > { %v1667_v12 = vmul.f32 %v1657_v26, %v8089_v16  ;;  %v1658_v18 = vmul.f32 %v8094_v14, %v8094_v14 }
 0x8da   : > { %v1677_v31 = vmul.f32 0.044715, %v1667_v12  ;;  %v1668_v13 = vmul.f32 %v1658_v18, %v8094_v14 }
 0x8db   : > { %v1626_v57 = vpop.f32.mrb[64].mxu1 }
 0x8dc   : > { %v1687_v39 = vadd.f32 %v1677_v31, %v8089_v16  ;;  %v1678_v24 = vmul.f32 0.044715, %v1668_v13  ;;  %v8102_v17 = vadd.f32 %v8086_v34, %v1626_v57  ;;  %v6259_v54 = vpop.f32.mrb[65].mxu1 }
 0x8dd   : > { %v1629_v21 = vpop.f32.mrb[66].mxu1 }
 0x8de   : > { %v1697_v6 = vmul.f32 0.7978846, %v1687_v39  ;;  %v1688_v19 = vadd.f32 %v1678_v24, %v8094_v14  ;;  %v1659_v22 = vmul.f32 %v8102_v17, %v8102_v17  ;;  %v8108_v29 = vadd.f32 %v8086_v34, %v1629_v21  ;;  %v6260_v56 = vpop.f32.mrb[67].mxu1 }
 0x8e0   : > { %6954 = vtanh.f32 %v1697_v6  ;;  %v1698_v45 = vmul.f32 0.7978846, %v1688_v19  ;;  %v1669_v28 = vmul.f32 %v1659_v22, %v8102_v17  ;;  %v1660_v46 = vmul.f32 %v8108_v29, %v8108_v29 }
 0x8e2   : > { %6956 = vtanh.f32 %v1698_v45  ;;  %v1679_v44 = vmul.f32 0.044715, %v1669_v28  ;;  %v1670_v8 = vmul.f32 %v1660_v46, %v8108_v29 }
 0x8e3   : > { %v1634_v9 = vpop.f32.mrb[68].mxu1 }
 0x8e4   : > { %v1689_v51 = vadd.f32 %v1679_v44, %v8102_v17  ;;  %v1680_v4 = vmul.f32 0.044715, %v1670_v8  ;;  %v8116_v35 = vadd.f32 %v8086_v34, %v1634_v9  ;;  %v6263_v27 = vpop.f32.mrb[69].mxu1 }
 0x8e5   : > { %v1637_v32 = vpop.f32.mrb[70].mxu1 }
 0x8e6   : > { %v1699_v0 = vmul.f32 0.7978846, %v1689_v51  ;;  %v1690_v15 = vadd.f32 %v1680_v4, %v8108_v29  ;;  %v1661_v36 = vmul.f32 %v8116_v35, %v8116_v35  ;;  %v8122_v59 = vadd.f32 %v8086_v34, %v1637_v32  ;;  %v6264_v47 = vpop.f32.mrb[71].mxu1 }
 0x8e8   : > { %6958 = vtanh.f32 %v1699_v0  ;;  %v1700_v10 = vmul.f32 0.7978846, %v1690_v15  ;;  %v1671_v2 = vmul.f32 %v1661_v36, %v8116_v35  ;;  %v1662_v26 = vmul.f32 %v8122_v59, %v8122_v59 }
 0x8ea   : > { %v6955_v61 = vpop.eup %6954  ;;  %6960 = vtanh.f32 %v1700_v10  ;;  %v1681_v12 = vmul.f32 0.044715, %v1671_v2  ;;  %v1672_v18 = vmul.f32 %v1662_v26, %v8122_v59 }
 0x8eb   : > { %v1717_v31 = vadd.f32 1.0, %v6955_v61  ;;  %v1642_v13 = vpop.f32.mrb[72].mxu1 }
 0x8ec   : > { %v6957_v57 = vpop.eup %6956  ;;  %v1691_v39 = vadd.f32 %v1681_v12, %v8116_v35  ;;  %v1682_v24 = vmul.f32 0.044715, %v1672_v18  ;;  %v8130_v54 = vadd.f32 %v8086_v34, %v1642_v13  ;;  %v6267_v21 = vpop.f32.mrb[73].mxu1 }
 0x8ed   : > { %v1727_v6 = vmul.f32 0.5, %v1717_v31  ;;  %v1718_v19 = vadd.f32 1.0, %v6957_v57  ;;  %v1645_v22 = vpop.f32.mrb[74].mxu1 }
 0x8ee   : > { %v1701_v56 = vmul.f32 0.7978846, %v1691_v39  ;;  %v1692_v45 = vadd.f32 %v1682_v24, %v8122_v59  ;;  %v1663_v28 = vmul.f32 %v8130_v54, %v8130_v54  ;;  %v1646_v46 = vadd.f32 %v8086_v34, %v1645_v22  ;;  %v6268_v44 = vpop.f32.mrb[75].mxu1 }
 0x8ef   : > { %v1728_v8 = vmul.f32 0.5, %v1718_v19  ;;  %v1737_v27 = vmul.f32 %v1727_v6, %v8089_v16 }
 0x8f0   : > { %6962 = vtanh.f32 %v1701_v56  ;;  %v1702_v9 = vmul.f32 0.7978846, %v1692_v45  ;;  %v1673_v51 = vmul.f32 %v1663_v28, %v8130_v54  ;;  %v1664_v4 = vmul.f32 %v1646_v46, %v1646_v46 }
 0x8f1   : > { %v1738_v32 = vmul.f32 %v1728_v8, %v8094_v14 }
 0x8f2   : > { %v6959_v0 = vpop.eup %6958  ;;  %6964 = vtanh.f32 %v1702_v9  ;;  %v1683_v15 = vmul.f32 0.044715, %v1673_v51  ;;  %v1674_v36 = vmul.f32 %v1664_v4, %v1646_v46 }
 0x8f3   : > { %v1747_v47 = vpack.c.bf16 %v1738_v32, %v1737_v27  ;;  %v1719_v10 = vadd.f32 1.0, %v6959_v0 }
 0x8f4   : > { %v6961_v2 = vpop.eup %6960  ;;  %v1693_v26 = vadd.f32 %v1683_v15, %v8130_v54  ;;  %v1684_v61 = vmul.f32 0.044715, %v1674_v36 }
 0x8f5   : > { %v1729_v12 = vmul.f32 0.5, %v1719_v10  ;;  %v1720_v18 = vadd.f32 1.0, %v6961_v2  ;;  %6276 = vmatmul.mubr.msk.bf16.vlgmr.msra.gmra.mrb[60].mxu0 %vm320_vm1, %v1747_v47 }
 0x8f6   : > { %v1703_v31 = vmul.f32 0.7978846, %v1693_v26  ;;  %v1694_v13 = vadd.f32 %v1684_v61, %v1646_v46  ;;  %6279 = vmatprep.mubr.msk.bf16.mxu0 %vm7271_vm0, %v7270_v1 }
 0x8f7   : > { %v1730_v16 = vmul.f32 0.5, %v1720_v18  ;;  %v1739_v57 = vmul.f32 %v1729_v12, %v8102_v17 }
 0x8f8   : > { %6966 = vtanh.f32 %v1703_v31  ;;  %v1704_v14 = vmul.f32 0.7978846, %v1694_v13 }
 0x8f9   : > { %v1740_v39 = vmul.f32 %v1730_v16, %v8108_v29 }
 0x8fa   : > { %v6963_v24 = vpop.eup %6962  ;;  %6968 = vtanh.f32 %v1704_v14 }
 0x8fb   : > { %v1721_v21 = vadd.f32 1.0, %v6963_v24  ;;  %v1748_v6 = vpack.c.bf16 %v1740_v39, %v1739_v57 }
 0x8fc   : > { %v6965_v19 = vpop.eup %6964 }
 0x8fd   : > { %v1731_v22 = vmul.f32 0.5, %v1721_v21  ;;  %v1722_v56 = vadd.f32 1.0, %v6965_v19  ;;  %6280 = vmatmul.mubr.msk.bf16.gmra.mrb[64].mxu0 %vm320_vm1, %v1748_v6 }
 0x8fe   : > { %6283 = vmatprep.mubr.msk.bf16.mxu0 %vm7271_vm0, %v7270_v1 }
 0x8ff   : > { %v1732_v45 = vmul.f32 0.5, %v1722_v56  ;;  %v1741_v28 = vmul.f32 %v1731_v22, %v8116_v35 }
 0x901   : > { %v1742_v44 = vmul.f32 %v1732_v45, %v8122_v59  ;;  %v1650_v17 = vpop.f32.mrb[76].mxu1  ;;  %v5633_v45 = vld [vmem:[%s9911_s5 + $0x6] ss:$0 sm:$0xff] }
 0x902   : > { %v6967_v8 = vpop.eup %6966  ;;  %v1651_v29 = vadd.f32 %v8086_v34, %v1650_v17  ;;  %v6271_v9 = vpop.f32.mrb[77].mxu1 }
 0x903   : > { %v1723_v51 = vadd.f32 1.0, %v6967_v8  ;;  %v1653_v4 = vpop.f32.mrb[78].mxu1  ;;  %v1749_v27 = vpack.c.bf16 %v1742_v44, %v1741_v28 }
 0x904   : > { %v6969_v32 = vpop.eup %6968  ;;  %v1665_v0 = vmul.f32 %v1651_v29, %v1651_v29  ;;  %v1654_v15 = vadd.f32 %v8086_v34, %v1653_v4  ;;  %v6272_v36 = vpop.f32.mrb[79].mxu1 }
 0x905   : > { %v1733_v47 = vmul.f32 0.5, %v1723_v51  ;;  %v1724_v10 = vadd.f32 1.0, %v6969_v32  ;;  %6284 = vmatmul.mubr.msk.bf16.gmra.mrb[68].mxu0 %vm320_vm1, %v1749_v27 }
 0x906   : > { %v1675_v35 = vmul.f32 %v1665_v0, %v1651_v29  ;;  %v1666_v2 = vmul.f32 %v1654_v15, %v1654_v15  ;;  %6287 = vmatprep.mubr.msk.bf16.mxu0 %vm7271_vm0, %v7270_v1 }
 0x907   : > { %v1734_v59 = vmul.f32 0.5, %v1724_v10  ;;  %v1743_v12 = vmul.f32 %v1733_v47, %v8130_v54 }
 0x908   : > { %v1685_v26 = vmul.f32 0.044715, %v1675_v35  ;;  %v1676_v61 = vmul.f32 %v1666_v2, %v1654_v15 }
 0x909   : > { %v1744_v18 = vmul.f32 %v1734_v59, %v1646_v46 }
 0x90a   : > { %v1695_v31 = vadd.f32 %v1685_v26, %v1651_v29  ;;  %v1686_v13 = vmul.f32 0.044715, %v1676_v61 }
 0x90b   : > { %v1750_v16 = vpack.c.bf16 %v1744_v18, %v1743_v12 }
 0x90c   : > { %v1705_v34 = vmul.f32 0.7978846, %v1695_v31  ;;  %v1696_v14 = vadd.f32 %v1686_v13, %v1654_v15 }
 0x90d   : > { %6288 = vmatmul.mubr.msk.bf16.gmra.mrb[72].mxu0 %vm320_vm1, %v1750_v16 }
 0x90e   : > { %6970 = vtanh.f32 %v1705_v34  ;;  %v1706_v57 = vmul.f32 0.7978846, %v1696_v14  ;;  %6291 = vmatprep.mubr.msk.bf16.mxu0 %vm7271_vm0, %v7270_v1 }
 0x910   : > { %6972 = vtanh.f32 %v1706_v57 }
 0x918   : > { %v6971_v39 = vpop.eup %6970 }
 0x919   : > { %v1725_v24 = vadd.f32 1.0, %v6971_v39 }
 0x91a   : > { %v6973_v21 = vpop.eup %6972 }
 0x91b   : > { %v1735_v6 = vmul.f32 0.5, %v1725_v24  ;;  %v1726_v19 = vadd.f32 1.0, %v6973_v21 }
 0x91d   : > { %v1736_v54 = vmul.f32 0.5, %v1726_v19  ;;  %v1745_v46 = vmul.f32 %v1735_v6, %v1651_v29 }
 0x91f   : > { %v1746_v22 = vmul.f32 %v1736_v54, %v1654_v15 }
 0x921   : > { %v1751_v56 = vpack.c.bf16 %v1746_v22, %v1745_v46 }
 0x923   : > { %6292 = vmatmul.mubr.msk.bf16.gmra.mrb[76].mxu0 %vm320_vm1, %v1751_v56 }
 0x924   : > { %6335 = vmatprep.mubr.msk.bf16.mxu0 %vm7271_vm0, %v7270_v1 }
 0x9c8   : > { %v1811_v28 = vpop.f32.mrb[60].mxu0 }
 0x9c9   : > { %v1812_v44 = vadd.f32 %v5633_v45, %v1811_v28  ;;  %v6277_v17 = vpop.f32.mrb[61].mxu0 }
 0x9ca   : > { %v1814_v8 = vpop.f32.mrb[62].mxu0 }
 0x9cb   : > { %v1850_v9 = vadd.f32 %v1812_v44, %v8034_v41  ;;  %v1815_v51 = vadd.f32 %v5633_v45, %v1814_v8  ;;  %v6278_v4 = vpop.f32.mrb[63].mxu0 }
 0x9cd   : > { %v8167_v29 = vadd.f32 %v1850_v9, %v7355_v20  ;;  %v1851_v27 = vadd.f32 %v1815_v51, %v8036_v11 }
 0x9cf   : > { %v8171_v32 = vadd.f32 %v1851_v27, %v7357_v23  ;;  %v1872_v0 = vsel %vm411_vm2, %v8167_v29, 0.0 }
 0x9d0   : > { %1873 = vadd.xlane.f32.xlu1 %v1872_v0  ;;  %v1819_v15 = vpop.f32.mrb[64].mxu0 }
 0x9d1   : > { %v1820_v36 = vadd.f32 %v5633_v45, %v1819_v15  ;;  %v6281_v47 = vpop.f32.mrb[65].mxu0  ;;  %v1875_v20 = vsel %vm411_vm2, %v8171_v32, 0.0 }
 0x9d2   : > { %v1822_v10 = vpop.f32.mrb[66].mxu0 }
 0x9d3   : > { %v1852_v41 = vadd.f32 %v1820_v36, %v8043_v25  ;;  %v1823_v35 = vadd.f32 %v5633_v45, %v1822_v10  ;;  %v6282_v2 = vpop.f32.mrb[67].mxu0 }
 0x9d4   : > { %1876 = vadd.xlane.f32.xlu1 %v1875_v20 }
 0x9d5   : > { %v8179_v11 = vadd.f32 %v1852_v41, %v7365_v30  ;;  %v1853_v23 = vadd.f32 %v1823_v35, %v8045_v5 }
 0x9d7   : > { %v8183_v59 = vadd.f32 %v1853_v23, %v7367_v33  ;;  %v1878_v26 = vsel %vm411_vm2, %v8179_v11, 0.0 }
 0x9d8   : > { %1879 = vadd.xlane.f32.xlu1 %v1878_v26  ;;  %v1827_v61 = vpop.f32.mrb[68].mxu0 }
 0x9d9   : > { %v1828_v25 = vadd.f32 %v5633_v45, %v1827_v61  ;;  %v6285_v12 = vpop.f32.mrb[69].mxu0  ;;  %v1881_v30 = vsel %vm411_vm2, %v8183_v59, 0.0 }
 0x9da   : > { %v1830_v18 = vpop.f32.mrb[70].mxu0 }
 0x9db   : > { %v1854_v31 = vadd.f32 %v1828_v25, %v8052_v52  ;;  %v1831_v13 = vadd.f32 %v5633_v45, %v1830_v18  ;;  %v6286_v16 = vpop.f32.mrb[71].mxu0 }
 0x9dc   : > { %1882 = vadd.xlane.f32.xlu1 %v1881_v30 }
 0x9dd   : > { %v8191_v5 = vadd.f32 %v1854_v31, %v7375_v40  ;;  %v1855_v33 = vadd.f32 %v1831_v13, %v8054_v42 }
 0x9df   : > { %v8195_v34 = vadd.f32 %v1855_v33, %v7377_v43  ;;  %v1884_v14 = vsel %vm411_vm2, %v8191_v5, 0.0 }
 0x9e0   : > { %1885 = vadd.xlane.f32.xlu1 %v1884_v14  ;;  %v1835_v57 = vpop.f32.mrb[72].mxu0 }
 0x9e1   : > { %v1836_v52 = vadd.f32 %v5633_v45, %v1835_v57  ;;  %v6289_v39 = vpop.f32.mrb[73].mxu0  ;;  %v1887_v24 = vsel %vm411_vm2, %v8195_v34, 0.0 }
 0x9e2   : > { %1888 = vadd.xlane.f32.xlu0 %v1887_v24  ;;  %v1838_v21 = vpop.f32.mrb[74].mxu0 }
 0x9e3   : > { %v1856_v40 = vadd.f32 %v1836_v52, %v8061_v58  ;;  %v1839_v6 = vadd.f32 %v5633_v45, %v1838_v21  ;;  %v6290_v19 = vpop.f32.mrb[75].mxu0 }
 0x9e5   : > { %v8203_v42 = vadd.f32 %v1856_v40, %v7385_v50  ;;  %v1857_v43 = vadd.f32 %v1839_v6, %v8063_v37 }
 0x9e7   : > { %v8207_v54 = vadd.f32 %v1857_v43, %v7387_v53  ;;  %v1890_v46 = vsel %vm411_vm2, %v8203_v42, 0.0 }
 0x9e8   : > { %1891 = vadd.xlane.f32.xlu1 %v1890_v46 }
 0x9e9   : > { %v1893_v22 = vsel %vm411_vm2, %v8207_v54, 0.0 }
 0x9ea   : > { %1894 = vadd.xlane.f32.xlu0 %v1893_v22 }
 0x9f6   : > { %v1843_v56 = vpop.f32.mrb[76].mxu0 }
 0x9f7   : > { %v1844_v58 = vadd.f32 %v5633_v45, %v1843_v56  ;;  %v6293_v28 = vpop.f32.mrb[77].mxu0 }
 0x9f8   : > { %v1846_v44 = vpop.f32.mrb[78].mxu0 }
 0x9f9   : > { %v1858_v50 = vadd.f32 %v1844_v58, %v8070_v62  ;;  %v1847_v17 = vadd.f32 %v5633_v45, %v1846_v44  ;;  %v6294_v8 = vpop.f32.mrb[79].mxu0  ;;  %v6815_v62 = vld [vmem:[%s9910_s4 + $0x20] sm:$0xff]   ;;  %v6816_v44 = vld [vmem:[%s9910_s4 + $0x28] sm:$0xff]  }
 0x9fa   : > { %6296 = vmatpush3.bf16.msra.mxu1 %v6815_v62 }
 0x9fb   : > { %v8215_v37 = vadd.f32 %v1858_v50, %v7395_v60  ;;  %v1859_v53 = vadd.f32 %v1847_v17, %v8072_v7  ;;  %6297 = vmatprep.subr.bf16.mxu1 %v7270_v1 }
 0x9fd   : > { %v8219_v9 = vadd.f32 %v1859_v53, %v7397_v63  ;;  %v1896_v51 = vsel %vm411_vm2, %v8215_v37, 0.0 }
 0x9fe   : > { %1897 = vadd.xlane.f32.xlu1 %v1896_v51  ;;  %6298 = vmatpush3.bf16.msra.mxu1 %v6816_v44 }
 0x9ff   : > { %v1899_v4 = vsel %vm411_vm2, %v8219_v9, 0.0  ;;  %6355 = vmatprep.subr.bf16.mxu1 %v7270_v1 }
 0xa00   : > { %1900 = vadd.xlane.f32.xlu0 %v1899_v4 }
 0xa5d   : > { %v1874_v60 = vpop.xlane.xlu1 %1873 }
 0xa5e   : > { %v1902_v7 = vmul.f32 0.03125, %v1874_v60 }
 0xa60   : > { %v8230_v63 = vsub.f32 %v8167_v29, %v1902_v7 }
 0xa61   : > { %v1877_v45 = vpop.xlane.xlu1 %1876 }
 0xa62   : > { %v1903_v27 = vmul.f32 0.03125, %v1877_v45  ;;  %v1922_v0 = vmul.f32 %v8230_v63, %v8230_v63 }
 0xa64   : > { %v8235_v15 = vsub.f32 %v8171_v32, %v1903_v27  ;;  %v1932_v36 = vsel %vm411_vm2, %v1922_v0, 0.0 }
 0xa65   : > { %v1880_v47 = vpop.xlane.xlu1 %1879  ;;  %1933 = vadd.xlane.f32.xlu1 %v1932_v36 }
 0xa66   : > { %v1904_v10 = vmul.f32 0.03125, %v1880_v47  ;;  %v1923_v41 = vmul.f32 %v8235_v15, %v8235_v15 }
 0xa68   : > { %v8241_v35 = vsub.f32 %v8179_v11, %v1904_v10  ;;  %v1935_v2 = vsel %vm411_vm2, %v1923_v41, 0.0 }
 0xa69   : > { %v1883_v20 = vpop.xlane.xlu1 %1882  ;;  %1936 = vadd.xlane.f32.xlu0 %v1935_v2 }
 0xa6a   : > { %v1905_v23 = vmul.f32 0.03125, %v1883_v20  ;;  %v1924_v26 = vmul.f32 %v8241_v35, %v8241_v35 }
 0xa6c   : > { %v8247_v61 = vsub.f32 %v8183_v59, %v1905_v23  ;;  %v1938_v25 = vsel %vm411_vm2, %v1924_v26, 0.0 }
 0xa6d   : > { %v1886_v12 = vpop.xlane.xlu1 %1885  ;;  %1939 = vadd.xlane.f32.xlu1 %v1938_v25 }
 0xa6e   : > { %v1906_v18 = vmul.f32 0.03125, %v1886_v12  ;;  %v1925_v31 = vmul.f32 %v8247_v61, %v8247_v61 }
 0xa6f   : > { %v1889_v13 = vpop.xlane.xlu0 %1888 }
 0xa70   : > { %v8253_v16 = vsub.f32 %v8191_v5, %v1906_v18  ;;  %v1907_v30 = vmul.f32 0.03125, %v1889_v13  ;;  %v1941_v33 = vsel %vm411_vm2, %v1925_v31, 0.0 }
 0xa71   : > { %1942 = vadd.xlane.f32.xlu0 %v1941_v33 }
 0xa72   : > { %v8257_v14 = vsub.f32 %v8195_v34, %v1907_v30  ;;  %v1926_v57 = vmul.f32 %v8253_v16, %v8253_v16  ;;  %v8297_v30 = vld [vmem:[%s9911_s5 + $0x7] ss:$0 sm:$0xff] }
 0xa74   : > { %v1944_v52 = vsel %vm411_vm2, %v1926_v57, 0.0  ;;  %v1927_v39 = vmul.f32 %v8257_v14, %v8257_v14 }
 0xa75   : > { %v1892_v24 = vpop.xlane.xlu1 %1891  ;;  %1945 = vadd.xlane.f32.xlu1 %v1944_v52 }
 0xa76   : > { %v1908_v21 = vmul.f32 0.03125, %v1892_v24  ;;  %v1947_v40 = vsel %vm411_vm2, %v1927_v39, 0.0 }
 0xa77   : > { %v1895_v6 = vpop.xlane.xlu0 %1894  ;;  %1948 = vadd.xlane.f32.xlu0 %v1947_v40 }
 0xa78   : > { %v8266_v19 = vsub.f32 %v8203_v42, %v1908_v21  ;;  %v1909_v43 = vmul.f32 0.03125, %v1895_v6 }
 0xa7a   : > { %v8269_v46 = vsub.f32 %v8207_v54, %v1909_v43  ;;  %v1928_v22 = vmul.f32 %v8266_v19, %v8266_v19 }
 0xa7c   : > { %v1950_v56 = vsel %vm411_vm2, %v1928_v22, 0.0  ;;  %v1929_v58 = vmul.f32 %v8269_v46, %v8269_v46 }
 0xa7d   : > { %1951 = vadd.xlane.f32.xlu1 %v1950_v56 }
 0xa7e   : > { %v1953_v28 = vsel %vm411_vm2, %v1929_v58, 0.0 }
 0xa7f   : > { %1954 = vadd.xlane.f32.xlu0 %v1953_v28 }
 0xa8b   : > { %v1898_v50 = vpop.xlane.xlu1 %1897 }
 0xa8c   : > { %v1910_v17 = vmul.f32 0.03125, %v1898_v50 }
 0xa8d   : > { %v1901_v8 = vpop.xlane.xlu0 %1900 }
 0xa8e   : > { %v8282_v53 = vsub.f32 %v8215_v37, %v1910_v17  ;;  %v1911_v51 = vmul.f32 0.03125, %v1901_v8 }
 0xa90   : > { %v8285_v4 = vsub.f32 %v8219_v9, %v1911_v51  ;;  %v1930_v62 = vmul.f32 %v8282_v53, %v8282_v53 }
 0xa92   : > { %v1956_v60 = vsel %vm411_vm2, %v1930_v62, 0.0  ;;  %v1931_v7 = vmul.f32 %v8285_v4, %v8285_v4 }
 0xa93   : > { %1957 = vadd.xlane.f32.xlu1 %v1956_v60 }
 0xa94   : > { %v1959_v45 = vsel %vm411_vm2, %v1931_v7, 0.0 }
 0xa95   : > { %1960 = vadd.xlane.f32.xlu0 %v1959_v45 }
 0xaf2   : > { %v1934_v27 = vpop.xlane.xlu1 %1933 }
 0xaf3   : > { %v1962_v0 = vmul.f32 0.03125, %v1934_v27 }
 0xaf5   : > { %v1972_v36 = vadd.f32 1e-06, %v1962_v0 }
 0xaf6   : > { %v1937_v47 = vpop.xlane.xlu0 %1936 }
 0xaf7   : > { %6974 = vrsqrt.f32 %v1972_v36  ;;  %v1963_v10 = vmul.f32 0.03125, %v1937_v47 }
 0xaf9   : > { %v1973_v41 = vadd.f32 1e-06, %v1963_v10 }
 0xafa   : > { %v1940_v2 = vpop.xlane.xlu1 %1939 }
 0xafb   : > { %6976 = vrsqrt.f32 %v1973_v41  ;;  %v1964_v20 = vmul.f32 0.03125, %v1940_v2 }
 0xafd   : > { %v1974_v23 = vadd.f32 1e-06, %v1964_v20 }
 0xafe   : > { %v1943_v26 = vpop.xlane.xlu0 %1942 }
 0xaff   : > { %6978 = vrsqrt.f32 %v1974_v23  ;;  %v1965_v25 = vmul.f32 0.03125, %v1943_v26 }
 0xb01   : > { %v6975_v12 = vpop.eup %6974  ;;  %v1975_v18 = vadd.f32 1e-06, %v1965_v25 }
 0xb02   : > { %v1992_v31 = vmul.f32 %v6975_v12, %v8230_v63  ;;  %v1946_v13 = vpop.xlane.xlu1 %1945  ;;  %v8304_v63 = vld [vmem:[%s9911_s5 + $0x8] ss:$0 sm:$0xff] }
 0xb03   : > { %6980 = vrsqrt.f32 %v1975_v18  ;;  %v1966_v33 = vmul.f32 0.03125, %v1946_v13 }
 0xb04   : > { %v1949_v57 = vpop.xlane.xlu0 %1948  ;;  %v2006_v21 = vmul.f32 %v8297_v30, %v1992_v31 }
 0xb05   : > { %v6977_v52 = vpop.eup %6976  ;;  %v1976_v39 = vadd.f32 1e-06, %v1966_v33  ;;  %v1967_v24 = vmul.f32 0.03125, %v1949_v57 }
 0xb06   : > { %v1993_v40 = vmul.f32 %v6977_v52, %v8235_v15  ;;  %v2020_v56 = vadd.f32 %v8304_v63, %v2006_v21 }
 0xb07   : > { %6982 = vrsqrt.f32 %v1976_v39  ;;  %v1977_v6 = vadd.f32 1e-06, %v1967_v24 }
 0xb08   : > { %v2007_v43 = vmul.f32 %v8297_v30, %v1993_v40 }
 0xb09   : > { %v6979_v22 = vpop.eup %6978  ;;  %6984 = vrsqrt.f32 %v1977_v6 }
 0xb0a   : > { %v2021_v58 = vadd.f32 %v8304_v63, %v2007_v43  ;;  %v1952_v28 = vpop.xlane.xlu1 %1951  ;;  %v1994_v44 = vmul.f32 %v6979_v22, %v8241_v35 }
 0xb0b   : > { %v1968_v50 = vmul.f32 0.03125, %v1952_v28 }
 0xb0c   : > { %v1955_v15 = vpop.xlane.xlu0 %1954  ;;  %v2034_v17 = vpack.c.bf16 %v2021_v58, %v2020_v56  ;;  %v2008_v7 = vmul.f32 %v8297_v30, %v1994_v44 }
 0xb0d   : > { %v6981_v8 = vpop.eup %6980  ;;  %v1978_v51 = vadd.f32 1e-06, %v1968_v50  ;;  %v1969_v62 = vmul.f32 0.03125, %v1955_v15 }
 0xb0e   : > { %6300 = vmatmul.mubr.msk.bf16.vlgmr.msra.gmra.mrb[80].mxu1 %vm411_vm2, %v2034_v17  ;;  %v1995_v60 = vmul.f32 %v6981_v8, %v8247_v61  ;;  %v2022_v0 = vadd.f32 %v8304_v63, %v2008_v7  ;;  %v6821_v17 = vld [vmem:[%s9910_s4 + $0x50] sm:$0xff]   ;;  %v6822_v8 = vld [vmem:[%s9910_s4 + $0x58] sm:$0xff]   ;;  %v8387_v7 = vld [vmem:[%s9911_s5 + $0x9] ss:$0 sm:$0xff] }
 0xb0f   : > { %6986 = vrsqrt.f32 %v1978_v51  ;;  %v1979_v45 = vadd.f32 1e-06, %v1969_v62  ;;  %6303 = vmatprep.mubr.msk.bf16.mxu1 %vm7271_vm0, %v7270_v1  ;;  %v6823_v51 = vld [vmem:[%s9910_s4 + $0x60] sm:$0xff]   ;;  %v6824_v62 = vld [vmem:[%s9910_s4 + $0x68] sm:$0xff]  }
 0xb10   : > { %v2009_v27 = vmul.f32 %v8297_v30, %v1995_v60  ;;  %v6825_v60 = vld [vmem:[%s9910_s4 + $0x88] sm:$0xff]  }
 0xb11   : > { %v6983_v35 = vpop.eup %6982  ;;  %6988 = vrsqrt.f32 %v1979_v45  ;;  %6356 = vmatpush3.bf16.msra.mxu1 %v6825_v60 }
 0xb12   : > { %v2023_v36 = vadd.f32 %v8304_v63, %v2009_v27  ;;  %v1996_v47 = vmul.f32 %v6983_v35, %v8253_v16  ;;  %6357 = vmatprep.subr.bf16.mxu1 %v7270_v1 }
 0xb13   : > { %v6985_v10 = vpop.eup %6984 }
 0xb14   : > { %v2035_v41 = vpack.c.bf16 %v2023_v36, %v2022_v0  ;;  %v1997_v61 = vmul.f32 %v6985_v10, %v8257_v14  ;;  %v2010_v2 = vmul.f32 %v8297_v30, %v1996_v47 }
 0xb16   : > { %6304 = vmatmul.mubr.msk.bf16.gmra.mrb[84].mxu1 %vm411_vm2, %v2035_v41  ;;  %v2011_v20 = vmul.f32 %v8297_v30, %v1997_v61  ;;  %v2024_v25 = vadd.f32 %v8304_v63, %v2010_v2 }
 0xb17   : > { %6307 = vmatprep.mubr.msk.bf16.mxu1 %vm7271_vm0, %v7270_v1 }
 0xb18   : > { %v2025_v23 = vadd.f32 %v8304_v63, %v2011_v20 }
 0xb19   : > { %v6987_v26 = vpop.eup %6986 }
 0xb1a   : > { %v1998_v16 = vmul.f32 %v6987_v26, %v8266_v19  ;;  %v2036_v18 = vpack.c.bf16 %v2025_v23, %v2024_v25 }
 0xb1b   : > { %v6989_v12 = vpop.eup %6988 }
 0xb1c   : > { %v1999_v14 = vmul.f32 %v6989_v12, %v8269_v46  ;;  %v2012_v31 = vmul.f32 %v8297_v30, %v1998_v16 }
 0xb1e   : > { %6308 = vmatmul.mubr.msk.bf16.gmra.mrb[88].mxu1 %vm411_vm2, %v2036_v18  ;;  %v2013_v13 = vmul.f32 %v8297_v30, %v1999_v14  ;;  %v2026_v19 = vadd.f32 %v8304_v63, %v2012_v31 }
 0xb1f   : > { %6311 = vmatprep.mubr.msk.bf16.mxu1 %vm7271_vm0, %v7270_v1 }
 0xb20   : > { %v1958_v33 = vpop.xlane.xlu1 %1957  ;;  %v2027_v57 = vadd.f32 %v8304_v63, %v2013_v13 }
 0xb21   : > { %v1970_v52 = vmul.f32 0.03125, %v1958_v33 }
 0xb22   : > { %v1961_v39 = vpop.xlane.xlu0 %1960  ;;  %v2037_v40 = vpack.c.bf16 %v2027_v57, %v2026_v19 }
 0xb23   : > { %v1980_v24 = vadd.f32 1e-06, %v1970_v52  ;;  %v1971_v21 = vmul.f32 0.03125, %v1961_v39 }
 0xb25   : > { %6990 = vrsqrt.f32 %v1980_v24  ;;  %v1981_v46 = vadd.f32 1e-06, %v1971_v21 }
 0xb26   : > { %6312 = vmatmul.mubr.msk.bf16.gmra.mrb[92].mxu1 %vm411_vm2, %v2037_v40 }
 0xb27   : > { %6992 = vrsqrt.f32 %v1981_v46  ;;  %6315 = vmatprep.mubr.msk.bf16.mxu1 %vm7271_vm0, %v7270_v1 }
 0xb2f   : > { %v6991_v6 = vpop.eup %6990 }
 0xb30   : > { %v2000_v43 = vmul.f32 %v6991_v6, %v8282_v53  ;;  %v6817_v53 = vld [vmem:[%s9910_s4 + $0x30] sm:$0xff]  }
 0xb31   : > { %v6993_v22 = vpop.eup %6992  ;;  %6320 = vmatpush3.bf16.msra.mxu0 %v6817_v53 }
 0xb32   : > { %v2001_v56 = vmul.f32 %v6993_v22, %v8285_v4  ;;  %v2014_v58 = vmul.f32 %v8297_v30, %v2000_v43  ;;  %6321 = vmatprep.subr.bf16.mxu0 %v7270_v1  ;;  %v6818_v4 = vld [vmem:[%s9910_s4 + $0x38] sm:$0xff]  }
 0xb34   : > { %v2015_v28 = vmul.f32 %v8297_v30, %v2001_v56  ;;  %v2028_v44 = vadd.f32 %v8304_v63, %v2014_v58  ;;  %v6819_v30 = vld [vmem:[%s9910_s4 + $0x40] sm:$0xff]  }
 0xb35   : > { %6322 = vmatpush3.bf16.msra.mxu0 %v6818_v4 }
 0xb36   : > { %v2029_v50 = vadd.f32 %v8304_v63, %v2015_v28  ;;  %6323 = vmatprep.subr.bf16.mxu0 %v7270_v1  ;;  %v6820_v63 = vld [vmem:[%s9910_s4 + $0x48] sm:$0xff]  }
 0xb38   : > { %v2038_v15 = vpack.c.bf16 %v2029_v50, %v2028_v44 }
 0xb39   : > { %6324 = vmatpush3.bf16.msra.mxu0 %v6819_v30 }
 0xb3a   : > { %6316 = vmatmul.mubr.msk.bf16.gmra.mrb[96].mxu1 %vm411_vm2, %v2038_v15  ;;  %6325 = vmatprep.subr.bf16.mxu0 %v7270_v1 }
 0xb3b   : > { %6359 = vmatprep.mubr.msk.bf16.mxu1 %vm7271_vm0, %v7270_v1 }
 0xb3d   : > { %6326 = vmatpush3.bf16.msra.mxu0 %v6820_v63 }
 0xb3e   : > { %6327 = vmatprep.subr.bf16.mxu0 %v7270_v1 }
 0xb41   : > { %6328 = vmatpush3.bf16.msra.mxu0 %v6821_v17 }
 0xb42   : > { %6329 = vmatprep.subr.bf16.mxu0 %v7270_v1 }
 0xb45   : > { %6330 = vmatpush3.bf16.msra.mxu0 %v6822_v8 }
 0xb46   : > { %6331 = vmatprep.subr.bf16.mxu0 %v7270_v1 }
 0xb49   : > { %6332 = vmatpush3.bf16.msra.mxu0 %v6823_v51 }
 0xb4a   : > { %6333 = vmatprep.subr.bf16.mxu0 %v7270_v1 }
 0xb4d   : > { %6334 = vmatpush3.bf16.msra.mxu0 %v6824_v62 }
 0xb4e   : > { %6379 = vmatprep.subr.bf16.mxu0 %v7270_v1 }
 0xbe1   : > { %v2105_v45 = vpop.f32.mrb[80].mxu1 }
 0xbe2   : > { %v8390_v27 = vadd.f32 %v8387_v7, %v2105_v45  ;;  %v6301_v35 = vpop.f32.mrb[81].mxu1 }
 0xbe3   : > { %v2108_v0 = vpop.f32.mrb[82].mxu1 }
 0xbe4   : > { %v2144_v36 = vmul.f32 %v8390_v27, %v8390_v27  ;;  %v8395_v47 = vadd.f32 %v8387_v7, %v2108_v0  ;;  %v6302_v10 = vpop.f32.mrb[83].mxu1 }
 0xbe6   : > { %v2154_v41 = vmul.f32 %v2144_v36, %v8390_v27  ;;  %v2145_v61 = vmul.f32 %v8395_v47, %v8395_v47 }
 0xbe8   : > { %v2164_v2 = vmul.f32 0.044715, %v2154_v41  ;;  %v2155_v20 = vmul.f32 %v2145_v61, %v8395_v47 }
 0xbe9   : > { %v2113_v23 = vpop.f32.mrb[84].mxu1 }
 0xbea   : > { %v2174_v26 = vadd.f32 %v2164_v2, %v8390_v27  ;;  %v2165_v25 = vmul.f32 0.044715, %v2155_v20  ;;  %v8403_v16 = vadd.f32 %v8387_v7, %v2113_v23  ;;  %v6305_v12 = vpop.f32.mrb[85].mxu1 }
 0xbeb   : > { %v2116_v18 = vpop.f32.mrb[86].mxu1 }
 0xbec   : > { %v2184_v14 = vmul.f32 0.7978846, %v2174_v26  ;;  %v2175_v31 = vadd.f32 %v2165_v25, %v8395_v47  ;;  %v2146_v13 = vmul.f32 %v8403_v16, %v8403_v16  ;;  %v8409_v33 = vadd.f32 %v8387_v7, %v2116_v18  ;;  %v6306_v57 = vpop.f32.mrb[87].mxu1 }
 0xbee   : > { %6994 = vtanh.f32 %v2184_v14  ;;  %v2185_v52 = vmul.f32 0.7978846, %v2175_v31  ;;  %v2156_v39 = vmul.f32 %v2146_v13, %v8403_v16  ;;  %v2147_v19 = vmul.f32 %v8409_v33, %v8409_v33 }
 0xbf0   : > { %6996 = vtanh.f32 %v2185_v52  ;;  %v2166_v24 = vmul.f32 0.044715, %v2156_v39  ;;  %v2157_v21 = vmul.f32 %v2147_v19, %v8409_v33 }
 0xbf1   : > { %v2121_v40 = vpop.f32.mrb[88].mxu1 }
 0xbf2   : > { %v2176_v46 = vadd.f32 %v2166_v24, %v8403_v16  ;;  %v2167_v6 = vmul.f32 0.044715, %v2157_v21  ;;  %v8417_v43 = vadd.f32 %v8387_v7, %v2121_v40  ;;  %v6309_v22 = vpop.f32.mrb[89].mxu1 }
 0xbf3   : > { %v2124_v56 = vpop.f32.mrb[90].mxu1 }
 0xbf4   : > { %v2186_v58 = vmul.f32 0.7978846, %v2176_v46  ;;  %v2177_v28 = vadd.f32 %v2167_v6, %v8409_v33  ;;  %v2148_v44 = vmul.f32 %v8417_v43, %v8417_v43  ;;  %v8423_v50 = vadd.f32 %v8387_v7, %v2124_v56  ;;  %v6310_v15 = vpop.f32.mrb[91].mxu1 }
 0xbf6   : > { %6998 = vtanh.f32 %v2186_v58  ;;  %v2187_v53 = vmul.f32 0.7978846, %v2177_v28  ;;  %v2158_v4 = vmul.f32 %v2148_v44, %v8417_v43  ;;  %v2149_v30 = vmul.f32 %v8423_v50, %v8423_v50 }
 0xbf8   : > { %v6995_v63 = vpop.eup %6994  ;;  %7000 = vtanh.f32 %v2187_v53  ;;  %v2168_v17 = vmul.f32 0.044715, %v2158_v4  ;;  %v2159_v8 = vmul.f32 %v2149_v30, %v8423_v50 }
 0xbf9   : > { %v2204_v51 = vadd.f32 1.0, %v6995_v63  ;;  %v2129_v62 = vpop.f32.mrb[92].mxu1 }
 0xbfa   : > { %v6997_v60 = vpop.eup %6996  ;;  %v2178_v45 = vadd.f32 %v2168_v17, %v8417_v43  ;;  %v2169_v35 = vmul.f32 0.044715, %v2159_v8  ;;  %v8431_v0 = vadd.f32 %v8387_v7, %v2129_v62  ;;  %v6313_v36 = vpop.f32.mrb[93].mxu1 }
 0xbfb   : > { %v2214_v10 = vmul.f32 0.5, %v2204_v51  ;;  %v2205_v41 = vadd.f32 1.0, %v6997_v60  ;;  %v2132_v61 = vpop.f32.mrb[94].mxu1 }
 0xbfc   : > { %v2188_v2 = vmul.f32 0.7978846, %v2178_v45  ;;  %v2179_v20 = vadd.f32 %v2169_v35, %v8423_v50  ;;  %v2150_v23 = vmul.f32 %v8431_v0, %v8431_v0  ;;  %v8437_v26 = vadd.f32 %v8387_v7, %v2132_v61  ;;  %v6314_v25 = vpop.f32.mrb[95].mxu1 }
 0xbfd   : > { %v2215_v12 = vmul.f32 0.5, %v2205_v41  ;;  %v2224_v13 = vmul.f32 %v2214_v10, %v8390_v27 }
 0xbfe   : > { %7002 = vtanh.f32 %v2188_v2  ;;  %v2189_v18 = vmul.f32 0.7978846, %v2179_v20  ;;  %v2160_v14 = vmul.f32 %v2150_v23, %v8431_v0  ;;  %v2151_v31 = vmul.f32 %v8437_v26, %v8437_v26 }
 0xbff   : > { %v2225_v57 = vmul.f32 %v2215_v12, %v8395_v47 }
 0xc00   : > { %v6999_v52 = vpop.eup %6998  ;;  %7004 = vtanh.f32 %v2189_v18  ;;  %v2170_v39 = vmul.f32 0.044715, %v2160_v14  ;;  %v2161_v19 = vmul.f32 %v2151_v31, %v8437_v26 }
 0xc01   : > { %v2250_v24 = vpack.c.bf16 %v2225_v57, %v2224_v13  ;;  %v2206_v21 = vadd.f32 1.0, %v6999_v52 }
 0xc02   : > { %v7001_v40 = vpop.eup %7000  ;;  %v2180_v46 = vadd.f32 %v2170_v39, %v8431_v0  ;;  %v2171_v6 = vmul.f32 0.044715, %v2161_v19 }
 0xc03   : > { %6336 = vmatmul.mubr.bf16.vlgmr.msra.gmra.mrb[80].mxu0 %v2250_v24  ;;  %v2207_v22 = vadd.f32 1.0, %v7001_v40  ;;  %v2216_v56 = vmul.f32 0.5, %v2206_v21 }
 0xc04   : > { %v2190_v58 = vmul.f32 0.7978846, %v2180_v46  ;;  %v2181_v28 = vadd.f32 %v2171_v6, %v8437_v26  ;;  %6339 = vmatprep.mubr.msk.bf16.mxu0 %vm7271_vm0, %v7270_v1 }
 0xc05   : > { %v2217_v27 = vmul.f32 0.5, %v2207_v22  ;;  %v2226_v44 = vmul.f32 %v2216_v56, %v8403_v16 }
 0xc06   : > { %7006 = vtanh.f32 %v2190_v58  ;;  %v2191_v47 = vmul.f32 0.7978846, %v2181_v28 }
 0xc07   : > { %v2227_v15 = vmul.f32 %v2217_v27, %v8409_v33 }
 0xc08   : > { %v7003_v53 = vpop.eup %7002  ;;  %7008 = vtanh.f32 %v2191_v47  ;;  %v5650_v47 = vld [vmem:[%s9911_s5 + $0xa] ss:$0 sm:$0xff] }
 0xc09   : > { %v2251_v4 = vpack.c.bf16 %v2227_v15, %v2226_v44  ;;  %v2208_v30 = vadd.f32 1.0, %v7003_v53 }
 0xc0a   : > { %v7005_v63 = vpop.eup %7004 }
 0xc0b   : > { %6340 = vmatmul.mubr.bf16.gmra.mrb[84].mxu0 %v2251_v4  ;;  %v2209_v17 = vadd.f32 1.0, %v7005_v63  ;;  %v2218_v8 = vmul.f32 0.5, %v2208_v30  ;;  %v5659_v4 = vld [vmem:[%s9911_s5 + $0xb] ss:$0 sm:$0xff] }
 0xc0c   : > { %6343 = vmatprep.mubr.msk.bf16.mxu0 %vm7271_vm0, %v7270_v1 }
 0xc0d   : > { %v2137_v51 = vpop.f32.mrb[96].mxu1  ;;  %v2219_v62 = vmul.f32 0.5, %v2209_v17  ;;  %v2228_v16 = vmul.f32 %v2218_v8, %v8417_v43 }
 0xc0e   : > { %v2138_v60 = vadd.f32 %v8387_v7, %v2137_v51  ;;  %v6317_v45 = vpop.f32.mrb[97].mxu1 }
 0xc0f   : > { %v2140_v35 = vpop.f32.mrb[98].mxu1  ;;  %v2229_v33 = vmul.f32 %v2219_v62, %v8423_v50 }
 0xc10   : > { %v7007_v36 = vpop.eup %7006  ;;  %v2152_v10 = vmul.f32 %v2138_v60, %v2138_v60  ;;  %v2141_v41 = vadd.f32 %v8387_v7, %v2140_v35  ;;  %v6318_v61 = vpop.f32.mrb[99].mxu1 }
 0xc11   : > { %v2252_v2 = vpack.c.bf16 %v2229_v33, %v2228_v16  ;;  %v2210_v20 = vadd.f32 1.0, %v7007_v36 }
 0xc12   : > { %v7009_v23 = vpop.eup %7008  ;;  %v2162_v25 = vmul.f32 %v2152_v10, %v2138_v60  ;;  %v2153_v12 = vmul.f32 %v2141_v41, %v2141_v41 }
 0xc13   : > { %6344 = vmatmul.mubr.bf16.gmra.mrb[88].mxu0 %v2252_v2  ;;  %v2211_v18 = vadd.f32 1.0, %v7009_v23  ;;  %v2220_v14 = vmul.f32 0.5, %v2210_v20 }
 0xc14   : > { %v2172_v31 = vmul.f32 0.044715, %v2162_v25  ;;  %v2163_v13 = vmul.f32 %v2153_v12, %v2141_v41  ;;  %6347 = vmatprep.mubr.msk.bf16.mxu0 %vm7271_vm0, %v7270_v1 }
 0xc15   : > { %v2221_v43 = vmul.f32 0.5, %v2211_v18  ;;  %v2230_v52 = vmul.f32 %v2220_v14, %v8431_v0 }
 0xc16   : > { %v2182_v50 = vadd.f32 %v2172_v31, %v2138_v60  ;;  %v2173_v57 = vmul.f32 0.044715, %v2163_v13 }
 0xc17   : > { %v2231_v7 = vmul.f32 %v2221_v43, %v8437_v26  ;;  %v6826_v26 = vld [vmem:[%s9910_s4 + $0x90] sm:$0xff]  }
 0xc18   : > { %v2192_v39 = vmul.f32 0.7978846, %v2182_v50  ;;  %v2183_v19 = vadd.f32 %v2173_v57, %v2141_v41  ;;  %6358 = vmatpush3.bf16.msra.mxu1 %v6826_v26  ;;  %v6827_v26 = vld [vmem:[%s9910_s4 + $0x98] sm:$0xff]  }
 0xc19   : > { %v2253_v24 = vpack.c.bf16 %v2231_v7, %v2230_v52  ;;  %6401 = vmatprep.subr.bf16.mxu1 %v7270_v1  ;;  %6380 = vmatpush3.bf16.msra.mxu0 %v6827_v26 }
 0xc1a   : > { %7010 = vtanh.f32 %v2192_v39  ;;  %v2193_v21 = vmul.f32 0.7978846, %v2183_v19  ;;  %6425 = vmatprep.subr.bf16.mxu0 %v7270_v1 }
 0xc1b   : > { %6348 = vmatmul.mubr.bf16.gmra.mrb[92].mxu0 %v2253_v24 }
 0xc1c   : > { %7012 = vtanh.f32 %v2193_v21  ;;  %6351 = vmatprep.mubr.msk.bf16.mxu0 %vm7271_vm0, %v7270_v1 }
 0xc24   : > { %v7011_v40 = vpop.eup %7010 }
 0xc25   : > { %v2212_v46 = vadd.f32 1.0, %v7011_v40 }
 0xc26   : > { %v7013_v6 = vpop.eup %7012 }
 0xc27   : > { %v2213_v22 = vadd.f32 1.0, %v7013_v6  ;;  %v2222_v56 = vmul.f32 0.5, %v2212_v46 }
 0xc29   : > { %v2223_v58 = vmul.f32 0.5, %v2213_v22  ;;  %v2232_v28 = vmul.f32 %v2222_v56, %v2138_v60 }
 0xc2b   : > { %v2233_v0 = vmul.f32 %v2223_v58, %v2141_v41 }
 0xc2d   : > { %v2254_v27 = vpack.c.bf16 %v2233_v0, %v2232_v28 }
 0xc2f   : > { %6352 = vmatmul.mubr.bf16.gmra.mrb[96].mxu0 %v2254_v27 }
 0xc30   : > { %6381 = vmatprep.mubr.msk.bf16.mxu0 %vm7271_vm0, %v7270_v1 }
 0xcd6   : > { %v2342_v44 = vpop.f32.mrb[80].mxu0 }
 0xcd7   : > { %v2343_v15 = vadd.f32 %v5650_v47, %v2342_v44  ;;  %v6337_v53 = vpop.f32.mrb[81].mxu0 }
 0xcd8   : > { %v2345_v30 = vpop.f32.mrb[82].mxu0 }
 0xcd9   : > { %v2346_v63 = vadd.f32 %v5650_v47, %v2345_v30  ;;  %v6338_v17 = vpop.f32.mrb[83].mxu0  ;;  %v8475_v8 = vmul.f32 %v5659_v4, %v2343_v15 }
 0xcdb   : > { %v8477_v51 = vmul.f32 %v5659_v4, %v2346_v63 }
 0xcdd   : > { %v2404_v62 = vpack.c.bf16 %v8477_v51, %v8475_v8 }
 0xcde   : > { %v2350_v60 = vpop.f32.mrb[84].mxu0 }
 0xcdf   : > { %v2351_v45 = vadd.f32 %v5650_v47, %v2350_v60  ;;  %v6341_v35 = vpop.f32.mrb[85].mxu0  ;;  %6360 = vmatmul.mubr.msk.bf16.vlgmr.msra.gmra.mrb[100].mxu1 %vm411_vm2, %v2404_v62 }
 0xce0   : > { %v2353_v16 = vpop.f32.mrb[86].mxu0  ;;  %6363 = vmatprep.mubr.msk.bf16.mxu1 %vm7271_vm0, %v7270_v1 }
 0xce1   : > { %v2354_v33 = vadd.f32 %v5650_v47, %v2353_v16  ;;  %v6342_v36 = vpop.f32.mrb[87].mxu0  ;;  %v8484_v10 = vmul.f32 %v5659_v4, %v2351_v45 }
 0xce3   : > { %v8486_v41 = vmul.f32 %v5659_v4, %v2354_v33 }
 0xce5   : > { %v2405_v61 = vpack.c.bf16 %v8486_v41, %v8484_v10 }
 0xce6   : > { %v2358_v2 = vpop.f32.mrb[88].mxu0 }
 0xce7   : > { %v2359_v20 = vadd.f32 %v5650_v47, %v2358_v2  ;;  %v6345_v23 = vpop.f32.mrb[89].mxu0  ;;  %6364 = vmatmul.mubr.msk.bf16.gmra.mrb[104].mxu1 %vm411_vm2, %v2405_v61 }
 0xce8   : > { %v2361_v25 = vpop.f32.mrb[90].mxu0  ;;  %6367 = vmatprep.mubr.msk.bf16.mxu1 %vm7271_vm0, %v7270_v1 }
 0xce9   : > { %v2362_v12 = vadd.f32 %v5650_v47, %v2361_v25  ;;  %v6346_v18 = vpop.f32.mrb[91].mxu0  ;;  %v8493_v14 = vmul.f32 %v5659_v4, %v2359_v20 }
 0xceb   : > { %v8495_v31 = vmul.f32 %v5659_v4, %v2362_v12 }
 0xced   : > { %v2406_v13 = vpack.c.bf16 %v8495_v31, %v8493_v14 }
 0xcee   : > { %v2366_v43 = vpop.f32.mrb[92].mxu0 }
 0xcef   : > { %v2367_v50 = vadd.f32 %v5650_v47, %v2366_v43  ;;  %v6349_v57 = vpop.f32.mrb[93].mxu0  ;;  %6368 = vmatmul.mubr.msk.bf16.gmra.mrb[108].mxu1 %vm411_vm2, %v2406_v13 }
 0xcf0   : > { %v2369_v52 = vpop.f32.mrb[94].mxu0  ;;  %6371 = vmatprep.mubr.msk.bf16.mxu1 %vm7271_vm0, %v7270_v1 }
 0xcf1   : > { %v2370_v7 = vadd.f32 %v5650_v47, %v2369_v52  ;;  %v6350_v39 = vpop.f32.mrb[95].mxu0  ;;  %v8502_v19 = vmul.f32 %v5659_v4, %v2367_v50 }
 0xcf3   : > { %v8504_v24 = vmul.f32 %v5659_v4, %v2370_v7 }
 0xcf5   : > { %v2407_v21 = vpack.c.bf16 %v8504_v24, %v8502_v19 }
 0xcf7   : > { %6372 = vmatmul.mubr.msk.bf16.gmra.mrb[112].mxu1 %vm411_vm2, %v2407_v21 }
 0xcf8   : > { %6375 = vmatprep.mubr.msk.bf16.mxu1 %vm7271_vm0, %v7270_v1 }
 0xd02   : > { %v2374_v40 = vpop.f32.mrb[96].mxu0 }
 0xd03   : > { %v2375_v46 = vadd.f32 %v5650_v47, %v2374_v40  ;;  %v6353_v6 = vpop.f32.mrb[97].mxu0 }
 0xd04   : > { %v2377_v22 = vpop.f32.mrb[98].mxu0 }
 0xd05   : > { %v2378_v56 = vadd.f32 %v5650_v47, %v2377_v22  ;;  %v6354_v58 = vpop.f32.mrb[99].mxu0  ;;  %v8511_v28 = vmul.f32 %v5659_v4, %v2375_v46  ;;  %v8527_v47 = vld [vmem:[%s9911_s5 + $0xc] ss:$0 sm:$0xff] }
 0xd07   : > { %v8513_v0 = vmul.f32 %v5659_v4, %v2378_v56 }
 0xd09   : > { %v2408_v27 = vpack.c.bf16 %v8513_v0, %v8511_v28 }
 0xd0b   : > { %6376 = vmatmul.mubr.msk.bf16.gmra.mrb[116].mxu1 %vm411_vm2, %v2408_v27 }
 0xd0c   : > { %6405 = vmatprep.mubr.msk.bf16.mxu1 %vm7271_vm0, %v7270_v1 }
 0xdb2   : > { %v2474_v44 = vpop.f32.mrb[100].mxu1 }
 0xdb3   : > { %v8530_v15 = vadd.f32 %v8527_v47, %v2474_v44  ;;  %v6361_v53 = vpop.f32.mrb[101].mxu1 }
 0xdb4   : > { %v2477_v4 = vpop.f32.mrb[102].mxu1 }
 0xdb5   : > { %v2513_v30 = vmul.f32 %v8530_v15, %v8530_v15  ;;  %v8535_v63 = vadd.f32 %v8527_v47, %v2477_v4  ;;  %v6362_v17 = vpop.f32.mrb[103].mxu1 }
 0xdb7   : > { %v2523_v62 = vmul.f32 %v2513_v30, %v8530_v15  ;;  %v2514_v60 = vmul.f32 %v8535_v63, %v8535_v63 }
 0xdb9   : > { %v2533_v45 = vmul.f32 0.044715, %v2523_v62  ;;  %v2524_v35 = vmul.f32 %v2514_v60, %v8535_v63 }
 0xdba   : > { %v2482_v16 = vpop.f32.mrb[104].mxu1 }
 0xdbb   : > { %v2543_v33 = vadd.f32 %v2533_v45, %v8530_v15  ;;  %v2534_v36 = vmul.f32 0.044715, %v2524_v35  ;;  %v8543_v61 = vadd.f32 %v8527_v47, %v2482_v16  ;;  %v6365_v2 = vpop.f32.mrb[105].mxu1 }
 0xdbc   : > { %v2485_v20 = vpop.f32.mrb[106].mxu1 }
 0xdbd   : > { %v2553_v23 = vmul.f32 0.7978846, %v2543_v33  ;;  %v2544_v25 = vadd.f32 %v2534_v36, %v8535_v63  ;;  %v2515_v12 = vmul.f32 %v8543_v61, %v8543_v61  ;;  %v8549_v18 = vadd.f32 %v8527_v47, %v2485_v20  ;;  %v6366_v13 = vpop.f32.mrb[107].mxu1 }
 0xdbf   : > { %7014 = vtanh.f32 %v2553_v23  ;;  %v2554_v43 = vmul.f32 0.7978846, %v2544_v25  ;;  %v2525_v50 = vmul.f32 %v2515_v12, %v8543_v61  ;;  %v2516_v57 = vmul.f32 %v8549_v18, %v8549_v18 }
 0xdc1   : > { %7016 = vtanh.f32 %v2554_v43  ;;  %v2535_v52 = vmul.f32 0.044715, %v2525_v50  ;;  %v2526_v7 = vmul.f32 %v2516_v57, %v8549_v18 }
 0xdc2   : > { %v2490_v39 = vpop.f32.mrb[108].mxu1 }
 0xdc3   : > { %v2545_v21 = vadd.f32 %v2535_v52, %v8543_v61  ;;  %v2536_v40 = vmul.f32 0.044715, %v2526_v7  ;;  %v8557_v46 = vadd.f32 %v8527_v47, %v2490_v39  ;;  %v6369_v6 = vpop.f32.mrb[109].mxu1 }
 0xdc4   : > { %v2493_v22 = vpop.f32.mrb[110].mxu1 }
 0xdc5   : > { %v2555_v56 = vmul.f32 0.7978846, %v2545_v21  ;;  %v2546_v58 = vadd.f32 %v2536_v40, %v8549_v18  ;;  %v2517_v27 = vmul.f32 %v8557_v46, %v8557_v46  ;;  %v8563_v26 = vadd.f32 %v8527_v47, %v2493_v22  ;;  %v6370_v44 = vpop.f32.mrb[111].mxu1 }
 0xdc7   : > { %7018 = vtanh.f32 %v2555_v56  ;;  %v2556_v53 = vmul.f32 0.7978846, %v2546_v58  ;;  %v2527_v4 = vmul.f32 %v2517_v27, %v8557_v46  ;;  %v2518_v30 = vmul.f32 %v8563_v26, %v8563_v26 }
 0xdc9   : > { %v7015_v17 = vpop.eup %7014  ;;  %7020 = vtanh.f32 %v2556_v53  ;;  %v2537_v62 = vmul.f32 0.044715, %v2527_v4  ;;  %v2528_v60 = vmul.f32 %v2518_v30, %v8563_v26 }
 0xdca   : > { %v2573_v45 = vadd.f32 1.0, %v7015_v17  ;;  %v2498_v35 = vpop.f32.mrb[112].mxu1 }
 0xdcb   : > { %v7017_v16 = vpop.eup %7016  ;;  %v2547_v33 = vadd.f32 %v2537_v62, %v8557_v46  ;;  %v2538_v36 = vmul.f32 0.044715, %v2528_v60  ;;  %v8571_v2 = vadd.f32 %v8527_v47, %v2498_v35  ;;  %v6373_v20 = vpop.f32.mrb[113].mxu1 }
 0xdcc   : > { %v2583_v23 = vmul.f32 0.5, %v2573_v45  ;;  %v2574_v25 = vadd.f32 1.0, %v7017_v16  ;;  %v2501_v12 = vpop.f32.mrb[114].mxu1 }
 0xdcd   : > { %v2557_v13 = vmul.f32 0.7978846, %v2547_v33  ;;  %v2548_v43 = vadd.f32 %v2538_v36, %v8563_v26  ;;  %v2519_v50 = vmul.f32 %v8571_v2, %v8571_v2  ;;  %v8577_v57 = vadd.f32 %v8527_v47, %v2501_v12  ;;  %v6374_v52 = vpop.f32.mrb[115].mxu1 }
 0xdce   : > { %v2584_v7 = vmul.f32 0.5, %v2574_v25  ;;  %v2593_v6 = vmul.f32 %v2583_v23, %v8530_v15 }
 0xdcf   : > { %7022 = vtanh.f32 %v2557_v13  ;;  %v2558_v39 = vmul.f32 0.7978846, %v2548_v43  ;;  %v2529_v21 = vmul.f32 %v2519_v50, %v8571_v2  ;;  %v2520_v40 = vmul.f32 %v8577_v57, %v8577_v57 }
 0xdd0   : > { %v2594_v22 = vmul.f32 %v2584_v7, %v8535_v63 }
 0xdd1   : > { %v7019_v56 = vpop.eup %7018  ;;  %7024 = vtanh.f32 %v2558_v39  ;;  %v2539_v58 = vmul.f32 0.044715, %v2529_v21  ;;  %v2530_v27 = vmul.f32 %v2520_v40, %v8577_v57 }
 0xdd2   : > { %v2603_v44 = vpack.c.bf16 %v2594_v22, %v2593_v6  ;;  %v2575_v53 = vadd.f32 1.0, %v7019_v56 }
 0xdd3   : > { %v7021_v4 = vpop.eup %7020  ;;  %v2549_v30 = vadd.f32 %v2539_v58, %v8571_v2  ;;  %v2540_v17 = vmul.f32 0.044715, %v2530_v27 }
 0xdd4   : > { %v2585_v62 = vmul.f32 0.5, %v2575_v53  ;;  %v2576_v60 = vadd.f32 1.0, %v7021_v4  ;;  %6382 = vmatmul.mubr.msk.bf16.vlgmr.msra.gmra.mrb[100].mxu0 %vm320_vm1, %v2603_v44 }
 0xdd5   : > { %v2559_v45 = vmul.f32 0.7978846, %v2549_v30  ;;  %v2550_v15 = vadd.f32 %v2540_v17, %v8577_v57  ;;  %6385 = vmatprep.mubr.msk.bf16.mxu0 %vm7271_vm0, %v7270_v1 }
 0xdd6   : > { %v2586_v63 = vmul.f32 0.5, %v2576_v60  ;;  %v2595_v16 = vmul.f32 %v2585_v62, %v8543_v61 }
 0xdd7   : > { %7026 = vtanh.f32 %v2559_v45  ;;  %v2560_v35 = vmul.f32 0.7978846, %v2550_v15 }
 0xdd8   : > { %v2596_v33 = vmul.f32 %v2586_v63, %v8549_v18 }
 0xdd9   : > { %v7023_v36 = vpop.eup %7022  ;;  %7028 = vtanh.f32 %v2560_v35 }
 0xdda   : > { %v2577_v20 = vadd.f32 1.0, %v7023_v36  ;;  %v2604_v23 = vpack.c.bf16 %v2596_v33, %v2595_v16 }
 0xddb   : > { %v7025_v25 = vpop.eup %7024 }
 0xddc   : > { %v2587_v12 = vmul.f32 0.5, %v2577_v20  ;;  %v2578_v13 = vadd.f32 1.0, %v7025_v25  ;;  %6386 = vmatmul.mubr.msk.bf16.gmra.mrb[104].mxu0 %vm320_vm1, %v2604_v23 }
 0xddd   : > { %6389 = vmatprep.mubr.msk.bf16.mxu0 %vm7271_vm0, %v7270_v1 }
 0xdde   : > { %v2588_v43 = vmul.f32 0.5, %v2578_v13  ;;  %v2506_v50 = vpop.f32.mrb[116].mxu1  ;;  %v2597_v61 = vmul.f32 %v2587_v12, %v8557_v46 }
 0xddf   : > { %v2507_v52 = vadd.f32 %v8527_v47, %v2506_v50  ;;  %v6377_v7 = vpop.f32.mrb[117].mxu1 }
 0xde0   : > { %v2598_v18 = vmul.f32 %v2588_v43, %v8563_v26  ;;  %v2509_v39 = vpop.f32.mrb[118].mxu1  ;;  %v5668_v43 = vld [vmem:[%s9911_s5 + $0xd] ss:$0 sm:$0xff] }
 0xde1   : > { %v7027_v21 = vpop.eup %7026  ;;  %v2521_v40 = vmul.f32 %v2507_v52, %v2507_v52  ;;  %v2510_v6 = vadd.f32 %v8527_v47, %v2509_v39  ;;  %v6378_v22 = vpop.f32.mrb[119].mxu1 }
 0xde2   : > { %v2579_v56 = vadd.f32 1.0, %v7027_v21  ;;  %v2605_v58 = vpack.c.bf16 %v2598_v18, %v2597_v61 }
 0xde3   : > { %v7029_v27 = vpop.eup %7028  ;;  %v2531_v44 = vmul.f32 %v2521_v40, %v2507_v52  ;;  %v2522_v53 = vmul.f32 %v2510_v6, %v2510_v6 }
 0xde4   : > { %v2589_v4 = vmul.f32 0.5, %v2579_v56  ;;  %v2580_v30 = vadd.f32 1.0, %v7029_v27  ;;  %6390 = vmatmul.mubr.msk.bf16.gmra.mrb[108].mxu0 %vm320_vm1, %v2605_v58 }
 0xde5   : > { %v2541_v17 = vmul.f32 0.044715, %v2531_v44  ;;  %v2532_v62 = vmul.f32 %v2522_v53, %v2510_v6  ;;  %6393 = vmatprep.mubr.msk.bf16.mxu0 %vm7271_vm0, %v7270_v1 }
 0xde6   : > { %v2590_v46 = vmul.f32 0.5, %v2580_v30  ;;  %v2599_v47 = vmul.f32 %v2589_v4, %v8571_v2 }
 0xde7   : > { %v2551_v26 = vadd.f32 %v2541_v17, %v2507_v52  ;;  %v2542_v60 = vmul.f32 0.044715, %v2532_v62 }
 0xde8   : > { %v2600_v45 = vmul.f32 %v2590_v46, %v8577_v57 }
 0xde9   : > { %v2561_v15 = vmul.f32 0.7978846, %v2551_v26  ;;  %v2552_v63 = vadd.f32 %v2542_v60, %v2510_v6 }
 0xdea   : > { %v2606_v35 = vpack.c.bf16 %v2600_v45, %v2599_v47 }
 0xdeb   : > { %7030 = vtanh.f32 %v2561_v15  ;;  %v2562_v16 = vmul.f32 0.7978846, %v2552_v63 }
 0xdec   : > { %6394 = vmatmul.mubr.msk.bf16.gmra.mrb[112].mxu0 %vm320_vm1, %v2606_v35 }
 0xded   : > { %7032 = vtanh.f32 %v2562_v16  ;;  %6397 = vmatprep.mubr.msk.bf16.mxu0 %vm7271_vm0, %v7270_v1 }
 0xdf5   : > { %v7031_v33 = vpop.eup %7030 }
 0xdf6   : > { %v2581_v36 = vadd.f32 1.0, %v7031_v33 }
 0xdf7   : > { %v7033_v20 = vpop.eup %7032 }
 0xdf8   : > { %v2591_v23 = vmul.f32 0.5, %v2581_v36  ;;  %v2582_v25 = vadd.f32 1.0, %v7033_v20 }
 0xdfa   : > { %v2592_v12 = vmul.f32 0.5, %v2582_v25  ;;  %v2601_v2 = vmul.f32 %v2591_v23, %v2507_v52 }
 0xdfc   : > { %v2602_v13 = vmul.f32 %v2592_v12, %v2510_v6 }
 0xdfe   : > { %v2607_v57 = vpack.c.bf16 %v2602_v13, %v2601_v2 }
 0xe00   : > { %6398 = vmatmul.mubr.msk.bf16.gmra.mrb[116].mxu0 %vm320_vm1, %v2607_v57 }
 0xe01   : > { %6435 = vmatprep.mubr.msk.bf16.mxu0 %vm7271_vm0, %v7270_v1 }
 0xea7   : > { %v2667_v50 = vpop.f32.mrb[100].mxu0 }
 0xea8   : > { %v2668_v7 = vadd.f32 %v5668_v43, %v2667_v50  ;;  %v6383_v61 = vpop.f32.mrb[101].mxu0 }
 0xea9   : > { %v2670_v18 = vpop.f32.mrb[102].mxu0 }
 0xeaa   : > { %v2706_v39 = vadd.f32 %v2668_v7, %v8475_v8  ;;  %v2671_v21 = vadd.f32 %v5668_v43, %v2670_v18  ;;  %v6384_v40 = vpop.f32.mrb[103].mxu0 }
 0xeac   : > { %v8615_v52 = vadd.f32 %v2706_v39, %v8167_v29  ;;  %v2707_v6 = vadd.f32 %v2671_v21, %v8477_v51 }
 0xeae   : > { %v8619_v22 = vadd.f32 %v2707_v6, %v8171_v32  ;;  %v2729_v56 = vsel %vm411_vm2, %v8615_v52, 0.0 }
 0xeaf   : > { %2730 = vadd.xlane.f32.xlu1 %v2729_v56  ;;  %v2675_v58 = vpop.f32.mrb[104].mxu0 }
 0xeb0   : > { %v2676_v27 = vadd.f32 %v5668_v43, %v2675_v58  ;;  %v6387_v44 = vpop.f32.mrb[105].mxu0  ;;  %v2732_v8 = vsel %vm411_vm2, %v8619_v22, 0.0 }
 0xeb1   : > { %2733 = vadd.xlane.f32.xlu0 %v2732_v8  ;;  %v2678_v53 = vpop.f32.mrb[106].mxu0 }
 0xeb2   : > { %v2708_v29 = vadd.f32 %v2676_v27, %v8484_v10  ;;  %v2679_v4 = vadd.f32 %v5668_v43, %v2678_v53  ;;  %v6388_v30 = vpop.f32.mrb[107].mxu0 }
 0xeb4   : > { %v8627_v51 = vadd.f32 %v2708_v29, %v8179_v11  ;;  %v2709_v32 = vadd.f32 %v2679_v4, %v8486_v41 }
 0xeb6   : > { %v8631_v17 = vadd.f32 %v2709_v32, %v8183_v59  ;;  %v2735_v62 = vsel %vm411_vm2, %v8627_v51, 0.0 }
 0xeb7   : > { %2736 = vadd.xlane.f32.xlu1 %v2735_v62  ;;  %v2683_v46 = vpop.f32.mrb[108].mxu0 }
 0xeb8   : > { %v2684_v26 = vadd.f32 %v5668_v43, %v2683_v46  ;;  %v6391_v60 = vpop.f32.mrb[109].mxu0  ;;  %v2738_v10 = vsel %vm411_vm2, %v8631_v17, 0.0 }
 0xeb9   : > { %2739 = vadd.xlane.f32.xlu0 %v2738_v10  ;;  %v2686_v47 = vpop.f32.mrb[110].mxu0 }
 0xeba   : > { %v2710_v11 = vadd.f32 %v2684_v26, %v8493_v14  ;;  %v2687_v45 = vadd.f32 %v5668_v43, %v2686_v47  ;;  %v6392_v15 = vpop.f32.mrb[111].mxu0 }
 0xebc   : > { %v8639_v41 = vadd.f32 %v2710_v11, %v8191_v5  ;;  %v2711_v59 = vadd.f32 %v2687_v45, %v8495_v31 }
 0xebe   : > { %v8643_v63 = vadd.f32 %v2711_v59, %v8195_v34  ;;  %v2741_v35 = vsel %vm411_vm2, %v8639_v41, 0.0 }
 0xebf   : > { %2742 = vadd.xlane.f32.xlu1 %v2741_v35  ;;  %v2691_v16 = vpop.f32.mrb[112].mxu0 }
 0xec0   : > { %v2692_v33 = vadd.f32 %v5668_v43, %v2691_v16  ;;  %v6395_v36 = vpop.f32.mrb[113].mxu0  ;;  %v2744_v14 = vsel %vm411_vm2, %v8643_v63, 0.0 }
 0xec1   : > { %2745 = vadd.xlane.f32.xlu0 %v2744_v14  ;;  %v2694_v20 = vpop.f32.mrb[114].mxu0 }
 0xec2   : > { %v2712_v5 = vadd.f32 %v2692_v33, %v8502_v19  ;;  %v2695_v23 = vadd.f32 %v5668_v43, %v2694_v20  ;;  %v6396_v25 = vpop.f32.mrb[115].mxu0 }
 0xec4   : > { %v8651_v31 = vadd.f32 %v2712_v5, %v8203_v42  ;;  %v2713_v34 = vadd.f32 %v2695_v23, %v8504_v24 }
 0xec6   : > { %v8655_v12 = vadd.f32 %v2713_v34, %v8207_v54  ;;  %v2747_v2 = vsel %vm411_vm2, %v8651_v31, 0.0 }
 0xec7   : > { %2748 = vadd.xlane.f32.xlu1 %v2747_v2 }
 0xec8   : > { %v2750_v13 = vsel %vm411_vm2, %v8655_v12, 0.0 }
 0xec9   : > { %2751 = vadd.xlane.f32.xlu0 %v2750_v13 }
 0xed3   : > { %v2699_v57 = vpop.f32.mrb[116].mxu0 }
 0xed4   : > { %v2700_v19 = vadd.f32 %v5668_v43, %v2699_v57  ;;  %v6399_v50 = vpop.f32.mrb[117].mxu0 }
 0xed5   : > { %v2702_v7 = vpop.f32.mrb[118].mxu0 }
 0xed6   : > { %v2714_v42 = vadd.f32 %v2700_v19, %v8511_v28  ;;  %v2703_v61 = vadd.f32 %v5668_v43, %v2702_v7  ;;  %v6400_v18 = vpop.f32.mrb[119].mxu0  ;;  %v6828_v28 = vld [vmem:[%s9910_s4 + $0xa0] sm:$0xff]  }
 0xed7   : > { %6402 = vmatpush3.bf16.msra.mxu1 %v6828_v28 }
 0xed8   : > { %v8663_v24 = vadd.f32 %v2714_v42, %v8215_v37  ;;  %v2715_v54 = vadd.f32 %v2703_v61, %v8513_v0  ;;  %6403 = vmatprep.subr.bf16.mxu1 %v7270_v1 }
 0xeda   : > { %v8667_v39 = vadd.f32 %v2715_v54, %v8219_v9  ;;  %v2753_v21 = vsel %vm411_vm2, %v8663_v24, 0.0 }
 0xedb   : > { %2754 = vadd.xlane.f32.xlu1 %v2753_v21  ;;  %v6829_v21 = vld [vmem:[%s9910_s4 + $0xa8] sm:$0xff]  }
 0xedc   : > { %v2756_v40 = vsel %vm411_vm2, %v8667_v39, 0.0  ;;  %6404 = vmatpush3.bf16.msra.mxu1 %v6829_v21 }
 0xedd   : > { %2757 = vadd.xlane.f32.xlu0 %v2756_v40  ;;  %6455 = vmatprep.subr.bf16.mxu1 %v7270_v1 }
 0xf3c   : > { %v2731_v37 = vpop.xlane.xlu1 %2730 }
 0xf3d   : > { %v2759_v0 = vmul.f32 0.03125, %v2731_v37 }
 0xf3e   : > { %v2734_v43 = vpop.xlane.xlu0 %2733 }
 0xf3f   : > { %v8678_v9 = vsub.f32 %v8615_v52, %v2759_v0  ;;  %v2760_v6 = vmul.f32 0.03125, %v2734_v43 }
 0xf41   : > { %v8681_v56 = vsub.f32 %v8619_v22, %v2760_v6  ;;  %v2779_v58 = vmul.f32 %v8678_v9, %v8678_v9 }
 0xf43   : > { %v2789_v27 = vsel %vm411_vm2, %v2779_v58, 0.0  ;;  %v2780_v44 = vmul.f32 %v8681_v56, %v8681_v56 }
 0xf44   : > { %v2737_v8 = vpop.xlane.xlu1 %2736  ;;  %2790 = vadd.xlane.f32.xlu1 %v2789_v27 }
 0xf45   : > { %v2761_v53 = vmul.f32 0.03125, %v2737_v8  ;;  %v2792_v29 = vsel %vm411_vm2, %v2780_v44, 0.0 }
 0xf46   : > { %v2740_v4 = vpop.xlane.xlu0 %2739  ;;  %2793 = vadd.xlane.f32.xlu0 %v2792_v29 }
 0xf47   : > { %v8690_v30 = vsub.f32 %v8627_v51, %v2761_v53  ;;  %v2762_v32 = vmul.f32 0.03125, %v2740_v4 }
 0xf49   : > { %v8693_v62 = vsub.f32 %v8631_v17, %v2762_v32  ;;  %v2781_v46 = vmul.f32 %v8690_v30, %v8690_v30 }
 0xf4b   : > { %v2795_v26 = vsel %vm411_vm2, %v2781_v46, 0.0  ;;  %v2782_v60 = vmul.f32 %v8693_v62, %v8693_v62 }
 0xf4c   : > { %v2743_v10 = vpop.xlane.xlu1 %2742  ;;  %2796 = vadd.xlane.f32.xlu1 %v2795_v26 }
 0xf4d   : > { %v2763_v47 = vmul.f32 0.03125, %v2743_v10  ;;  %v2798_v11 = vsel %vm411_vm2, %v2782_v60, 0.0 }
 0xf4e   : > { %v2746_v45 = vpop.xlane.xlu0 %2745  ;;  %2799 = vadd.xlane.f32.xlu0 %v2798_v11 }
 0xf4f   : > { %v8702_v15 = vsub.f32 %v8639_v41, %v2763_v47  ;;  %v2764_v59 = vmul.f32 0.03125, %v2746_v45  ;;  %v8744_v47 = vld [vmem:[%s9911_s5 + $0x10] ss:$0 sm:$0xff] }
 0xf51   : > { %v8705_v35 = vsub.f32 %v8643_v63, %v2764_v59  ;;  %v2783_v16 = vmul.f32 %v8702_v15, %v8702_v15 }
 0xf53   : > { %v2801_v33 = vsel %vm411_vm2, %v2783_v16, 0.0  ;;  %v2784_v36 = vmul.f32 %v8705_v35, %v8705_v35 }
 0xf54   : > { %v2749_v14 = vpop.xlane.xlu1 %2748  ;;  %2802 = vadd.xlane.f32.xlu1 %v2801_v33 }
 0xf55   : > { %v2765_v20 = vmul.f32 0.03125, %v2749_v14  ;;  %v2804_v5 = vsel %vm411_vm2, %v2784_v36, 0.0 }
 0xf56   : > { %v2752_v23 = vpop.xlane.xlu0 %2751  ;;  %2805 = vadd.xlane.f32.xlu0 %v2804_v5 }
 0xf57   : > { %v8714_v25 = vsub.f32 %v8651_v31, %v2765_v20  ;;  %v2766_v34 = vmul.f32 0.03125, %v2752_v23  ;;  %v8752_v20 = vld [vmem:[%s9911_s5 + $0x11] ss:$0 sm:$0xff] }
 0xf59   : > { %v8717_v2 = vsub.f32 %v8655_v12, %v2766_v34  ;;  %v2785_v13 = vmul.f32 %v8714_v25, %v8714_v25 }
 0xf5b   : > { %v2807_v57 = vsel %vm411_vm2, %v2785_v13, 0.0  ;;  %v2786_v19 = vmul.f32 %v8717_v2, %v8717_v2 }
 0xf5c   : > { %2808 = vadd.xlane.f32.xlu1 %v2807_v57 }
 0xf5d   : > { %v2810_v50 = vsel %vm411_vm2, %v2786_v19, 0.0 }
 0xf5e   : > { %2811 = vadd.xlane.f32.xlu0 %v2810_v50 }
 0xf68   : > { %v2755_v7 = vpop.xlane.xlu1 %2754 }
 0xf69   : > { %v2767_v42 = vmul.f32 0.03125, %v2755_v7 }
 0xf6a   : > { %v2758_v61 = vpop.xlane.xlu0 %2757 }
 0xf6b   : > { %v8726_v18 = vsub.f32 %v8663_v24, %v2767_v42  ;;  %v2768_v54 = vmul.f32 0.03125, %v2758_v61 }
 0xf6d   : > { %v8732_v40 = vsub.f32 %v8667_v39, %v2768_v54  ;;  %v2787_v28 = vmul.f32 %v8726_v18, %v8726_v18 }
 0xf6f   : > { %v2813_v37 = vsel %vm411_vm2, %v2787_v28, 0.0  ;;  %v2788_v0 = vmul.f32 %v8732_v40, %v8732_v40 }
 0xf70   : > { %2814 = vadd.xlane.f32.xlu1 %v2813_v37 }
 0xf71   : > { %v2816_v43 = vsel %vm411_vm2, %v2788_v0, 0.0 }
 0xf72   : > { %2817 = vadd.xlane.f32.xlu0 %v2816_v43 }
 0xfd1   : > { %v2791_v6 = vpop.xlane.xlu1 %2790 }
 0xfd2   : > { %v2819_v58 = vmul.f32 0.03125, %v2791_v6 }
 0xfd3   : > { %v2794_v27 = vpop.xlane.xlu0 %2793 }
 0xfd4   : > { %v2829_v44 = vadd.f32 1e-06, %v2819_v58  ;;  %v2820_v8 = vmul.f32 0.03125, %v2794_v27 }
 0xfd6   : > { %7034 = vrsqrt.f32 %v2829_v44  ;;  %v2830_v53 = vadd.f32 1e-06, %v2820_v8 }
 0xfd8   : > { %7036 = vrsqrt.f32 %v2830_v53 }
 0xfd9   : > { %v2797_v29 = vpop.xlane.xlu1 %2796 }
 0xfda   : > { %v2821_v4 = vmul.f32 0.03125, %v2797_v29 }
 0xfdb   : > { %v2800_v32 = vpop.xlane.xlu0 %2799 }
 0xfdc   : > { %v2831_v46 = vadd.f32 1e-06, %v2821_v4  ;;  %v2822_v26 = vmul.f32 0.03125, %v2800_v32 }
 0xfde   : > { %7038 = vrsqrt.f32 %v2831_v46  ;;  %v2832_v60 = vadd.f32 1e-06, %v2822_v26 }
 0xfe0   : > { %v7035_v10 = vpop.eup %7034  ;;  %7040 = vrsqrt.f32 %v2832_v60 }
 0xfe1   : > { %v2849_v11 = vmul.f32 %v7035_v10, %v8678_v9  ;;  %v2803_v45 = vpop.xlane.xlu1 %2802 }
 0xfe2   : > { %v7037_v59 = vpop.eup %7036  ;;  %v2823_v16 = vmul.f32 0.03125, %v2803_v45 }
 0xfe3   : > { %v2863_v33 = vmul.f32 %v8744_v47, %v2849_v11  ;;  %v2850_v36 = vmul.f32 %v7037_v59, %v8681_v56  ;;  %v2806_v14 = vpop.xlane.xlu0 %2805 }
 0xfe4   : > { %v2833_v5 = vadd.f32 1e-06, %v2823_v16  ;;  %v2824_v23 = vmul.f32 0.03125, %v2806_v14 }
 0xfe5   : > { %v2864_v34 = vmul.f32 %v8744_v47, %v2850_v36  ;;  %v2877_v9 = vadd.f32 %v8752_v20, %v2863_v33 }
 0xfe6   : > { %7042 = vrsqrt.f32 %v2833_v5  ;;  %v2834_v13 = vadd.f32 1e-06, %v2824_v23 }
 0xfe7   : > { %v2878_v57 = vadd.f32 %v8752_v20, %v2864_v34 }
 0xfe8   : > { %v7039_v19 = vpop.eup %7038  ;;  %7044 = vrsqrt.f32 %v2834_v13 }
 0xfe9   : > { %v2809_v50 = vpop.xlane.xlu1 %2808  ;;  %v2892_v56 = vpack.c.bf16 %v2878_v57, %v2877_v9  ;;  %v2851_v7 = vmul.f32 %v7039_v19, %v8690_v30 }
 0xfea   : > { %v7041_v42 = vpop.eup %7040  ;;  %v2825_v61 = vmul.f32 0.03125, %v2809_v50 }
 0xfeb   : > { %v2852_v54 = vmul.f32 %v7041_v42, %v8693_v62  ;;  %6406 = vmatmul.mubr.msk.bf16.vlgmr.msra.gmra.mrb[120].mxu1 %vm411_vm2, %v2892_v56  ;;  %v2812_v21 = vpop.xlane.xlu0 %2811  ;;  %v2865_v28 = vmul.f32 %v8744_v47, %v2851_v7 }
 0xfec   : > { %v2835_v37 = vadd.f32 1e-06, %v2825_v61  ;;  %v2826_v0 = vmul.f32 0.03125, %v2812_v21  ;;  %6409 = vmatprep.mubr.msk.bf16.mxu1 %vm7271_vm0, %v7270_v1 }
 0xfed   : > { %v2866_v43 = vmul.f32 %v8744_v47, %v2852_v54  ;;  %v2879_v30 = vadd.f32 %v8752_v20, %v2865_v28 }
 0xfee   : > { %7046 = vrsqrt.f32 %v2835_v37  ;;  %v2836_v6 = vadd.f32 1e-06, %v2826_v0 }
 0xfef   : > { %v2880_v58 = vadd.f32 %v8752_v20, %v2866_v43 }
 0xff0   : > { %v7043_v27 = vpop.eup %7042  ;;  %7048 = vrsqrt.f32 %v2836_v6 }
 0xff1   : > { %v2893_v62 = vpack.c.bf16 %v2880_v58, %v2879_v30  ;;  %v2853_v44 = vmul.f32 %v7043_v27, %v8702_v15 }
 0xff2   : > { %v7045_v8 = vpop.eup %7044 }
 0xff3   : > { %v2854_v53 = vmul.f32 %v7045_v8, %v8705_v35  ;;  %6410 = vmatmul.mubr.msk.bf16.gmra.mrb[124].mxu1 %vm411_vm2, %v2893_v62  ;;  %v2867_v29 = vmul.f32 %v8744_v47, %v2853_v44 }
 0xff4   : > { %6413 = vmatprep.mubr.msk.bf16.mxu1 %vm7271_vm0, %v7270_v1 }
 0xff5   : > { %v2868_v4 = vmul.f32 %v8744_v47, %v2854_v53  ;;  %v2881_v32 = vadd.f32 %v8752_v20, %v2867_v29 }
 0xff7   : > { %v2882_v46 = vadd.f32 %v8752_v20, %v2868_v4 }
 0xff8   : > { %v7047_v26 = vpop.eup %7046 }
 0xff9   : > { %v2894_v60 = vpack.c.bf16 %v2882_v46, %v2881_v32  ;;  %v2855_v15 = vmul.f32 %v7047_v26, %v8714_v25 }
 0xffa   : > { %v7049_v10 = vpop.eup %7048 }
 0xffb   : > { %v2856_v35 = vmul.f32 %v7049_v10, %v8717_v2  ;;  %6414 = vmatmul.mubr.msk.bf16.gmra.mrb[128].mxu1 %vm411_vm2, %v2894_v60  ;;  %v2869_v11 = vmul.f32 %v8744_v47, %v2855_v15 }
 0xffc   : > { %6417 = vmatprep.mubr.msk.bf16.mxu1 %vm7271_vm0, %v7270_v1 }
 0xffd   : > { %v2815_v45 = vpop.xlane.xlu1 %2814  ;;  %v2870_v59 = vmul.f32 %v8744_v47, %v2856_v35  ;;  %v2883_v36 = vadd.f32 %v8752_v20, %v2869_v11 }
 0xffe   : > { %v2827_v16 = vmul.f32 0.03125, %v2815_v45 }
 0xfff   : > { %v2818_v33 = vpop.xlane.xlu0 %2817  ;;  %v2884_v14 = vadd.f32 %v8752_v20, %v2870_v59 }
0x1000   : > { %v2837_v25 = vadd.f32 1e-06, %v2827_v16  ;;  %v2828_v5 = vmul.f32 0.03125, %v2818_v33 }
0x1001   : > { %v2895_v23 = vpack.c.bf16 %v2884_v14, %v2883_v36 }
0x1002   : > { %7050 = vrsqrt.f32 %v2837_v25  ;;  %v2838_v2 = vadd.f32 1e-06, %v2828_v5 }
0x1003   : > { %6418 = vmatmul.mubr.msk.bf16.gmra.mrb[132].mxu1 %vm411_vm2, %v2895_v23 }
0x1004   : > { %7052 = vrsqrt.f32 %v2838_v2  ;;  %6421 = vmatprep.mubr.msk.bf16.mxu1 %vm7271_vm0, %v7270_v1 }
0x100c   : > { %v7051_v34 = vpop.eup %7050 }
0x100d   : > { %v2857_v13 = vmul.f32 %v7051_v34, %v8726_v18  ;;  %v8799_v18 = vld [vmem:[%s9911_s5 + $0x12] ss:$0 sm:$0xff] }
0x100e   : > { %v7053_v9 = vpop.eup %7052 }
0x100f   : > { %v2858_v57 = vmul.f32 %v7053_v9, %v8732_v40  ;;  %v2871_v19 = vmul.f32 %v8744_v47, %v2857_v13 }
0x1011   : > { %v2872_v50 = vmul.f32 %v8744_v47, %v2858_v57  ;;  %v2885_v56 = vadd.f32 %v8752_v20, %v2871_v19 }
0x1013   : > { %v2886_v7 = vadd.f32 %v8752_v20, %v2872_v50 }
0x1015   : > { %v2896_v42 = vpack.c.bf16 %v2886_v7, %v2885_v56 }
0x1017   : > { %6422 = vmatmul.mubr.msk.bf16.gmra.mrb[136].mxu1 %vm411_vm2, %v2896_v42 }
0x1018   : > { %6465 = vmatprep.mubr.msk.bf16.mxu1 %vm7271_vm0, %v7270_v1 }
0x10be   : > { %v2963_v40 = vpop.f32.mrb[120].mxu1 }
0x10bf   : > { %v2964_v61 = vadd.f32 %v8799_v18, %v2963_v40  ;;  %v6407_v54 = vpop.f32.mrb[121].mxu1 }
0x10c0   : > { %v2966_v47 = vpop.f32.mrb[122].mxu1 }
0x10c1   : > { %v2967_v21 = vadd.f32 %v8799_v18, %v2966_v47  ;;  %v6408_v28 = vpop.f32.mrb[123].mxu1  ;;  %v8804_v20 = vmul.f32 %v2964_v61, %v7614_v49  ;;  %v8807_v37 = vmul.f32 %v2964_v61, %v7609_v48  ;;  %v8810_v0 = vmul.f32 %v7595_v38, %v2964_v61 }
0x10c2   : > { %v8822_v27 = vmul.f32 %v7773_v55, %v2964_v61 }
0x10c3   : > { %v8813_v43 = vmul.f32 %v2967_v21, %v7614_v49  ;;  %v8816_v6 = vmul.f32 %v2967_v21, %v7609_v48  ;;  %v3002_v30 = vpack.c.bf16 %v2967_v21, %v2964_v61  ;;  %v8819_v58 = vmul.f32 %v7595_v38, %v2967_v21 }
0x10c4   : > { %v8825_v62 = vmul.f32 %v7773_v55, %v2967_v21 }
0x10c5   : > { %v3017_v44 = vpack.c.bf16 %v8813_v43, %v8804_v20  ;;  %v3280_v8 = vpack.c.bf16 %v8816_v6, %v8807_v37  ;;  %3027 = vrot.lane.b32.xlu1 %v3002_v30, %s7272_s18  ;;  %v3493_v53 = vpack.c.bf16 %v8819_v58, %v8810_v0 }
0x10c6   : > { %v2971_v29 = vpop.f32.mrb[124].mxu1 }
0x10c7   : > { %v2972_v32 = vadd.f32 %v8799_v18, %v2971_v29  ;;  %v6411_v46 = vpop.f32.mrb[125].mxu1 }
0x10c8   : > { %v2974_v26 = vpop.f32.mrb[126].mxu1 }
0x10c9   : > { %v2975_v60 = vadd.f32 %v8799_v18, %v2974_v26  ;;  %v6412_v15 = vpop.f32.mrb[127].mxu1  ;;  %v3485_v10 = vmul.f32 %v7595_v38, %v2972_v32  ;;  %v8840_v35 = vmul.f32 %v2972_v32, %v7614_v49  ;;  %v8843_v11 = vmul.f32 %v2972_v32, %v7609_v48 }
0x10ca   : > { %v8853_v36 = vmul.f32 %v7773_v55, %v2972_v32 }
0x10cb   : > { %v3003_v45 = vpack.c.bf16 %v2975_v60, %v2972_v32  ;;  %v3486_v59 = vmul.f32 %v7595_v38, %v2975_v60  ;;  %v8847_v16 = vmul.f32 %v2975_v60, %v7614_v49  ;;  %v8850_v33 = vmul.f32 %v2975_v60, %v7609_v48 }
0x10cc   : > { %v8856_v14 = vmul.f32 %v7773_v55, %v2975_v60 }
0x10cd   : > { %3029 = vrot.lane.b32.xlu0 %v3003_v45, %s7272_s18  ;;  %v3494_v25 = vpack.c.bf16 %v3486_v59, %v3485_v10  ;;  %v3018_v5 = vpack.c.bf16 %v8847_v16, %v8840_v35  ;;  %v3281_v23 = vpack.c.bf16 %v8850_v33, %v8843_v11 }
0x10ce   : > { %v2979_v2 = vpop.f32.mrb[128].mxu1 }
0x10cf   : > { %v2980_v13 = vadd.f32 %v8799_v18, %v2979_v2  ;;  %v6415_v9 = vpop.f32.mrb[129].mxu1 }
0x10d0   : > { %v2982_v57 = vpop.f32.mrb[130].mxu1 }
0x10d1   : > { %v2983_v19 = vadd.f32 %v8799_v18, %v2982_v57  ;;  %v6416_v50 = vpop.f32.mrb[131].mxu1  ;;  %v3487_v56 = vmul.f32 %v7595_v38, %v2980_v13  ;;  %v8869_v7 = vmul.f32 %v2980_v13, %v7614_v49  ;;  %v8872_v42 = vmul.f32 %v2980_v13, %v7609_v48 }
0x10d2   : > { %v8882_v21 = vmul.f32 %v7773_v55, %v2980_v13 }
0x10d3   : > { %v3004_v40 = vpack.c.bf16 %v2983_v19, %v2980_v13  ;;  %v3488_v61 = vmul.f32 %v7595_v38, %v2983_v19  ;;  %v8876_v54 = vmul.f32 %v2983_v19, %v7614_v49  ;;  %v8879_v47 = vmul.f32 %v2983_v19, %v7609_v48 }
0x10d4   : > { %v8885_v28 = vmul.f32 %v7773_v55, %v2983_v19 }
0x10d5   : > { %3031 = vrot.lane.b32.xlu1 %v3004_v40, %s7272_s18  ;;  %v3495_v30 = vpack.c.bf16 %v3488_v61, %v3487_v56  ;;  %v3019_v29 = vpack.c.bf16 %v8876_v54, %v8869_v7  ;;  %v3282_v32 = vpack.c.bf16 %v8879_v47, %v8872_v42 }
0x10d6   : > { %v2987_v46 = vpop.f32.mrb[132].mxu1 }
0x10d7   : > { %v2988_v60 = vadd.f32 %v8799_v18, %v2987_v46  ;;  %v6419_v15 = vpop.f32.mrb[133].mxu1 }
0x10d8   : > { %v2990_v10 = vpop.f32.mrb[134].mxu1 }
0x10d9   : > { %v2991_v45 = vadd.f32 %v8799_v18, %v2990_v10  ;;  %v6420_v59 = vpop.f32.mrb[135].mxu1  ;;  %v3489_v2 = vmul.f32 %v7595_v38, %v2988_v60  ;;  %v8898_v13 = vmul.f32 %v2988_v60, %v7614_v49  ;;  %v8901_v9 = vmul.f32 %v2988_v60, %v7609_v48 }
0x10da   : > { %v8911_v40 = vmul.f32 %v7773_v55, %v2988_v60 }
0x10db   : > { %v3005_v57 = vpack.c.bf16 %v2991_v45, %v2988_v60  ;;  %v3490_v19 = vmul.f32 %v7595_v38, %v2991_v45  ;;  %v8905_v50 = vmul.f32 %v2991_v45, %v7614_v49  ;;  %v8908_v56 = vmul.f32 %v2991_v45, %v7609_v48 }
0x10dc   : > { %v8914_v61 = vmul.f32 %v7773_v55, %v2991_v45 }
0x10dd   : > { %3033 = vrot.lane.b32.xlu1 %v3005_v57, %s7272_s18  ;;  %v3496_v46 = vpack.c.bf16 %v3490_v19, %v3489_v2  ;;  %v3020_v15 = vpack.c.bf16 %v8905_v50, %v8898_v13  ;;  %v9915_v6 = vpack.c.bf16 %v8908_v56, %v8901_v9 }
0x10e1   : > { %3510 = vrot.lane.b32.xlu1 %v3494_v25, %s7273_s19 }
0x10e5   : > { %3514 = vrot.lane.b32.xlu1 %v3496_v46, %s7273_s19 }
0x10ea   : > { %v2995_v60 = vpop.f32.mrb[136].mxu1 }
0x10eb   : > { %v2996_v45 = vadd.f32 %v8799_v18, %v2995_v60  ;;  %v6423_v26 = vpop.f32.mrb[137].mxu1 }
0x10ec   : > { %v2998_v34 = vpop.f32.mrb[138].mxu1 }
0x10ed   : > { %v2999_v2 = vadd.f32 %v8799_v18, %v2998_v34  ;;  %v6424_v57 = vpop.f32.mrb[139].mxu1  ;;  %v3491_v19 = vmul.f32 %v7595_v38, %v2996_v45  ;;  %v8929_v4 = vmul.f32 %v2996_v45, %v7614_v49  ;;  %v8932_v10 = vmul.f32 %v2996_v45, %v7609_v48 }
0x10ee   : > { %v8942_v18 = vmul.f32 %v7773_v55, %v2996_v45 }
0x10ef   : > { %v3006_v59 = vpack.c.bf16 %v2999_v2, %v2996_v45  ;;  %v3492_v25 = vmul.f32 %v7595_v38, %v2999_v2  ;;  %v8936_v46 = vmul.f32 %v2999_v2, %v7614_v49  ;;  %v8939_v26 = vmul.f32 %v2999_v2, %v7609_v48 }
0x10f0   : > { %v8945_v34 = vmul.f32 %v7773_v55, %v2999_v2 }
0x10f1   : > { %3035 = vrot.lane.b32.xlu0 %v3006_v59, %s7272_s18  ;;  %v3497_v60 = vpack.c.bf16 %v3492_v25, %v3491_v19  ;;  %v3021_v57 = vpack.c.bf16 %v8936_v46, %v8929_v4  ;;  %v3284_v38 = vpack.c.bf16 %v8939_v26, %v8932_v10 }
0x10f2   : > { %v3264_v49 = vpack.c.bf16 %v8945_v34, %v8942_v18 }
0x10f5   : > { %3508 = vrot.lane.b32.xlu0 %v3493_v53, %s7273_s19 }
0x10f9   : > { %3512 = vrot.lane.b32.xlu0 %v3495_v30, %s7273_s19 }
0x10fd   : > { %3516 = vrot.lane.b32.xlu0 %v3497_v60, %s7273_s19 }
0x1137   : > { %v3028_v48 = vpop.permute.xlu1 %3027 }
0x1138   : > { %v3053_v55 = vsel %vm411_vm2, %v3028_v48, 0 }
0x1139   : > { %6426 = vmatpush3.bf16.xpose.msra.mxu0 %v3053_v55  ;;  %6456 = vmatpush3.bf16.xpose.msra.mxu1 %v3053_v55 }
0x113a   : > { %6427 = vmatprep.subr.bf16.mxu0 %v7270_v1  ;;  %6457 = vmatprep.subr.bf16.mxu1 %v7270_v1 }
0x113f   : > { %v3030_v59 = vpop.permute.xlu0 %3029 }
0x1140   : > { %v3056_v45 = vsel %vm411_vm2, %v3030_v59, 0 }
0x1141   : > { %6428 = vmatpush3.bf16.xpose.msra.mxu0 %v3056_v45  ;;  %6458 = vmatpush3.bf16.xpose.msra.mxu1 %v3056_v45 }
0x1142   : > { %6429 = vmatprep.subr.bf16.mxu0 %v7270_v1  ;;  %6459 = vmatprep.subr.bf16.mxu1 %v7270_v1 }
0x1147   : > { %v3032_v0 = vpop.permute.xlu1 %3031 }
0x1148   : > { %v3059_v58 = vsel %vm411_vm2, %v3032_v0, 0 }
0x1149   : > { %6430 = vmatpush3.bf16.xpose.msra.mxu0 %v3059_v58  ;;  %6460 = vmatpush3.bf16.xpose.msra.mxu1 %v3059_v58 }
0x114a   : > { %6431 = vmatprep.subr.bf16.mxu0 %v7270_v1  ;;  %6461 = vmatprep.subr.bf16.mxu1 %v7270_v1 }
0x114f   : > { %v3034_v53 = vpop.permute.xlu1 %3033 }
0x1150   : > { %v3062_v30 = vsel %vm411_vm2, %v3034_v53, 0 }
0x1151   : > { %6432 = vmatpush3.bf16.xpose.msra.mxu0 %v3062_v30  ;;  %6462 = vmatpush3.bf16.xpose.msra.mxu1 %v3062_v30 }
0x1152   : > { %6433 = vmatprep.subr.bf16.mxu0 %v7270_v1  ;;  %6463 = vmatprep.subr.bf16.mxu1 %v7270_v1 }
0x1153   : > { %v3511_v60 = vpop.permute.xlu1 %3510 }
0x1157   : > { %v3515_v37 = vpop.permute.xlu1 %3514 }
0x1163   : > { %v3036_v2 = vpop.permute.xlu0 %3035 }
0x1164   : > { %v3065_v19 = vsel %vm411_vm2, %v3036_v2, 0 }
0x1165   : > { %6434 = vmatpush3.bf16.xpose.msra.mxu0 %v3065_v19  ;;  %6464 = vmatpush3.bf16.xpose.msra.mxu1 %v3065_v19 }
0x1166   : > { %6485 = vmatprep.subr.bf16.mxu0 %v7270_v1  ;;  %6545 = vmatprep.subr.bf16.mxu1 %v7270_v1 }
0x1167   : > { %v3509_v25 = vpop.permute.xlu0 %3508 }
0x116b   : > { %v3513_v20 = vpop.permute.xlu0 %3512 }
0x116c   : > { %6436 = vmatmul.mubr.msk.bf16.vlgmr.msra.gmra.mrb[120].mxu0 %vm411_vm2, %v3017_v44  ;;  %6466 = vmatmul.mubr.msk.bf16.vlgmr.msra.gmra.mrb[140].mxu1 %vm411_vm2, %v3280_v8 }
0x116d   : > { %6486 = vmatpush3.bf16.msra.mxu0 %v3509_v25  ;;  %6439 = vmatprep.mubr.msk.bf16.mxu0 %vm7271_vm0, %v7270_v1 }
0x116e   : > { %6487 = vmatprep.subr.bf16.mxu0 %v7270_v1  ;;  %6469 = vmatprep.mubr.msk.bf16.mxu1 %vm7271_vm0, %v7270_v1 }
0x116f   : > { %v3517_v43 = vpop.permute.xlu0 %3516 }
0x1171   : > { %6488 = vmatpush3.bf16.msra.mxu0 %v3511_v60 }
0x1172   : > { %6489 = vmatprep.subr.bf16.mxu0 %v7270_v1 }
0x1174   : > { %6440 = vmatmul.mubr.msk.bf16.gmra.mrb[124].mxu0 %vm411_vm2, %v3018_v5  ;;  %6470 = vmatmul.mubr.msk.bf16.gmra.mrb[144].mxu1 %vm411_vm2, %v3281_v23 }
0x1175   : > { %6490 = vmatpush3.bf16.msra.mxu0 %v3513_v20  ;;  %6443 = vmatprep.mubr.msk.bf16.mxu0 %vm7271_vm0, %v7270_v1 }
0x1176   : > { %6491 = vmatprep.subr.bf16.mxu0 %v7270_v1  ;;  %6473 = vmatprep.mubr.msk.bf16.mxu1 %vm7271_vm0, %v7270_v1 }
0x1179   : > { %6492 = vmatpush3.bf16.msra.mxu0 %v3515_v37 }
0x117a   : > { %6493 = vmatprep.subr.bf16.mxu0 %v7270_v1 }
0x117c   : > { %6444 = vmatmul.mubr.msk.bf16.gmra.mrb[128].mxu0 %vm411_vm2, %v3019_v29  ;;  %6474 = vmatmul.mubr.msk.bf16.gmra.mrb[148].mxu1 %vm411_vm2, %v3282_v32 }
0x117d   : > { %6494 = vmatpush3.bf16.msra.mxu0 %v3517_v43  ;;  %6447 = vmatprep.mubr.msk.bf16.mxu0 %vm7271_vm0, %v7270_v1 }
0x117e   : > { %6477 = vmatprep.mubr.msk.bf16.mxu1 %vm7271_vm0, %v7270_v1  ;;  %6515 = vmatprep.subr.bf16.mxu0 %v7270_v1 }
0x1184   : > { %6448 = vmatmul.mubr.msk.bf16.gmra.mrb[132].mxu0 %vm411_vm2, %v3020_v15  ;;  %6478 = vmatmul.mubr.msk.bf16.gmra.mrb[152].mxu1 %vm411_vm2, %v9915_v6 }
0x1185   : > { %6451 = vmatprep.mubr.msk.bf16.mxu0 %vm7271_vm0, %v7270_v1  ;;  %6481 = vmatprep.mubr.msk.bf16.mxu1 %vm7271_vm0, %v7270_v1 }
0x118c   : > { %6452 = vmatmul.mubr.msk.bf16.gmra.mrb[136].mxu0 %vm411_vm2, %v3021_v57  ;;  %6482 = vmatmul.mubr.msk.bf16.gmra.mrb[156].mxu1 %vm411_vm2, %v3284_v38 }
0x118d   : > { %6495 = vmatprep.mubr.msk.bf16.mxu0 %vm7271_vm0, %v7270_v1  ;;  %6549 = vmatprep.mubr.msk.bf16.mxu1 %vm7271_vm0, %v7270_v1 }
0x123f   : > { %v9040_v44 = vpop.f32.mrb[120].mxu0  ;;  %v9042_v8 = vpop.f32.mrb[140].mxu1 }
0x1240   : > { %v6437_v35 = vpop.f32.mrb[121].mxu0  ;;  %v6467_v11 = vpop.f32.mrb[141].mxu1  ;;  %v3373_v4 = vsel %vm823_vm7, %v9042_v8, -inf  ;;  %v3140_v16 = vsel %vm823_vm7, %v9040_v44, -inf }
0x1241   : > { %3374 = vmax.xlane.f32.xlu1 %v3373_v4  ;;  %v9048_v33 = vpop.f32.mrb[142].mxu1  ;;  %3141 = vmax.xlane.f32.xlu0 %v3140_v16  ;;  %v9050_v5 = vpop.f32.mrb[122].mxu0  ;;  %v9916_v35 = vpack.c.bf16 %v8825_v62, %v8822_v27  ;;  %v9917_v62 = vpack.c.bf16 %v8856_v14, %v8853_v36 }
0x1242   : > { %v6438_v23 = vpop.f32.mrb[123].mxu0  ;;  %v6468_v7 = vpop.f32.mrb[143].mxu1  ;;  %v3376_v42 = vsel %vm823_vm7, %v9048_v33, -inf  ;;  %v3143_v54 = vsel %vm823_vm7, %v9050_v5, -inf }
0x1245   : > { %3377 = vmax.xlane.f32.xlu0 %v3376_v42  ;;  %3144 = vmax.xlane.f32.xlu1 %v3143_v54 }
0x1247   : > { %v9056_v47 = vpop.f32.mrb[124].mxu0  ;;  %v9058_v29 = vpop.f32.mrb[144].mxu1 }
0x1248   : > { %v6441_v32 = vpop.f32.mrb[125].mxu0  ;;  %v6471_v13 = vpop.f32.mrb[145].mxu1 }
0x1249   : > { %v9060_v9 = vpop.f32.mrb[126].mxu0  ;;  %v9062_v50 = vpop.f32.mrb[146].mxu1 }
0x124a   : > { %v6442_v56 = vpop.f32.mrb[127].mxu0  ;;  %v6472_v15 = vpop.f32.mrb[147].mxu1  ;;  %v3382_v10 = vsel %vm823_vm7, %v9062_v50, -inf  ;;  %v3149_v46 = vsel %vm823_vm7, %v9060_v9, -inf }
0x124b   : > { %3383 = vmax.xlane.f32.xlu1 %v3382_v10  ;;  %v3379_v56 = vsel %vm823_vm7, %v9058_v29, -inf  ;;  %v3146_v15 = vsel %vm823_vm7, %v9056_v47, -inf }
0x124f   : > { %v9068_v26 = vpop.f32.mrb[148].mxu1  ;;  %3150 = vmax.xlane.f32.xlu1 %v3149_v46  ;;  %v9070_v57 = vpop.f32.mrb[128].mxu0 }
0x1250   : > { %v6445_v38 = vpop.f32.mrb[129].mxu0  ;;  %v6475_v48 = vpop.f32.mrb[149].mxu1  ;;  %v3385_v10 = vsel %vm823_vm7, %v9068_v26, -inf  ;;  %v3152_v46 = vsel %vm823_vm7, %v9070_v57, -inf }
0x1251   : > { %v9072_v55 = vpop.f32.mrb[130].mxu0  ;;  %v9074_v59 = vpop.f32.mrb[150].mxu1 }
0x1252   : > { %v6446_v45 = vpop.f32.mrb[131].mxu0  ;;  %v6476_v0 = vpop.f32.mrb[151].mxu1  ;;  %v3388_v58 = vsel %vm823_vm7, %v9074_v59, -inf  ;;  %v3155_v53 = vsel %vm823_vm7, %v9072_v55, -inf }
0x1253   : > { %3389 = vmax.xlane.f32.xlu1 %v3388_v58  ;;  %v9918_v0 = vpack.c.bf16 %v8885_v28, %v8882_v21 }
0x1257   : > { %v9080_v30 = vpop.f32.mrb[152].mxu1  ;;  %3156 = vmax.xlane.f32.xlu1 %v3155_v53  ;;  %v9082_v2 = vpop.f32.mrb[132].mxu0 }
0x1258   : > { %v6449_v19 = vpop.f32.mrb[133].mxu0  ;;  %v6479_v25 = vpop.f32.mrb[153].mxu1  ;;  %v3391_v36 = vsel %vm823_vm7, %v9080_v30, -inf  ;;  %v3158_v14 = vsel %vm823_vm7, %v9082_v2, -inf }
0x1259   : > { %v9084_v60 = vpop.f32.mrb[134].mxu0  ;;  %v9086_v20 = vpop.f32.mrb[154].mxu1 }
0x125a   : > { %v6450_v37 = vpop.f32.mrb[135].mxu0  ;;  %v6480_v43 = vpop.f32.mrb[155].mxu1  ;;  %v3394_v6 = vsel %vm823_vm7, %v9086_v20, -inf  ;;  %v3161_v11 = vsel %vm823_vm7, %v9084_v60, -inf }
0x125b   : > { %3616 = vrot.lane.b32.xlu0 %v9916_v35, %s7273_s19  ;;  %3395 = vmax.xlane.f32.xlu1 %v3394_v6 }
0x125f   : > { %v9096_v4 = vpop.f32.mrb[156].mxu1  ;;  %3162 = vmax.xlane.f32.xlu1 %v3161_v11  ;;  %v9098_v16 = vpop.f32.mrb[136].mxu0 }
0x1260   : > { %v6453_v23 = vpop.f32.mrb[137].mxu0  ;;  %v6483_v7 = vpop.f32.mrb[157].mxu1  ;;  %v3397_v38 = vsel %vm823_vm7, %v9096_v4, -inf  ;;  %v3164_v48 = vsel %vm823_vm7, %v9098_v16, -inf }
0x1261   : > { %v9100_v42 = vpop.f32.mrb[138].mxu0  ;;  %v9102_v54 = vpop.f32.mrb[158].mxu1 }
0x1262   : > { %v6454_v32 = vpop.f32.mrb[139].mxu0  ;;  %v6484_v13 = vpop.f32.mrb[159].mxu1  ;;  %v3400_v27 = vsel %vm823_vm7, %v9102_v54, -inf  ;;  %v3167_v45 = vsel %vm823_vm7, %v9100_v42, -inf }
0x1263   : > { %3401 = vmax.xlane.f32.xlu1 %v3400_v27 }
0x1274   : > { %3618 = vrot.lane.b32.xlu1 %v9917_v62, %s7273_s19 }
0x127a   : > { %3380 = vmax.xlane.f32.xlu0 %v3379_v56 }
0x127e   : > { %3147 = vmax.xlane.f32.xlu0 %v3146_v15 }
0x1282   : > { %3386 = vmax.xlane.f32.xlu0 %v3385_v10 }
0x1286   : > { %3153 = vmax.xlane.f32.xlu0 %v3152_v46 }
0x128a   : > { %3392 = vmax.xlane.f32.xlu0 %v3391_v36 }
0x128e   : > { %3159 = vmax.xlane.f32.xlu0 %v3158_v14 }
0x1292   : > { %3398 = vmax.xlane.f32.xlu0 %v3397_v38 }
0x1296   : > { %3165 = vmax.xlane.f32.xlu0 %v3164_v48 }
0x1298   : > { %3168 = vmax.xlane.f32.xlu1 %v3167_v45 }
0x12ac   : > { %3620 = vrot.lane.b32.xlu0 %v9918_v0, %s7273_s19 }
0x12ce   : > { %v3375_v58 = vpop.xlane.xlu1 %3374  ;;  %v3142_v53 = vpop.xlane.xlu0 %3141 }
0x12cf   : > { %v3403_v19 = vsub.f32 %v9042_v8, %v3375_v58  ;;  %v3170_v25 = vsub.f32 %v9040_v44, %v3142_v53 }
0x12d1   : > { %v3413_v37 = vmul.f32 1.442695, %v3403_v19  ;;  %v3180_v43 = vmul.f32 1.442695, %v3170_v25 }
0x12d2   : > { %v3378_v6 = vpop.xlane.xlu0 %3377  ;;  %v3145_v35 = vpop.xlane.xlu1 %3144 }
0x12d3   : > { %7054 = vpow2.f32 %v3413_v37  ;;  %v3404_v11 = vsub.f32 %v9048_v33, %v3378_v6  ;;  %v3171_v23 = vsub.f32 %v9050_v5, %v3145_v35 }
0x12d4   : > { %7056 = vpow2.f32 %v3180_v43 }
0x12d5   : > { %v3415_v7 = vmul.f32 1.442695, %v3404_v11  ;;  %v3182_v32 = vmul.f32 1.442695, %v3171_v23 }
0x12d6   : > { %v9152_v15 = vpop.permute.xlu0 %3616 }
0x12d7   : > { %7058 = vpow2.f32 %v3415_v7 }
0x12d8   : > { %7060 = vpow2.f32 %v3182_v32  ;;  %v3384_v62 = vpop.xlane.xlu1 %3383 }
0x12d9   : > { %v3406_v14 = vsub.f32 %v9062_v50, %v3384_v62 }
0x12db   : > { %v3419_v58 = vmul.f32 1.442695, %v3406_v14 }
0x12dc   : > { %v3151_v56 = vpop.xlane.xlu1 %3150 }
0x12dd   : > { %v9136_v21 = vpop.eup %7054  ;;  %v3173_v53 = vsub.f32 %v9060_v9, %v3151_v56 }
0x12de   : > { %v9138_v28 = vpop.eup %7056  ;;  %v3433_v44 = vsel %vm823_vm7, %v9136_v21, 0.0 }
0x12df   : > { %3434 = vadd.xlane.f32.xlu0 %v3433_v44  ;;  %v3200_v8 = vsel %vm823_vm7, %v9138_v28, 0.0  ;;  %v3186_v43 = vmul.f32 1.442695, %v3173_v53 }
0x12e0   : > { %3201 = vadd.xlane.f32.xlu1 %v3200_v8  ;;  %v3390_v10 = vpop.xlane.xlu1 %3389 }
0x12e1   : > { %v9144_v33 = vpop.eup %7058  ;;  %v3408_v37 = vsub.f32 %v9074_v59, %v3390_v10 }
0x12e2   : > { %v3436_v5 = vsel %vm823_vm7, %v9144_v33, 0.0  ;;  %v9148_v13 = vpop.eup %7060 }
0x12e3   : > { %v3203_v27 = vsel %vm823_vm7, %v9148_v13, 0.0  ;;  %v3423_v11 = vmul.f32 1.442695, %v3408_v37 }
0x12e4   : > { %3437 = vadd.xlane.f32.xlu1 %v3436_v5  ;;  %v3157_v0 = vpop.xlane.xlu1 %3156 }
0x12e8   : > { %3204 = vadd.xlane.f32.xlu1 %v3203_v27  ;;  %v3396_v6 = vpop.xlane.xlu1 %3395 }
0x12e9   : > { %v3410_v9 = vsub.f32 %v9086_v20, %v3396_v6 }
0x12eb   : > { %v3427_v5 = vmul.f32 1.442695, %v3410_v9 }
0x12ec   : > { %v9167_v8 = vpop.xlane.xlu1 %3162 }
0x1307   : > { %v3381_v46 = vpop.xlane.xlu0 %3380 }
0x1308   : > { %v3405_v36 = vsub.f32 %v9058_v29, %v3381_v46 }
0x130a   : > { %v3417_v38 = vmul.f32 1.442695, %v3405_v36  ;;  %v3402_v36 = vpop.xlane.xlu1 %3401 }
0x130b   : > { %v3148_v48 = vpop.xlane.xlu0 %3147 }
0x130c   : > { %7062 = vpow2.f32 %v3417_v38  ;;  %v3172_v45 = vsub.f32 %v9056_v47, %v3148_v48  ;;  %v3175_v47 = vsub.f32 %v9072_v55, %v3157_v0 }
0x130e   : > { %v3184_v19 = vmul.f32 1.442695, %v3172_v45 }
0x130f   : > { %v3387_v25 = vpop.xlane.xlu0 %3386 }
0x1310   : > { %7064 = vpow2.f32 %v3184_v19  ;;  %v3407_v29 = vsub.f32 %v9068_v26, %v3387_v25  ;;  %v3190_v26 = vmul.f32 1.442695, %v3175_v47 }
0x1311   : > { %7066 = vpow2.f32 %v3419_v58 }
0x1312   : > { %7068 = vpow2.f32 %v3186_v43  ;;  %v3421_v7 = vmul.f32 1.442695, %v3407_v29 }
0x1313   : > { %v3154_v50 = vpop.xlane.xlu0 %3153 }
0x1314   : > { %v3174_v35 = vsub.f32 %v9070_v57, %v3154_v50 }
0x1316   : > { %v9162_v23 = vpop.eup %7062  ;;  %v3188_v32 = vmul.f32 1.442695, %v3174_v35 }
0x1317   : > { %v3393_v44 = vpop.xlane.xlu0 %3392  ;;  %v3439_v59 = vsel %vm823_vm7, %v9162_v23, 0.0 }
0x1318   : > { %7070 = vpow2.f32 %v3188_v32  ;;  %3440 = vadd.xlane.f32.xlu0 %v3439_v59  ;;  %v3409_v57 = vsub.f32 %v9080_v30, %v3393_v44 }
0x1319   : > { %7072 = vpow2.f32 %v3423_v11 }
0x131a   : > { %v9170_v55 = vpop.eup %7064  ;;  %7074 = vpow2.f32 %v3421_v7  ;;  %v3425_v10 = vmul.f32 1.442695, %v3409_v57  ;;  %v9919_v57 = vpack.c.bf16 %v8914_v61, %v8911_v40 }
0x131b   : > { %v3160_v27 = vpop.xlane.xlu0 %3159  ;;  %v3206_v20 = vsel %vm823_vm7, %v9170_v55, 0.0  ;;  %v9174_v62 = vpop.eup %7066  ;;  %7076 = vpow2.f32 %v3190_v26 }
0x131c   : > { %v3176_v56 = vsub.f32 %v9082_v2, %v3160_v27  ;;  %3207 = vadd.xlane.f32.xlu1 %v3206_v20  ;;  %7078 = vpow2.f32 %v3427_v5  ;;  %v3442_v30 = vsel %vm823_vm7, %v9174_v62, 0.0  ;;  %v9179_v38 = vpop.eup %7068  ;;  %v3412_v2 = vsub.f32 %v9102_v54, %v3402_v36  ;;  %v3619_v26 = vpop.permute.xlu1 %3618 }
0x131d   : > { %7080 = vpow2.f32 %v3425_v10  ;;  %v3209_v19 = vsel %vm823_vm7, %v9179_v38, 0.0 }
0x131e   : > { %v3192_v46 = vmul.f32 1.442695, %v3176_v56  ;;  %v3177_v56 = vsub.f32 %v9084_v60, %v9167_v8 }
0x131f   : > { %v3399_v14 = vpop.xlane.xlu0 %3398 }
0x1320   : > { %v3411_v48 = vsub.f32 %v9096_v4, %v3399_v14  ;;  %3443 = vadd.xlane.f32.xlu1 %v3442_v30  ;;  %7082 = vpow2.f32 %v3192_v46  ;;  %v3431_v4 = vmul.f32 1.442695, %v3412_v2  ;;  %v3194_v46 = vmul.f32 1.442695, %v3177_v56 }
0x1322   : > { %v9182_v45 = vpop.eup %7070  ;;  %v3429_v0 = vmul.f32 1.442695, %v3411_v48 }
0x1323   : > { %v9185_v58 = vpop.eup %7072  ;;  %v3212_v53 = vsel %vm823_vm7, %v9182_v45, 0.0  ;;  %v3166_v10 = vpop.xlane.xlu0 %3165 }
0x1324   : > { %v9191_v25 = vpop.eup %7074  ;;  %3213 = vadd.xlane.f32.xlu0 %v3212_v53  ;;  %3210 = vadd.xlane.f32.xlu1 %v3209_v19  ;;  %7084 = vpow2.f32 %v3429_v0  ;;  %v3448_v54 = vsel %vm823_vm7, %v9185_v58, 0.0  ;;  %v3178_v36 = vsub.f32 %v9098_v16, %v3166_v10 }
0x1325   : > { %v9193_v37 = vpop.eup %7076  ;;  %v3445_v43 = vsel %vm823_vm7, %v9191_v25, 0.0  ;;  %7086 = vpow2.f32 %v3431_v4  ;;  %v3169_v5 = vpop.xlane.xlu1 %3168 }
0x1326   : > { %v9199_v29 = vpop.eup %7078  ;;  %v3215_v35 = vsel %vm823_vm7, %v9193_v37, 0.0  ;;  %v3179_v27 = vsub.f32 %v9100_v42, %v3169_v5  ;;  %v3196_v18 = vmul.f32 1.442695, %v3178_v36 }
0x1327   : > { %v9201_v6 = vpop.eup %7080  ;;  %v3454_v50 = vsel %vm823_vm7, %v9199_v29, 0.0 }
0x1328   : > { %3449 = vadd.xlane.f32.xlu0 %v3448_v54  ;;  %3446 = vadd.xlane.f32.xlu1 %v3445_v43  ;;  %v3451_v9 = vsel %vm823_vm7, %v9201_v6, 0.0  ;;  %v3198_v20 = vmul.f32 1.442695, %v3179_v27 }
0x132a   : > { %v9207_v11 = vpop.eup %7082  ;;  %7088 = vpow2.f32 %v3198_v20 }
0x132b   : > { %v3218_v47 = vsel %vm823_vm7, %v9207_v11, 0.0  ;;  %7090 = vpow2.f32 %v3194_v46 }
0x132c   : > { %3455 = vadd.xlane.f32.xlu0 %v3454_v50  ;;  %3216 = vadd.xlane.f32.xlu1 %v3215_v35  ;;  %7092 = vpow2.f32 %v3196_v18 }
0x132e   : > { %v9213_v7 = vpop.eup %7084 }
0x132f   : > { %v3457_v32 = vsel %vm823_vm7, %v9213_v7, 0.0  ;;  %v9217_v44 = vpop.eup %7086 }
0x1330   : > { %3219 = vadd.xlane.f32.xlu0 %v3218_v47  ;;  %3452 = vadd.xlane.f32.xlu1 %v3451_v9  ;;  %v3460_v59 = vsel %vm823_vm7, %v9217_v44, 0.0 }
0x1334   : > { %3458 = vadd.xlane.f32.xlu1 %v3457_v32  ;;  %v9233_v34 = vpop.eup %7088 }
0x1335   : > { %v3227_v40 = vsel %vm823_vm7, %v9233_v34, 0.0  ;;  %v9237_v61 = vpop.eup %7090 }
0x1336   : > { %v3221_v60 = vsel %vm823_vm7, %v9237_v61, 0.0  ;;  %v9241_v42 = vpop.eup %7092 }
0x1337   : > { %v3224_v16 = vsel %vm823_vm7, %v9241_v42, 0.0 }
0x1338   : > { %3461 = vadd.xlane.f32.xlu1 %v3460_v59 }
0x1346   : > { %3624 = vrot.lane.b32.xlu0 %v3264_v49, %s7273_s19  ;;  %v3621_v49 = vpop.permute.xlu0 %3620 }
0x1349   : > { %3622 = vrot.lane.b32.xlu1 %v9919_v57, %s7273_s19 }
0x1365   : > { %3228 = vadd.xlane.f32.xlu0 %v3227_v40 }
0x136c   : > { %v3435_v8 = vpop.xlane.xlu0 %3434 }
0x136d   : > { %v9243_v14 = vpop.xlane.xlu1 %3201  ;;  %3222 = vadd.xlane.f32.xlu1 %v3221_v60  ;;  %7094 = vrcp.f32 %v3435_v8 }
0x1371   : > { %v3438_v30 = vpop.xlane.xlu1 %3437  ;;  %3225 = vadd.xlane.f32.xlu1 %v3224_v16 }
0x1372   : > { %7096 = vrcp.f32 %v3438_v30 }
0x1377   : > { %v7095_v48 = vpop.eup %7094 }
0x1378   : > { %v3473_v0 = vmul.f32 %v7095_v48, %v9136_v21  ;;  %v6830_v21 = vld [vmem:[%s9910_s4 + $0xb0] sm:$0xff]  }
0x1379   : > { %6546 = vmatpush3.bf16.msra.mxu1 %v6830_v21 }
0x137a   : > { %6547 = vmatprep.subr.bf16.mxu1 %v7270_v1 }
0x137c   : > { %v7097_v2 = vpop.eup %7096 }
0x137d   : > { %v3474_v53 = vmul.f32 %v7097_v2, %v9144_v33  ;;  %v3205_v33 = vpop.xlane.xlu1 %3204 }
0x137f   : > { %v3498_v19 = vpack.c.bf16 %v3474_v53, %v3473_v0 }
0x1381   : > { %6496 = vmatmul.mubr.msk.bf16.vlgmr.msra.gmra.mrb[140].mxu0 %vm823_vm7, %v3498_v19 }
0x1382   : > { %6516 = vmatpush3.bf16.msra.mxu0 %v9152_v15  ;;  %6499 = vmatprep.mubr.msk.bf16.mxu0 %vm7271_vm0, %v7270_v1 }
0x1383   : > { %6517 = vmatprep.subr.bf16.mxu0 %v7270_v1 }
0x1386   : > { %6518 = vmatpush3.bf16.msra.mxu0 %v3619_v26 }
0x1387   : > { %6519 = vmatprep.subr.bf16.mxu0 %v7270_v1 }
0x138a   : > { %6520 = vmatpush3.bf16.msra.mxu0 %v3621_v49 }
0x138b   : > { %6521 = vmatprep.subr.bf16.mxu0 %v7270_v1 }
0x13a5   : > { %v3441_v15 = vpop.xlane.xlu0 %3440 }
0x13a6   : > { %7098 = vrcp.f32 %v3441_v15 }
0x13a9   : > { %v3208_v4 = vpop.xlane.xlu1 %3207 }
0x13ad   : > { %v3444_v54 = vpop.xlane.xlu1 %3443 }
0x13ae   : > { %7100 = vrcp.f32 %v3444_v54 }
0x13b0   : > { %v7099_v9 = vpop.eup %7098 }
0x13b1   : > { %v3214_v43 = vpop.xlane.xlu0 %3213  ;;  %v3211_v50 = vpop.xlane.xlu1 %3210  ;;  %v3475_v26 = vmul.f32 %v7099_v9, %v9162_v23 }
0x13b5   : > { %v3450_v35 = vpop.xlane.xlu0 %3449  ;;  %v3447_v47 = vpop.xlane.xlu1 %3446 }
0x13b6   : > { %7102 = vrcp.f32 %v3450_v35 }
0x13b7   : > { %7104 = vrcp.f32 %v3447_v47 }
0x13b8   : > { %v7101_v32 = vpop.eup %7100 }
0x13b9   : > { %v3217_v59 = vpop.xlane.xlu1 %3216  ;;  %v3476_v57 = vmul.f32 %v7101_v32, %v9174_v62  ;;  %v3456_v5 = vpop.xlane.xlu0 %3455 }
0x13ba   : > { %7106 = vrcp.f32 %v3456_v5 }
0x13bb   : > { %v3499_v27 = vpack.c.bf16 %v3476_v57, %v3475_v26 }
0x13bd   : > { %6500 = vmatmul.mubr.msk.bf16.gmra.mrb[144].mxu0 %vm823_vm7, %v3499_v27  ;;  %v3453_v20 = vpop.xlane.xlu1 %3452  ;;  %v3220_v49 = vpop.xlane.xlu0 %3219 }
0x13be   : > { %6503 = vmatprep.mubr.msk.bf16.mxu0 %vm7271_vm0, %v7270_v1  ;;  %7108 = vrcp.f32 %v3453_v20 }
0x13c0   : > { %v7103_v56 = vpop.eup %7102 }
0x13c1   : > { %v7105_v10 = vpop.eup %7104  ;;  %v3459_v46 = vpop.xlane.xlu1 %3458  ;;  %v3478_v36 = vmul.f32 %v7103_v56, %v9185_v58 }
0x13c2   : > { %v3477_v18 = vmul.f32 %v7105_v10, %v9191_v25  ;;  %7110 = vrcp.f32 %v3459_v46  ;;  %v3625_v48 = vpop.permute.xlu0 %3624 }
0x13c4   : > { %v3500_v23 = vpack.c.bf16 %v3478_v36, %v3477_v18  ;;  %v7107_v40 = vpop.eup %7106 }
0x13c5   : > { %v3462_v62 = vpop.xlane.xlu1 %3461  ;;  %v3480_v58 = vmul.f32 %v7107_v40, %v9199_v29 }
0x13c6   : > { %6504 = vmatmul.mubr.msk.bf16.gmra.mrb[148].mxu0 %vm823_vm7, %v3500_v23  ;;  %7112 = vrcp.f32 %v3462_v62 }
0x13c7   : > { %6507 = vmatprep.mubr.msk.bf16.mxu0 %vm7271_vm0, %v7270_v1  ;;  %7114 = vrcp.f32 %v3205_v33 }
0x13c8   : > { %v7109_v60 = vpop.eup %7108  ;;  %7116 = vrcp.f32 %v9243_v14 }
0x13c9   : > { %v3623_v8 = vpop.permute.xlu1 %3622  ;;  %v3479_v16 = vmul.f32 %v7109_v60, %v9201_v6  ;;  %7118 = vrcp.f32 %v3211_v50 }
0x13ca   : > { %6522 = vmatpush3.bf16.msra.mxu0 %v3623_v8  ;;  %7120 = vrcp.f32 %v3208_v4 }
0x13cb   : > { %6523 = vmatprep.subr.bf16.mxu0 %v7270_v1  ;;  %v3501_v25 = vpack.c.bf16 %v3480_v58, %v3479_v16  ;;  %7122 = vrcp.f32 %v3217_v59 }
0x13cc   : > { %v7111_v30 = vpop.eup %7110  ;;  %7124 = vrcp.f32 %v3214_v43 }
0x13cd   : > { %v3481_v6 = vmul.f32 %v7111_v30, %v9213_v7  ;;  %7126 = vrcp.f32 %v3220_v49 }
0x13ce   : > { %6508 = vmatmul.mubr.msk.bf16.gmra.mrb[152].mxu0 %vm823_vm7, %v3501_v25 }
0x13cf   : > { %6524 = vmatpush3.bf16.msra.mxu0 %v3625_v48  ;;  %6511 = vmatprep.mubr.msk.bf16.mxu0 %vm7271_vm0, %v7270_v1 }
0x13d0   : > { %v7113_v2 = vpop.eup %7112  ;;  %6593 = vmatprep.subr.bf16.mxu0 %v7270_v1 }
0x13d1   : > { %v3482_v29 = vmul.f32 %v7113_v2, %v9217_v44  ;;  %v7115_v53 = vpop.eup %7114 }
0x13d2   : > { %v7117_v14 = vpop.eup %7116  ;;  %v3241_v19 = vmul.f32 %v7115_v53, %v9148_v13 }
0x13d3   : > { %v3502_v0 = vpack.c.bf16 %v3482_v29, %v3481_v6  ;;  %v3240_v21 = vmul.f32 %v7117_v14, %v9138_v28  ;;  %v7119_v15 = vpop.eup %7118 }
0x13d4   : > { %v7121_v7 = vpop.eup %7120  ;;  %v3243_v44 = vmul.f32 %v7119_v15, %v9179_v38 }
0x13d5   : > { %v3265_v33 = vpack.c.bf16 %v3241_v19, %v3240_v21  ;;  %v3242_v4 = vmul.f32 %v7121_v7, %v9170_v55  ;;  %v7123_v50 = vpop.eup %7122  ;;  %v6833_v21 = vld [vmem:[%s9910_s4 + $0x118] sm:$0xff]  }
0x13d6   : > { %6512 = vmatmul.mubr.msk.bf16.gmra.mrb[156].mxu0 %vm823_vm7, %v3502_v0  ;;  %v7125_v13 = vpop.eup %7124  ;;  %v3245_v28 = vmul.f32 %v7123_v50, %v9193_v37 }
0x13d7   : > { %6525 = vmatprep.mubr.msk.bf16.mxu0 %vm7271_vm0, %v7270_v1  ;;  %v3266_v54 = vpack.c.bf16 %v3243_v44, %v3242_v4  ;;  %v3244_v43 = vmul.f32 %v7125_v13, %v9182_v45  ;;  %v7127_v9 = vpop.eup %7126  ;;  %v5726_v4 = vld [vmem:[%s9911_s5 + $0x14] ss:$0 sm:$0xff] }
0x13d8   : > { %v3246_v59 = vmul.f32 %v7127_v9, %v9207_v11  ;;  %v6831_v11 = vld [vmem:[%s9910_s4 + $0xb8] sm:$0xff]  }
0x13d9   : > { %v3267_v35 = vpack.c.bf16 %v3245_v28, %v3244_v43  ;;  %6548 = vmatpush3.bf16.msra.mxu1 %v6831_v11 }
0x13da   : > { %6569 = vmatprep.subr.bf16.mxu1 %v7270_v1 }
0x13de   : > { %6526 = vmatmul.mubr.msk.bf16.vlgmr.msra.gmra.mrb[140].mxu0 %vm823_vm7, %v3265_v33  ;;  %v5717_v33 = vld [vmem:[%s9911_s5 + $0x13] ss:$0 sm:$0xff] }
0x13df   : > { %6529 = vmatprep.mubr.msk.bf16.mxu0 %vm7271_vm0, %v7270_v1 }
0x13e6   : > { %6530 = vmatmul.mubr.msk.bf16.gmra.mrb[144].mxu0 %vm823_vm7, %v3266_v54 }
0x13e7   : > { %6533 = vmatprep.mubr.msk.bf16.mxu0 %vm7271_vm0, %v7270_v1 }
0x13ee   : > { %6534 = vmatmul.mubr.msk.bf16.gmra.mrb[148].mxu0 %vm823_vm7, %v3267_v35 }
0x13ef   : > { %6537 = vmatprep.mubr.msk.bf16.mxu0 %vm7271_vm0, %v7270_v1 }
0x13f2   : > { %v3229_v38 = vpop.xlane.xlu0 %3228 }
0x13fa   : > { %v3223_v55 = vpop.xlane.xlu1 %3222 }
0x13fb   : > { %7128 = vrcp.f32 %v3223_v55 }
0x13fe   : > { %v3226_v47 = vpop.xlane.xlu1 %3225 }
0x13ff   : > { %7130 = vrcp.f32 %v3226_v47 }
0x1400   : > { %7132 = vrcp.f32 %v3229_v38 }
0x1405   : > { %v7129_v32 = vpop.eup %7128 }
0x1406   : > { %v3247_v37 = vmul.f32 %v7129_v32, %v9237_v61 }
0x1408   : > { %v3268_v45 = vpack.c.bf16 %v3247_v37, %v3246_v59 }
0x1409   : > { %v7131_v26 = vpop.eup %7130 }
0x140a   : > { %6538 = vmatmul.mubr.msk.bf16.gmra.mrb[152].mxu0 %vm823_vm7, %v3268_v45  ;;  %v7133_v57 = vpop.eup %7132  ;;  %v3248_v5 = vmul.f32 %v7131_v26, %v9241_v42 }
0x140b   : > { %6541 = vmatprep.mubr.msk.bf16.mxu0 %vm7271_vm0, %v7270_v1  ;;  %v3249_v27 = vmul.f32 %v7133_v57, %v9233_v34  ;;  %v6832_v34 = vld [vmem:[%s9910_s4 + $0x110] sm:$0xff]  }
0x140d   : > { %v3269_v20 = vpack.c.bf16 %v3249_v27, %v3248_v5 }
0x1412   : > { %6542 = vmatmul.mubr.msk.bf16.gmra.mrb[156].mxu0 %vm823_vm7, %v3269_v20 }
0x1413   : > { %6595 = vmatprep.mubr.msk.bf16.mxu0 %vm7271_vm0, %v7270_v1 }
0x14b1   : > { %v3680_v61 = vpop.f32.mrb[140].mxu0 }
0x14b2   : > { %v6527_v56 = vpop.f32.mrb[141].mxu0 }
0x14b3   : > { %v3683_v10 = vpop.f32.mrb[142].mxu0 }
0x14b4   : > { %v3723_v42 = vpack.c.bf16 %v3683_v10, %v3680_v61  ;;  %v6528_v46 = vpop.f32.mrb[143].mxu0 }
0x14b6   : > { %6550 = vmatmul.mubr.msk.bf16.vlgmr.msra.gmra.mrb[160].mxu1 %vm411_vm2, %v3723_v42 }
0x14b7   : > { %6553 = vmatprep.mubr.msk.bf16.mxu1 %vm7271_vm0, %v7270_v1  ;;  %6570 = vmatpush3.bf16.msra.mxu1 %v6832_v34 }
0x14b8   : > { %6571 = vmatprep.subr.bf16.mxu1 %v7270_v1 }
0x14b9   : > { %v3688_v36 = vpop.f32.mrb[144].mxu0 }
0x14ba   : > { %v6531_v18 = vpop.f32.mrb[145].mxu0 }
0x14bb   : > { %v3691_v23 = vpop.f32.mrb[146].mxu0  ;;  %6572 = vmatpush3.bf16.msra.mxu1 %v6833_v21 }
0x14bc   : > { %v3724_v62 = vpack.c.bf16 %v3691_v23, %v3688_v36  ;;  %v6532_v40 = vpop.f32.mrb[147].mxu0  ;;  %6615 = vmatprep.subr.bf16.mxu1 %v7270_v1 }
0x14be   : > { %6554 = vmatmul.mubr.msk.bf16.gmra.mrb[164].mxu1 %vm411_vm2, %v3724_v62 }
0x14bf   : > { %6557 = vmatprep.mubr.msk.bf16.mxu1 %vm7271_vm0, %v7270_v1 }
0x14c1   : > { %v3696_v49 = vpop.f32.mrb[148].mxu0 }
0x14c2   : > { %v6535_v60 = vpop.f32.mrb[149].mxu0 }
0x14c3   : > { %v3699_v8 = vpop.f32.mrb[150].mxu0 }
0x14c4   : > { %v3725_v16 = vpack.c.bf16 %v3699_v8, %v3696_v49  ;;  %v6536_v58 = vpop.f32.mrb[151].mxu0 }
0x14c6   : > { %6558 = vmatmul.mubr.msk.bf16.gmra.mrb[168].mxu1 %vm411_vm2, %v3725_v16 }
0x14c7   : > { %6561 = vmatprep.mubr.msk.bf16.mxu1 %vm7271_vm0, %v7270_v1 }
0x14dd   : > { %v3704_v25 = vpop.f32.mrb[152].mxu0 }
0x14de   : > { %v6539_v30 = vpop.f32.mrb[153].mxu0 }
0x14df   : > { %v3707_v48 = vpop.f32.mrb[154].mxu0 }
0x14e0   : > { %v3726_v2 = vpack.c.bf16 %v3707_v48, %v3704_v25  ;;  %v6540_v6 = vpop.f32.mrb[155].mxu0 }
0x14e2   : > { %6562 = vmatmul.mubr.msk.bf16.gmra.mrb[172].mxu1 %vm411_vm2, %v3726_v2 }
0x14e3   : > { %6565 = vmatprep.mubr.msk.bf16.mxu1 %vm7271_vm0, %v7270_v1 }
0x14e5   : > { %v3712_v29 = vpop.f32.mrb[156].mxu0 }
0x14e6   : > { %v6543_v0 = vpop.f32.mrb[157].mxu0 }
0x14e7   : > { %v3715_v53 = vpop.f32.mrb[158].mxu0  ;;  %v6834_v0 = vld [vmem:[%s9910_s4 + $0x120] sm:$0xff]  }
0x14e8   : > { %v3727_v14 = vpack.c.bf16 %v3715_v53, %v3712_v29  ;;  %v6544_v19 = vpop.f32.mrb[159].mxu0  ;;  %6594 = vmatpush3.bf16.msra.mxu0 %v6834_v0  ;;  %v9393_v53 = vld [vmem:[%s9911_s5 + $0x15] ss:$0 sm:$0xff] }
0x14e9   : > { %6639 = vmatprep.subr.bf16.mxu0 %v7270_v1 }
0x14ea   : > { %6566 = vmatmul.mubr.msk.bf16.gmra.mrb[176].mxu1 %vm411_vm2, %v3727_v14 }
0x14eb   : > { %6573 = vmatprep.mubr.msk.bf16.mxu1 %vm7271_vm0, %v7270_v1 }
0x1589   : > { %v3794_v15 = vpop.f32.mrb[160].mxu1 }
0x158a   : > { %v3795_v7 = vadd.f32 %v5717_v33, %v3794_v15  ;;  %v6551_v44 = vpop.f32.mrb[161].mxu1 }
0x158b   : > { %v3797_v54 = vpop.f32.mrb[162].mxu1 }
0x158c   : > { %v3798_v50 = vadd.f32 %v5717_v33, %v3797_v54  ;;  %v6552_v13 = vpop.f32.mrb[163].mxu1  ;;  %v9341_v28 = vmul.f32 %v5726_v4, %v3795_v7 }
0x158e   : > { %v9343_v43 = vmul.f32 %v5726_v4, %v3798_v50 }
0x1590   : > { %v3856_v35 = vpack.c.bf16 %v9343_v43, %v9341_v28 }
0x1591   : > { %v3802_v55 = vpop.f32.mrb[164].mxu1 }
0x1592   : > { %v3803_v38 = vadd.f32 %v5717_v33, %v3802_v55  ;;  %v6555_v47 = vpop.f32.mrb[165].mxu1  ;;  %6574 = vmatmul.mubr.msk.bf16.vlgmr.msra.gmra.mrb[180].mxu1 %vm411_vm2, %v3856_v35 }
0x1593   : > { %v3805_v9 = vpop.f32.mrb[166].mxu1  ;;  %6577 = vmatprep.mubr.msk.bf16.mxu1 %vm7271_vm0, %v7270_v1 }
0x1594   : > { %v3806_v32 = vadd.f32 %v5717_v33, %v3805_v9  ;;  %v6556_v59 = vpop.f32.mrb[167].mxu1  ;;  %v9350_v37 = vmul.f32 %v5726_v4, %v3803_v38 }
0x1596   : > { %v9352_v45 = vmul.f32 %v5726_v4, %v3806_v32 }
0x1598   : > { %v3857_v26 = vpack.c.bf16 %v9352_v45, %v9350_v37 }
0x1599   : > { %v3810_v57 = vpop.f32.mrb[168].mxu1 }
0x159a   : > { %v3811_v5 = vadd.f32 %v5717_v33, %v3810_v57  ;;  %v6559_v27 = vpop.f32.mrb[169].mxu1  ;;  %6578 = vmatmul.mubr.msk.bf16.gmra.mrb[184].mxu1 %vm411_vm2, %v3857_v26 }
0x159b   : > { %v3813_v20 = vpop.f32.mrb[170].mxu1  ;;  %6581 = vmatprep.mubr.msk.bf16.mxu1 %vm7271_vm0, %v7270_v1 }
0x159c   : > { %v3814_v11 = vadd.f32 %v5717_v33, %v3813_v20  ;;  %v6560_v61 = vpop.f32.mrb[171].mxu1  ;;  %v9359_v56 = vmul.f32 %v5726_v4, %v3811_v5 }
0x159e   : > { %v9361_v10 = vmul.f32 %v5726_v4, %v3814_v11 }
0x15a0   : > { %v3858_v34 = vpack.c.bf16 %v9361_v10, %v9359_v56 }
0x15a2   : > { %6582 = vmatmul.mubr.msk.bf16.gmra.mrb[188].mxu1 %vm411_vm2, %v3858_v34 }
0x15a3   : > { %6585 = vmatprep.mubr.msk.bf16.mxu1 %vm7271_vm0, %v7270_v1 }
0x15b5   : > { %v3818_v42 = vpop.f32.mrb[172].mxu1 }
0x15b6   : > { %v3819_v46 = vadd.f32 %v5717_v33, %v3818_v42  ;;  %v6563_v36 = vpop.f32.mrb[173].mxu1 }
0x15b7   : > { %v3821_v18 = vpop.f32.mrb[174].mxu1 }
0x15b8   : > { %v3822_v23 = vadd.f32 %v5717_v33, %v3821_v18  ;;  %v6564_v62 = vpop.f32.mrb[175].mxu1  ;;  %v9368_v40 = vmul.f32 %v5726_v4, %v3819_v46 }
0x15ba   : > { %v9370_v49 = vmul.f32 %v5726_v4, %v3822_v23 }
0x15bc   : > { %v3859_v60 = vpack.c.bf16 %v9370_v49, %v9368_v40 }
0x15bd   : > { %v3826_v8 = vpop.f32.mrb[176].mxu1 }
0x15be   : > { %v3827_v16 = vadd.f32 %v5717_v33, %v3826_v8  ;;  %v6567_v58 = vpop.f32.mrb[177].mxu1  ;;  %6586 = vmatmul.mubr.msk.bf16.gmra.mrb[192].mxu1 %vm411_vm2, %v3859_v60 }
0x15bf   : > { %v3829_v25 = vpop.f32.mrb[178].mxu1  ;;  %6589 = vmatprep.mubr.msk.bf16.mxu1 %vm7271_vm0, %v7270_v1 }
0x15c0   : > { %v3830_v30 = vadd.f32 %v5717_v33, %v3829_v25  ;;  %v6568_v48 = vpop.f32.mrb[179].mxu1  ;;  %v9377_v2 = vmul.f32 %v5726_v4, %v3827_v16 }
0x15c2   : > { %v9379_v6 = vmul.f32 %v5726_v4, %v3830_v30 }
0x15c4   : > { %v3860_v29 = vpack.c.bf16 %v9379_v6, %v9377_v2 }
0x15c6   : > { %6590 = vmatmul.mubr.msk.bf16.gmra.mrb[196].mxu1 %vm411_vm2, %v3860_v29 }
0x15c7   : > { %6619 = vmatprep.mubr.msk.bf16.mxu1 %vm7271_vm0, %v7270_v1 }
0x1665   : > { %v3926_v14 = vpop.f32.mrb[180].mxu1 }
0x1666   : > { %v3927_v19 = vadd.f32 %v9393_v53, %v3926_v14  ;;  %v6575_v21 = vpop.f32.mrb[181].mxu1 }
0x1667   : > { %v3929_v33 = vpop.f32.mrb[182].mxu1 }
0x1668   : > { %v3965_v15 = vmul.f32 %v3927_v19, %v3927_v19  ;;  %v3930_v7 = vadd.f32 %v9393_v53, %v3929_v33  ;;  %v6576_v44 = vpop.f32.mrb[183].mxu1 }
0x166a   : > { %v3975_v4 = vmul.f32 %v3965_v15, %v3927_v19  ;;  %v3966_v54 = vmul.f32 %v3930_v7, %v3930_v7 }
0x166c   : > { %v3985_v50 = vmul.f32 0.044715, %v3975_v4  ;;  %v3976_v13 = vmul.f32 %v3966_v54, %v3930_v7 }
0x166d   : > { %v3934_v35 = vpop.f32.mrb[184].mxu1 }
0x166e   : > { %v3995_v55 = vadd.f32 %v3985_v50, %v3927_v19  ;;  %v3986_v38 = vmul.f32 0.044715, %v3976_v13  ;;  %v3935_v47 = vadd.f32 %v9393_v53, %v3934_v35  ;;  %v6579_v9 = vpop.f32.mrb[185].mxu1 }
0x166f   : > { %v3937_v32 = vpop.f32.mrb[186].mxu1 }
0x1670   : > { %v4005_v59 = vmul.f32 0.7978846, %v3995_v55  ;;  %v3996_v26 = vadd.f32 %v3986_v38, %v3930_v7  ;;  %v3967_v57 = vmul.f32 %v3935_v47, %v3935_v47  ;;  %v3938_v5 = vadd.f32 %v9393_v53, %v3937_v32  ;;  %v6580_v27 = vpop.f32.mrb[187].mxu1 }
0x1672   : > { %7134 = vtanh.f32 %v4005_v59  ;;  %v4006_v20 = vmul.f32 0.7978846, %v3996_v26  ;;  %v3977_v11 = vmul.f32 %v3967_v57, %v3935_v47  ;;  %v3968_v61 = vmul.f32 %v3938_v5, %v3938_v5 }
0x1674   : > { %7136 = vtanh.f32 %v4006_v20  ;;  %v3987_v34 = vmul.f32 0.044715, %v3977_v11  ;;  %v3978_v42 = vmul.f32 %v3968_v61, %v3938_v5 }
0x1675   : > { %v3942_v46 = vpop.f32.mrb[188].mxu1 }
0x1676   : > { %v3997_v36 = vadd.f32 %v3987_v34, %v3935_v47  ;;  %v3988_v18 = vmul.f32 0.044715, %v3978_v42  ;;  %v3943_v23 = vadd.f32 %v9393_v53, %v3942_v46  ;;  %v6583_v62 = vpop.f32.mrb[189].mxu1 }
0x1677   : > { %v3945_v60 = vpop.f32.mrb[190].mxu1 }
0x1678   : > { %v4007_v8 = vmul.f32 0.7978846, %v3997_v36  ;;  %v3998_v16 = vadd.f32 %v3988_v18, %v3938_v5  ;;  %v3969_v58 = vmul.f32 %v3943_v23, %v3943_v23  ;;  %v3946_v25 = vadd.f32 %v9393_v53, %v3945_v60  ;;  %v6584_v30 = vpop.f32.mrb[191].mxu1 }
0x167a   : > { %7138 = vtanh.f32 %v4007_v8  ;;  %v4008_v48 = vmul.f32 0.7978846, %v3998_v16  ;;  %v3979_v29 = vmul.f32 %v3969_v58, %v3943_v23  ;;  %v3970_v0 = vmul.f32 %v3946_v25, %v3946_v25 }
0x167c   : > { %v7135_v14 = vpop.eup %7134  ;;  %7140 = vtanh.f32 %v4008_v48  ;;  %v3989_v21 = vmul.f32 0.044715, %v3979_v29  ;;  %v3980_v33 = vmul.f32 %v3970_v0, %v3946_v25 }
0x167d   : > { %v4025_v15 = vadd.f32 1.0, %v7135_v14 }
0x167e   : > { %v7137_v44 = vpop.eup %7136  ;;  %v3999_v4 = vadd.f32 %v3989_v21, %v3943_v23  ;;  %v3990_v54 = vmul.f32 0.044715, %v3980_v33 }
0x167f   : > { %v4035_v50 = vmul.f32 0.5, %v4025_v15  ;;  %v4026_v13 = vadd.f32 1.0, %v7137_v44 }
0x1680   : > { %v4009_v35 = vmul.f32 0.7978846, %v3999_v4  ;;  %v4000_v55 = vadd.f32 %v3990_v54, %v3946_v25 }
0x1681   : > { %v4036_v38 = vmul.f32 0.5, %v4026_v13  ;;  %v4045_v32 = vmul.f32 %v4035_v50, %v3927_v19 }
0x1682   : > { %7142 = vtanh.f32 %v4009_v35  ;;  %v4010_v9 = vmul.f32 0.7978846, %v4000_v55 }
0x1683   : > { %v4046_v59 = vmul.f32 %v4036_v38, %v3930_v7 }
0x1684   : > { %v7139_v26 = vpop.eup %7138  ;;  %7144 = vtanh.f32 %v4010_v9 }
0x1685   : > { %v4055_v57 = vpack.c.bf16 %v4046_v59, %v4045_v32  ;;  %v4027_v27 = vadd.f32 1.0, %v7139_v26 }
0x1686   : > { %v7141_v20 = vpop.eup %7140 }
0x1687   : > { %v4037_v11 = vmul.f32 0.5, %v4027_v27  ;;  %v4028_v61 = vadd.f32 1.0, %v7141_v20  ;;  %6596 = vmatmul.mubr.msk.bf16.vlgmr.msra.gmra.mrb[160].mxu0 %vm320_vm1, %v4055_v57 }
0x1688   : > { %6599 = vmatprep.mubr.msk.bf16.mxu0 %vm7271_vm0, %v7270_v1 }
0x1689   : > { %v4038_v34 = vmul.f32 0.5, %v4028_v61  ;;  %v4047_v42 = vmul.f32 %v4037_v11, %v3935_v47 }
0x168b   : > { %v4048_v46 = vmul.f32 %v4038_v34, %v3938_v5 }
0x168c   : > { %v7143_v36 = vpop.eup %7142 }
0x168d   : > { %v4029_v18 = vadd.f32 1.0, %v7143_v36  ;;  %v4056_v62 = vpack.c.bf16 %v4048_v46, %v4047_v42 }
0x168e   : > { %v7145_v19 = vpop.eup %7144 }
0x168f   : > { %v4039_v7 = vmul.f32 0.5, %v4029_v18  ;;  %v4030_v60 = vadd.f32 1.0, %v7145_v19  ;;  %6600 = vmatmul.mubr.msk.bf16.gmra.mrb[164].mxu0 %vm320_vm1, %v4056_v62 }
0x1690   : > { %6603 = vmatprep.mubr.msk.bf16.mxu0 %vm7271_vm0, %v7270_v1 }
0x1691   : > { %v4040_v8 = vmul.f32 0.5, %v4030_v60  ;;  %v3950_v16 = vpop.f32.mrb[192].mxu1  ;;  %v4049_v48 = vmul.f32 %v4039_v7, %v3943_v23 }
0x1692   : > { %v3951_v58 = vadd.f32 %v9393_v53, %v3950_v16  ;;  %v6587_v30 = vpop.f32.mrb[193].mxu1 }
0x1693   : > { %v4050_v29 = vmul.f32 %v4040_v8, %v3946_v25  ;;  %v3953_v47 = vpop.f32.mrb[194].mxu1 }
0x1694   : > { %v3971_v5 = vmul.f32 %v3951_v58, %v3951_v58  ;;  %v3954_v0 = vadd.f32 %v9393_v53, %v3953_v47  ;;  %v6588_v14 = vpop.f32.mrb[195].mxu1 }
0x1695   : > { %v4057_v21 = vpack.c.bf16 %v4050_v29, %v4049_v48 }
0x1696   : > { %v3981_v33 = vmul.f32 %v3971_v5, %v3951_v58  ;;  %v3972_v15 = vmul.f32 %v3954_v0, %v3954_v0 }
0x1697   : > { %6604 = vmatmul.mubr.msk.bf16.gmra.mrb[168].mxu0 %vm320_vm1, %v4057_v21 }
0x1698   : > { %v3991_v44 = vmul.f32 0.044715, %v3981_v33  ;;  %v3982_v4 = vmul.f32 %v3972_v15, %v3954_v0  ;;  %6607 = vmatprep.mubr.msk.bf16.mxu0 %vm7271_vm0, %v7270_v1 }
0x1699   : > { %v3958_v54 = vpop.f32.mrb[196].mxu1 }
0x169a   : > { %v4001_v50 = vadd.f32 %v3991_v44, %v3951_v58  ;;  %v3992_v13 = vmul.f32 0.044715, %v3982_v4  ;;  %v3959_v23 = vadd.f32 %v9393_v53, %v3958_v54  ;;  %v6591_v25 = vpop.f32.mrb[197].mxu1 }
0x169b   : > { %v3961_v35 = vpop.f32.mrb[198].mxu1 }
0x169c   : > { %v4011_v55 = vmul.f32 0.7978846, %v4001_v50  ;;  %v4002_v38 = vadd.f32 %v3992_v13, %v3954_v0  ;;  %v3973_v9 = vmul.f32 %v3959_v23, %v3959_v23  ;;  %v3962_v32 = vadd.f32 %v9393_v53, %v3961_v35  ;;  %v6592_v59 = vpop.f32.mrb[199].mxu1 }
0x169e   : > { %7146 = vtanh.f32 %v4011_v55  ;;  %v4012_v26 = vmul.f32 0.7978846, %v4002_v38  ;;  %v3983_v57 = vmul.f32 %v3973_v9, %v3959_v23  ;;  %v3974_v27 = vmul.f32 %v3962_v32, %v3962_v32 }
0x16a0   : > { %7148 = vtanh.f32 %v4012_v26  ;;  %v3993_v20 = vmul.f32 0.044715, %v3983_v57  ;;  %v3984_v11 = vmul.f32 %v3974_v27, %v3962_v32 }
0x16a2   : > { %v4003_v61 = vadd.f32 %v3993_v20, %v3959_v23  ;;  %v3994_v34 = vmul.f32 0.044715, %v3984_v11 }
0x16a4   : > { %v4013_v42 = vmul.f32 0.7978846, %v4003_v61  ;;  %v4004_v46 = vadd.f32 %v3994_v34, %v3962_v32 }
0x16a6   : > { %7150 = vtanh.f32 %v4013_v42  ;;  %v4014_v36 = vmul.f32 0.7978846, %v4004_v46 }
0x16a8   : > { %v7147_v18 = vpop.eup %7146  ;;  %7152 = vtanh.f32 %v4014_v36 }
0x16a9   : > { %v4031_v62 = vadd.f32 1.0, %v7147_v18 }
0x16aa   : > { %v7149_v19 = vpop.eup %7148 }
0x16ab   : > { %v4041_v7 = vmul.f32 0.5, %v4031_v62  ;;  %v4032_v53 = vadd.f32 1.0, %v7149_v19 }
0x16ad   : > { %v4042_v60 = vmul.f32 0.5, %v4032_v53  ;;  %v4051_v8 = vmul.f32 %v4041_v7, %v3951_v58  ;;  %v5743_v58 = vld [vmem:[%s9911_s5 + $0x16] ss:$0 sm:$0xff] }
0x16af   : > { %v4052_v16 = vmul.f32 %v4042_v60, %v3954_v0 }
0x16b0   : > { %v7151_v30 = vpop.eup %7150 }
0x16b1   : > { %v4033_v48 = vadd.f32 1.0, %v7151_v30  ;;  %v4058_v29 = vpack.c.bf16 %v4052_v16, %v4051_v8 }
0x16b2   : > { %v7153_v47 = vpop.eup %7152 }
0x16b3   : > { %v4043_v5 = vmul.f32 0.5, %v4033_v48  ;;  %v4034_v14 = vadd.f32 1.0, %v7153_v47  ;;  %6608 = vmatmul.mubr.msk.bf16.gmra.mrb[172].mxu0 %vm320_vm1, %v4058_v29 }
0x16b4   : > { %6611 = vmatprep.mubr.msk.bf16.mxu0 %vm7271_vm0, %v7270_v1 }
0x16b5   : > { %v4044_v21 = vmul.f32 0.5, %v4034_v14  ;;  %v4053_v33 = vmul.f32 %v4043_v5, %v3959_v23 }
0x16b7   : > { %v4054_v15 = vmul.f32 %v4044_v21, %v3962_v32 }
0x16b9   : > { %v4059_v44 = vpack.c.bf16 %v4054_v15, %v4053_v33 }
0x16bb   : > { %6612 = vmatmul.mubr.msk.bf16.gmra.mrb[176].mxu0 %vm320_vm1, %v4059_v44 }
0x16bc   : > { %6655 = vmatprep.mubr.msk.bf16.mxu0 %vm7271_vm0, %v7270_v1 }
0x175a   : > { %v4119_v0 = vpop.f32.mrb[160].mxu0 }
0x175b   : > { %v4120_v4 = vadd.f32 %v5743_v58, %v4119_v0  ;;  %v6597_v54 = vpop.f32.mrb[161].mxu0 }
0x175c   : > { %v4122_v50 = vpop.f32.mrb[162].mxu0 }
0x175d   : > { %v4158_v13 = vadd.f32 %v4120_v4, %v9341_v28  ;;  %v4123_v25 = vadd.f32 %v5743_v58, %v4122_v50  ;;  %v6598_v35 = vpop.f32.mrb[163].mxu0 }
0x175f   : > { %v4159_v23 = vadd.f32 %v4123_v25, %v9343_v43  ;;  %v9426_v55 = vadd.f32 %v4158_v13, %v8615_v52 }
0x1761   : > { %v4180_v38 = vsel %vm411_vm2, %v9426_v55, 0.0  ;;  %v9431_v9 = vadd.f32 %v4159_v23, %v8619_v22 }
0x1762   : > { %4181 = vadd.xlane.f32.xlu1 %v4180_v38  ;;  %v4127_v32 = vpop.f32.mrb[164].mxu0 }
0x1763   : > { %v4128_v59 = vadd.f32 %v5743_v58, %v4127_v32  ;;  %v6601_v26 = vpop.f32.mrb[165].mxu0  ;;  %v4183_v43 = vsel %vm411_vm2, %v9431_v9, 0.0 }
0x1764   : > { %v4130_v57 = vpop.f32.mrb[166].mxu0 }
0x1765   : > { %v4160_v28 = vadd.f32 %v4128_v59, %v9350_v37  ;;  %v4131_v27 = vadd.f32 %v5743_v58, %v4130_v57  ;;  %v6602_v20 = vpop.f32.mrb[167].mxu0 }
0x1766   : > { %4184 = vadd.xlane.f32.xlu1 %v4183_v43 }
0x1767   : > { %v9437_v52 = vadd.f32 %v4160_v28, %v8627_v51  ;;  %v4161_v11 = vadd.f32 %v4131_v27, %v9352_v45 }
0x1769   : > { %v9441_v22 = vadd.f32 %v4161_v11, %v8631_v17  ;;  %v4186_v61 = vsel %vm411_vm2, %v9437_v52, 0.0 }
0x176a   : > { %4187 = vadd.xlane.f32.xlu1 %v4186_v61  ;;  %v4135_v34 = vpop.f32.mrb[168].mxu0 }
0x176b   : > { %v4136_v37 = vadd.f32 %v5743_v58, %v4135_v34  ;;  %v6605_v42 = vpop.f32.mrb[169].mxu0  ;;  %v4189_v51 = vsel %vm411_vm2, %v9441_v22, 0.0 }
0x176c   : > { %v4138_v46 = vpop.f32.mrb[170].mxu0 }
0x176d   : > { %v4162_v36 = vadd.f32 %v4136_v37, %v9359_v56  ;;  %v4139_v18 = vadd.f32 %v5743_v58, %v4138_v46  ;;  %v6606_v62 = vpop.f32.mrb[171].mxu0 }
0x176e   : > { %4190 = vadd.xlane.f32.xlu1 %v4189_v51 }
0x176f   : > { %v9449_v45 = vadd.f32 %v4162_v36, %v8639_v41  ;;  %v4163_v17 = vadd.f32 %v4139_v18, %v9361_v10 }
0x1771   : > { %v9453_v19 = vadd.f32 %v4163_v17, %v8643_v63  ;;  %v4192_v7 = vsel %vm411_vm2, %v9449_v45, 0.0 }
0x1772   : > { %4193 = vadd.xlane.f32.xlu1 %v4192_v7  ;;  %v6835_v7 = vld [vmem:[%s9910_s4 + $0xc0] sm:$0xff]  }
0x1773   : > { %v4195_v56 = vsel %vm411_vm2, %v9453_v19, 0.0  ;;  %6616 = vmatpush3.bf16.msra.mxu1 %v6835_v7 }
0x1774   : > { %6617 = vmatprep.subr.bf16.mxu1 %v7270_v1 }
0x1776   : > { %4196 = vadd.xlane.f32.xlu1 %v4195_v56 }
0x1786   : > { %v4143_v53 = vpop.f32.mrb[172].mxu0 }
0x1787   : > { %v4144_v60 = vadd.f32 %v5743_v58, %v4143_v53  ;;  %v6609_v8 = vpop.f32.mrb[173].mxu0 }
0x1788   : > { %v4146_v16 = vpop.f32.mrb[174].mxu0 }
0x1789   : > { %v4164_v41 = vadd.f32 %v4144_v60, %v9368_v40  ;;  %v4147_v30 = vadd.f32 %v5743_v58, %v4146_v16  ;;  %v6610_v48 = vpop.f32.mrb[175].mxu0 }
0x178b   : > { %v9461_v10 = vadd.f32 %v4164_v41, %v8651_v31  ;;  %v4165_v63 = vadd.f32 %v4147_v30, %v9370_v49  ;;  %v6836_v41 = vld [vmem:[%s9910_s4 + $0xc8] sm:$0xff]  }
0x178c   : > { %6618 = vmatpush3.bf16.msra.mxu1 %v6836_v41 }
0x178d   : > { %v9465_v29 = vadd.f32 %v4165_v63, %v8655_v12  ;;  %v4198_v47 = vsel %vm411_vm2, %v9461_v10, 0.0  ;;  %6675 = vmatprep.subr.bf16.mxu1 %v7270_v1 }
0x178e   : > { %4199 = vadd.xlane.f32.xlu1 %v4198_v47  ;;  %v4151_v5 = vpop.f32.mrb[176].mxu0 }
0x178f   : > { %v4152_v14 = vadd.f32 %v5743_v58, %v4151_v5  ;;  %v6613_v21 = vpop.f32.mrb[177].mxu0  ;;  %v4201_v40 = vsel %vm411_vm2, %v9465_v29, 0.0 }
0x1790   : > { %4202 = vadd.xlane.f32.xlu0 %v4201_v40  ;;  %v4154_v33 = vpop.f32.mrb[178].mxu0 }
0x1791   : > { %v4166_v31 = vadd.f32 %v4152_v14, %v9377_v2  ;;  %v4155_v15 = vadd.f32 %v5743_v58, %v4154_v33  ;;  %v6614_v44 = vpop.f32.mrb[179].mxu0 }
0x1793   : > { %v9473_v49 = vadd.f32 %v4166_v31, %v8663_v24  ;;  %v4167_v12 = vadd.f32 %v4155_v15, %v9379_v6 }
0x1795   : > { %v9477_v0 = vadd.f32 %v4167_v12, %v8667_v39  ;;  %v4204_v4 = vsel %vm411_vm2, %v9473_v49, 0.0 }
0x1796   : > { %4205 = vadd.xlane.f32.xlu1 %v4204_v4 }
0x1797   : > { %v4207_v54 = vsel %vm411_vm2, %v9477_v0, 0.0 }
0x1798   : > { %4208 = vadd.xlane.f32.xlu0 %v4207_v54 }
0x17ef   : > { %v4182_v50 = vpop.xlane.xlu1 %4181 }
0x17f0   : > { %v4210_v2 = vmul.f32 0.03125, %v4182_v50 }
0x17f2   : > { %v9484_v58 = vsub.f32 %v9426_v55, %v4210_v2 }
0x17f3   : > { %v4185_v24 = vpop.xlane.xlu1 %4184 }
0x17f4   : > { %v4211_v13 = vmul.f32 0.03125, %v4185_v24  ;;  %v4230_v6 = vmul.f32 %v9484_v58, %v9484_v58 }
0x17f6   : > { %v9489_v39 = vsub.f32 %v9431_v9, %v4211_v13  ;;  %v4240_v25 = vsel %vm411_vm2, %v4230_v6, 0.0 }
0x17f7   : > { %v4188_v35 = vpop.xlane.xlu1 %4187  ;;  %4241 = vadd.xlane.f32.xlu1 %v4240_v25 }
0x17f8   : > { %v4212_v23 = vmul.f32 0.03125, %v4188_v35  ;;  %v4231_v38 = vmul.f32 %v9489_v39, %v9489_v39 }
0x17fa   : > { %v9495_v32 = vsub.f32 %v9437_v52, %v4212_v23  ;;  %v4243_v55 = vsel %vm411_vm2, %v4231_v38, 0.0 }
0x17fb   : > { %v4191_v59 = vpop.xlane.xlu1 %4190  ;;  %4244 = vadd.xlane.f32.xlu0 %v4243_v55 }
0x17fc   : > { %v4213_v26 = vmul.f32 0.03125, %v4191_v59  ;;  %v4232_v9 = vmul.f32 %v9495_v32, %v9495_v32 }
0x17fe   : > { %v9501_v57 = vsub.f32 %v9441_v22, %v4213_v26  ;;  %v4246_v28 = vsel %vm411_vm2, %v4232_v9, 0.0 }
0x17ff   : > { %v4194_v27 = vpop.xlane.xlu1 %4193  ;;  %4247 = vadd.xlane.f32.xlu1 %v4246_v28  ;;  %v9555_v28 = vld [vmem:[%s9911_s5 + $0x17] ss:$0 sm:$0xff] }
0x1800   : > { %v4214_v20 = vmul.f32 0.03125, %v4194_v27  ;;  %v4233_v43 = vmul.f32 %v9501_v57, %v9501_v57 }
0x1802   : > { %v9507_v11 = vsub.f32 %v9449_v45, %v4214_v20  ;;  %v4249_v61 = vsel %vm411_vm2, %v4233_v43, 0.0 }
0x1803   : > { %v4197_v34 = vpop.xlane.xlu1 %4196  ;;  %4250 = vadd.xlane.f32.xlu0 %v4249_v61 }
0x1804   : > { %v4215_v37 = vmul.f32 0.03125, %v4197_v34  ;;  %v4234_v42 = vmul.f32 %v9507_v11, %v9507_v11 }
0x1806   : > { %v9513_v46 = vsub.f32 %v9453_v19, %v4215_v37  ;;  %v4252_v36 = vsel %vm411_vm2, %v4234_v42, 0.0  ;;  %v9562_v42 = vld [vmem:[%s9911_s5 + $0x18] ss:$0 sm:$0xff] }
0x1807   : > { %4253 = vadd.xlane.f32.xlu1 %v4252_v36 }
0x1808   : > { %v4235_v18 = vmul.f32 %v9513_v46, %v9513_v46 }
0x180a   : > { %v4255_v62 = vsel %vm411_vm2, %v4235_v18, 0.0 }
0x180b   : > { %4256 = vadd.xlane.f32.xlu0 %v4255_v62 }
0x181b   : > { %v4200_v51 = vpop.xlane.xlu1 %4199 }
0x181c   : > { %v4216_v17 = vmul.f32 0.03125, %v4200_v51 }
0x181d   : > { %v4203_v56 = vpop.xlane.xlu0 %4202 }
0x181e   : > { %v9523_v53 = vsub.f32 %v9461_v10, %v4216_v17  ;;  %v4217_v60 = vmul.f32 0.03125, %v4203_v56 }
0x1820   : > { %v9527_v8 = vsub.f32 %v9465_v29, %v4217_v60  ;;  %v4236_v16 = vmul.f32 %v9523_v53, %v9523_v53 }
0x1822   : > { %v4258_v30 = vsel %vm411_vm2, %v4236_v16, 0.0  ;;  %v4237_v48 = vmul.f32 %v9527_v8, %v9527_v8 }
0x1823   : > { %4259 = vadd.xlane.f32.xlu1 %v4258_v30  ;;  %v4206_v63 = vpop.xlane.xlu1 %4205 }
0x1824   : > { %v4218_v47 = vmul.f32 0.03125, %v4206_v63  ;;  %v4261_v5 = vsel %vm411_vm2, %v4237_v48, 0.0 }
0x1825   : > { %4262 = vadd.xlane.f32.xlu0 %v4261_v5  ;;  %v4209_v14 = vpop.xlane.xlu0 %4208 }
0x1826   : > { %v9540_v21 = vsub.f32 %v9473_v49, %v4218_v47  ;;  %v4219_v40 = vmul.f32 0.03125, %v4209_v14 }
0x1828   : > { %v9543_v33 = vsub.f32 %v9477_v0, %v4219_v40  ;;  %v4238_v31 = vmul.f32 %v9540_v21, %v9540_v21 }
0x182a   : > { %v4264_v15 = vsel %vm411_vm2, %v4238_v31, 0.0  ;;  %v4239_v44 = vmul.f32 %v9543_v33, %v9543_v33 }
0x182b   : > { %4265 = vadd.xlane.f32.xlu1 %v4264_v15 }
0x182c   : > { %v4267_v12 = vsel %vm411_vm2, %v4239_v44, 0.0 }
0x182d   : > { %4268 = vadd.xlane.f32.xlu0 %v4267_v12 }
0x1884   : > { %v4242_v4 = vpop.xlane.xlu1 %4241 }
0x1885   : > { %v4270_v54 = vmul.f32 0.03125, %v4242_v4 }
0x1887   : > { %v4280_v50 = vadd.f32 1e-06, %v4270_v54 }
0x1888   : > { %v4245_v2 = vpop.xlane.xlu0 %4244 }
0x1889   : > { %7154 = vrsqrt.f32 %v4280_v50  ;;  %v4271_v24 = vmul.f32 0.03125, %v4245_v2 }
0x188b   : > { %v4281_v13 = vadd.f32 1e-06, %v4271_v24 }
0x188c   : > { %v4248_v6 = vpop.xlane.xlu1 %4247 }
0x188d   : > { %7156 = vrsqrt.f32 %v4281_v13  ;;  %v4272_v25 = vmul.f32 0.03125, %v4248_v6 }
0x188f   : > { %v4282_v35 = vadd.f32 1e-06, %v4272_v25 }
0x1890   : > { %v4251_v23 = vpop.xlane.xlu0 %4250 }
0x1891   : > { %7158 = vrsqrt.f32 %v4282_v35  ;;  %v4273_v38 = vmul.f32 0.03125, %v4251_v23 }
0x1893   : > { %v7155_v55 = vpop.eup %7154  ;;  %v4283_v59 = vadd.f32 1e-06, %v4273_v38 }
0x1894   : > { %v4300_v26 = vmul.f32 %v7155_v55, %v9484_v58  ;;  %v4254_v9 = vpop.xlane.xlu1 %4253 }
0x1895   : > { %7160 = vrsqrt.f32 %v4283_v59  ;;  %v4274_v27 = vmul.f32 0.03125, %v4254_v9 }
0x1896   : > { %v4314_v61 = vmul.f32 %v9555_v28, %v4300_v26 }
0x1897   : > { %v7157_v20 = vpop.eup %7156  ;;  %v4284_v43 = vadd.f32 1e-06, %v4274_v27 }
0x1898   : > { %v4301_v34 = vmul.f32 %v7157_v20, %v9489_v39  ;;  %v4257_v37 = vpop.xlane.xlu0 %4256  ;;  %v4328_v51 = vadd.f32 %v9562_v42, %v4314_v61 }
0x1899   : > { %7162 = vrsqrt.f32 %v4284_v43  ;;  %v4275_v58 = vmul.f32 0.03125, %v4257_v37 }
0x189a   : > { %v4315_v36 = vmul.f32 %v9555_v28, %v4301_v34 }
0x189b   : > { %v7159_v18 = vpop.eup %7158  ;;  %v4285_v62 = vadd.f32 1e-06, %v4275_v58 }
0x189c   : > { %v4329_v17 = vadd.f32 %v9562_v42, %v4315_v36  ;;  %v4302_v7 = vmul.f32 %v7159_v18, %v9495_v32 }
0x189d   : > { %7164 = vrsqrt.f32 %v4285_v62 }
0x189e   : > { %v4342_v39 = vpack.c.bf16 %v4329_v17, %v4328_v51  ;;  %v4316_v16 = vmul.f32 %v9555_v28, %v4302_v7  ;;  %v6841_v51 = vld [vmem:[%s9910_s4 + $0xf0] sm:$0xff]   ;;  %v6842_v17 = vld [vmem:[%s9910_s4 + $0xf8] sm:$0xff]   ;;  %v6843_v7 = vld [vmem:[%s9910_s4 + $0x100] sm:$0xff]  }
0x189f   : > { %v7161_v56 = vpop.eup %7160 }
0x18a0   : > { %v4303_v60 = vmul.f32 %v7161_v56, %v9501_v57  ;;  %6620 = vmatmul.mubr.msk.bf16.vlgmr.msra.gmra.mrb[200].mxu1 %vm411_vm2, %v4342_v39  ;;  %v4330_v63 = vadd.f32 %v9562_v42, %v4316_v16  ;;  %v6844_v39 = vld [vmem:[%s9910_s4 + $0x108] sm:$0xff]  }
0x18a1   : > { %6623 = vmatprep.mubr.msk.bf16.mxu1 %vm7271_vm0, %v7270_v1  ;;  %v6845_v56 = vld [vmem:[%s9910_s4 + $0x128] sm:$0xff]  }
0x18a2   : > { %v4317_v41 = vmul.f32 %v9555_v28, %v4303_v60  ;;  %6676 = vmatpush3.bf16.msra.mxu1 %v6845_v56  ;;  %v9645_v60 = vld [vmem:[%s9911_s5 + $0x19] ss:$0 sm:$0xff] }
0x18a3   : > { %v7163_v30 = vpop.eup %7162  ;;  %6677 = vmatprep.subr.bf16.mxu1 %v7270_v1 }
0x18a4   : > { %v4304_v48 = vmul.f32 %v7163_v30, %v9507_v11  ;;  %v4331_v32 = vadd.f32 %v9562_v42, %v4317_v41 }
0x18a6   : > { %v4343_v47 = vpack.c.bf16 %v4331_v32, %v4330_v63  ;;  %v4318_v14 = vmul.f32 %v9555_v28, %v4304_v48 }
0x18a7   : > { %v7165_v5 = vpop.eup %7164 }
0x18a8   : > { %v4305_v57 = vmul.f32 %v7165_v5, %v9513_v46  ;;  %6624 = vmatmul.mubr.msk.bf16.gmra.mrb[204].mxu1 %vm411_vm2, %v4343_v47  ;;  %v4332_v31 = vadd.f32 %v9562_v42, %v4318_v14 }
0x18a9   : > { %6627 = vmatprep.mubr.msk.bf16.mxu1 %vm7271_vm0, %v7270_v1 }
0x18aa   : > { %v4319_v40 = vmul.f32 %v9555_v28, %v4305_v57 }
0x18ac   : > { %v4333_v11 = vadd.f32 %v9562_v42, %v4319_v40 }
0x18ae   : > { %v4344_v15 = vpack.c.bf16 %v4333_v11, %v4332_v31 }
0x18b0   : > { %6628 = vmatmul.mubr.msk.bf16.gmra.mrb[208].mxu1 %vm411_vm2, %v4344_v15  ;;  %v4260_v44 = vpop.xlane.xlu1 %4259 }
0x18b1   : > { %v4276_v12 = vmul.f32 0.03125, %v4260_v44  ;;  %6631 = vmatprep.mubr.msk.bf16.mxu1 %vm7271_vm0, %v7270_v1 }
0x18b2   : > { %v4263_v46 = vpop.xlane.xlu0 %4262 }
0x18b3   : > { %v4286_v4 = vadd.f32 1e-06, %v4276_v12  ;;  %v4277_v54 = vmul.f32 0.03125, %v4263_v46 }
0x18b5   : > { %7166 = vrsqrt.f32 %v4286_v4  ;;  %v4287_v50 = vadd.f32 1e-06, %v4277_v54 }
0x18b7   : > { %7168 = vrsqrt.f32 %v4287_v50 }
0x18b8   : > { %v4266_v2 = vpop.xlane.xlu1 %4265 }
0x18b9   : > { %v4278_v24 = vmul.f32 0.03125, %v4266_v2 }
0x18ba   : > { %v4269_v13 = vpop.xlane.xlu0 %4268 }
0x18bb   : > { %v4288_v6 = vadd.f32 1e-06, %v4278_v24  ;;  %v4279_v25 = vmul.f32 0.03125, %v4269_v13 }
0x18bd   : > { %7170 = vrsqrt.f32 %v4288_v6  ;;  %v4289_v35 = vadd.f32 1e-06, %v4279_v25 }
0x18bf   : > { %v7167_v23 = vpop.eup %7166  ;;  %7172 = vrsqrt.f32 %v4289_v35 }
0x18c0   : > { %v4306_v38 = vmul.f32 %v7167_v23, %v9523_v53 }
0x18c1   : > { %v7169_v55 = vpop.eup %7168 }
0x18c2   : > { %v4307_v59 = vmul.f32 %v7169_v55, %v9527_v8  ;;  %v4320_v26 = vmul.f32 %v9555_v28, %v4306_v38 }
0x18c4   : > { %v4321_v9 = vmul.f32 %v9555_v28, %v4307_v59  ;;  %v4334_v27 = vadd.f32 %v9562_v42, %v4320_v26 }
0x18c6   : > { %v4335_v20 = vadd.f32 %v9562_v42, %v4321_v9 }
0x18c7   : > { %v7171_v43 = vpop.eup %7170 }
0x18c8   : > { %v4308_v61 = vmul.f32 %v7171_v43, %v9540_v21  ;;  %v4345_v34 = vpack.c.bf16 %v4335_v20, %v4334_v27  ;;  %v6837_v21 = vld [vmem:[%s9910_s4 + $0xd0] sm:$0xff]  }
0x18c9   : > { %v7173_v37 = vpop.eup %7172  ;;  %6640 = vmatpush3.bf16.msra.mxu0 %v6837_v21 }
0x18ca   : > { %v4309_v58 = vmul.f32 %v7173_v37, %v9543_v33  ;;  %6632 = vmatmul.mubr.msk.bf16.gmra.mrb[212].mxu1 %vm411_vm2, %v4345_v34  ;;  %v4322_v53 = vmul.f32 %v9555_v28, %v4308_v61  ;;  %6641 = vmatprep.subr.bf16.mxu0 %v7270_v1  ;;  %v6838_v33 = vld [vmem:[%s9910_s4 + $0xd8] sm:$0xff]  }
0x18cb   : > { %6635 = vmatprep.mubr.msk.bf16.mxu1 %vm7271_vm0, %v7270_v1 }
0x18cc   : > { %v4323_v8 = vmul.f32 %v9555_v28, %v4309_v58  ;;  %v4336_v36 = vadd.f32 %v9562_v42, %v4322_v53  ;;  %v6839_v28 = vld [vmem:[%s9910_s4 + $0xe0] sm:$0xff]  }
0x18cd   : > { %6642 = vmatpush3.bf16.msra.mxu0 %v6838_v33 }
0x18ce   : > { %v4337_v18 = vadd.f32 %v9562_v42, %v4323_v8  ;;  %6643 = vmatprep.subr.bf16.mxu0 %v7270_v1  ;;  %v6840_v42 = vld [vmem:[%s9910_s4 + $0xe8] sm:$0xff]  }
0x18d0   : > { %v4346_v62 = vpack.c.bf16 %v4337_v18, %v4336_v36 }
0x18d1   : > { %6644 = vmatpush3.bf16.msra.mxu0 %v6839_v28 }
0x18d2   : > { %6636 = vmatmul.mubr.msk.bf16.gmra.mrb[216].mxu1 %vm411_vm2, %v4346_v62  ;;  %6645 = vmatprep.subr.bf16.mxu0 %v7270_v1 }
0x18d3   : > { %6679 = vmatprep.mubr.msk.bf16.mxu1 %vm7271_vm0, %v7270_v1 }
0x18d5   : > { %6646 = vmatpush3.bf16.msra.mxu0 %v6840_v42 }
0x18d6   : > { %6647 = vmatprep.subr.bf16.mxu0 %v7270_v1 }
0x18d9   : > { %6648 = vmatpush3.bf16.msra.mxu0 %v6841_v51 }
0x18da   : > { %6649 = vmatprep.subr.bf16.mxu0 %v7270_v1 }
0x18dd   : > { %6650 = vmatpush3.bf16.msra.mxu0 %v6842_v17 }
0x18de   : > { %6651 = vmatprep.subr.bf16.mxu0 %v7270_v1 }
0x18e1   : > { %6652 = vmatpush3.bf16.msra.mxu0 %v6843_v7 }
0x18e2   : > { %6653 = vmatprep.subr.bf16.mxu0 %v7270_v1 }
0x18e5   : > { %6654 = vmatpush3.bf16.msra.mxu0 %v6844_v39 }
0x18e6   : > { %6699 = vmatprep.subr.bf16.mxu0 %v7270_v1 }
0x1973   : > { %v4413_v16 = vpop.f32.mrb[200].mxu1 }
0x1974   : > { %v4414_v41 = vadd.f32 %v9645_v60, %v4413_v16  ;;  %v6621_v30 = vpop.f32.mrb[201].mxu1 }
0x1975   : > { %v4416_v48 = vpop.f32.mrb[202].mxu1 }
0x1976   : > { %v4452_v63 = vmul.f32 %v4414_v41, %v4414_v41  ;;  %v4417_v32 = vadd.f32 %v9645_v60, %v4416_v48  ;;  %v6622_v47 = vpop.f32.mrb[203].mxu1 }
0x1978   : > { %v4462_v5 = vmul.f32 %v4452_v63, %v4414_v41  ;;  %v4453_v57 = vmul.f32 %v4417_v32, %v4417_v32 }
0x197a   : > { %v4472_v14 = vmul.f32 0.044715, %v4462_v5  ;;  %v4463_v40 = vmul.f32 %v4453_v57, %v4417_v32 }
0x197b   : > { %v4421_v31 = vpop.f32.mrb[204].mxu1 }
0x197c   : > { %v4482_v11 = vadd.f32 %v4472_v14, %v4414_v41  ;;  %v4473_v15 = vmul.f32 0.044715, %v4463_v40  ;;  %v4422_v44 = vadd.f32 %v9645_v60, %v4421_v31  ;;  %v6625_v12 = vpop.f32.mrb[205].mxu1 }
0x197d   : > { %v4424_v46 = vpop.f32.mrb[206].mxu1 }
0x197e   : > { %v4492_v4 = vmul.f32 0.7978846, %v4482_v11  ;;  %v4483_v54 = vadd.f32 %v4473_v15, %v4417_v32  ;;  %v4454_v50 = vmul.f32 %v4422_v44, %v4422_v44  ;;  %v4425_v2 = vadd.f32 %v9645_v60, %v4424_v46  ;;  %v6626_v24 = vpop.f32.mrb[207].mxu1 }
0x1980   : > { %7174 = vtanh.f32 %v4492_v4  ;;  %v4493_v13 = vmul.f32 0.7978846, %v4483_v54  ;;  %v4464_v6 = vmul.f32 %v4454_v50, %v4422_v44  ;;  %v4455_v25 = vmul.f32 %v4425_v2, %v4425_v2 }
0x1982   : > { %7176 = vtanh.f32 %v4493_v13  ;;  %v4474_v35 = vmul.f32 0.044715, %v4464_v6  ;;  %v4465_v23 = vmul.f32 %v4455_v25, %v4425_v2 }
0x1983   : > { %v4429_v38 = vpop.f32.mrb[208].mxu1 }
0x1984   : > { %v4484_v55 = vadd.f32 %v4474_v35, %v4422_v44  ;;  %v4475_v59 = vmul.f32 0.044715, %v4465_v23  ;;  %v4430_v26 = vadd.f32 %v9645_v60, %v4429_v38  ;;  %v6629_v9 = vpop.f32.mrb[209].mxu1 }
0x1985   : > { %v4432_v27 = vpop.f32.mrb[210].mxu1 }
0x1986   : > { %v4494_v20 = vmul.f32 0.7978846, %v4484_v55  ;;  %v4485_v43 = vadd.f32 %v4475_v59, %v4425_v2  ;;  %v4456_v61 = vmul.f32 %v4430_v26, %v4430_v26  ;;  %v4433_v34 = vadd.f32 %v9645_v60, %v4432_v27  ;;  %v6630_v37 = vpop.f32.mrb[211].mxu1 }
0x1988   : > { %7178 = vtanh.f32 %v4494_v20  ;;  %v4495_v58 = vmul.f32 0.7978846, %v4485_v43  ;;  %v4466_v53 = vmul.f32 %v4456_v61, %v4430_v26  ;;  %v4457_v8 = vmul.f32 %v4433_v34, %v4433_v34 }
0x198a   : > { %v7175_v36 = vpop.eup %7174  ;;  %7180 = vtanh.f32 %v4495_v58  ;;  %v4476_v18 = vmul.f32 0.044715, %v4466_v53  ;;  %v4467_v62 = vmul.f32 %v4457_v8, %v4433_v34 }
0x198b   : > { %v4512_v21 = vadd.f32 1.0, %v7175_v36 }
0x198c   : > { %v7177_v33 = vpop.eup %7176  ;;  %v4486_v28 = vadd.f32 %v4476_v18, %v4430_v26  ;;  %v4477_v42 = vmul.f32 0.044715, %v4467_v62 }
0x198d   : > { %v4522_v51 = vmul.f32 0.5, %v4512_v21  ;;  %v4513_v17 = vadd.f32 1.0, %v7177_v33 }
0x198e   : > { %v4496_v7 = vmul.f32 0.7978846, %v4486_v28  ;;  %v4487_v39 = vadd.f32 %v4477_v42, %v4433_v34 }
0x198f   : > { %v4523_v56 = vmul.f32 0.5, %v4513_v17  ;;  %v4532_v30 = vmul.f32 %v4522_v51, %v4414_v41 }
0x1990   : > { %7182 = vtanh.f32 %v4496_v7  ;;  %v4497_v16 = vmul.f32 0.7978846, %v4487_v39 }
0x1991   : > { %v4533_v48 = vmul.f32 %v4523_v56, %v4417_v32 }
0x1992   : > { %v7179_v63 = vpop.eup %7178  ;;  %7184 = vtanh.f32 %v4497_v16 }
0x1993   : > { %v4558_v47 = vpack.c.bf16 %v4533_v48, %v4532_v30  ;;  %v4514_v5 = vadd.f32 1.0, %v7179_v63 }
0x1994   : > { %v7181_v57 = vpop.eup %7180 }
0x1995   : > { %6656 = vmatmul.mubr.bf16.vlgmr.msra.gmra.mrb[180].mxu0 %v4558_v47  ;;  %v4515_v14 = vadd.f32 1.0, %v7181_v57  ;;  %v4524_v40 = vmul.f32 0.5, %v4514_v5 }
0x1996   : > { %6659 = vmatprep.mubr.msk.bf16.mxu0 %vm7271_vm0, %v7270_v1 }
0x1997   : > { %v4525_v31 = vmul.f32 0.5, %v4515_v14  ;;  %v4534_v11 = vmul.f32 %v4524_v40, %v4422_v44 }
0x1999   : > { %v4535_v15 = vmul.f32 %v4525_v31, %v4425_v2 }
0x199a   : > { %v7183_v12 = vpop.eup %7182 }
0x199b   : > { %v4559_v46 = vpack.c.bf16 %v4535_v15, %v4534_v11  ;;  %v4516_v4 = vadd.f32 1.0, %v7183_v12 }
0x199c   : > { %v7185_v54 = vpop.eup %7184 }
0x199d   : > { %6660 = vmatmul.mubr.bf16.gmra.mrb[184].mxu0 %v4559_v46  ;;  %v4437_v41 = vpop.f32.mrb[212].mxu1  ;;  %v4517_v32 = vadd.f32 1.0, %v7185_v54  ;;  %v4526_v50 = vmul.f32 0.5, %v4516_v4 }
0x199e   : > { %v4438_v24 = vadd.f32 %v9645_v60, %v4437_v41  ;;  %v6633_v13 = vpop.f32.mrb[213].mxu1  ;;  %6663 = vmatprep.mubr.msk.bf16.mxu0 %vm7271_vm0, %v7270_v1 }
0x199f   : > { %v4440_v6 = vpop.f32.mrb[214].mxu1  ;;  %v4527_v25 = vmul.f32 0.5, %v4517_v32  ;;  %v4536_v23 = vmul.f32 %v4526_v50, %v4430_v26  ;;  %v6846_v50 = vld [vmem:[%s9910_s4 + $0x130] sm:$0xff]  }
0x19a0   : > { %v4458_v35 = vmul.f32 %v4438_v24, %v4438_v24  ;;  %v4441_v44 = vadd.f32 %v9645_v60, %v4440_v6  ;;  %v6634_v2 = vpop.f32.mrb[215].mxu1  ;;  %6678 = vmatpush3.bf16.msra.mxu1 %v6846_v50 }
0x19a1   : > { %v4537_v38 = vmul.f32 %v4527_v25, %v4433_v34 }
0x19a2   : > { %v4468_v55 = vmul.f32 %v4458_v35, %v4438_v24  ;;  %v4459_v59 = vmul.f32 %v4441_v44, %v4441_v44  ;;  %v5794_v35 = vld [vmem:[%s9911_s5 + $0x1b] ss:$0 sm:$0xff] }
0x19a3   : > { %v4560_v9 = vpack.c.bf16 %v4537_v38, %v4536_v23 }
0x19a4   : > { %v4478_v27 = vmul.f32 0.044715, %v4468_v55  ;;  %v4469_v20 = vmul.f32 %v4459_v59, %v4441_v44 }
0x19a5   : > { %6664 = vmatmul.mubr.bf16.gmra.mrb[188].mxu0 %v4560_v9  ;;  %v4445_v43 = vpop.f32.mrb[216].mxu1 }
0x19a6   : > { %v4488_v61 = vadd.f32 %v4478_v27, %v4438_v24  ;;  %v4479_v37 = vmul.f32 0.044715, %v4469_v20  ;;  %v4446_v58 = vadd.f32 %v9645_v60, %v4445_v43  ;;  %v6637_v53 = vpop.f32.mrb[217].mxu1  ;;  %6667 = vmatprep.mubr.msk.bf16.mxu0 %vm7271_vm0, %v7270_v1 }
0x19a7   : > { %v4448_v8 = vpop.f32.mrb[218].mxu1 }
0x19a8   : > { %v4498_v36 = vmul.f32 0.7978846, %v4488_v61  ;;  %v4489_v18 = vadd.f32 %v4479_v37, %v4441_v44  ;;  %v4460_v26 = vmul.f32 %v4446_v58, %v4446_v58  ;;  %v4449_v34 = vadd.f32 %v9645_v60, %v4448_v8  ;;  %v6638_v62 = vpop.f32.mrb[219].mxu1 }
0x19aa   : > { %7186 = vtanh.f32 %v4498_v36  ;;  %v4499_v21 = vmul.f32 0.7978846, %v4489_v18  ;;  %v4470_v33 = vmul.f32 %v4460_v26, %v4446_v58  ;;  %v4461_v28 = vmul.f32 %v4449_v34, %v4449_v34 }
0x19ac   : > { %7188 = vtanh.f32 %v4499_v21  ;;  %v4480_v42 = vmul.f32 0.044715, %v4470_v33  ;;  %v4471_v51 = vmul.f32 %v4461_v28, %v4449_v34 }
0x19ae   : > { %v4490_v17 = vadd.f32 %v4480_v42, %v4446_v58  ;;  %v4481_v7 = vmul.f32 0.044715, %v4471_v51 }
0x19b0   : > { %v4500_v39 = vmul.f32 0.7978846, %v4490_v17  ;;  %v4491_v56 = vadd.f32 %v4481_v7, %v4449_v34 }
0x19b2   : > { %7190 = vtanh.f32 %v4500_v39  ;;  %v4501_v16 = vmul.f32 0.7978846, %v4491_v56 }
0x19b4   : > { %v7187_v30 = vpop.eup %7186  ;;  %7192 = vtanh.f32 %v4501_v16 }
0x19b5   : > { %v4518_v48 = vadd.f32 1.0, %v7187_v30 }
0x19b6   : > { %v7189_v63 = vpop.eup %7188 }
0x19b7   : > { %v4519_v47 = vadd.f32 1.0, %v7189_v63  ;;  %v4528_v60 = vmul.f32 0.5, %v4518_v48 }
0x19b9   : > { %v4529_v5 = vmul.f32 0.5, %v4519_v47  ;;  %v4538_v57 = vmul.f32 %v4528_v60, %v4438_v24  ;;  %v5784_v24 = vld [vmem:[%s9911_s5 + $0x1a] ss:$0 sm:$0xff] }
0x19bb   : > { %v4539_v14 = vmul.f32 %v4529_v5, %v4441_v44 }
0x19bc   : > { %v7191_v40 = vpop.eup %7190 }
0x19bd   : > { %v4561_v31 = vpack.c.bf16 %v4539_v14, %v4538_v57  ;;  %v4520_v11 = vadd.f32 1.0, %v7191_v40 }
0x19be   : > { %v7193_v15 = vpop.eup %7192 }
0x19bf   : > { %6668 = vmatmul.mubr.bf16.gmra.mrb[192].mxu0 %v4561_v31  ;;  %v4521_v12 = vadd.f32 1.0, %v7193_v15  ;;  %v4530_v46 = vmul.f32 0.5, %v4520_v11 }
0x19c0   : > { %6671 = vmatprep.mubr.msk.bf16.mxu0 %vm7271_vm0, %v7270_v1 }
0x19c1   : > { %v4531_v4 = vmul.f32 0.5, %v4521_v12  ;;  %v4540_v54 = vmul.f32 %v4530_v46, %v4446_v58  ;;  %v6847_v12 = vld [vmem:[%s9910_s4 + $0x138] sm:$0xff]  }
0x19c2   : > { %6700 = vmatpush3.bf16.msra.mxu0 %v6847_v12  ;;  %v9719_v46 = vld [vmem:[%s9911_s5 + $0x1c] ss:$0 sm:$0xff] }
0x19c3   : > { %v4541_v41 = vmul.f32 %v4531_v4, %v4449_v34 }
0x19c5   : > { %v4562_v32 = vpack.c.bf16 %v4541_v41, %v4540_v54 }
0x19c7   : > { %6672 = vmatmul.mubr.bf16.gmra.mrb[196].mxu0 %v4562_v32 }
0x19c8   : > { %6701 = vmatprep.mubr.msk.bf16.mxu0 %vm7271_vm0, %v7270_v1 }
0x1a68   : > { %v4650_v13 = vpop.f32.mrb[180].mxu0 }
0x1a69   : > { %v4651_v6 = vadd.f32 %v5784_v24, %v4650_v13  ;;  %v6657_v25 = vpop.f32.mrb[181].mxu0 }
0x1a6a   : > { %v4653_v44 = vpop.f32.mrb[182].mxu0 }
0x1a6b   : > { %v4654_v2 = vadd.f32 %v5784_v24, %v4653_v44  ;;  %v6658_v23 = vpop.f32.mrb[183].mxu0  ;;  %v4694_v38 = vmul.f32 %v5794_v35, %v4651_v6 }
0x1a6d   : > { %v4695_v55 = vmul.f32 %v5794_v35, %v4654_v2 }
0x1a6f   : > { %v4712_v59 = vpack.c.bf16 %v4695_v55, %v4694_v38 }
0x1a70   : > { %v4658_v9 = vpop.f32.mrb[184].mxu0 }
0x1a71   : > { %v4659_v27 = vadd.f32 %v5784_v24, %v4658_v9  ;;  %v6661_v20 = vpop.f32.mrb[185].mxu0  ;;  %6680 = vmatmul.mubr.msk.bf16.vlgmr.msra.gmra.mrb[220].mxu1 %vm411_vm2, %v4712_v59 }
0x1a72   : > { %v4661_v43 = vpop.f32.mrb[186].mxu0  ;;  %6683 = vmatprep.mubr.msk.bf16.mxu1 %vm7271_vm0, %v7270_v1 }
0x1a73   : > { %v4662_v61 = vadd.f32 %v5784_v24, %v4661_v43  ;;  %v6662_v37 = vpop.f32.mrb[187].mxu0  ;;  %v9679_v58 = vmul.f32 %v5794_v35, %v4659_v27 }
0x1a75   : > { %v9681_v53 = vmul.f32 %v5794_v35, %v4662_v61 }
0x1a77   : > { %v4713_v8 = vpack.c.bf16 %v9681_v53, %v9679_v58 }
0x1a78   : > { %v4666_v36 = vpop.f32.mrb[188].mxu0 }
0x1a79   : > { %v4667_v18 = vadd.f32 %v5784_v24, %v4666_v36  ;;  %v6665_v26 = vpop.f32.mrb[189].mxu0  ;;  %6684 = vmatmul.mubr.msk.bf16.gmra.mrb[224].mxu1 %vm411_vm2, %v4713_v8 }
0x1a7a   : > { %v4669_v34 = vpop.f32.mrb[190].mxu0  ;;  %6687 = vmatprep.mubr.msk.bf16.mxu1 %vm7271_vm0, %v7270_v1 }
0x1a7b   : > { %v4670_v62 = vadd.f32 %v5784_v24, %v4669_v34  ;;  %v6666_v21 = vpop.f32.mrb[191].mxu0  ;;  %v9688_v33 = vmul.f32 %v5794_v35, %v4667_v18 }
0x1a7d   : > { %v9690_v28 = vmul.f32 %v5794_v35, %v4670_v62 }
0x1a7f   : > { %v4714_v42 = vpack.c.bf16 %v9690_v28, %v9688_v33 }
0x1a81   : > { %6688 = vmatmul.mubr.msk.bf16.gmra.mrb[228].mxu1 %vm411_vm2, %v4714_v42 }
0x1a82   : > { %6691 = vmatprep.mubr.msk.bf16.mxu1 %vm7271_vm0, %v7270_v1 }
0x1a92   : > { %v4674_v51 = vpop.f32.mrb[192].mxu0 }
0x1a93   : > { %v4675_v17 = vadd.f32 %v5784_v24, %v4674_v51  ;;  %v6669_v7 = vpop.f32.mrb[193].mxu0 }
0x1a94   : > { %v4677_v39 = vpop.f32.mrb[194].mxu0 }
0x1a95   : > { %v4678_v56 = vadd.f32 %v5784_v24, %v4677_v39  ;;  %v6670_v16 = vpop.f32.mrb[195].mxu0  ;;  %v9697_v30 = vmul.f32 %v5794_v35, %v4675_v17 }
0x1a97   : > { %v9699_v48 = vmul.f32 %v5794_v35, %v4678_v56 }
0x1a99   : > { %v4715_v63 = vpack.c.bf16 %v9699_v48, %v9697_v30 }
0x1a9a   : > { %v4682_v47 = vpop.f32.mrb[196].mxu0 }
0x1a9b   : > { %v4683_v60 = vadd.f32 %v5784_v24, %v4682_v47  ;;  %v6673_v5 = vpop.f32.mrb[197].mxu0  ;;  %6692 = vmatmul.mubr.msk.bf16.gmra.mrb[232].mxu1 %vm411_vm2, %v4715_v63 }
0x1a9c   : > { %v4685_v57 = vpop.f32.mrb[198].mxu0  ;;  %6695 = vmatprep.mubr.msk.bf16.mxu1 %vm7271_vm0, %v7270_v1 }
0x1a9d   : > { %v4686_v14 = vadd.f32 %v5784_v24, %v4685_v57  ;;  %v6674_v40 = vpop.f32.mrb[199].mxu0  ;;  %v9706_v31 = vmul.f32 %v5794_v35, %v4683_v60 }
0x1a9f   : > { %v9708_v11 = vmul.f32 %v5794_v35, %v4686_v14 }
0x1aa1   : > { %v4716_v15 = vpack.c.bf16 %v9708_v11, %v9706_v31 }
0x1aa3   : > { %6696 = vmatmul.mubr.msk.bf16.gmra.mrb[236].mxu1 %vm411_vm2, %v4716_v15 }
0x1b44   : > { %v4782_v4 = vpop.f32.mrb[220].mxu1 }
0x1b45   : > { %v4783_v54 = vadd.f32 %v9719_v46, %v4782_v4  ;;  %v6681_v41 = vpop.f32.mrb[221].mxu1 }
0x1b46   : > { %v4785_v32 = vpop.f32.mrb[222].mxu1 }
0x1b47   : > { %v4821_v50 = vmul.f32 %v4783_v54, %v4783_v54  ;;  %v4786_v24 = vadd.f32 %v9719_v46, %v4785_v32  ;;  %v6682_v13 = vpop.f32.mrb[223].mxu1 }
0x1b49   : > { %v4831_v6 = vmul.f32 %v4821_v50, %v4783_v54  ;;  %v4822_v25 = vmul.f32 %v4786_v24, %v4786_v24 }
0x1b4b   : > { %v4841_v35 = vmul.f32 0.044715, %v4831_v6  ;;  %v4832_v44 = vmul.f32 %v4822_v25, %v4786_v24 }
0x1b4c   : > { %v4790_v2 = vpop.f32.mrb[224].mxu1 }
0x1b4d   : > { %v4851_v23 = vadd.f32 %v4841_v35, %v4783_v54  ;;  %v4842_v38 = vmul.f32 0.044715, %v4832_v44  ;;  %v4791_v55 = vadd.f32 %v9719_v46, %v4790_v2  ;;  %v6685_v59 = vpop.f32.mrb[225].mxu1 }
0x1b4e   : > { %v4793_v9 = vpop.f32.mrb[226].mxu1 }
0x1b4f   : > { %v4861_v27 = vmul.f32 0.7978846, %v4851_v23  ;;  %v4852_v20 = vadd.f32 %v4842_v38, %v4786_v24  ;;  %v4823_v43 = vmul.f32 %v4791_v55, %v4791_v55  ;;  %v4794_v61 = vadd.f32 %v9719_v46, %v4793_v9  ;;  %v6686_v37 = vpop.f32.mrb[227].mxu1 }
0x1b51   : > { %7194 = vtanh.f32 %v4861_v27  ;;  %v4862_v8 = vmul.f32 0.7978846, %v4852_v20  ;;  %v4833_v36 = vmul.f32 %v4823_v43, %v4791_v55  ;;  %v4824_v18 = vmul.f32 %v4794_v61, %v4794_v61 }
0x1b53   : > { %7196 = vtanh.f32 %v4862_v8  ;;  %v4843_v26 = vmul.f32 0.044715, %v4833_v36  ;;  %v4834_v34 = vmul.f32 %v4824_v18, %v4794_v61 }
0x1b54   : > { %v4798_v62 = vpop.f32.mrb[228].mxu1 }
0x1b55   : > { %v4853_v21 = vadd.f32 %v4843_v26, %v4791_v55  ;;  %v4844_v42 = vmul.f32 0.044715, %v4834_v34  ;;  %v4799_v51 = vadd.f32 %v9719_v46, %v4798_v62  ;;  %v6689_v17 = vpop.f32.mrb[229].mxu1 }
0x1b56   : > { %v4801_v7 = vpop.f32.mrb[230].mxu1 }
0x1b57   : > { %v4863_v39 = vmul.f32 0.7978846, %v4853_v21  ;;  %v4854_v56 = vadd.f32 %v4844_v42, %v4794_v61  ;;  %v4825_v16 = vmul.f32 %v4799_v51, %v4799_v51  ;;  %v4802_v63 = vadd.f32 %v9719_v46, %v4801_v7  ;;  %v6690_v47 = vpop.f32.mrb[231].mxu1 }
0x1b59   : > { %7198 = vtanh.f32 %v4863_v39  ;;  %v4864_v60 = vmul.f32 0.7978846, %v4854_v56  ;;  %v4835_v5 = vmul.f32 %v4825_v16, %v4799_v51  ;;  %v4826_v57 = vmul.f32 %v4802_v63, %v4802_v63 }
0x1b5b   : > { %v7195_v14 = vpop.eup %7194  ;;  %7200 = vtanh.f32 %v4864_v60  ;;  %v4845_v40 = vmul.f32 0.044715, %v4835_v5  ;;  %v4836_v15 = vmul.f32 %v4826_v57, %v4802_v63 }
0x1b5c   : > { %v4881_v12 = vadd.f32 1.0, %v7195_v14 }
0x1b5d   : > { %v7197_v4 = vpop.eup %7196  ;;  %v4855_v41 = vadd.f32 %v4845_v40, %v4799_v51  ;;  %v4846_v32 = vmul.f32 0.044715, %v4836_v15 }
0x1b5e   : > { %v4891_v50 = vmul.f32 0.5, %v4881_v12  ;;  %v4882_v13 = vadd.f32 1.0, %v7197_v4 }
0x1b5f   : > { %v4865_v6 = vmul.f32 0.7978846, %v4855_v41  ;;  %v4856_v25 = vadd.f32 %v4846_v32, %v4802_v63 }
0x1b60   : > { %v4892_v35 = vmul.f32 0.5, %v4882_v13  ;;  %v4901_v2 = vmul.f32 %v4891_v50, %v4783_v54 }
0x1b61   : > { %7202 = vtanh.f32 %v4865_v6  ;;  %v4866_v44 = vmul.f32 0.7978846, %v4856_v25 }
0x1b62   : > { %v4902_v23 = vmul.f32 %v4892_v35, %v4786_v24 }
0x1b63   : > { %v7199_v38 = vpop.eup %7198  ;;  %7204 = vtanh.f32 %v4866_v44 }
0x1b64   : > { %v4911_v59 = vpack.c.bf16 %v4902_v23, %v4901_v2  ;;  %v4883_v9 = vadd.f32 1.0, %v7199_v38 }
0x1b65   : > { %v7201_v27 = vpop.eup %7200 }
0x1b66   : > { %v4893_v20 = vmul.f32 0.5, %v4883_v9  ;;  %v4884_v43 = vadd.f32 1.0, %v7201_v27  ;;  %6702 = vmatmul.mubr.msk.bf16.vlgmr.msra.gmra.mrb[200].mxu0 %vm320_vm1, %v4911_v59 }
0x1b67   : > { %6705 = vmatprep.mubr.msk.bf16.mxu0 %vm7271_vm0, %v7270_v1 }
0x1b68   : > { %v4894_v37 = vmul.f32 0.5, %v4884_v43  ;;  %v4903_v8 = vmul.f32 %v4893_v20, %v4791_v55 }
0x1b6a   : > { %v4904_v36 = vmul.f32 %v4894_v37, %v4794_v61 }
0x1b6b   : > { %v7203_v18 = vpop.eup %7202 }
0x1b6c   : > { %v4885_v26 = vadd.f32 1.0, %v7203_v18  ;;  %v4912_v34 = vpack.c.bf16 %v4904_v36, %v4903_v8 }
0x1b6d   : > { %v7205_v54 = vpop.eup %7204 }
0x1b6e   : > { %v4895_v24 = vmul.f32 0.5, %v4885_v26  ;;  %v4886_v62 = vadd.f32 1.0, %v7205_v54  ;;  %6706 = vmatmul.mubr.msk.bf16.gmra.mrb[204].mxu0 %vm320_vm1, %v4912_v34  ;;  %v4806_v21 = vpop.f32.mrb[232].mxu1 }
0x1b6f   : > { %v4807_v42 = vadd.f32 %v9719_v46, %v4806_v21  ;;  %v6693_v17 = vpop.f32.mrb[233].mxu1  ;;  %6709 = vmatprep.mubr.msk.bf16.mxu0 %vm7271_vm0, %v7270_v1 }
0x1b70   : > { %v4896_v7 = vmul.f32 0.5, %v4886_v62  ;;  %v4809_v39 = vpop.f32.mrb[234].mxu1  ;;  %v4905_v16 = vmul.f32 %v4895_v24, %v4799_v51 }
0x1b71   : > { %v4827_v56 = vmul.f32 %v4807_v42, %v4807_v42  ;;  %v4810_v55 = vadd.f32 %v9719_v46, %v4809_v39  ;;  %v6694_v61 = vpop.f32.mrb[235].mxu1 }
0x1b72   : > { %v4906_v47 = vmul.f32 %v4896_v7, %v4802_v63 }
0x1b73   : > { %v4837_v60 = vmul.f32 %v4827_v56, %v4807_v42  ;;  %v4828_v5 = vmul.f32 %v4810_v55, %v4810_v55 }
0x1b74   : > { %v4913_v57 = vpack.c.bf16 %v4906_v47, %v4905_v16 }
0x1b75   : > { %v4847_v14 = vmul.f32 0.044715, %v4837_v60  ;;  %v4838_v40 = vmul.f32 %v4828_v5, %v4810_v55 }
0x1b76   : > { %6710 = vmatmul.mubr.msk.bf16.gmra.mrb[208].mxu0 %vm320_vm1, %v4913_v57  ;;  %v4814_v15 = vpop.f32.mrb[236].mxu1  ;;  %v5811_v57 = vld [vmem:[%s9911_s5 + $0x1d] ss:$0 sm:$0xff] }
0x1b77   : > { %v4857_v12 = vadd.f32 %v4847_v14, %v4807_v42  ;;  %v4848_v4 = vmul.f32 0.044715, %v4838_v40  ;;  %v4815_v41 = vadd.f32 %v9719_v46, %v4814_v15  ;;  %v6697_v32 = vpop.f32.mrb[237].mxu1  ;;  %6713 = vmatprep.mubr.msk.bf16.mxu0 %vm7271_vm0, %v7270_v1 }
0x1b78   : > { %v4817_v50 = vpop.f32.mrb[238].mxu1 }
0x1b79   : > { %v4867_v13 = vmul.f32 0.7978846, %v4857_v12  ;;  %v4858_v51 = vadd.f32 %v4848_v4, %v4810_v55  ;;  %v4829_v63 = vmul.f32 %v4815_v41, %v4815_v41  ;;  %v4818_v6 = vadd.f32 %v9719_v46, %v4817_v50  ;;  %v6698_v25 = vpop.f32.mrb[239].mxu1 }
0x1b7b   : > { %7206 = vtanh.f32 %v4867_v13  ;;  %v4868_v35 = vmul.f32 0.7978846, %v4858_v51  ;;  %v4839_v44 = vmul.f32 %v4829_v63, %v4815_v41  ;;  %v4830_v2 = vmul.f32 %v4818_v6, %v4818_v6 }
0x1b7d   : > { %7208 = vtanh.f32 %v4868_v35  ;;  %v4849_v23 = vmul.f32 0.044715, %v4839_v44  ;;  %v4840_v38 = vmul.f32 %v4830_v2, %v4818_v6 }
0x1b7f   : > { %v4859_v59 = vadd.f32 %v4849_v23, %v4815_v41  ;;  %v4850_v9 = vmul.f32 0.044715, %v4840_v38 }
0x1b81   : > { %v4869_v27 = vmul.f32 0.7978846, %v4859_v59  ;;  %v4860_v20 = vadd.f32 %v4850_v9, %v4818_v6 }
0x1b83   : > { %7210 = vtanh.f32 %v4869_v27  ;;  %v4870_v43 = vmul.f32 0.7978846, %v4860_v20 }
0x1b85   : > { %v7207_v37 = vpop.eup %7206  ;;  %7212 = vtanh.f32 %v4870_v43 }
0x1b86   : > { %v4887_v8 = vadd.f32 1.0, %v7207_v37 }
0x1b87   : > { %v7209_v36 = vpop.eup %7208 }
0x1b88   : > { %v4897_v18 = vmul.f32 0.5, %v4887_v8  ;;  %v4888_v46 = vadd.f32 1.0, %v7209_v36 }
0x1b8a   : > { %v4898_v26 = vmul.f32 0.5, %v4888_v46  ;;  %v4907_v34 = vmul.f32 %v4897_v18, %v4807_v42 }
0x1b8c   : > { %v4908_v54 = vmul.f32 %v4898_v26, %v4810_v55 }
0x1b8d   : > { %v7211_v24 = vpop.eup %7210 }
0x1b8e   : > { %v4889_v62 = vadd.f32 1.0, %v7211_v24  ;;  %v4914_v21 = vpack.c.bf16 %v4908_v54, %v4907_v34 }
0x1b8f   : > { %v7213_v17 = vpop.eup %7212 }
0x1b90   : > { %v4899_v7 = vmul.f32 0.5, %v4889_v62  ;;  %v4890_v39 = vadd.f32 1.0, %v7213_v17  ;;  %6714 = vmatmul.mubr.msk.bf16.gmra.mrb[212].mxu0 %vm320_vm1, %v4914_v21 }
0x1b91   : > { %6717 = vmatprep.mubr.msk.bf16.mxu0 %vm7271_vm0, %v7270_v1 }
0x1b92   : > { %v4900_v56 = vmul.f32 0.5, %v4890_v39  ;;  %v4909_v61 = vmul.f32 %v4899_v7, %v4815_v41 }
0x1b94   : > { %v4910_v16 = vmul.f32 %v4900_v56, %v4818_v6 }
0x1b96   : > { %v4915_v47 = vpack.c.bf16 %v4910_v16, %v4909_v61 }
0x1b98   : > { %6718 = vmatmul.mubr.msk.bf16.gmra.mrb[216].mxu0 %vm320_vm1, %v4915_v47 }
0x1c39   : > { %v4975_v60 = vpop.f32.mrb[200].mxu0 }
0x1c3a   : > { %v6703_v42 = vpop.f32.mrb[201].mxu0 }
0x1c3b   : > { %v4977_v55 = vpop.f32.mrb[202].mxu0 }
0x1c3c   : > { %v6704_v5 = vpop.f32.mrb[203].mxu0 }
0x1c41   : > { %v4981_v14 = vpop.f32.mrb[204].mxu0 }
0x1c42   : > { %v4982_v40 = vadd.f32 %v5811_v57, %v4981_v14  ;;  %v6707_v15 = vpop.f32.mrb[205].mxu0 }
0x1c43   : > { %v4984_v12 = vpop.f32.mrb[206].mxu0 }
0x1c44   : > { %v5012_v1 = vadd.f32 %v4982_v40, %v9679_v58  ;;  %v4985_v4 = vadd.f32 %v5811_v57, %v4984_v12  ;;  %v6708_v41 = vpop.f32.mrb[207].mxu0 }
0x1c46   : > { %v5013_v32 = vadd.f32 %v4985_v4, %v9681_v53  ;;  %v5020_v50 = vadd.f32 %v5012_v1, %v9437_v52 }
0x1c48   : > { %v5030_v13 = vsel %vm411_vm2, %v5020_v50, 0.0  ;;  %v5021_v51 = vadd.f32 %v5013_v32, %v9441_v22 }
0x1c49   : > { %5031 = vadd.xlane.f32.xlu1 %v5030_v13  ;;  %v4989_v63 = vpop.f32.mrb[208].mxu0 }
0x1c4a   : > { %v4990_v6 = vadd.f32 %v5811_v57, %v4989_v63  ;;  %v6711_v25 = vpop.f32.mrb[209].mxu0  ;;  %v5033_v35 = vsel %vm411_vm2, %v5021_v51, 0.0 }
0x1c4b   : > { %5034 = vadd.xlane.f32.xlu0 %v5033_v35  ;;  %v4992_v44 = vpop.f32.mrb[210].mxu0 }
0x1c4c   : > { %v5014_v58 = vadd.f32 %v4990_v6, %v9688_v33  ;;  %v4993_v2 = vadd.f32 %v5811_v57, %v4992_v44  ;;  %v6712_v23 = vpop.f32.mrb[211].mxu0 }
0x1c4e   : > { %v5015_v53 = vadd.f32 %v4993_v2, %v9690_v28  ;;  %v5022_v52 = vadd.f32 %v5014_v58, %v9449_v45 }
0x1c50   : > { %v5036_v38 = vsel %vm411_vm2, %v5022_v52, 0.0  ;;  %v5023_v22 = vadd.f32 %v5015_v53, %v9453_v19 }
0x1c51   : > { %5037 = vadd.xlane.f32.xlu1 %v5036_v38 }
0x1c52   : > { %v5039_v59 = vsel %vm411_vm2, %v5023_v22, 0.0 }
0x1c53   : > { %5040 = vadd.xlane.f32.xlu0 %v5039_v59 }
0x1c63   : > { %v4997_v9 = vpop.f32.mrb[212].mxu0 }
0x1c64   : > { %v4998_v27 = vadd.f32 %v5811_v57, %v4997_v9  ;;  %v6715_v20 = vpop.f32.mrb[213].mxu0  ;;  %v6848_v9 = vld [vmem:[%s9908_s2 + $0x8] sm:$0xff]  }
0x1c65   : > { %v5000_v43 = vpop.f32.mrb[214].mxu0  ;;  %v6849_v20 = vld [vmem:[%s9908_s2 + $0x10] sm:$0xff]   ;;  %6721 = vmatprep.subr.bf16.mxu1 %v6848_v9 }
0x1c66   : > { %v5016_v33 = vadd.f32 %v4998_v27, %v9697_v30  ;;  %v5001_v37 = vadd.f32 %v5811_v57, %v5000_v43  ;;  %v6716_v8 = vpop.f32.mrb[215].mxu0  ;;  %6722 = vmatpush3.bf16.msra.mxu1 %v6848_v9 }
0x1c67   : > { %6723 = vmatprep.subr.bf16.mxu1 %v6849_v20 }
0x1c68   : > { %v5017_v28 = vadd.f32 %v5001_v37, %v9699_v48  ;;  %v5024_v45 = vadd.f32 %v5016_v33, %v9461_v10 }
0x1c6a   : > { %v5042_v36 = vsel %vm411_vm2, %v5024_v45, 0.0  ;;  %v5025_v19 = vadd.f32 %v5017_v28, %v9465_v29  ;;  %6724 = vmatpush3.bf16.msra.mxu1 %v6849_v20 }
0x1c6b   : > { %5043 = vadd.xlane.f32.xlu1 %v5042_v36  ;;  %v5005_v18 = vpop.f32.mrb[216].mxu0 }
0x1c6c   : > { %v5006_v46 = vadd.f32 %v5811_v57, %v5005_v18  ;;  %v6719_v26 = vpop.f32.mrb[217].mxu0  ;;  %v5045_v34 = vsel %vm411_vm2, %v5025_v19, 0.0 }
0x1c6d   : > { %5046 = vadd.xlane.f32.xlu0 %v5045_v34  ;;  %v5008_v54 = vpop.f32.mrb[218].mxu0 }
0x1c6e   : > { %v5018_v30 = vadd.f32 %v5006_v46, %v9706_v31  ;;  %v5009_v24 = vadd.f32 %v5811_v57, %v5008_v54  ;;  %v6720_v62 = vpop.f32.mrb[219].mxu0 }
0x1c70   : > { %v5019_v48 = vadd.f32 %v5009_v24, %v9708_v11  ;;  %v5026_v10 = vadd.f32 %v5018_v30, %v9473_v49  ;;  %v5818_v30 = vld [vmem:[%s9909_s3] ss:$0 sm:$0xff] }
0x1c72   : > { %v5048_v21 = vsel %vm411_vm2, %v5026_v10, 0.0  ;;  %v5027_v29 = vadd.f32 %v5019_v48, %v9477_v0 }
0x1c73   : > { %5049 = vadd.xlane.f32.xlu1 %v5048_v21  ;;  %v5819_v21 = vld [vmem:[%s9909_s3 + $0x1] ss:$0 sm:$0xff] }
0x1c74   : > { %v5051_v17 = vsel %vm411_vm2, %v5027_v29, 0.0 }
0x1c75   : > { %5052 = vadd.xlane.f32.xlu0 %v5051_v17 }
0x1cd6   : > { %v5032_v7 = vpop.xlane.xlu1 %5031 }
0x1cd7   : > { %v5054_v39 = vmul.f32 0.03125, %v5032_v7 }
0x1cd8   : > { %v5035_v56 = vpop.xlane.xlu0 %5034 }
0x1cd9   : > { %v9771_v61 = vsub.f32 %v5020_v50, %v5054_v39  ;;  %v5055_v31 = vmul.f32 0.03125, %v5035_v56 }
0x1cdb   : > { %v9773_v16 = vsub.f32 %v5021_v51, %v5055_v31  ;;  %v5070_v11 = vmul.f32 %v9771_v61, %v9771_v61 }
0x1cdd   : > { %v5078_v49 = vsel %vm411_vm2, %v5070_v11, 0.0  ;;  %v5071_v0 = vmul.f32 %v9773_v16, %v9773_v16 }
0x1cde   : > { %v5038_v47 = vpop.xlane.xlu1 %5037  ;;  %5079 = vadd.xlane.f32.xlu1 %v5078_v49 }
0x1cdf   : > { %v5056_v60 = vmul.f32 0.03125, %v5038_v47  ;;  %v5081_v42 = vsel %vm411_vm2, %v5071_v0, 0.0 }
0x1ce0   : > { %v5041_v55 = vpop.xlane.xlu0 %5040  ;;  %5082 = vadd.xlane.f32.xlu0 %v5081_v42 }
0x1ce1   : > { %v9781_v5 = vsub.f32 %v5022_v52, %v5056_v60  ;;  %v5057_v57 = vmul.f32 0.03125, %v5041_v55 }
0x1ce3   : > { %v9783_v14 = vsub.f32 %v5023_v22, %v5057_v57  ;;  %v5072_v40 = vmul.f32 %v9781_v5, %v9781_v5 }
0x1ce5   : > { %v5084_v15 = vsel %vm411_vm2, %v5072_v40, 0.0  ;;  %v5073_v12 = vmul.f32 %v9783_v14, %v9783_v14 }
0x1ce6   : > { %5085 = vadd.xlane.f32.xlu1 %v5084_v15 }
0x1ce7   : > { %v5087_v1 = vsel %vm411_vm2, %v5073_v12, 0.0 }
0x1ce8   : > { %5088 = vadd.xlane.f32.xlu0 %v5087_v1 }
0x1cf8   : > { %v5044_v4 = vpop.xlane.xlu1 %5043 }
0x1cf9   : > { %v5058_v41 = vmul.f32 0.03125, %v5044_v4 }
0x1cfa   : > { %v5047_v32 = vpop.xlane.xlu0 %5046 }
0x1cfb   : > { %v9791_v50 = vsub.f32 %v5024_v45, %v5058_v41  ;;  %v5059_v13 = vmul.f32 0.03125, %v5047_v32 }
0x1cfd   : > { %v9793_v51 = vsub.f32 %v5025_v19, %v5059_v13  ;;  %v5074_v63 = vmul.f32 %v9791_v50, %v9791_v50 }
0x1cff   : > { %v5090_v6 = vsel %vm411_vm2, %v5074_v63, 0.0  ;;  %v5075_v25 = vmul.f32 %v9793_v51, %v9793_v51 }
0x1d00   : > { %5091 = vadd.xlane.f32.xlu1 %v5090_v6  ;;  %v5050_v35 = vpop.xlane.xlu1 %5049 }
0x1d01   : > { %v5060_v44 = vmul.f32 0.03125, %v5050_v35  ;;  %v5093_v58 = vsel %vm411_vm2, %v5075_v25, 0.0 }
0x1d02   : > { %5094 = vadd.xlane.f32.xlu0 %v5093_v58  ;;  %v5053_v2 = vpop.xlane.xlu0 %5052 }
0x1d03   : > { %v9801_v23 = vsub.f32 %v5026_v10, %v5060_v44  ;;  %v5061_v53 = vmul.f32 0.03125, %v5053_v2 }
0x1d05   : > { %v9803_v52 = vsub.f32 %v5027_v29, %v5061_v53  ;;  %v5076_v38 = vmul.f32 %v9801_v23, %v9801_v23 }
0x1d07   : > { %v5096_v22 = vsel %vm411_vm2, %v5076_v38, 0.0  ;;  %v5077_v59 = vmul.f32 %v9803_v52, %v9803_v52 }
0x1d08   : > { %5097 = vadd.xlane.f32.xlu1 %v5096_v22 }
0x1d09   : > { %v5099_v27 = vsel %vm411_vm2, %v5077_v59, 0.0 }
0x1d0a   : > { %5100 = vadd.xlane.f32.xlu0 %v5099_v27 }
0x1d6b   : > { %v5080_v43 = vpop.xlane.xlu1 %5079 }
0x1d6c   : > { %v5102_v33 = vmul.f32 0.03125, %v5080_v43 }
0x1d6d   : > { %v5083_v37 = vpop.xlane.xlu0 %5082 }
0x1d6e   : > { %v5110_v8 = vadd.f32 1e-06, %v5102_v33  ;;  %v5103_v28 = vmul.f32 0.03125, %v5083_v37  ;;  %v6853_v37 = vld [vmem:[%s9908_s2 + $0x30] sm:$0xff]  }
0x1d70   : > { %7214 = vrsqrt.f32 %v5110_v8  ;;  %v5111_v45 = vadd.f32 1e-06, %v5103_v28  ;;  %v9850_v8 = vld [vmem:[%s9909_s3 + $0x2] ss:$0 sm:$0xff] }
0x1d72   : > { %7216 = vrsqrt.f32 %v5111_v45 }
0x1d73   : > { %v5086_v36 = vpop.xlane.xlu1 %5085 }
0x1d74   : > { %v5104_v19 = vmul.f32 0.03125, %v5086_v36 }
0x1d75   : > { %v5089_v18 = vpop.xlane.xlu0 %5088 }
0x1d76   : > { %v5112_v46 = vadd.f32 1e-06, %v5104_v19  ;;  %v5105_v26 = vmul.f32 0.03125, %v5089_v18 }
0x1d78   : > { %7218 = vrsqrt.f32 %v5112_v46  ;;  %v5113_v34 = vadd.f32 1e-06, %v5105_v26 }
0x1d7a   : > { %v7215_v54 = vpop.eup %7214  ;;  %7220 = vrsqrt.f32 %v5113_v34 }
0x1d7b   : > { %v5126_v24 = vmul.f32 %v7215_v54, %v9771_v61 }
0x1d7c   : > { %v7217_v62 = vpop.eup %7216 }
0x1d7d   : > { %v5127_v48 = vmul.f32 %v7217_v62, %v9773_v16  ;;  %v5138_v10 = vmul.f32 %v5818_v30, %v5126_v24 }
0x1d7f   : > { %v5139_v29 = vmul.f32 %v5818_v30, %v5127_v48  ;;  %v5150_v17 = vadd.f32 %v5819_v21, %v5138_v10 }
0x1d81   : > { %v5151_v7 = vadd.f32 %v5819_v21, %v5139_v29 }
0x1d82   : > { %v7219_v39 = vpop.eup %7218 }
0x1d83   : > { %v5128_v56 = vmul.f32 %v7219_v39, %v9781_v5  ;;  %v5162_v31 = vpack.c.bf16 %v5151_v7, %v5150_v17 }
0x1d84   : > { %v7221_v11 = vpop.eup %7220 }
0x1d85   : > { %v5140_v49 = vmul.f32 %v5818_v30, %v5128_v56  ;;  %v5129_v0 = vmul.f32 %v7221_v11, %v9783_v14  ;;  %6725 = vmatprep.mubr.msk.bf16.mxu1 %vm411_vm2, %v5162_v31 }
0x1d87   : > { %v5141_v61 = vmul.f32 %v5818_v30, %v5129_v0  ;;  %v5152_v16 = vadd.f32 %v5819_v21, %v5140_v49 }
0x1d89   : > { %v5153_v47 = vadd.f32 %v5819_v21, %v5141_v61 }
0x1d8b   : > { %v5163_v60 = vpack.c.bf16 %v5153_v47, %v5152_v16 }
0x1d8d   : > { %6726 = vmatmul.mubr.msk.bf16.vlgmr.msra.gmra.mrb[240].mxu1 %vm411_vm2, %v5163_v60  ;;  %v5092_v42 = vpop.xlane.xlu1 %5091 }
0x1d8e   : > { %v5106_v55 = vmul.f32 0.03125, %v5092_v42 }
0x1d8f   : > { %v5095_v57 = vpop.xlane.xlu0 %5094 }
0x1d90   : > { %v5114_v40 = vadd.f32 1e-06, %v5106_v55  ;;  %v5107_v15 = vmul.f32 0.03125, %v5095_v57 }
0x1d92   : > { %7222 = vrsqrt.f32 %v5114_v40  ;;  %v5115_v5 = vadd.f32 1e-06, %v5107_v15 }
0x1d94   : > { %7224 = vrsqrt.f32 %v5115_v5 }
0x1d95   : > { %v5098_v12 = vpop.xlane.xlu1 %5097 }
0x1d96   : > { %v5108_v1 = vmul.f32 0.03125, %v5098_v12 }
0x1d97   : > { %v5101_v4 = vpop.xlane.xlu0 %5100 }
0x1d98   : > { %v5116_v14 = vadd.f32 1e-06, %v5108_v1  ;;  %v5109_v41 = vmul.f32 0.03125, %v5101_v4 }
0x1d9a   : > { %7226 = vrsqrt.f32 %v5116_v14  ;;  %v5117_v32 = vadd.f32 1e-06, %v5109_v41 }
0x1d9c   : > { %v7223_v13 = vpop.eup %7222  ;;  %7228 = vrsqrt.f32 %v5117_v32 }
0x1d9d   : > { %v5130_v63 = vmul.f32 %v7223_v13, %v9791_v50 }
0x1d9e   : > { %v7225_v6 = vpop.eup %7224 }
0x1d9f   : > { %v5131_v25 = vmul.f32 %v7225_v6, %v9793_v51  ;;  %v5142_v35 = vmul.f32 %v5818_v30, %v5130_v63  ;;  %v6850_v51 = vld [vmem:[%s9908_s2 + $0x18] sm:$0xff]  }
0x1da0   : > { %6733 = vmatprep.subr.bf16.mxu1 %v6850_v51 }
0x1da1   : > { %v5143_v44 = vmul.f32 %v5818_v30, %v5131_v25  ;;  %v5154_v58 = vadd.f32 %v5819_v21, %v5142_v35  ;;  %6734 = vmatpush3.bf16.msra.mxu1 %v6850_v51 }
0x1da3   : > { %v5155_v2 = vadd.f32 %v5819_v21, %v5143_v44 }
0x1da4   : > { %v7227_v53 = vpop.eup %7226 }
0x1da5   : > { %v5132_v38 = vmul.f32 %v7227_v53, %v9801_v23  ;;  %v5164_v22 = vpack.c.bf16 %v5155_v2, %v5154_v58  ;;  %v6851_v23 = vld [vmem:[%s9908_s2 + $0x20] sm:$0xff]  }
0x1da6   : > { %v7229_v59 = vpop.eup %7228  ;;  %6735 = vmatprep.subr.bf16.mxu1 %v6851_v23 }
0x1da7   : > { %v5133_v9 = vmul.f32 %v7229_v59, %v9803_v52  ;;  %6729 = vmatprep.mubr.msk.bf16.mxu1 %vm411_vm2, %v5164_v22  ;;  %v5144_v27 = vmul.f32 %v5818_v30, %v5132_v38  ;;  %6736 = vmatpush3.bf16.msra.mxu1 %v6851_v23  ;;  %v6852_v52 = vld [vmem:[%s9908_s2 + $0x28] sm:$0xff]  }
0x1da8   : > { %6737 = vmatprep.subr.bf16.mxu1 %v6852_v52 }
0x1da9   : > { %v5145_v20 = vmul.f32 %v5818_v30, %v5133_v9  ;;  %v5156_v43 = vadd.f32 %v5819_v21, %v5144_v27 }
0x1dab   : > { %v5157_v50 = vadd.f32 %v5819_v21, %v5145_v20  ;;  %6738 = vmatpush3.bf16.msra.mxu1 %v6852_v52 }
0x1dac   : > { %6739 = vmatprep.subr.bf16.mxu1 %v6853_v37 }
0x1dad   : > { %v5165_v33 = vpack.c.bf16 %v5157_v50, %v5156_v43 }
0x1daf   : > { %6730 = vmatmul.mubr.msk.bf16.gmra.mrb[244].mxu1 %vm411_vm2, %v5165_v33 }
0x1db0   : > { %6740 = vmatpush3.bf16.msra.mxu1 %v6853_v37 }
0x1e60   : > { %v6727_v28 = vpop.f32.mrb[240].mxu1 }
0x1e61   : > { %v5238_v45 = vadd.f32 %v6727_v28, %v9850_v8  ;;  %v5229_v36 = vpop.f32.mrb[241].mxu1 }
0x1e62   : > { %v5230_v19 = vadd.f32 %v9850_v8, %v5229_v36  ;;  %v6728_v18 = vpop.f32.mrb[242].mxu1 }
0x1e63   : > { %v5262_v46 = vmul.f32 %v5238_v45, %v5238_v45  ;;  %v5241_v26 = vadd.f32 %v6728_v18, %v9850_v8  ;;  %v5232_v34 = vpop.f32.mrb[243].mxu1 }
0x1e64   : > { %v5260_v54 = vmul.f32 %v5230_v19, %v5230_v19  ;;  %v5233_v30 = vadd.f32 %v9850_v8, %v5232_v34 }
0x1e65   : > { %v5270_v24 = vmul.f32 %v5262_v46, %v5238_v45  ;;  %v5263_v62 = vmul.f32 %v5241_v26, %v5241_v26 }
0x1e66   : > { %v5268_v48 = vmul.f32 %v5260_v54, %v5230_v19  ;;  %v5261_v10 = vmul.f32 %v5233_v30, %v5233_v30 }
0x1e67   : > { %v5278_v21 = vmul.f32 0.044715, %v5270_v24  ;;  %v5271_v29 = vmul.f32 %v5263_v62, %v5241_v26 }
0x1e68   : > { %v5276_v17 = vmul.f32 0.044715, %v5268_v48  ;;  %v5269_v7 = vmul.f32 %v5261_v10, %v5233_v30 }
0x1e69   : > { %v5286_v39 = vadd.f32 %v5278_v21, %v5238_v45  ;;  %v5279_v56 = vmul.f32 0.044715, %v5271_v29 }
0x1e6a   : > { %v5284_v31 = vadd.f32 %v5276_v17, %v5230_v19  ;;  %v5277_v11 = vmul.f32 0.044715, %v5269_v7 }
0x1e6b   : > { %v5294_v49 = vmul.f32 0.7978846, %v5286_v39  ;;  %v5287_v0 = vadd.f32 %v5279_v56, %v5241_v26 }
0x1e6c   : > { %v5292_v61 = vmul.f32 0.7978846, %v5284_v31  ;;  %v5285_v16 = vadd.f32 %v5277_v11, %v5233_v30 }
0x1e6d   : > { %7230 = vtanh.f32 %v5294_v49  ;;  %v5295_v47 = vmul.f32 0.7978846, %v5287_v0 }
0x1e6e   : > { %7232 = vtanh.f32 %v5292_v61  ;;  %v5293_v60 = vmul.f32 0.7978846, %v5285_v16 }
0x1e6f   : > { %7234 = vtanh.f32 %v5295_v47 }
0x1e70   : > { %7236 = vtanh.f32 %v5293_v60 }
0x1e77   : > { %v7231_v42 = vpop.eup %7230 }
0x1e78   : > { %v7233_v55 = vpop.eup %7232  ;;  %v5310_v57 = vadd.f32 1.0, %v7231_v42 }
0x1e79   : > { %v7235_v40 = vpop.eup %7234  ;;  %v5308_v15 = vadd.f32 1.0, %v7233_v55  ;;  %v5827_v55 = vld [vmem:[%s9909_s3 + $0x3] ss:$0 sm:$0xff] }
0x1e7a   : > { %v7237_v5 = vpop.eup %7236  ;;  %v5318_v12 = vmul.f32 0.5, %v5310_v57  ;;  %v5311_v1 = vadd.f32 1.0, %v7235_v40 }
0x1e7b   : > { %v5316_v4 = vmul.f32 0.5, %v5308_v15  ;;  %v5309_v14 = vadd.f32 1.0, %v7237_v5 }
0x1e7c   : > { %v5319_v41 = vmul.f32 0.5, %v5311_v1  ;;  %v5326_v13 = vmul.f32 %v5318_v12, %v5238_v45 }
0x1e7d   : > { %v5317_v32 = vmul.f32 0.5, %v5309_v14  ;;  %v5324_v6 = vmul.f32 %v5316_v4, %v5230_v19 }
0x1e7e   : > { %v5327_v63 = vmul.f32 %v5319_v41, %v5241_v26 }
0x1e7f   : > { %v5325_v25 = vmul.f32 %v5317_v32, %v5233_v30 }
0x1e80   : > { %v5341_v35 = vpack.c.bf16 %v5327_v63, %v5326_v13 }
0x1e81   : > { %v5340_v44 = vpack.c.bf16 %v5325_v25, %v5324_v6 }
0x1e82   : > { %v6731_v58 = vpop.f32.mrb[244].mxu1 }
0x1e83   : > { %v5254_v2 = vadd.f32 %v6731_v58, %v9850_v8  ;;  %6741 = vmatprep.mubr.msk.bf16.mxu1 %vm5373_vm8, %v5340_v44  ;;  %v5245_v53 = vpop.f32.mrb[245].mxu1 }
0x1e84   : > { %v5246_v38 = vadd.f32 %v9850_v8, %v5245_v53  ;;  %6742 = vmatmul.mubr.msk.bf16.vlgmr.msra.gmra.mrb[248].mxu1 %vm5373_vm8, %v5341_v35  ;;  %v6732_v22 = vpop.f32.mrb[246].mxu1 }
0x1e85   : > { %v5266_v59 = vmul.f32 %v5254_v2, %v5254_v2  ;;  %v5257_v9 = vadd.f32 %v6732_v22, %v9850_v8  ;;  %v5248_v27 = vpop.f32.mrb[247].mxu1 }
0x1e86   : > { %v5264_v20 = vmul.f32 %v5246_v38, %v5246_v38  ;;  %v5249_v43 = vadd.f32 %v9850_v8, %v5248_v27 }
0x1e87   : > { %v5274_v50 = vmul.f32 %v5266_v59, %v5254_v2  ;;  %v5267_v33 = vmul.f32 %v5257_v9, %v5257_v9 }
0x1e88   : > { %v5272_v51 = vmul.f32 %v5264_v20, %v5246_v38  ;;  %v5265_v23 = vmul.f32 %v5249_v43, %v5249_v43 }
0x1e89   : > { %v5282_v52 = vmul.f32 0.044715, %v5274_v50  ;;  %v5275_v37 = vmul.f32 %v5267_v33, %v5257_v9 }
0x1e8a   : > { %v5280_v28 = vmul.f32 0.044715, %v5272_v51  ;;  %v5273_v45 = vmul.f32 %v5265_v23, %v5249_v43 }
0x1e8b   : > { %v5290_v36 = vadd.f32 %v5282_v52, %v5254_v2  ;;  %v5283_v19 = vmul.f32 0.044715, %v5275_v37 }
0x1e8c   : > { %v5288_v18 = vadd.f32 %v5280_v28, %v5246_v38  ;;  %v5281_v46 = vmul.f32 0.044715, %v5273_v45 }
0x1e8d   : > { %v5298_v26 = vmul.f32 0.7978846, %v5290_v36  ;;  %v5291_v34 = vadd.f32 %v5283_v19, %v5257_v9 }
0x1e8e   : > { %v5296_v54 = vmul.f32 0.7978846, %v5288_v18  ;;  %v5289_v30 = vadd.f32 %v5281_v46, %v5249_v43 }
0x1e8f   : > { %7238 = vtanh.f32 %v5298_v26  ;;  %v5299_v24 = vmul.f32 0.7978846, %v5291_v34 }
0x1e90   : > { %7240 = vtanh.f32 %v5296_v54  ;;  %v5297_v8 = vmul.f32 0.7978846, %v5289_v30 }
0x1e91   : > { %7242 = vtanh.f32 %v5299_v24 }
0x1e92   : > { %7244 = vtanh.f32 %v5297_v8 }
0x1e99   : > { %v7239_v62 = vpop.eup %7238 }
0x1e9a   : > { %v7241_v48 = vpop.eup %7240  ;;  %v5314_v10 = vadd.f32 1.0, %v7239_v62 }
0x1e9b   : > { %v7243_v21 = vpop.eup %7242  ;;  %v5312_v29 = vadd.f32 1.0, %v7241_v48 }
0x1e9c   : > { %v7245_v17 = vpop.eup %7244  ;;  %v5322_v7 = vmul.f32 0.5, %v5314_v10  ;;  %v5315_v39 = vadd.f32 1.0, %v7243_v21 }
0x1e9d   : > { %v5320_v56 = vmul.f32 0.5, %v5312_v29  ;;  %v5313_v31 = vadd.f32 1.0, %v7245_v17 }
0x1e9e   : > { %v5323_v11 = vmul.f32 0.5, %v5315_v39  ;;  %v5330_v0 = vmul.f32 %v5322_v7, %v5254_v2 }
0x1e9f   : > { %v5321_v49 = vmul.f32 0.5, %v5313_v31  ;;  %v5328_v16 = vmul.f32 %v5320_v56, %v5246_v38 }
0x1ea0   : > { %v5331_v61 = vmul.f32 %v5323_v11, %v5257_v9 }
0x1ea1   : > { %v5329_v47 = vmul.f32 %v5321_v49, %v5249_v43 }
0x1ea2   : > { %v5343_v60 = vpack.c.bf16 %v5331_v61, %v5330_v0 }
0x1ea3   : > { %v5342_v42 = vpack.c.bf16 %v5329_v47, %v5328_v16 }
0x1ea5   : > { %6745 = vmatprep.mubr.msk.bf16.mxu1 %vm5373_vm8, %v5342_v42 }
0x1ea6   : > { %6746 = vmatmul.mubr.msk.bf16.gmra.mrb[252].mxu1 %vm5373_vm8, %v5343_v60 }
0x1f57   : > { %v6743_v57 = vpop.f32.mrb[248].mxu1 }
0x1f58   : > { %v5429_v40 = vadd.f32 %v6743_v57, %v5827_v55  ;;  %v5420_v15 = vpop.f32.mrb[249].mxu1 }
0x1f59   : > { %v5421_v5 = vadd.f32 %v5827_v55, %v5420_v15  ;;  %v6744_v12 = vpop.f32.mrb[250].mxu1 }
0x1f5a   : > { %v5456_v1 = vmul.f32 0.5, %v5429_v40  ;;  %v5432_v4 = vadd.f32 %v6744_v12, %v5827_v55  ;;  %v5423_v14 = vpop.f32.mrb[251].mxu1 }
0x1f5b   : > { %v5454_v41 = vmul.f32 0.5, %v5421_v5  ;;  %v5424_v32 = vadd.f32 %v5827_v55, %v5423_v14 }
0x1f5c   : > { %7246 = vtanh.f32 %v5456_v1  ;;  %v5457_v13 = vmul.f32 0.5, %v5432_v4 }
0x1f5d   : > { %7248 = vtanh.f32 %v5454_v41  ;;  %v5455_v63 = vmul.f32 0.5, %v5424_v32 }
0x1f5e   : > { %7250 = vtanh.f32 %v5457_v13 }
0x1f5f   : > { %7252 = vtanh.f32 %v5455_v63 }
0x1f66   : > { %v7247_v6 = vpop.eup %7246 }
0x1f67   : > { %v7249_v25 = vpop.eup %7248  ;;  %v5472_v35 = vadd.f32 1.0, %v7247_v6 }
0x1f68   : > { %v7251_v44 = vpop.eup %7250  ;;  %v5470_v2 = vadd.f32 1.0, %v7249_v25 }
0x1f69   : > { %v7253_v53 = vpop.eup %7252  ;;  %v5480_v3 = vmul.f32 0.5, %v5472_v35  ;;  %v5473_v38 = vadd.f32 1.0, %v7251_v44 }
0x1f6a   : > { %v5478_v22 = vmul.f32 0.5, %v5470_v2  ;;  %v5471_v59 = vadd.f32 1.0, %v7253_v53 }
0x1f6b   : > { %v5488_v9 = vsel %vm9870_vm11, %v5480_v3, %v5429_v40  ;;  %v5481_v27 = vmul.f32 0.5, %v5473_v38 }
0x1f6c   : > { %5496 = vst [vmem:[%s9877_s23 + $0x10] sm:$0xff] %v5488_v9  ;;  %v5486_v20 = vsel %vm9870_vm11, %v5478_v22, %v5421_v5  ;;  %v5479_v43 = vmul.f32 0.5, %v5471_v59 }
0x1f6d   : > { %5494 = vst [vmem:[%s9877_s23] sm:$0xff] %v5486_v20  ;;  %v5489_v50 = vsel %vm9870_vm11, %v5481_v27, %v5432_v4 }
0x1f6e   : > { %5497 = vst [vmem:[%s9877_s23 + $0x18] sm:$0xff] %v5489_v50  ;;  %v5487_v33 = vsel %vm9870_vm11, %v5479_v43, %v5424_v32 }
0x1f6f   : > { %5495 = vst [vmem:[%s9877_s23 + $0x8] sm:$0xff] %v5487_v33 }
0x1f79   : > { %v6747_v51 = vpop.f32.mrb[252].mxu1 }
0x1f7a   : > { %v5445_v23 = vadd.f32 %v6747_v51, %v5827_v55  ;;  %v5436_v52 = vpop.f32.mrb[253].mxu1 }
0x1f7b   : > { %v5437_v37 = vadd.f32 %v5827_v55, %v5436_v52  ;;  %v6748_v28 = vpop.f32.mrb[254].mxu1 }
0x1f7c   : > { %v5460_v45 = vmul.f32 0.5, %v5445_v23  ;;  %v5448_v36 = vadd.f32 %v6748_v28, %v5827_v55  ;;  %v5439_v19 = vpop.f32.mrb[255].mxu1 }
0x1f7d   : > { %v5458_v18 = vmul.f32 0.5, %v5437_v37  ;;  %v5440_v46 = vadd.f32 %v5827_v55, %v5439_v19 }
0x1f7e   : > { %7254 = vtanh.f32 %v5460_v45  ;;  %v5461_v26 = vmul.f32 0.5, %v5448_v36 }
0x1f7f   : > { %7256 = vtanh.f32 %v5458_v18  ;;  %v5459_v34 = vmul.f32 0.5, %v5440_v46 }
0x1f80   : > { %7258 = vtanh.f32 %v5461_v26 }
0x1f81   : > { %7260 = vtanh.f32 %v5459_v34 }
0x1f88   : > { %v7255_v54 = vpop.eup %7254 }
0x1f89   : > { %v7257_v30 = vpop.eup %7256  ;;  %v5476_v24 = vadd.f32 1.0, %v7255_v54 }
0x1f8a   : > { %v7259_v8 = vpop.eup %7258  ;;  %v5474_v62 = vadd.f32 1.0, %v7257_v30 }
0x1f8b   : > { %v7261_v48 = vpop.eup %7260  ;;  %v5484_v10 = vmul.f32 0.5, %v5476_v24  ;;  %v5477_v21 = vadd.f32 1.0, %v7259_v8 }
0x1f8c   : > { %v5482_v29 = vmul.f32 0.5, %v5474_v62  ;;  %v5475_v17 = vadd.f32 1.0, %v7261_v48 }
0x1f8d   : > { %v5492_v7 = vsel %vm9870_vm11, %v5484_v10, %v5445_v23  ;;  %v5485_v39 = vmul.f32 0.5, %v5477_v21 }
0x1f8e   : > { %5500 = vst [vmem:[%s9877_s23 + $0x30] sm:$0xff] %v5492_v7  ;;  %v5490_v56 = vsel %vm9870_vm11, %v5482_v29, %v5437_v37  ;;  %v5483_v31 = vmul.f32 0.5, %v5475_v17 }
0x1f8f   : > { %5498 = vst [vmem:[%s9877_s23 + $0x20] sm:$0xff] %v5490_v56  ;;  %v5493_v11 = vsel %vm9870_vm11, %v5485_v39, %v5448_v36 }
0x1f90   : > { %5501 = vst [vmem:[%s9877_s23 + $0x38] sm:$0xff] %v5493_v11  ;;  %v5491_v49 = vsel %vm9870_vm11, %v5483_v31, %v5440_v46 }
0x1f91   : > { %5499 = vst [vmem:[%s9877_s23 + $0x28] sm:$0xff] %v5491_v49 }
0x1f92 PF: > { %s16_s21 = sadd.s32 1, %s7268_s21  }
0x1f93   : > { %p13_p4 = scmp.ge.s32.totalorder %s16_s21, 4  }
0x1f95   :  { %15 = sbr.rel (!%p13_p4) target bundleno = 1 (0x1), region = 79 }

</bundles_post_ra>
